<compile_context>
chip_gen: v5e
topology: v5e:2x2
jax: 0.10.0
libtpu: 0.0.40
codegen_flags: <defaults>
</compile_context>

<pallas_src>
import functools
import math

import numpy as np
import jax
import jax.numpy as jnp
from jax.experimental import pallas as pl
from jax.experimental.pallas import tpu as pltpu


# ----------------------------------------------------------------------------
# Bilinear-interpolation matrices (F.interpolate, mode='bilinear',
# align_corners=False).  Static numpy, computed at trace time.
# ----------------------------------------------------------------------------
def _interp_matrix(out_size, in_size):
    m = np.zeros((out_size, in_size), np.float32)
    scale = in_size / out_size
    for o in range(out_size):
        src = max((o + 0.5) * scale - 0.5, 0.0)   # PyTorch clamps lower side only
        i0 = min(int(math.floor(src)), in_size - 1)
        i1 = min(i0 + 1, in_size - 1)
        w1 = src - float(i0)
        m[o, i0] += 1.0 - w1
        m[o, i1] += w1
    return m


def _resize_to_padded_canvas_matrix(h, w, hi, wi):
    """((h+2)*(w+2), hi*wi) matrix: bilinear resize (hi,wi)->(h,w) AND scatter
    into the interior of a zero-padded (h+2, w+2) canvas (border rows are 0)."""
    rh = np.zeros((h + 2, hi), np.float32)
    rh[1:h + 1] = _interp_matrix(h, hi)
    rw = np.zeros((w + 2, wi), np.float32)
    rw[1:w + 1] = _interp_matrix(w, wi)
    return np.kron(rh, rw)


# ----------------------------------------------------------------------------
# Fused kernel: 4x (conv3x3 -> resize-to-padded-canvas) -> concat -> conv3x3
# ----------------------------------------------------------------------------
def _fused_spp_kernel(x0, x1, x2, x3,
                      w0, w1, w2, w3,
                      b0, b1, b2, b3,
                      r0, r1, r2, r3,
                      wc, bc,
                      o_ref, *, hh, ww):
    hp, wp = hh + 2, ww + 2

    def conv3x3(xp, w_ref, b_ref):
        # xp: (Hi+2, Wi+2, Cin) zero-padded bf16 value -> (Hi*Wi, Cout) f32
        hpad, wpad, cin = xp.shape
        hi, wi = hpad - 2, wpad - 2
        cout = w_ref.shape[3]
        acc = jnp.zeros((hi * wi, cout), jnp.float32)
        for ky in range(3):
            for kx in range(3):
                patch = xp[ky:ky + hi, kx:kx + wi, :].reshape(hi * wi, cin)
                acc = acc + jnp.dot(patch, w_ref[ky, kx],
                                    preferred_element_type=jnp.float32)
        return acc + b_ref[...]                       # (hi*wi, cout) f32

    def level(x_ref, w_ref, b_ref, r_ref):
        # conv (bias included; R rows sum to 1 inside, 0 on the border, so
        # adding the bias before the resize matmul is exact), then one MXU
        # matmul does bilinear-resize + scatter into the padded canvas.
        acc = conv3x3(x_ref[0], w_ref, b_ref)         # (Hi*Wi, Cout) f32
        z = jnp.dot(r_ref[...], acc.astype(jnp.bfloat16),
                    preferred_element_type=jnp.float32)   # (hp*wp, Cout) f32
        return z.reshape(hp, wp, w_ref.shape[3]).astype(jnp.bfloat16)

    # channel-concat of the four padded, resized pyramid outputs (zero border
    # doubles as the SAME padding of the final conv).
    catp = jnp.concatenate(
        [level(x0, w0, b0, r0),
         level(x1, w1, b1, r1),
         level(x2, w2, b2, r2),     # f8 level: r2 is the identity scatter
         level(x3, w3, b3, r3)],
        axis=-1)                                      # (hp, wp, 256) bf16

    out = conv3x3(catp, wc, bc)                       # (hh*ww, 128) f32
    o_ref[0] = out.astype(o_ref.dtype)


# ----------------------------------------------------------------------------
# Module: parameters + forward
# ----------------------------------------------------------------------------
_PYRAMID_SPECS = [(64, 32), (64, 32), (128, 64), (256, 128)]  # (Cin, Cout)


def init_params(key):
    params = {'pw': [], 'pb': []}
    for cin, cout in _PYRAMID_SPECS:
        key, k1, k2 = jax.random.split(key, 3)
        params['pw'].append(jax.random.normal(k1, (3, 3, cin, cout), jnp.float32) * 0.05)
        params['pb'].append(jax.random.normal(k2, (1, cout), jnp.float32) * 0.01)
    key, k1, k2 = jax.random.split(key, 3)
    params['cw'] = jax.random.normal(k1, (3, 3, 256, 128), jnp.float32) * 0.05
    params['cb'] = jax.random.normal(k2, (1, 128), jnp.float32) * 0.01
    return params


def spp_resonly_center_f16(f16, f8, f4, f2, params):
    """Inputs/outputs in NCHW, matching the PyTorch module."""
    B, _, h, w = f8.shape
    feats = [f2, f4, f8, f16]                         # fea_dict order f1..f4

    xs, rs = [], []
    for x in feats:
        xn = jnp.transpose(x, (0, 2, 3, 1)).astype(jnp.bfloat16)   # NCHW -> NHWC
        hi, wi = xn.shape[1], xn.shape[2]
        xs.append(jnp.pad(xn, ((0, 0), (1, 1), (1, 1), (0, 0))))   # SAME padding
        rs.append(jnp.asarray(_resize_to_padded_canvas_matrix(h, w, hi, wi),
                              jnp.bfloat16))

    ws = [wi_.astype(jnp.bfloat16) for wi_ in params['pw']]
    bs = [bi_.astype(jnp.float32) for bi_ in params['pb']]
    wc = params['cw'].astype(jnp.bfloat16)
    bc = params['cb'].astype(jnp.float32)
    cout = wc.shape[-1]

    def full_spec(a):
        return pl.BlockSpec(a.shape, lambda b, _nd=a.ndim: (0,) * _nd)

    in_specs = (
        [pl.BlockSpec((1,) + x.shape[1:], lambda b: (b, 0, 0, 0)) for x in xs]
        + [full_spec(a) for a in ws]
        + [full_spec(a) for a in bs]
        + [full_spec(a) for a in rs]
        + [full_spec(wc), full_spec(bc)]
    )

    out = pl.pallas_call(
        functools.partial(_fused_spp_kernel, hh=h, ww=w),
        out_shape=jax.ShapeDtypeStruct((B, h * w, cout), jnp.float32),
        grid=(B,),
        in_specs=in_specs,
        out_specs=pl.BlockSpec((1, h * w, cout), lambda b: (b, 0, 0)),
        compiler_params=pltpu.CompilerParams(dimension_semantics=("parallel",)),
    )(*xs, *ws, *bs, *rs, wc, bc)

    out = out.reshape(B, h, w, cout)
    return jnp.transpose(out, (0, 3, 1, 2))           # NHWC -> NCHW


# ----------------------------------------------------------------------------
# Pure-JAX fp32 reference (module semantics) for a lightweight cross-check
# ----------------------------------------------------------------------------
def _conv3x3_ref(x_nhwc, w, b):
    B, H, W, _ = x_nhwc.shape
    xp = jnp.pad(x_nhwc, ((0, 0), (1, 1), (1, 1), (0, 0)))
    out = jnp.zeros((B, H, W, w.shape[-1]), jnp.float32)
    for ky in range(3):
        for kx in range(3):
            out = out + jnp.einsum('bhwc,cd->bhwd',
                                   xp[:, ky:ky + H, kx:kx + W, :], w[ky, kx],
                                   precision=jax.lax.Precision.HIGHEST)
    return out + b[0]


def _resize_ref(x_nhwc, out_hw):
    ah = jnp.asarray(_interp_matrix(out_hw[0], x_nhwc.shape[1]))
    aw = jnp.asarray(_interp_matrix(out_hw[1], x_nhwc.shape[2]))
    t = jnp.einsum('oh,bhwc->bowc', ah, x_nhwc, precision=jax.lax.Precision.HIGHEST)
    return jnp.einsum('pw,bowc->bopc', aw, t, precision=jax.lax.Precision.HIGHEST)


if __name__ == "__main__":
    key = jax.random.PRNGKey(0)
    key, kp, k1, k2, k3, k4 = jax.random.split(key, 6)
    params = init_params(kp)

    B = 2
    f2 = jax.random.normal(k1, (B, 64, 16, 16), jnp.float32)
    f4 = jax.random.normal(k2, (B, 64, 8, 8), jnp.float32)
    f8 = jax.random.normal(k3, (B, 128, 4, 4), jnp.float32)
    f16 = jax.random.normal(k4, (B, 256, 2, 2), jnp.float32)

    fwd = jax.jit(spp_resonly_center_f16)
    out = jax.block_until_ready(fwd(f16, f8, f4, f2, params))
    assert out.shape == (B, 128, 4, 4), out.shape

    # Cross-check against a pure-JAX fp32 reference of the same math
    # (kernel runs bf16 MXU matmuls with f32 accumulation -> relative check).
    h, w = f8.shape[2], f8.shape[3]
    refs = []
    for i, x in enumerate([f2, f4, f8, f16]):
        xn = jnp.transpose(x, (0, 2, 3, 1))
        y = _conv3x3_ref(xn, params['pw'][i], params['pb'][i])
        refs.append(_resize_ref(y, (h, w)))
    ref = _conv3x3_ref(jnp.concatenate(refs, axis=-1), params['cw'], params['cb'])
    ref = jnp.transpose(ref, (0, 3, 1, 2))

    max_err = float(jnp.max(jnp.abs(out - ref)))
    tol = 3e-2 * max(1.0, float(jnp.max(jnp.abs(ref))))
    assert max_err < tol, f"max abs error too large: {max_err} (tol {tol})"

    print("KERNEL_OK")
</pallas_src>

<mosaic_0001>
module attributes {stable_mosaic.version = 11 : i64} {
  func.func @_fused_spp_kernel(%arg0: i32, %arg1: memref<1x18x18x64xbf16, #tpu.memory_space<vmem>>, %arg2: memref<1x10x10x64xbf16, #tpu.memory_space<vmem>>, %arg3: memref<1x6x6x128xbf16, #tpu.memory_space<vmem>>, %arg4: memref<1x4x4x256xbf16, #tpu.memory_space<vmem>>, %arg5: memref<3x3x64x32xbf16, #tpu.memory_space<vmem>>, %arg6: memref<3x3x64x32xbf16, #tpu.memory_space<vmem>>, %arg7: memref<3x3x128x64xbf16, #tpu.memory_space<vmem>>, %arg8: memref<3x3x256x128xbf16, #tpu.memory_space<vmem>>, %arg9: memref<1x32xf32, #tpu.memory_space<vmem>>, %arg10: memref<1x32xf32, #tpu.memory_space<vmem>>, %arg11: memref<1x64xf32, #tpu.memory_space<vmem>>, %arg12: memref<1x128xf32, #tpu.memory_space<vmem>>, %arg13: memref<36x256xbf16, #tpu.memory_space<vmem>>, %arg14: memref<36x64xbf16, #tpu.memory_space<vmem>>, %arg15: memref<36x16xbf16, #tpu.memory_space<vmem>>, %arg16: memref<36x4xbf16, #tpu.memory_space<vmem>>, %arg17: memref<3x3x256x128xbf16, #tpu.memory_space<vmem>>, %arg18: memref<1x128xf32, #tpu.memory_space<vmem>>, %arg19: memref<1x16x128xf32, #tpu.memory_space<vmem>>) attributes {dimension_semantics = [#tpu.dimension_semantics<parallel>], iteration_bounds = array<i64: 2>, scalar_prefetch = 0 : i64, scratch_operands = 0 : i64, tpu.core_type = #tpu.core_type<tc>, window_params = [{transform_indices = @transform_0, window_bounds = array<i64: 1, 18, 18, 64>}, {transform_indices = @transform_1, window_bounds = array<i64: 1, 10, 10, 64>}, {transform_indices = @transform_2, window_bounds = array<i64: 1, 6, 6, 128>}, {transform_indices = @transform_3, window_bounds = array<i64: 1, 4, 4, 256>}, {pipeline_mode = #tpu.pipeline_mode<synchronous>, transform_indices = @transform_4, window_bounds = array<i64: 3, 3, 64, 32>}, {pipeline_mode = #tpu.pipeline_mode<synchronous>, transform_indices = @transform_5, window_bounds = array<i64: 3, 3, 64, 32>}, {pipeline_mode = #tpu.pipeline_mode<synchronous>, transform_indices = @transform_6, window_bounds = array<i64: 3, 3, 128, 64>}, {pipeline_mode = #tpu.pipeline_mode<synchronous>, transform_indices = @transform_7, window_bounds = array<i64: 3, 3, 256, 128>}, {pipeline_mode = #tpu.pipeline_mode<synchronous>, transform_indices = @transform_8, window_bounds = array<i64: 1, 32>}, {pipeline_mode = #tpu.pipeline_mode<synchronous>, transform_indices = @transform_9, window_bounds = array<i64: 1, 32>}, {pipeline_mode = #tpu.pipeline_mode<synchronous>, transform_indices = @transform_10, window_bounds = array<i64: 1, 64>}, {pipeline_mode = #tpu.pipeline_mode<synchronous>, transform_indices = @transform_11, window_bounds = array<i64: 1, 128>}, {pipeline_mode = #tpu.pipeline_mode<synchronous>, transform_indices = @transform_12, window_bounds = array<i64: 36, 256>}, {pipeline_mode = #tpu.pipeline_mode<synchronous>, transform_indices = @transform_13, window_bounds = array<i64: 36, 64>}, {pipeline_mode = #tpu.pipeline_mode<synchronous>, transform_indices = @transform_14, window_bounds = array<i64: 36, 16>}, {pipeline_mode = #tpu.pipeline_mode<synchronous>, transform_indices = @transform_15, window_bounds = array<i64: 36, 4>}, {pipeline_mode = #tpu.pipeline_mode<synchronous>, transform_indices = @transform_16, window_bounds = array<i64: 3, 3, 256, 128>}, {pipeline_mode = #tpu.pipeline_mode<synchronous>, transform_indices = @transform_17, window_bounds = array<i64: 1, 128>}, {transform_indices = @transform_18, window_bounds = array<i64: 1, 16, 128>}]} {
    %c0 = arith.constant 0 : index
    %c0_0 = arith.constant 0 : index
    %c0_1 = arith.constant 0 : index
    %c0_2 = arith.constant 0 : index
    %0 = vector.load %arg1[%c0, %c0_0, %c0_1, %c0_2] : memref<1x18x18x64xbf16, #tpu.memory_space<vmem>>, vector<1x18x18x64xbf16>
    %1 = vector.shape_cast %0 : vector<1x18x18x64xbf16> to vector<18x18x64xbf16>
    %cst = arith.constant 0.000000e+00 : f32
    %2 = vector.broadcast %cst : f32 to vector<256x32xf32>
    %3 = vector.extract_strided_slice %1 {offsets = [0, 0, 0], sizes = [16, 16, 64], strides = [1, 1, 1]} : vector<18x18x64xbf16> to vector<16x16x64xbf16>
    %4 = vector.shape_cast %3 : vector<16x16x64xbf16> to vector<256x64xbf16>
    %c0_3 = arith.constant 0 : index
    %c0_4 = arith.constant 0 : index
    %c0_5 = arith.constant 0 : index
    %c0_6 = arith.constant 0 : index
    %5 = vector.load %arg5[%c0_3, %c0_4, %c0_5, %c0_6] : memref<3x3x64x32xbf16, #tpu.memory_space<vmem>>, vector<1x1x64x32xbf16>
    %6 = vector.shape_cast %5 : vector<1x1x64x32xbf16> to vector<64x32xbf16>
    %cst_7 = arith.constant dense<0.000000e+00> : vector<256x32xf32>
    %7 = tpu.matmul %4, %6, %cst_7 {dimension_numbers = #tpu.dot_dimension_numbers<[1], [0], [0], [1], [0, 0, 1, 1], [], []>} : vector<256x64xbf16>, vector<64x32xbf16>, vector<256x32xf32> -> vector<256x32xf32>
    %8 = arith.addf %2, %7 : vector<256x32xf32>
    %9 = vector.extract_strided_slice %1 {offsets = [0, 1, 0], sizes = [16, 16, 64], strides = [1, 1, 1]} : vector<18x18x64xbf16> to vector<16x16x64xbf16>
    %10 = vector.shape_cast %9 : vector<16x16x64xbf16> to vector<256x64xbf16>
    %c0_8 = arith.constant 0 : index
    %c1 = arith.constant 1 : index
    %c0_9 = arith.constant 0 : index
    %c0_10 = arith.constant 0 : index
    %11 = vector.load %arg5[%c0_8, %c1, %c0_9, %c0_10] : memref<3x3x64x32xbf16, #tpu.memory_space<vmem>>, vector<1x1x64x32xbf16>
    %12 = vector.shape_cast %11 : vector<1x1x64x32xbf16> to vector<64x32xbf16>
    %cst_11 = arith.constant dense<0.000000e+00> : vector<256x32xf32>
    %13 = tpu.matmul %10, %12, %cst_11 {dimension_numbers = #tpu.dot_dimension_numbers<[1], [0], [0], [1], [0, 0, 1, 1], [], []>} : vector<256x64xbf16>, vector<64x32xbf16>, vector<256x32xf32> -> vector<256x32xf32>
    %14 = arith.addf %8, %13 : vector<256x32xf32>
    %15 = vector.extract_strided_slice %1 {offsets = [0, 2, 0], sizes = [16, 16, 64], strides = [1, 1, 1]} : vector<18x18x64xbf16> to vector<16x16x64xbf16>
    %16 = vector.shape_cast %15 : vector<16x16x64xbf16> to vector<256x64xbf16>
    %c0_12 = arith.constant 0 : index
    %c2 = arith.constant 2 : index
    %c0_13 = arith.constant 0 : index
    %c0_14 = arith.constant 0 : index
    %17 = vector.load %arg5[%c0_12, %c2, %c0_13, %c0_14] : memref<3x3x64x32xbf16, #tpu.memory_space<vmem>>, vector<1x1x64x32xbf16>
    %18 = vector.shape_cast %17 : vector<1x1x64x32xbf16> to vector<64x32xbf16>
    %cst_15 = arith.constant dense<0.000000e+00> : vector<256x32xf32>
    %19 = tpu.matmul %16, %18, %cst_15 {dimension_numbers = #tpu.dot_dimension_numbers<[1], [0], [0], [1], [0, 0, 1, 1], [], []>} : vector<256x64xbf16>, vector<64x32xbf16>, vector<256x32xf32> -> vector<256x32xf32>
    %20 = arith.addf %14, %19 : vector<256x32xf32>
    %21 = vector.extract_strided_slice %1 {offsets = [1, 0, 0], sizes = [16, 16, 64], strides = [1, 1, 1]} : vector<18x18x64xbf16> to vector<16x16x64xbf16>
    %22 = vector.shape_cast %21 : vector<16x16x64xbf16> to vector<256x64xbf16>
    %c1_16 = arith.constant 1 : index
    %c0_17 = arith.constant 0 : index
    %c0_18 = arith.constant 0 : index
    %c0_19 = arith.constant 0 : index
    %23 = vector.load %arg5[%c1_16, %c0_17, %c0_18, %c0_19] : memref<3x3x64x32xbf16, #tpu.memory_space<vmem>>, vector<1x1x64x32xbf16>
    %24 = vector.shape_cast %23 : vector<1x1x64x32xbf16> to vector<64x32xbf16>
    %cst_20 = arith.constant dense<0.000000e+00> : vector<256x32xf32>
    %25 = tpu.matmul %22, %24, %cst_20 {dimension_numbers = #tpu.dot_dimension_numbers<[1], [0], [0], [1], [0, 0, 1, 1], [], []>} : vector<256x64xbf16>, vector<64x32xbf16>, vector<256x32xf32> -> vector<256x32xf32>
    %26 = arith.addf %20, %25 : vector<256x32xf32>
    %27 = vector.extract_strided_slice %1 {offsets = [1, 1, 0], sizes = [16, 16, 64], strides = [1, 1, 1]} : vector<18x18x64xbf16> to vector<16x16x64xbf16>
    %28 = vector.shape_cast %27 : vector<16x16x64xbf16> to vector<256x64xbf16>
    %c1_21 = arith.constant 1 : index
    %c1_22 = arith.constant 1 : index
    %c0_23 = arith.constant 0 : index
    %c0_24 = arith.constant 0 : index
    %29 = vector.load %arg5[%c1_21, %c1_22, %c0_23, %c0_24] : memref<3x3x64x32xbf16, #tpu.memory_space<vmem>>, vector<1x1x64x32xbf16>
    %30 = vector.shape_cast %29 : vector<1x1x64x32xbf16> to vector<64x32xbf16>
    %cst_25 = arith.constant dense<0.000000e+00> : vector<256x32xf32>
    %31 = tpu.matmul %28, %30, %cst_25 {dimension_numbers = #tpu.dot_dimension_numbers<[1], [0], [0], [1], [0, 0, 1, 1], [], []>} : vector<256x64xbf16>, vector<64x32xbf16>, vector<256x32xf32> -> vector<256x32xf32>
    %32 = arith.addf %26, %31 : vector<256x32xf32>
    %33 = vector.extract_strided_slice %1 {offsets = [1, 2, 0], sizes = [16, 16, 64], strides = [1, 1, 1]} : vector<18x18x64xbf16> to vector<16x16x64xbf16>
    %34 = vector.shape_cast %33 : vector<16x16x64xbf16> to vector<256x64xbf16>
    %c1_26 = arith.constant 1 : index
    %c2_27 = arith.constant 2 : index
    %c0_28 = arith.constant 0 : index
    %c0_29 = arith.constant 0 : index
    %35 = vector.load %arg5[%c1_26, %c2_27, %c0_28, %c0_29] : memref<3x3x64x32xbf16, #tpu.memory_space<vmem>>, vector<1x1x64x32xbf16>
    %36 = vector.shape_cast %35 : vector<1x1x64x32xbf16> to vector<64x32xbf16>
    %cst_30 = arith.constant dense<0.000000e+00> : vector<256x32xf32>
    %37 = tpu.matmul %34, %36, %cst_30 {dimension_numbers = #tpu.dot_dimension_numbers<[1], [0], [0], [1], [0, 0, 1, 1], [], []>} : vector<256x64xbf16>, vector<64x32xbf16>, vector<256x32xf32> -> vector<256x32xf32>
    %38 = arith.addf %32, %37 : vector<256x32xf32>
    %39 = vector.extract_strided_slice %1 {offsets = [2, 0, 0], sizes = [16, 16, 64], strides = [1, 1, 1]} : vector<18x18x64xbf16> to vector<16x16x64xbf16>
    %40 = vector.shape_cast %39 : vector<16x16x64xbf16> to vector<256x64xbf16>
    %c2_31 = arith.constant 2 : index
    %c0_32 = arith.constant 0 : index
    %c0_33 = arith.constant 0 : index
    %c0_34 = arith.constant 0 : index
    %41 = vector.load %arg5[%c2_31, %c0_32, %c0_33, %c0_34] : memref<3x3x64x32xbf16, #tpu.memory_space<vmem>>, vector<1x1x64x32xbf16>
    %42 = vector.shape_cast %41 : vector<1x1x64x32xbf16> to vector<64x32xbf16>
    %cst_35 = arith.constant dense<0.000000e+00> : vector<256x32xf32>
    %43 = tpu.matmul %40, %42, %cst_35 {dimension_numbers = #tpu.dot_dimension_numbers<[1], [0], [0], [1], [0, 0, 1, 1], [], []>} : vector<256x64xbf16>, vector<64x32xbf16>, vector<256x32xf32> -> vector<256x32xf32>
    %44 = arith.addf %38, %43 : vector<256x32xf32>
    %45 = vector.extract_strided_slice %1 {offsets = [2, 1, 0], sizes = [16, 16, 64], strides = [1, 1, 1]} : vector<18x18x64xbf16> to vector<16x16x64xbf16>
    %46 = vector.shape_cast %45 : vector<16x16x64xbf16> to vector<256x64xbf16>
    %c2_36 = arith.constant 2 : index
    %c1_37 = arith.constant 1 : index
    %c0_38 = arith.constant 0 : index
    %c0_39 = arith.constant 0 : index
    %47 = vector.load %arg5[%c2_36, %c1_37, %c0_38, %c0_39] : memref<3x3x64x32xbf16, #tpu.memory_space<vmem>>, vector<1x1x64x32xbf16>
    %48 = vector.shape_cast %47 : vector<1x1x64x32xbf16> to vector<64x32xbf16>
    %cst_40 = arith.constant dense<0.000000e+00> : vector<256x32xf32>
    %49 = tpu.matmul %46, %48, %cst_40 {dimension_numbers = #tpu.dot_dimension_numbers<[1], [0], [0], [1], [0, 0, 1, 1], [], []>} : vector<256x64xbf16>, vector<64x32xbf16>, vector<256x32xf32> -> vector<256x32xf32>
    %50 = arith.addf %44, %49 : vector<256x32xf32>
    %51 = vector.extract_strided_slice %1 {offsets = [2, 2, 0], sizes = [16, 16, 64], strides = [1, 1, 1]} : vector<18x18x64xbf16> to vector<16x16x64xbf16>
    %52 = vector.shape_cast %51 : vector<16x16x64xbf16> to vector<256x64xbf16>
    %c2_41 = arith.constant 2 : index
    %c2_42 = arith.constant 2 : index
    %c0_43 = arith.constant 0 : index
    %c0_44 = arith.constant 0 : index
    %53 = vector.load %arg5[%c2_41, %c2_42, %c0_43, %c0_44] : memref<3x3x64x32xbf16, #tpu.memory_space<vmem>>, vector<1x1x64x32xbf16>
    %54 = vector.shape_cast %53 : vector<1x1x64x32xbf16> to vector<64x32xbf16>
    %cst_45 = arith.constant dense<0.000000e+00> : vector<256x32xf32>
    %55 = tpu.matmul %52, %54, %cst_45 {dimension_numbers = #tpu.dot_dimension_numbers<[1], [0], [0], [1], [0, 0, 1, 1], [], []>} : vector<256x64xbf16>, vector<64x32xbf16>, vector<256x32xf32> -> vector<256x32xf32>
    %56 = arith.addf %50, %55 : vector<256x32xf32>
    %c0_46 = arith.constant 0 : index
    %c0_47 = arith.constant 0 : index
    %57 = vector.load %arg9[%c0_46, %c0_47] : memref<1x32xf32, #tpu.memory_space<vmem>>, vector<1x32xf32>
    %58 = vector.broadcast %57 : vector<1x32xf32> to vector<256x32xf32>
    %59 = arith.addf %56, %58 : vector<256x32xf32>
    %c0_48 = arith.constant 0 : index
    %c0_49 = arith.constant 0 : index
    %60 = vector.load %arg13[%c0_48, %c0_49] : memref<36x256xbf16, #tpu.memory_space<vmem>>, vector<36x256xbf16>
    %61 = arith.truncf %59 : vector<256x32xf32> to vector<256x32xbf16>
    %cst_50 = arith.constant dense<0.000000e+00> : vector<36x32xf32>
    %62 = tpu.matmul %60, %61, %cst_50 {dimension_numbers = #tpu.dot_dimension_numbers<[1], [0], [0], [1], [0, 0, 1, 1], [], []>} : vector<36x256xbf16>, vector<256x32xbf16>, vector<36x32xf32> -> vector<36x32xf32>
    %63 = vector.shape_cast %62 : vector<36x32xf32> to vector<6x6x32xf32>
    %64 = arith.truncf %63 : vector<6x6x32xf32> to vector<6x6x32xbf16>
    %c0_51 = arith.constant 0 : index
    %c0_52 = arith.constant 0 : index
    %c0_53 = arith.constant 0 : index
    %c0_54 = arith.constant 0 : index
    %65 = vector.load %arg2[%c0_51, %c0_52, %c0_53, %c0_54] : memref<1x10x10x64xbf16, #tpu.memory_space<vmem>>, vector<1x10x10x64xbf16>
    %66 = vector.shape_cast %65 : vector<1x10x10x64xbf16> to vector<10x10x64xbf16>
    %cst_55 = arith.constant 0.000000e+00 : f32
    %67 = vector.broadcast %cst_55 : f32 to vector<64x32xf32>
    %68 = vector.extract_strided_slice %66 {offsets = [0, 0, 0], sizes = [8, 8, 64], strides = [1, 1, 1]} : vector<10x10x64xbf16> to vector<8x8x64xbf16>
    %69 = vector.shape_cast %68 : vector<8x8x64xbf16> to vector<64x64xbf16>
    %c0_56 = arith.constant 0 : index
    %c0_57 = arith.constant 0 : index
    %c0_58 = arith.constant 0 : index
    %c0_59 = arith.constant 0 : index
    %70 = vector.load %arg6[%c0_56, %c0_57, %c0_58, %c0_59] : memref<3x3x64x32xbf16, #tpu.memory_space<vmem>>, vector<1x1x64x32xbf16>
    %71 = vector.shape_cast %70 : vector<1x1x64x32xbf16> to vector<64x32xbf16>
    %cst_60 = arith.constant dense<0.000000e+00> : vector<64x32xf32>
    %72 = tpu.matmul %69, %71, %cst_60 {dimension_numbers = #tpu.dot_dimension_numbers<[1], [0], [0], [1], [0, 0, 1, 1], [], []>} : vector<64x64xbf16>, vector<64x32xbf16>, vector<64x32xf32> -> vector<64x32xf32>
    %73 = arith.addf %67, %72 : vector<64x32xf32>
    %74 = vector.extract_strided_slice %66 {offsets = [0, 1, 0], sizes = [8, 8, 64], strides = [1, 1, 1]} : vector<10x10x64xbf16> to vector<8x8x64xbf16>
    %75 = vector.shape_cast %74 : vector<8x8x64xbf16> to vector<64x64xbf16>
    %c0_61 = arith.constant 0 : index
    %c1_62 = arith.constant 1 : index
    %c0_63 = arith.constant 0 : index
    %c0_64 = arith.constant 0 : index
    %76 = vector.load %arg6[%c0_61, %c1_62, %c0_63, %c0_64] : memref<3x3x64x32xbf16, #tpu.memory_space<vmem>>, vector<1x1x64x32xbf16>
    %77 = vector.shape_cast %76 : vector<1x1x64x32xbf16> to vector<64x32xbf16>
    %cst_65 = arith.constant dense<0.000000e+00> : vector<64x32xf32>
    %78 = tpu.matmul %75, %77, %cst_65 {dimension_numbers = #tpu.dot_dimension_numbers<[1], [0], [0], [1], [0, 0, 1, 1], [], []>} : vector<64x64xbf16>, vector<64x32xbf16>, vector<64x32xf32> -> vector<64x32xf32>
    %79 = arith.addf %73, %78 : vector<64x32xf32>
    %80 = vector.extract_strided_slice %66 {offsets = [0, 2, 0], sizes = [8, 8, 64], strides = [1, 1, 1]} : vector<10x10x64xbf16> to vector<8x8x64xbf16>
    %81 = vector.shape_cast %80 : vector<8x8x64xbf16> to vector<64x64xbf16>
    %c0_66 = arith.constant 0 : index
    %c2_67 = arith.constant 2 : index
    %c0_68 = arith.constant 0 : index
    %c0_69 = arith.constant 0 : index
    %82 = vector.load %arg6[%c0_66, %c2_67, %c0_68, %c0_69] : memref<3x3x64x32xbf16, #tpu.memory_space<vmem>>, vector<1x1x64x32xbf16>
    %83 = vector.shape_cast %82 : vector<1x1x64x32xbf16> to vector<64x32xbf16>
    %cst_70 = arith.constant dense<0.000000e+00> : vector<64x32xf32>
    %84 = tpu.matmul %81, %83, %cst_70 {dimension_numbers = #tpu.dot_dimension_numbers<[1], [0], [0], [1], [0, 0, 1, 1], [], []>} : vector<64x64xbf16>, vector<64x32xbf16>, vector<64x32xf32> -> vector<64x32xf32>
    %85 = arith.addf %79, %84 : vector<64x32xf32>
    %86 = vector.extract_strided_slice %66 {offsets = [1, 0, 0], sizes = [8, 8, 64], strides = [1, 1, 1]} : vector<10x10x64xbf16> to vector<8x8x64xbf16>
    %87 = vector.shape_cast %86 : vector<8x8x64xbf16> to vector<64x64xbf16>
    %c1_71 = arith.constant 1 : index
    %c0_72 = arith.constant 0 : index
    %c0_73 = arith.constant 0 : index
    %c0_74 = arith.constant 0 : index
    %88 = vector.load %arg6[%c1_71, %c0_72, %c0_73, %c0_74] : memref<3x3x64x32xbf16, #tpu.memory_space<vmem>>, vector<1x1x64x32xbf16>
    %89 = vector.shape_cast %88 : vector<1x1x64x32xbf16> to vector<64x32xbf16>
    %cst_75 = arith.constant dense<0.000000e+00> : vector<64x32xf32>
    %90 = tpu.matmul %87, %89, %cst_75 {dimension_numbers = #tpu.dot_dimension_numbers<[1], [0], [0], [1], [0, 0, 1, 1], [], []>} : vector<64x64xbf16>, vector<64x32xbf16>, vector<64x32xf32> -> vector<64x32xf32>
    %91 = arith.addf %85, %90 : vector<64x32xf32>
    %92 = vector.extract_strided_slice %66 {offsets = [1, 1, 0], sizes = [8, 8, 64], strides = [1, 1, 1]} : vector<10x10x64xbf16> to vector<8x8x64xbf16>
    %93 = vector.shape_cast %92 : vector<8x8x64xbf16> to vector<64x64xbf16>
    %c1_76 = arith.constant 1 : index
    %c1_77 = arith.constant 1 : index
    %c0_78 = arith.constant 0 : index
    %c0_79 = arith.constant 0 : index
    %94 = vector.load %arg6[%c1_76, %c1_77, %c0_78, %c0_79] : memref<3x3x64x32xbf16, #tpu.memory_space<vmem>>, vector<1x1x64x32xbf16>
    %95 = vector.shape_cast %94 : vector<1x1x64x32xbf16> to vector<64x32xbf16>
    %cst_80 = arith.constant dense<0.000000e+00> : vector<64x32xf32>
    %96 = tpu.matmul %93, %95, %cst_80 {dimension_numbers = #tpu.dot_dimension_numbers<[1], [0], [0], [1], [0, 0, 1, 1], [], []>} : vector<64x64xbf16>, vector<64x32xbf16>, vector<64x32xf32> -> vector<64x32xf32>
    %97 = arith.addf %91, %96 : vector<64x32xf32>
    %98 = vector.extract_strided_slice %66 {offsets = [1, 2, 0], sizes = [8, 8, 64], strides = [1, 1, 1]} : vector<10x10x64xbf16> to vector<8x8x64xbf16>
    %99 = vector.shape_cast %98 : vector<8x8x64xbf16> to vector<64x64xbf16>
    %c1_81 = arith.constant 1 : index
    %c2_82 = arith.constant 2 : index
    %c0_83 = arith.constant 0 : index
    %c0_84 = arith.constant 0 : index
    %100 = vector.load %arg6[%c1_81, %c2_82, %c0_83, %c0_84] : memref<3x3x64x32xbf16, #tpu.memory_space<vmem>>, vector<1x1x64x32xbf16>
    %101 = vector.shape_cast %100 : vector<1x1x64x32xbf16> to vector<64x32xbf16>
    %cst_85 = arith.constant dense<0.000000e+00> : vector<64x32xf32>
    %102 = tpu.matmul %99, %101, %cst_85 {dimension_numbers = #tpu.dot_dimension_numbers<[1], [0], [0], [1], [0, 0, 1, 1], [], []>} : vector<64x64xbf16>, vector<64x32xbf16>, vector<64x32xf32> -> vector<64x32xf32>
    %103 = arith.addf %97, %102 : vector<64x32xf32>
    %104 = vector.extract_strided_slice %66 {offsets = [2, 0, 0], sizes = [8, 8, 64], strides = [1, 1, 1]} : vector<10x10x64xbf16> to vector<8x8x64xbf16>
    %105 = vector.shape_cast %104 : vector<8x8x64xbf16> to vector<64x64xbf16>
    %c2_86 = arith.constant 2 : index
    %c0_87 = arith.constant 0 : index
    %c0_88 = arith.constant 0 : index
    %c0_89 = arith.constant 0 : index
    %106 = vector.load %arg6[%c2_86, %c0_87, %c0_88, %c0_89] : memref<3x3x64x32xbf16, #tpu.memory_space<vmem>>, vector<1x1x64x32xbf16>
    %107 = vector.shape_cast %106 : vector<1x1x64x32xbf16> to vector<64x32xbf16>
    %cst_90 = arith.constant dense<0.000000e+00> : vector<64x32xf32>
    %108 = tpu.matmul %105, %107, %cst_90 {dimension_numbers = #tpu.dot_dimension_numbers<[1], [0], [0], [1], [0, 0, 1, 1], [], []>} : vector<64x64xbf16>, vector<64x32xbf16>, vector<64x32xf32> -> vector<64x32xf32>
    %109 = arith.addf %103, %108 : vector<64x32xf32>
    %110 = vector.extract_strided_slice %66 {offsets = [2, 1, 0], sizes = [8, 8, 64], strides = [1, 1, 1]} : vector<10x10x64xbf16> to vector<8x8x64xbf16>
    %111 = vector.shape_cast %110 : vector<8x8x64xbf16> to vector<64x64xbf16>
    %c2_91 = arith.constant 2 : index
    %c1_92 = arith.constant 1 : index
    %c0_93 = arith.constant 0 : index
    %c0_94 = arith.constant 0 : index
    %112 = vector.load %arg6[%c2_91, %c1_92, %c0_93, %c0_94] : memref<3x3x64x32xbf16, #tpu.memory_space<vmem>>, vector<1x1x64x32xbf16>
    %113 = vector.shape_cast %112 : vector<1x1x64x32xbf16> to vector<64x32xbf16>
    %cst_95 = arith.constant dense<0.000000e+00> : vector<64x32xf32>
    %114 = tpu.matmul %111, %113, %cst_95 {dimension_numbers = #tpu.dot_dimension_numbers<[1], [0], [0], [1], [0, 0, 1, 1], [], []>} : vector<64x64xbf16>, vector<64x32xbf16>, vector<64x32xf32> -> vector<64x32xf32>
    %115 = arith.addf %109, %114 : vector<64x32xf32>
    %116 = vector.extract_strided_slice %66 {offsets = [2, 2, 0], sizes = [8, 8, 64], strides = [1, 1, 1]} : vector<10x10x64xbf16> to vector<8x8x64xbf16>
    %117 = vector.shape_cast %116 : vector<8x8x64xbf16> to vector<64x64xbf16>
    %c2_96 = arith.constant 2 : index
    %c2_97 = arith.constant 2 : index
    %c0_98 = arith.constant 0 : index
    %c0_99 = arith.constant 0 : index
    %118 = vector.load %arg6[%c2_96, %c2_97, %c0_98, %c0_99] : memref<3x3x64x32xbf16, #tpu.memory_space<vmem>>, vector<1x1x64x32xbf16>
    %119 = vector.shape_cast %118 : vector<1x1x64x32xbf16> to vector<64x32xbf16>
    %cst_100 = arith.constant dense<0.000000e+00> : vector<64x32xf32>
    %120 = tpu.matmul %117, %119, %cst_100 {dimension_numbers = #tpu.dot_dimension_numbers<[1], [0], [0], [1], [0, 0, 1, 1], [], []>} : vector<64x64xbf16>, vector<64x32xbf16>, vector<64x32xf32> -> vector<64x32xf32>
    %121 = arith.addf %115, %120 : vector<64x32xf32>
    %c0_101 = arith.constant 0 : index
    %c0_102 = arith.constant 0 : index
    %122 = vector.load %arg10[%c0_101, %c0_102] : memref<1x32xf32, #tpu.memory_space<vmem>>, vector<1x32xf32>
    %123 = vector.broadcast %122 : vector<1x32xf32> to vector<64x32xf32>
    %124 = arith.addf %121, %123 : vector<64x32xf32>
    %c0_103 = arith.constant 0 : index
    %c0_104 = arith.constant 0 : index
    %125 = vector.load %arg14[%c0_103, %c0_104] : memref<36x64xbf16, #tpu.memory_space<vmem>>, vector<36x64xbf16>
    %126 = arith.truncf %124 : vector<64x32xf32> to vector<64x32xbf16>
    %cst_105 = arith.constant dense<0.000000e+00> : vector<36x32xf32>
    %127 = tpu.matmul %125, %126, %cst_105 {dimension_numbers = #tpu.dot_dimension_numbers<[1], [0], [0], [1], [0, 0, 1, 1], [], []>} : vector<36x64xbf16>, vector<64x32xbf16>, vector<36x32xf32> -> vector<36x32xf32>
    %128 = vector.shape_cast %127 : vector<36x32xf32> to vector<6x6x32xf32>
    %129 = arith.truncf %128 : vector<6x6x32xf32> to vector<6x6x32xbf16>
    %c0_106 = arith.constant 0 : index
    %c0_107 = arith.constant 0 : index
    %c0_108 = arith.constant 0 : index
    %c0_109 = arith.constant 0 : index
    %130 = vector.load %arg3[%c0_106, %c0_107, %c0_108, %c0_109] : memref<1x6x6x128xbf16, #tpu.memory_space<vmem>>, vector<1x6x6x128xbf16>
    %131 = vector.shape_cast %130 : vector<1x6x6x128xbf16> to vector<6x6x128xbf16>
    %cst_110 = arith.constant 0.000000e+00 : f32
    %132 = vector.broadcast %cst_110 : f32 to vector<16x64xf32>
    %133 = vector.extract_strided_slice %131 {offsets = [0, 0, 0], sizes = [4, 4, 128], strides = [1, 1, 1]} : vector<6x6x128xbf16> to vector<4x4x128xbf16>
    %134 = vector.shape_cast %133 : vector<4x4x128xbf16> to vector<16x128xbf16>
    %c0_111 = arith.constant 0 : index
    %c0_112 = arith.constant 0 : index
    %c0_113 = arith.constant 0 : index
    %c0_114 = arith.constant 0 : index
    %135 = vector.load %arg7[%c0_111, %c0_112, %c0_113, %c0_114] : memref<3x3x128x64xbf16, #tpu.memory_space<vmem>>, vector<1x1x128x64xbf16>
    %136 = vector.shape_cast %135 : vector<1x1x128x64xbf16> to vector<128x64xbf16>
    %cst_115 = arith.constant dense<0.000000e+00> : vector<16x64xf32>
    %137 = tpu.matmul %134, %136, %cst_115 {dimension_numbers = #tpu.dot_dimension_numbers<[1], [0], [0], [1], [0, 0, 1, 1], [], []>} : vector<16x128xbf16>, vector<128x64xbf16>, vector<16x64xf32> -> vector<16x64xf32>
    %138 = arith.addf %132, %137 : vector<16x64xf32>
    %139 = vector.extract_strided_slice %131 {offsets = [0, 1, 0], sizes = [4, 4, 128], strides = [1, 1, 1]} : vector<6x6x128xbf16> to vector<4x4x128xbf16>
    %140 = vector.shape_cast %139 : vector<4x4x128xbf16> to vector<16x128xbf16>
    %c0_116 = arith.constant 0 : index
    %c1_117 = arith.constant 1 : index
    %c0_118 = arith.constant 0 : index
    %c0_119 = arith.constant 0 : index
    %141 = vector.load %arg7[%c0_116, %c1_117, %c0_118, %c0_119] : memref<3x3x128x64xbf16, #tpu.memory_space<vmem>>, vector<1x1x128x64xbf16>
    %142 = vector.shape_cast %141 : vector<1x1x128x64xbf16> to vector<128x64xbf16>
    %cst_120 = arith.constant dense<0.000000e+00> : vector<16x64xf32>
    %143 = tpu.matmul %140, %142, %cst_120 {dimension_numbers = #tpu.dot_dimension_numbers<[1], [0], [0], [1], [0, 0, 1, 1], [], []>} : vector<16x128xbf16>, vector<128x64xbf16>, vector<16x64xf32> -> vector<16x64xf32>
    %144 = arith.addf %138, %143 : vector<16x64xf32>
    %145 = vector.extract_strided_slice %131 {offsets = [0, 2, 0], sizes = [4, 4, 128], strides = [1, 1, 1]} : vector<6x6x128xbf16> to vector<4x4x128xbf16>
    %146 = vector.shape_cast %145 : vector<4x4x128xbf16> to vector<16x128xbf16>
    %c0_121 = arith.constant 0 : index
    %c2_122 = arith.constant 2 : index
    %c0_123 = arith.constant 0 : index
    %c0_124 = arith.constant 0 : index
    %147 = vector.load %arg7[%c0_121, %c2_122, %c0_123, %c0_124] : memref<3x3x128x64xbf16, #tpu.memory_space<vmem>>, vector<1x1x128x64xbf16>
    %148 = vector.shape_cast %147 : vector<1x1x128x64xbf16> to vector<128x64xbf16>
    %cst_125 = arith.constant dense<0.000000e+00> : vector<16x64xf32>
    %149 = tpu.matmul %146, %148, %cst_125 {dimension_numbers = #tpu.dot_dimension_numbers<[1], [0], [0], [1], [0, 0, 1, 1], [], []>} : vector<16x128xbf16>, vector<128x64xbf16>, vector<16x64xf32> -> vector<16x64xf32>
    %150 = arith.addf %144, %149 : vector<16x64xf32>
    %151 = vector.extract_strided_slice %131 {offsets = [1, 0, 0], sizes = [4, 4, 128], strides = [1, 1, 1]} : vector<6x6x128xbf16> to vector<4x4x128xbf16>
    %152 = vector.shape_cast %151 : vector<4x4x128xbf16> to vector<16x128xbf16>
    %c1_126 = arith.constant 1 : index
    %c0_127 = arith.constant 0 : index
    %c0_128 = arith.constant 0 : index
    %c0_129 = arith.constant 0 : index
    %153 = vector.load %arg7[%c1_126, %c0_127, %c0_128, %c0_129] : memref<3x3x128x64xbf16, #tpu.memory_space<vmem>>, vector<1x1x128x64xbf16>
    %154 = vector.shape_cast %153 : vector<1x1x128x64xbf16> to vector<128x64xbf16>
    %cst_130 = arith.constant dense<0.000000e+00> : vector<16x64xf32>
    %155 = tpu.matmul %152, %154, %cst_130 {dimension_numbers = #tpu.dot_dimension_numbers<[1], [0], [0], [1], [0, 0, 1, 1], [], []>} : vector<16x128xbf16>, vector<128x64xbf16>, vector<16x64xf32> -> vector<16x64xf32>
    %156 = arith.addf %150, %155 : vector<16x64xf32>
    %157 = vector.extract_strided_slice %131 {offsets = [1, 1, 0], sizes = [4, 4, 128], strides = [1, 1, 1]} : vector<6x6x128xbf16> to vector<4x4x128xbf16>
    %158 = vector.shape_cast %157 : vector<4x4x128xbf16> to vector<16x128xbf16>
    %c1_131 = arith.constant 1 : index
    %c1_132 = arith.constant 1 : index
    %c0_133 = arith.constant 0 : index
    %c0_134 = arith.constant 0 : index
    %159 = vector.load %arg7[%c1_131, %c1_132, %c0_133, %c0_134] : memref<3x3x128x64xbf16, #tpu.memory_space<vmem>>, vector<1x1x128x64xbf16>
    %160 = vector.shape_cast %159 : vector<1x1x128x64xbf16> to vector<128x64xbf16>
    %cst_135 = arith.constant dense<0.000000e+00> : vector<16x64xf32>
    %161 = tpu.matmul %158, %160, %cst_135 {dimension_numbers = #tpu.dot_dimension_numbers<[1], [0], [0], [1], [0, 0, 1, 1], [], []>} : vector<16x128xbf16>, vector<128x64xbf16>, vector<16x64xf32> -> vector<16x64xf32>
    %162 = arith.addf %156, %161 : vector<16x64xf32>
    %163 = vector.extract_strided_slice %131 {offsets = [1, 2, 0], sizes = [4, 4, 128], strides = [1, 1, 1]} : vector<6x6x128xbf16> to vector<4x4x128xbf16>
    %164 = vector.shape_cast %163 : vector<4x4x128xbf16> to vector<16x128xbf16>
    %c1_136 = arith.constant 1 : index
    %c2_137 = arith.constant 2 : index
    %c0_138 = arith.constant 0 : index
    %c0_139 = arith.constant 0 : index
    %165 = vector.load %arg7[%c1_136, %c2_137, %c0_138, %c0_139] : memref<3x3x128x64xbf16, #tpu.memory_space<vmem>>, vector<1x1x128x64xbf16>
    %166 = vector.shape_cast %165 : vector<1x1x128x64xbf16> to vector<128x64xbf16>
    %cst_140 = arith.constant dense<0.000000e+00> : vector<16x64xf32>
    %167 = tpu.matmul %164, %166, %cst_140 {dimension_numbers = #tpu.dot_dimension_numbers<[1], [0], [0], [1], [0, 0, 1, 1], [], []>} : vector<16x128xbf16>, vector<128x64xbf16>, vector<16x64xf32> -> vector<16x64xf32>
    %168 = arith.addf %162, %167 : vector<16x64xf32>
    %169 = vector.extract_strided_slice %131 {offsets = [2, 0, 0], sizes = [4, 4, 128], strides = [1, 1, 1]} : vector<6x6x128xbf16> to vector<4x4x128xbf16>
    %170 = vector.shape_cast %169 : vector<4x4x128xbf16> to vector<16x128xbf16>
    %c2_141 = arith.constant 2 : index
    %c0_142 = arith.constant 0 : index
    %c0_143 = arith.constant 0 : index
    %c0_144 = arith.constant 0 : index
    %171 = vector.load %arg7[%c2_141, %c0_142, %c0_143, %c0_144] : memref<3x3x128x64xbf16, #tpu.memory_space<vmem>>, vector<1x1x128x64xbf16>
    %172 = vector.shape_cast %171 : vector<1x1x128x64xbf16> to vector<128x64xbf16>
    %cst_145 = arith.constant dense<0.000000e+00> : vector<16x64xf32>
    %173 = tpu.matmul %170, %172, %cst_145 {dimension_numbers = #tpu.dot_dimension_numbers<[1], [0], [0], [1], [0, 0, 1, 1], [], []>} : vector<16x128xbf16>, vector<128x64xbf16>, vector<16x64xf32> -> vector<16x64xf32>
    %174 = arith.addf %168, %173 : vector<16x64xf32>
    %175 = vector.extract_strided_slice %131 {offsets = [2, 1, 0], sizes = [4, 4, 128], strides = [1, 1, 1]} : vector<6x6x128xbf16> to vector<4x4x128xbf16>
    %176 = vector.shape_cast %175 : vector<4x4x128xbf16> to vector<16x128xbf16>
    %c2_146 = arith.constant 2 : index
    %c1_147 = arith.constant 1 : index
    %c0_148 = arith.constant 0 : index
    %c0_149 = arith.constant 0 : index
    %177 = vector.load %arg7[%c2_146, %c1_147, %c0_148, %c0_149] : memref<3x3x128x64xbf16, #tpu.memory_space<vmem>>, vector<1x1x128x64xbf16>
    %178 = vector.shape_cast %177 : vector<1x1x128x64xbf16> to vector<128x64xbf16>
    %cst_150 = arith.constant dense<0.000000e+00> : vector<16x64xf32>
    %179 = tpu.matmul %176, %178, %cst_150 {dimension_numbers = #tpu.dot_dimension_numbers<[1], [0], [0], [1], [0, 0, 1, 1], [], []>} : vector<16x128xbf16>, vector<128x64xbf16>, vector<16x64xf32> -> vector<16x64xf32>
    %180 = arith.addf %174, %179 : vector<16x64xf32>
    %181 = vector.extract_strided_slice %131 {offsets = [2, 2, 0], sizes = [4, 4, 128], strides = [1, 1, 1]} : vector<6x6x128xbf16> to vector<4x4x128xbf16>
    %182 = vector.shape_cast %181 : vector<4x4x128xbf16> to vector<16x128xbf16>
    %c2_151 = arith.constant 2 : index
    %c2_152 = arith.constant 2 : index
    %c0_153 = arith.constant 0 : index
    %c0_154 = arith.constant 0 : index
    %183 = vector.load %arg7[%c2_151, %c2_152, %c0_153, %c0_154] : memref<3x3x128x64xbf16, #tpu.memory_space<vmem>>, vector<1x1x128x64xbf16>
    %184 = vector.shape_cast %183 : vector<1x1x128x64xbf16> to vector<128x64xbf16>
    %cst_155 = arith.constant dense<0.000000e+00> : vector<16x64xf32>
    %185 = tpu.matmul %182, %184, %cst_155 {dimension_numbers = #tpu.dot_dimension_numbers<[1], [0], [0], [1], [0, 0, 1, 1], [], []>} : vector<16x128xbf16>, vector<128x64xbf16>, vector<16x64xf32> -> vector<16x64xf32>
    %186 = arith.addf %180, %185 : vector<16x64xf32>
    %c0_156 = arith.constant 0 : index
    %c0_157 = arith.constant 0 : index
    %187 = vector.load %arg11[%c0_156, %c0_157] : memref<1x64xf32, #tpu.memory_space<vmem>>, vector<1x64xf32>
    %188 = vector.broadcast %187 : vector<1x64xf32> to vector<16x64xf32>
    %189 = arith.addf %186, %188 : vector<16x64xf32>
    %c0_158 = arith.constant 0 : index
    %c0_159 = arith.constant 0 : index
    %190 = vector.load %arg15[%c0_158, %c0_159] : memref<36x16xbf16, #tpu.memory_space<vmem>>, vector<36x16xbf16>
    %191 = arith.truncf %189 : vector<16x64xf32> to vector<16x64xbf16>
    %cst_160 = arith.constant dense<0.000000e+00> : vector<36x64xf32>
    %192 = tpu.matmul %190, %191, %cst_160 {dimension_numbers = #tpu.dot_dimension_numbers<[1], [0], [0], [1], [0, 0, 1, 1], [], []>} : vector<36x16xbf16>, vector<16x64xbf16>, vector<36x64xf32> -> vector<36x64xf32>
    %193 = vector.shape_cast %192 : vector<36x64xf32> to vector<6x6x64xf32>
    %194 = arith.truncf %193 : vector<6x6x64xf32> to vector<6x6x64xbf16>
    %c0_161 = arith.constant 0 : index
    %c0_162 = arith.constant 0 : index
    %c0_163 = arith.constant 0 : index
    %c0_164 = arith.constant 0 : index
    %195 = vector.load %arg4[%c0_161, %c0_162, %c0_163, %c0_164] : memref<1x4x4x256xbf16, #tpu.memory_space<vmem>>, vector<1x4x4x256xbf16>
    %196 = vector.shape_cast %195 : vector<1x4x4x256xbf16> to vector<4x4x256xbf16>
    %cst_165 = arith.constant 0.000000e+00 : f32
    %197 = vector.broadcast %cst_165 : f32 to vector<4x128xf32>
    %198 = vector.extract_strided_slice %196 {offsets = [0, 0, 0], sizes = [2, 2, 256], strides = [1, 1, 1]} : vector<4x4x256xbf16> to vector<2x2x256xbf16>
    %199 = vector.shape_cast %198 : vector<2x2x256xbf16> to vector<4x256xbf16>
    %c0_166 = arith.constant 0 : index
    %c0_167 = arith.constant 0 : index
    %c0_168 = arith.constant 0 : index
    %c0_169 = arith.constant 0 : index
    %200 = vector.load %arg8[%c0_166, %c0_167, %c0_168, %c0_169] : memref<3x3x256x128xbf16, #tpu.memory_space<vmem>>, vector<1x1x256x128xbf16>
    %201 = vector.shape_cast %200 : vector<1x1x256x128xbf16> to vector<256x128xbf16>
    %cst_170 = arith.constant dense<0.000000e+00> : vector<4x128xf32>
    %202 = tpu.matmul %199, %201, %cst_170 {dimension_numbers = #tpu.dot_dimension_numbers<[1], [0], [0], [1], [0, 0, 1, 1], [], []>} : vector<4x256xbf16>, vector<256x128xbf16>, vector<4x128xf32> -> vector<4x128xf32>
    %203 = arith.addf %197, %202 : vector<4x128xf32>
    %204 = vector.extract_strided_slice %196 {offsets = [0, 1, 0], sizes = [2, 2, 256], strides = [1, 1, 1]} : vector<4x4x256xbf16> to vector<2x2x256xbf16>
    %205 = vector.shape_cast %204 : vector<2x2x256xbf16> to vector<4x256xbf16>
    %c0_171 = arith.constant 0 : index
    %c1_172 = arith.constant 1 : index
    %c0_173 = arith.constant 0 : index
    %c0_174 = arith.constant 0 : index
    %206 = vector.load %arg8[%c0_171, %c1_172, %c0_173, %c0_174] : memref<3x3x256x128xbf16, #tpu.memory_space<vmem>>, vector<1x1x256x128xbf16>
    %207 = vector.shape_cast %206 : vector<1x1x256x128xbf16> to vector<256x128xbf16>
    %cst_175 = arith.constant dense<0.000000e+00> : vector<4x128xf32>
    %208 = tpu.matmul %205, %207, %cst_175 {dimension_numbers = #tpu.dot_dimension_numbers<[1], [0], [0], [1], [0, 0, 1, 1], [], []>} : vector<4x256xbf16>, vector<256x128xbf16>, vector<4x128xf32> -> vector<4x128xf32>
    %209 = arith.addf %203, %208 : vector<4x128xf32>
    %210 = vector.extract_strided_slice %196 {offsets = [0, 2, 0], sizes = [2, 2, 256], strides = [1, 1, 1]} : vector<4x4x256xbf16> to vector<2x2x256xbf16>
    %211 = vector.shape_cast %210 : vector<2x2x256xbf16> to vector<4x256xbf16>
    %c0_176 = arith.constant 0 : index
    %c2_177 = arith.constant 2 : index
    %c0_178 = arith.constant 0 : index
    %c0_179 = arith.constant 0 : index
    %212 = vector.load %arg8[%c0_176, %c2_177, %c0_178, %c0_179] : memref<3x3x256x128xbf16, #tpu.memory_space<vmem>>, vector<1x1x256x128xbf16>
    %213 = vector.shape_cast %212 : vector<1x1x256x128xbf16> to vector<256x128xbf16>
    %cst_180 = arith.constant dense<0.000000e+00> : vector<4x128xf32>
    %214 = tpu.matmul %211, %213, %cst_180 {dimension_numbers = #tpu.dot_dimension_numbers<[1], [0], [0], [1], [0, 0, 1, 1], [], []>} : vector<4x256xbf16>, vector<256x128xbf16>, vector<4x128xf32> -> vector<4x128xf32>
    %215 = arith.addf %209, %214 : vector<4x128xf32>
    %216 = vector.extract_strided_slice %196 {offsets = [1, 0, 0], sizes = [2, 2, 256], strides = [1, 1, 1]} : vector<4x4x256xbf16> to vector<2x2x256xbf16>
    %217 = vector.shape_cast %216 : vector<2x2x256xbf16> to vector<4x256xbf16>
    %c1_181 = arith.constant 1 : index
    %c0_182 = arith.constant 0 : index
    %c0_183 = arith.constant 0 : index
    %c0_184 = arith.constant 0 : index
    %218 = vector.load %arg8[%c1_181, %c0_182, %c0_183, %c0_184] : memref<3x3x256x128xbf16, #tpu.memory_space<vmem>>, vector<1x1x256x128xbf16>
    %219 = vector.shape_cast %218 : vector<1x1x256x128xbf16> to vector<256x128xbf16>
    %cst_185 = arith.constant dense<0.000000e+00> : vector<4x128xf32>
    %220 = tpu.matmul %217, %219, %cst_185 {dimension_numbers = #tpu.dot_dimension_numbers<[1], [0], [0], [1], [0, 0, 1, 1], [], []>} : vector<4x256xbf16>, vector<256x128xbf16>, vector<4x128xf32> -> vector<4x128xf32>
    %221 = arith.addf %215, %220 : vector<4x128xf32>
    %222 = vector.extract_strided_slice %196 {offsets = [1, 1, 0], sizes = [2, 2, 256], strides = [1, 1, 1]} : vector<4x4x256xbf16> to vector<2x2x256xbf16>
    %223 = vector.shape_cast %222 : vector<2x2x256xbf16> to vector<4x256xbf16>
    %c1_186 = arith.constant 1 : index
    %c1_187 = arith.constant 1 : index
    %c0_188 = arith.constant 0 : index
    %c0_189 = arith.constant 0 : index
    %224 = vector.load %arg8[%c1_186, %c1_187, %c0_188, %c0_189] : memref<3x3x256x128xbf16, #tpu.memory_space<vmem>>, vector<1x1x256x128xbf16>
    %225 = vector.shape_cast %224 : vector<1x1x256x128xbf16> to vector<256x128xbf16>
    %cst_190 = arith.constant dense<0.000000e+00> : vector<4x128xf32>
    %226 = tpu.matmul %223, %225, %cst_190 {dimension_numbers = #tpu.dot_dimension_numbers<[1], [0], [0], [1], [0, 0, 1, 1], [], []>} : vector<4x256xbf16>, vector<256x128xbf16>, vector<4x128xf32> -> vector<4x128xf32>
    %227 = arith.addf %221, %226 : vector<4x128xf32>
    %228 = vector.extract_strided_slice %196 {offsets = [1, 2, 0], sizes = [2, 2, 256], strides = [1, 1, 1]} : vector<4x4x256xbf16> to vector<2x2x256xbf16>
    %229 = vector.shape_cast %228 : vector<2x2x256xbf16> to vector<4x256xbf16>
    %c1_191 = arith.constant 1 : index
    %c2_192 = arith.constant 2 : index
    %c0_193 = arith.constant 0 : index
    %c0_194 = arith.constant 0 : index
    %230 = vector.load %arg8[%c1_191, %c2_192, %c0_193, %c0_194] : memref<3x3x256x128xbf16, #tpu.memory_space<vmem>>, vector<1x1x256x128xbf16>
    %231 = vector.shape_cast %230 : vector<1x1x256x128xbf16> to vector<256x128xbf16>
    %cst_195 = arith.constant dense<0.000000e+00> : vector<4x128xf32>
    %232 = tpu.matmul %229, %231, %cst_195 {dimension_numbers = #tpu.dot_dimension_numbers<[1], [0], [0], [1], [0, 0, 1, 1], [], []>} : vector<4x256xbf16>, vector<256x128xbf16>, vector<4x128xf32> -> vector<4x128xf32>
    %233 = arith.addf %227, %232 : vector<4x128xf32>
    %234 = vector.extract_strided_slice %196 {offsets = [2, 0, 0], sizes = [2, 2, 256], strides = [1, 1, 1]} : vector<4x4x256xbf16> to vector<2x2x256xbf16>
    %235 = vector.shape_cast %234 : vector<2x2x256xbf16> to vector<4x256xbf16>
    %c2_196 = arith.constant 2 : index
    %c0_197 = arith.constant 0 : index
    %c0_198 = arith.constant 0 : index
    %c0_199 = arith.constant 0 : index
    %236 = vector.load %arg8[%c2_196, %c0_197, %c0_198, %c0_199] : memref<3x3x256x128xbf16, #tpu.memory_space<vmem>>, vector<1x1x256x128xbf16>
    %237 = vector.shape_cast %236 : vector<1x1x256x128xbf16> to vector<256x128xbf16>
    %cst_200 = arith.constant dense<0.000000e+00> : vector<4x128xf32>
    %238 = tpu.matmul %235, %237, %cst_200 {dimension_numbers = #tpu.dot_dimension_numbers<[1], [0], [0], [1], [0, 0, 1, 1], [], []>} : vector<4x256xbf16>, vector<256x128xbf16>, vector<4x128xf32> -> vector<4x128xf32>
    %239 = arith.addf %233, %238 : vector<4x128xf32>
    %240 = vector.extract_strided_slice %196 {offsets = [2, 1, 0], sizes = [2, 2, 256], strides = [1, 1, 1]} : vector<4x4x256xbf16> to vector<2x2x256xbf16>
    %241 = vector.shape_cast %240 : vector<2x2x256xbf16> to vector<4x256xbf16>
    %c2_201 = arith.constant 2 : index
    %c1_202 = arith.constant 1 : index
    %c0_203 = arith.constant 0 : index
    %c0_204 = arith.constant 0 : index
    %242 = vector.load %arg8[%c2_201, %c1_202, %c0_203, %c0_204] : memref<3x3x256x128xbf16, #tpu.memory_space<vmem>>, vector<1x1x256x128xbf16>
    %243 = vector.shape_cast %242 : vector<1x1x256x128xbf16> to vector<256x128xbf16>
    %cst_205 = arith.constant dense<0.000000e+00> : vector<4x128xf32>
    %244 = tpu.matmul %241, %243, %cst_205 {dimension_numbers = #tpu.dot_dimension_numbers<[1], [0], [0], [1], [0, 0, 1, 1], [], []>} : vector<4x256xbf16>, vector<256x128xbf16>, vector<4x128xf32> -> vector<4x128xf32>
    %245 = arith.addf %239, %244 : vector<4x128xf32>
    %246 = vector.extract_strided_slice %196 {offsets = [2, 2, 0], sizes = [2, 2, 256], strides = [1, 1, 1]} : vector<4x4x256xbf16> to vector<2x2x256xbf16>
    %247 = vector.shape_cast %246 : vector<2x2x256xbf16> to vector<4x256xbf16>
    %c2_206 = arith.constant 2 : index
    %c2_207 = arith.constant 2 : index
    %c0_208 = arith.constant 0 : index
    %c0_209 = arith.constant 0 : index
    %248 = vector.load %arg8[%c2_206, %c2_207, %c0_208, %c0_209] : memref<3x3x256x128xbf16, #tpu.memory_space<vmem>>, vector<1x1x256x128xbf16>
    %249 = vector.shape_cast %248 : vector<1x1x256x128xbf16> to vector<256x128xbf16>
    %cst_210 = arith.constant dense<0.000000e+00> : vector<4x128xf32>
    %250 = tpu.matmul %247, %249, %cst_210 {dimension_numbers = #tpu.dot_dimension_numbers<[1], [0], [0], [1], [0, 0, 1, 1], [], []>} : vector<4x256xbf16>, vector<256x128xbf16>, vector<4x128xf32> -> vector<4x128xf32>
    %251 = arith.addf %245, %250 : vector<4x128xf32>
    %c0_211 = arith.constant 0 : index
    %c0_212 = arith.constant 0 : index
    %252 = vector.load %arg12[%c0_211, %c0_212] : memref<1x128xf32, #tpu.memory_space<vmem>>, vector<1x128xf32>
    %253 = vector.broadcast %252 : vector<1x128xf32> to vector<4x128xf32>
    %254 = arith.addf %251, %253 : vector<4x128xf32>
    %c0_213 = arith.constant 0 : index
    %c0_214 = arith.constant 0 : index
    %255 = vector.load %arg16[%c0_213, %c0_214] : memref<36x4xbf16, #tpu.memory_space<vmem>>, vector<36x4xbf16>
    %256 = arith.truncf %254 : vector<4x128xf32> to vector<4x128xbf16>
    %cst_215 = arith.constant dense<0.000000e+00> : vector<36x128xf32>
    %257 = tpu.matmul %255, %256, %cst_215 {dimension_numbers = #tpu.dot_dimension_numbers<[1], [0], [0], [1], [0, 0, 1, 1], [], []>} : vector<36x4xbf16>, vector<4x128xbf16>, vector<36x128xf32> -> vector<36x128xf32>
    %258 = vector.shape_cast %257 : vector<36x128xf32> to vector<6x6x128xf32>
    %259 = arith.truncf %258 : vector<6x6x128xf32> to vector<6x6x128xbf16>
    %260 = tpu.concatenate %64, %129, %194, %259 in 2 : vector<6x6x32xbf16>, vector<6x6x32xbf16>, vector<6x6x64xbf16>, vector<6x6x128xbf16> -> vector<6x6x256xbf16>
    %cst_216 = arith.constant 0.000000e+00 : f32
    %261 = vector.broadcast %cst_216 : f32 to vector<16x128xf32>
    %262 = vector.extract_strided_slice %260 {offsets = [0, 0, 0], sizes = [4, 4, 256], strides = [1, 1, 1]} : vector<6x6x256xbf16> to vector<4x4x256xbf16>
    %263 = vector.shape_cast %262 : vector<4x4x256xbf16> to vector<16x256xbf16>
    %c0_217 = arith.constant 0 : index
    %c0_218 = arith.constant 0 : index
    %c0_219 = arith.constant 0 : index
    %c0_220 = arith.constant 0 : index
    %264 = vector.load %arg17[%c0_217, %c0_218, %c0_219, %c0_220] : memref<3x3x256x128xbf16, #tpu.memory_space<vmem>>, vector<1x1x256x128xbf16>
    %265 = vector.shape_cast %264 : vector<1x1x256x128xbf16> to vector<256x128xbf16>
    %cst_221 = arith.constant dense<0.000000e+00> : vector<16x128xf32>
    %266 = tpu.matmul %263, %265, %cst_221 {dimension_numbers = #tpu.dot_dimension_numbers<[1], [0], [0], [1], [0, 0, 1, 1], [], []>} : vector<16x256xbf16>, vector<256x128xbf16>, vector<16x128xf32> -> vector<16x128xf32>
    %267 = arith.addf %261, %266 : vector<16x128xf32>
    %268 = vector.extract_strided_slice %260 {offsets = [0, 1, 0], sizes = [4, 4, 256], strides = [1, 1, 1]} : vector<6x6x256xbf16> to vector<4x4x256xbf16>
    %269 = vector.shape_cast %268 : vector<4x4x256xbf16> to vector<16x256xbf16>
    %c0_222 = arith.constant 0 : index
    %c1_223 = arith.constant 1 : index
    %c0_224 = arith.constant 0 : index
    %c0_225 = arith.constant 0 : index
    %270 = vector.load %arg17[%c0_222, %c1_223, %c0_224, %c0_225] : memref<3x3x256x128xbf16, #tpu.memory_space<vmem>>, vector<1x1x256x128xbf16>
    %271 = vector.shape_cast %270 : vector<1x1x256x128xbf16> to vector<256x128xbf16>
    %cst_226 = arith.constant dense<0.000000e+00> : vector<16x128xf32>
    %272 = tpu.matmul %269, %271, %cst_226 {dimension_numbers = #tpu.dot_dimension_numbers<[1], [0], [0], [1], [0, 0, 1, 1], [], []>} : vector<16x256xbf16>, vector<256x128xbf16>, vector<16x128xf32> -> vector<16x128xf32>
    %273 = arith.addf %267, %272 : vector<16x128xf32>
    %274 = vector.extract_strided_slice %260 {offsets = [0, 2, 0], sizes = [4, 4, 256], strides = [1, 1, 1]} : vector<6x6x256xbf16> to vector<4x4x256xbf16>
    %275 = vector.shape_cast %274 : vector<4x4x256xbf16> to vector<16x256xbf16>
    %c0_227 = arith.constant 0 : index
    %c2_228 = arith.constant 2 : index
    %c0_229 = arith.constant 0 : index
    %c0_230 = arith.constant 0 : index
    %276 = vector.load %arg17[%c0_227, %c2_228, %c0_229, %c0_230] : memref<3x3x256x128xbf16, #tpu.memory_space<vmem>>, vector<1x1x256x128xbf16>
    %277 = vector.shape_cast %276 : vector<1x1x256x128xbf16> to vector<256x128xbf16>
    %cst_231 = arith.constant dense<0.000000e+00> : vector<16x128xf32>
    %278 = tpu.matmul %275, %277, %cst_231 {dimension_numbers = #tpu.dot_dimension_numbers<[1], [0], [0], [1], [0, 0, 1, 1], [], []>} : vector<16x256xbf16>, vector<256x128xbf16>, vector<16x128xf32> -> vector<16x128xf32>
    %279 = arith.addf %273, %278 : vector<16x128xf32>
    %280 = vector.extract_strided_slice %260 {offsets = [1, 0, 0], sizes = [4, 4, 256], strides = [1, 1, 1]} : vector<6x6x256xbf16> to vector<4x4x256xbf16>
    %281 = vector.shape_cast %280 : vector<4x4x256xbf16> to vector<16x256xbf16>
    %c1_232 = arith.constant 1 : index
    %c0_233 = arith.constant 0 : index
    %c0_234 = arith.constant 0 : index
    %c0_235 = arith.constant 0 : index
    %282 = vector.load %arg17[%c1_232, %c0_233, %c0_234, %c0_235] : memref<3x3x256x128xbf16, #tpu.memory_space<vmem>>, vector<1x1x256x128xbf16>
    %283 = vector.shape_cast %282 : vector<1x1x256x128xbf16> to vector<256x128xbf16>
    %cst_236 = arith.constant dense<0.000000e+00> : vector<16x128xf32>
    %284 = tpu.matmul %281, %283, %cst_236 {dimension_numbers = #tpu.dot_dimension_numbers<[1], [0], [0], [1], [0, 0, 1, 1], [], []>} : vector<16x256xbf16>, vector<256x128xbf16>, vector<16x128xf32> -> vector<16x128xf32>
    %285 = arith.addf %279, %284 : vector<16x128xf32>
    %286 = vector.extract_strided_slice %260 {offsets = [1, 1, 0], sizes = [4, 4, 256], strides = [1, 1, 1]} : vector<6x6x256xbf16> to vector<4x4x256xbf16>
    %287 = vector.shape_cast %286 : vector<4x4x256xbf16> to vector<16x256xbf16>
    %c1_237 = arith.constant 1 : index
    %c1_238 = arith.constant 1 : index
    %c0_239 = arith.constant 0 : index
    %c0_240 = arith.constant 0 : index
    %288 = vector.load %arg17[%c1_237, %c1_238, %c0_239, %c0_240] : memref<3x3x256x128xbf16, #tpu.memory_space<vmem>>, vector<1x1x256x128xbf16>
    %289 = vector.shape_cast %288 : vector<1x1x256x128xbf16> to vector<256x128xbf16>
    %cst_241 = arith.constant dense<0.000000e+00> : vector<16x128xf32>
    %290 = tpu.matmul %287, %289, %cst_241 {dimension_numbers = #tpu.dot_dimension_numbers<[1], [0], [0], [1], [0, 0, 1, 1], [], []>} : vector<16x256xbf16>, vector<256x128xbf16>, vector<16x128xf32> -> vector<16x128xf32>
    %291 = arith.addf %285, %290 : vector<16x128xf32>
    %292 = vector.extract_strided_slice %260 {offsets = [1, 2, 0], sizes = [4, 4, 256], strides = [1, 1, 1]} : vector<6x6x256xbf16> to vector<4x4x256xbf16>
    %293 = vector.shape_cast %292 : vector<4x4x256xbf16> to vector<16x256xbf16>
    %c1_242 = arith.constant 1 : index
    %c2_243 = arith.constant 2 : index
    %c0_244 = arith.constant 0 : index
    %c0_245 = arith.constant 0 : index
    %294 = vector.load %arg17[%c1_242, %c2_243, %c0_244, %c0_245] : memref<3x3x256x128xbf16, #tpu.memory_space<vmem>>, vector<1x1x256x128xbf16>
    %295 = vector.shape_cast %294 : vector<1x1x256x128xbf16> to vector<256x128xbf16>
    %cst_246 = arith.constant dense<0.000000e+00> : vector<16x128xf32>
    %296 = tpu.matmul %293, %295, %cst_246 {dimension_numbers = #tpu.dot_dimension_numbers<[1], [0], [0], [1], [0, 0, 1, 1], [], []>} : vector<16x256xbf16>, vector<256x128xbf16>, vector<16x128xf32> -> vector<16x128xf32>
    %297 = arith.addf %291, %296 : vector<16x128xf32>
    %298 = vector.extract_strided_slice %260 {offsets = [2, 0, 0], sizes = [4, 4, 256], strides = [1, 1, 1]} : vector<6x6x256xbf16> to vector<4x4x256xbf16>
    %299 = vector.shape_cast %298 : vector<4x4x256xbf16> to vector<16x256xbf16>
    %c2_247 = arith.constant 2 : index
    %c0_248 = arith.constant 0 : index
    %c0_249 = arith.constant 0 : index
    %c0_250 = arith.constant 0 : index
    %300 = vector.load %arg17[%c2_247, %c0_248, %c0_249, %c0_250] : memref<3x3x256x128xbf16, #tpu.memory_space<vmem>>, vector<1x1x256x128xbf16>
    %301 = vector.shape_cast %300 : vector<1x1x256x128xbf16> to vector<256x128xbf16>
    %cst_251 = arith.constant dense<0.000000e+00> : vector<16x128xf32>
    %302 = tpu.matmul %299, %301, %cst_251 {dimension_numbers = #tpu.dot_dimension_numbers<[1], [0], [0], [1], [0, 0, 1, 1], [], []>} : vector<16x256xbf16>, vector<256x128xbf16>, vector<16x128xf32> -> vector<16x128xf32>
    %303 = arith.addf %297, %302 : vector<16x128xf32>
    %304 = vector.extract_strided_slice %260 {offsets = [2, 1, 0], sizes = [4, 4, 256], strides = [1, 1, 1]} : vector<6x6x256xbf16> to vector<4x4x256xbf16>
    %305 = vector.shape_cast %304 : vector<4x4x256xbf16> to vector<16x256xbf16>
    %c2_252 = arith.constant 2 : index
    %c1_253 = arith.constant 1 : index
    %c0_254 = arith.constant 0 : index
    %c0_255 = arith.constant 0 : index
    %306 = vector.load %arg17[%c2_252, %c1_253, %c0_254, %c0_255] : memref<3x3x256x128xbf16, #tpu.memory_space<vmem>>, vector<1x1x256x128xbf16>
    %307 = vector.shape_cast %306 : vector<1x1x256x128xbf16> to vector<256x128xbf16>
    %cst_256 = arith.constant dense<0.000000e+00> : vector<16x128xf32>
    %308 = tpu.matmul %305, %307, %cst_256 {dimension_numbers = #tpu.dot_dimension_numbers<[1], [0], [0], [1], [0, 0, 1, 1], [], []>} : vector<16x256xbf16>, vector<256x128xbf16>, vector<16x128xf32> -> vector<16x128xf32>
    %309 = arith.addf %303, %308 : vector<16x128xf32>
    %310 = vector.extract_strided_slice %260 {offsets = [2, 2, 0], sizes = [4, 4, 256], strides = [1, 1, 1]} : vector<6x6x256xbf16> to vector<4x4x256xbf16>
    %311 = vector.shape_cast %310 : vector<4x4x256xbf16> to vector<16x256xbf16>
    %c2_257 = arith.constant 2 : index
    %c2_258 = arith.constant 2 : index
    %c0_259 = arith.constant 0 : index
    %c0_260 = arith.constant 0 : index
    %312 = vector.load %arg17[%c2_257, %c2_258, %c0_259, %c0_260] : memref<3x3x256x128xbf16, #tpu.memory_space<vmem>>, vector<1x1x256x128xbf16>
    %313 = vector.shape_cast %312 : vector<1x1x256x128xbf16> to vector<256x128xbf16>
    %cst_261 = arith.constant dense<0.000000e+00> : vector<16x128xf32>
    %314 = tpu.matmul %311, %313, %cst_261 {dimension_numbers = #tpu.dot_dimension_numbers<[1], [0], [0], [1], [0, 0, 1, 1], [], []>} : vector<16x256xbf16>, vector<256x128xbf16>, vector<16x128xf32> -> vector<16x128xf32>
    %315 = arith.addf %309, %314 : vector<16x128xf32>
    %c0_262 = arith.constant 0 : index
    %c0_263 = arith.constant 0 : index
    %316 = vector.load %arg18[%c0_262, %c0_263] : memref<1x128xf32, #tpu.memory_space<vmem>>, vector<1x128xf32>
    %317 = vector.broadcast %316 : vector<1x128xf32> to vector<16x128xf32>
    %318 = arith.addf %315, %317 : vector<16x128xf32>
    %c0_264 = arith.constant 0 : index
    %c0_265 = arith.constant 0 : index
    %c0_266 = arith.constant 0 : index
    %319 = vector.load %arg19[%c0_264, %c0_265, %c0_266] : memref<1x16x128xf32, #tpu.memory_space<vmem>>, vector<1x16x128xf32>
    %320 = vector.shape_cast %319 : vector<1x16x128xf32> to vector<16x128xf32>
    %321 = vector.shape_cast %318 : vector<16x128xf32> to vector<1x16x128xf32>
    tpu.vector_store %arg19[%c0_264, %c0_265, %c0_266], %321 {strides = array<i32>} : memref<1x16x128xf32, #tpu.memory_space<vmem>>, vector<1x16x128xf32>,
    return
  }
  func.func @transform_0(%arg0: i32) -> (i32, i32, i32, i32) {
    %c0_i32 = arith.constant 0 : i32
    %c0_i32_0 = arith.constant 0 : i32
    %c0_i32_1 = arith.constant 0 : i32
    %c0_i32_2 = arith.constant 0 : i32
    return %arg0, %c0_i32, %c0_i32_0, %c0_i32_1 : i32, i32, i32, i32
  }
  func.func @transform_1(%arg0: i32) -> (i32, i32, i32, i32) {
    %c0_i32 = arith.constant 0 : i32
    %c0_i32_0 = arith.constant 0 : i32
    %c0_i32_1 = arith.constant 0 : i32
    %c0_i32_2 = arith.constant 0 : i32
    return %arg0, %c0_i32, %c0_i32_0, %c0_i32_1 : i32, i32, i32, i32
  }
  func.func @transform_2(%arg0: i32) -> (i32, i32, i32, i32) {
    %c0_i32 = arith.constant 0 : i32
    %c0_i32_0 = arith.constant 0 : i32
    %c0_i32_1 = arith.constant 0 : i32
    %c0_i32_2 = arith.constant 0 : i32
    return %arg0, %c0_i32, %c0_i32_0, %c0_i32_1 : i32, i32, i32, i32
  }
  func.func @transform_3(%arg0: i32) -> (i32, i32, i32, i32) {
    %c0_i32 = arith.constant 0 : i32
    %c0_i32_0 = arith.constant 0 : i32
    %c0_i32_1 = arith.constant 0 : i32
    %c0_i32_2 = arith.constant 0 : i32
    return %arg0, %c0_i32, %c0_i32_0, %c0_i32_1 : i32, i32, i32, i32
  }
  func.func @transform_4(%arg0: i32) -> (i32, i32, i32, i32) {
    %c0_i32 = arith.constant 0 : i32
    %c0_i32_0 = arith.constant 0 : i32
    %c0_i32_1 = arith.constant 0 : i32
    %c0_i32_2 = arith.constant 0 : i32
    %c0_i32_3 = arith.constant 0 : i32
    return %c0_i32, %c0_i32_0, %c0_i32_1, %c0_i32_2 : i32, i32, i32, i32
  }
  func.func @transform_5(%arg0: i32) -> (i32, i32, i32, i32) {
    %c0_i32 = arith.constant 0 : i32
    %c0_i32_0 = arith.constant 0 : i32
    %c0_i32_1 = arith.constant 0 : i32
    %c0_i32_2 = arith.constant 0 : i32
    %c0_i32_3 = arith.constant 0 : i32
    return %c0_i32, %c0_i32_0, %c0_i32_1, %c0_i32_2 : i32, i32, i32, i32
  }
  func.func @transform_6(%arg0: i32) -> (i32, i32, i32, i32) {
    %c0_i32 = arith.constant 0 : i32
    %c0_i32_0 = arith.constant 0 : i32
    %c0_i32_1 = arith.constant 0 : i32
    %c0_i32_2 = arith.constant 0 : i32
    %c0_i32_3 = arith.constant 0 : i32
    return %c0_i32, %c0_i32_0, %c0_i32_1, %c0_i32_2 : i32, i32, i32, i32
  }
  func.func @transform_7(%arg0: i32) -> (i32, i32, i32, i32) {
    %c0_i32 = arith.constant 0 : i32
    %c0_i32_0 = arith.constant 0 : i32
    %c0_i32_1 = arith.constant 0 : i32
    %c0_i32_2 = arith.constant 0 : i32
    %c0_i32_3 = arith.constant 0 : i32
    return %c0_i32, %c0_i32_0, %c0_i32_1, %c0_i32_2 : i32, i32, i32, i32
  }
  func.func @transform_8(%arg0: i32) -> (i32, i32) {
    %c0_i32 = arith.constant 0 : i32
    %c0_i32_0 = arith.constant 0 : i32
    %c0_i32_1 = arith.constant 0 : i32
    return %c0_i32, %c0_i32_0 : i32, i32
  }
  func.func @transform_9(%arg0: i32) -> (i32, i32) {
    %c0_i32 = arith.constant 0 : i32
    %c0_i32_0 = arith.constant 0 : i32
    %c0_i32_1 = arith.constant 0 : i32
    return %c0_i32, %c0_i32_0 : i32, i32
  }
  func.func @transform_10(%arg0: i32) -> (i32, i32) {
    %c0_i32 = arith.constant 0 : i32
    %c0_i32_0 = arith.constant 0 : i32
    %c0_i32_1 = arith.constant 0 : i32
    return %c0_i32, %c0_i32_0 : i32, i32
  }
  func.func @transform_11(%arg0: i32) -> (i32, i32) {
    %c0_i32 = arith.constant 0 : i32
    %c0_i32_0 = arith.constant 0 : i32
    %c0_i32_1 = arith.constant 0 : i32
    return %c0_i32, %c0_i32_0 : i32, i32
  }
  func.func @transform_12(%arg0: i32) -> (i32, i32) {
    %c0_i32 = arith.constant 0 : i32
    %c0_i32_0 = arith.constant 0 : i32
    %c0_i32_1 = arith.constant 0 : i32
    return %c0_i32, %c0_i32_0 : i32, i32
  }
  func.func @transform_13(%arg0: i32) -> (i32, i32) {
    %c0_i32 = arith.constant 0 : i32
    %c0_i32_0 = arith.constant 0 : i32
    %c0_i32_1 = arith.constant 0 : i32
    return %c0_i32, %c0_i32_0 : i32, i32
  }
  func.func @transform_14(%arg0: i32) -> (i32, i32) {
    %c0_i32 = arith.constant 0 : i32
    %c0_i32_0 = arith.constant 0 : i32
    %c0_i32_1 = arith.constant 0 : i32
    return %c0_i32, %c0_i32_0 : i32, i32
  }
  func.func @transform_15(%arg0: i32) -> (i32, i32) {
    %c0_i32 = arith.constant 0 : i32
    %c0_i32_0 = arith.constant 0 : i32
    %c0_i32_1 = arith.constant 0 : i32
    return %c0_i32, %c0_i32_0 : i32, i32
  }
  func.func @transform_16(%arg0: i32) -> (i32, i32, i32, i32) {
    %c0_i32 = arith.constant 0 : i32
    %c0_i32_0 = arith.constant 0 : i32
    %c0_i32_1 = arith.constant 0 : i32
    %c0_i32_2 = arith.constant 0 : i32
    %c0_i32_3 = arith.constant 0 : i32
    return %c0_i32, %c0_i32_0, %c0_i32_1, %c0_i32_2 : i32, i32, i32, i32
  }
  func.func @transform_17(%arg0: i32) -> (i32, i32) {
    %c0_i32 = arith.constant 0 : i32
    %c0_i32_0 = arith.constant 0 : i32
    %c0_i32_1 = arith.constant 0 : i32
    return %c0_i32, %c0_i32_0 : i32, i32
  }
  func.func @transform_18(%arg0: i32) -> (i32, i32, i32) {
    %c0_i32 = arith.constant 0 : i32
    %c0_i32_0 = arith.constant 0 : i32
    %c0_i32_1 = arith.constant 0 : i32
    return %arg0, %c0_i32, %c0_i32_0 : i32, i32, i32
  }
}

</mosaic_0001>

<bundles_post_ra>
// kernel: spp_resonly_center_f16.1
= control target key start
LH: loop header
LB: loop body
LE: loop exit
PB: predicated region body
PF: predicated region fallthrough
CT: control target
= control target key end

     0   :  { %s15961_s0 = inlined_call_operand.vmem [shape: bf16[2,18,18,64], index: 0, kind: input, shape index: {}]   ;;  %s15962_s1 = inlined_call_operand.vmem [shape: bf16[2,10,10,64], index: 1, kind: input, shape index: {}]   ;;  %s15963_s2 = inlined_call_operand.vmem [shape: bf16[2,6,6,128], index: 2, kind: input, shape index: {}]   ;;  %s15964_s3 = inlined_call_operand.vmem [shape: bf16[2,4,4,256], index: 3, kind: input, shape index: {}]   ;;  %s15965_s4 = inlined_call_operand.vmem [shape: bf16[3,3,64,32], index: 4, kind: input, shape index: {}]   ;;  %s15966_s5 = inlined_call_operand.vmem [shape: bf16[3,3,64,32], index: 5, kind: input, shape index: {}]   ;;  %s15967_s6 = inlined_call_operand.vmem [shape: bf16[3,3,128,64], index: 6, kind: input, shape index: {}]   ;;  %s15968_s7 = inlined_call_operand.vmem [shape: bf16[3,3,256,128], index: 7, kind: input, shape index: {}]   ;;  %s15969_s8 = inlined_call_operand.vmem [shape: f32[1,32], index: 8, kind: input, shape index: {}]   ;;  %s15970_s9 = inlined_call_operand.vmem [shape: f32[1,32], index: 9, kind: input, shape index: {}]   ;;  %s15971_s10 = inlined_call_operand.vmem [shape: f32[1,64], index: 10, kind: input, shape index: {}]   ;;  %s15972_s11 = inlined_call_operand.vmem [shape: f32[1,128], index: 11, kind: input, shape index: {}]   ;;  %s15973_s12 = inlined_call_operand.vmem [shape: bf16[36,256], index: 12, kind: input, shape index: {}]   ;;  %s15974_s13 = inlined_call_operand.vmem [shape: bf16[36,64], index: 13, kind: input, shape index: {}]   ;;  %s15975_s14 = inlined_call_operand.vmem [shape: bf16[36,16], index: 14, kind: input, shape index: {}]   ;;  %s15976_s15 = inlined_call_operand.vmem [shape: bf16[36,4], index: 15, kind: input, shape index: {}]   ;;  %s15977_s16 = inlined_call_operand.vmem [shape: bf16[3,3,256,128], index: 16, kind: input, shape index: {}]   ;;  %s15978_s17 = inlined_call_operand.vmem [shape: f32[1,128], index: 17, kind: input, shape index: {}]   ;;  %s15979_s18 = inlined_call_operand.hbm [shape: f32[2,16,128], index: 18, kind: output, shape index: {}]  }
   0x1   :  { %15996 = sst [smem:[#allocation41_spill]] %s15961_s0 }
   0x2   :  { %15997 = sst [smem:[#allocation42_spill]] %s15962_s1 }
   0x3   :  { %15998 = sst [smem:[#allocation43_spill]] %s15963_s2 }
   0x4   :  { %15999 = sst [smem:[#allocation44_spill]] %s15964_s3 }
   0x5   :  { %16000 = sst [smem:[#allocation45_spill]] %s15965_s4 }
   0x6   :  { %23 = vsyncpa [#allocation3], 0 }
   0x7   :  { %25 = vsyncpa [#allocation3 + $0x1], 0  ;;  %s12515_s27 = smov 0   ;;  %s12517_s28 = smov 0  }
   0x8   :  { %s12519_s29 = smov 0   ;;  %s12521_s30 = smov 0  }
   0x9 LB: > { %16001 = sst [smem:[#allocation5_spill]] %s12402_s27  ;;  %s12536_s0 = sadd.s32 4294967295, %s12414_s30   ;;  %s12414_s30 = sphi %s12521_s30, %s16116_s30   ;;  %s12410_s29 = sphi %s12519_s29, %s16118_s29   ;;  %s12406_s28 = sphi %s12517_s28, %s16120_s28   ;;  %s12402_s27 = sphi %s12515_s27, %s16119_s27  }
   0xa   : > { %16002 = sst [smem:[#allocation6_spill]] %s12410_s29  ;;  %s8975_s19 = sadd.s32 4294967294, %s12414_s30  }
   0xb   : > { %16003 = sst [smem:[#allocation7_spill]] %s12414_s30  ;;  %s12540_s1 = sadd.s32 1, %s12414_s30  }
   0xc   : > { %16004 = sst [smem:[#allocation8_spill]] %s12540_s1  ;;  %s436_s20 = sadd.s32 1, %s12410_s29 }
   0xd   : > { %s433_s21 = ssub.s32 %s12414_s30, %s12540_s1  ;;  %p446_p0 = scmp.ne.s32.totalorder %s12410_s29, %s12406_s28 }
   0xe   : > { %p434_p1 = scmp.eq.s32.totalorder %s433_s21, 0  ;;  %p447_p2 = scmp.eq.s32.totalorder %s12536_s0, 1 }
   0xf   : > { %p452_p3 = scmp.ne.s32.totalorder %s12406_s28, %s12402_s27  ;;  %p453_p4 = scmp.eq.s32.totalorder %s8975_s19, 1 }
  0x10   : > { %s12551_s22 = scalar_select %p434_p1, %s12410_s29, %s436_s20  }
  0x11   : > { %p12553_p5 = por %p447_p2, %p446_p0  ;;  %p12557_p6 = por %p453_p4, %p452_p3 }
  0x12   : > { %16005 = sst [smem:[#allocation9_spill]] %s12551_s22  ;;  %p8978_p7 = scmp.ge.s32.totalorder %s12414_s30, 1 }
  0x13   : > { %s16007_s23 = scalar_select %p12557_p6, 1, 0 }
  0x14   : > { %p545_p8 = scmp.lt.s32.totalorder %s12414_s30, 3 }
  0x15   : > { %16008 = sst [smem:[#allocation10_spill]] %s16007_s23 }
  0x16   : > { %p546_p9 = pnand %p8978_p7, %p545_p8 }
  0x18   : > { %549 = sbr.rel (%p546_p9) target bundleno = 2619 (0xa3b), region = 92 }
  0x1d   : > { %s16009_s4 = sld [smem:[#allocation45_spill]]  ;;  %p614_p10 = scmp.lt.s32.totalorder %s12536_s0, 1  ;;  %vm1560_vm0 = vcmask 1042432   ;;  %vm1561_vm1 = vcmask 1046532   ;;  %vm697_vm2 = vsmask.f32 3328 }
  0x1e   : > { %s16010_s1 = sld [smem:[#allocation41_spill]]  ;;  %vm12609_vm3 = vmor %vm1560_vm0, %vm1561_vm1  ;;  %vm698_vm4 = vsmask.f32 7440  ;;  %vm1165_vm5 = vcmask 523264   ;;  %v16013_v44 = vmov 0  ;;  %vm4268_vm7 = vcmask 1041408  }
  0x1f   : > { %s12583_s26 = scalar_select %p614_p10, %s12536_s0, 1  ;;  %vm12640_vm6 = vmor %vm697_vm2, %vm698_vm4  ;;  %vm4272_vm8 = vcmask 1043458   ;;  %vm4294_vm9 = vsmask.f32 1280  ;;  %vm4295_vm10 = vsmask.f32 3336 }
  0x20   : > { %v16014_v44 = vsel %vm12640_vm6, 4294967295, %v16013_v44  ;;  %s16096_s30 = sld [smem:[#allocation42_spill]]  ;;  %s15994_s19 = smov 32   ;;  %vm14398_vm11 = vmor %vm4294_vm9, %vm4295_vm10  ;;  %vm4297_vm12 = vsmask.f32 5392  ;;  %vm4520_vm0 = vcmask 1040384  }
  0x21   : > { %s12293_s25 = smul.u32 216, %s12583_s26  ;;  %16015 = vst [vmem:[#allocation11_spill] sm:$0xff] %v16014_v44  ;;  %s16098_s20 = sld [smem:[#allocation43_spill]]  ;;  %vm14418_vm13 = vmor %vm14398_vm11, %vm4297_vm12  ;;  %vm4299_vm14 = vsmask.f32 7448  ;;  %vm4521_vm1 = vcmask 1042434  }
  0x22   : > { %s12294_s29 = smul.u32 80, %s12583_s26  ;;  %vm14441_vm15 = vmor %vm14418_vm13, %vm4299_vm14  ;;  %vm5423_vm10 = vsmask.f32 256  ;;  %vm5424_vm11 = vsmask.f32 1284  ;;  %s16109_s3 = sld [smem:[#allocation44_spill]] }
  0x23   : > { %v11861_v0 = vld [vmem:[%s16009_s4 + $0x58] sm:$0xff]  ;;  %v11860_v4 = vld [vmem:[%s16009_s4 + $0x50] sm:$0xff]  ;;  %v11859_v8 = vld [vmem:[%s16009_s4 + $0x48] sm:$0xff]  ;;  %s12295_s24 = smul.u32 24, %s12583_s26  ;;  %vm5426_vm13 = vsmask.f32 2312 }
  0x24   : > { %v11865_v1 = vld [vmem:[%s16009_s4 + $0x78] sm:$0xff]  ;;  %1808 = vmatpush.bf16.msra.mxu2 %v11861_v0  ;;  %v11864_v5 = vld [vmem:[%s16009_s4 + $0x70] sm:$0xff]  ;;  %v11863_v9 = vld [vmem:[%s16009_s4 + $0x68] sm:$0xff]  ;;  %s12607_s21 = scalar_lea.vmem %s16010_s1, %s12293_s25  ;;  %vm5428_vm14 = vsmask.f32 3340  ;;  %s12417_s22 = smov 64  }
  0x25   : > { %v11857_v2 = vld [vmem:[%s16009_s4 + $0x38] sm:$0xff]  ;;  %1970 = vmatpush.bf16.msra.mxu3 %v11865_v1  ;;  %v11856_v6 = vld [vmem:[%s16009_s4 + $0x30] sm:$0xff]  ;;  %v11855_v10 = vld [vmem:[%s16009_s4 + $0x28] sm:$0xff] }
  0x26   : > { %v11853_v3 = vld [vmem:[%s16009_s4 + $0x18] sm:$0xff]  ;;  %1218 = vmatpush.bf16.msra.mxu0 %v11857_v2  ;;  %v11852_v7 = vld [vmem:[%s16009_s4 + $0x10] sm:$0xff]  ;;  %v11851_v11 = vld [vmem:[%s16009_s4 + $0x8] sm:$0xff]  ;;  %s13713_s23 = scalar_lea.vmem %s16096_s30, %s12294_s29  ;;  %s611_s30 = sand.u32 1, %s12406_s28  }
  0x27   : > { %1459 = vmatpush.bf16.msra.mxu1 %v11853_v3  ;;  %v635_v13 = vld [vmem:[%s12607_s21] sm:$0xf]  ;;  %v636_v14 = vld [vmem:[%s12607_s21 + $0x4] sm:$0xf]  ;;  %v637_v15 = vld [vmem:[%s12607_s21 + $0x8] sm:$0x1]  ;;  %s14321_s29 = scalar_lea.vmem %s16098_s20, %s12295_s24 }
  0x28   : > { %1809 = vmatpush.bf16.msra.mxu2 %v11860_v4  ;;  %v9121_v16 = vrot.slane %v635_v13, 9  ;;  %v1565_v17 = vrot.slane %v636_v14, 5  ;;  %v1568_v18 = vrot.slane %v637_v15, 5  ;;  %v701_v19 = vshrl.u32 %v635_v13, 16  ;;  %v11858_v20 = vld [vmem:[%s16009_s4 + $0x40] sm:$0xff]  ;;  %v12635_v39 = vld [vmem:[%s12607_s21 + $0xc] sm:$0xff]  ;;  %vm14522_vm2 = vmor %vm4520_vm0, %vm4521_vm1 }
  0x29   : > { %1971 = vmatpush.bf16.msra.mxu3 %v11864_v5  ;;  %v704_v21 = vshll.u32 %v635_v13, 16  ;;  %v710_v22 = vshll.u32 %v636_v14, 16  ;;  %v714_v23 = vshrl.u32 %v636_v14, 16  ;;  %v720_v24 = vshll.u32 %v637_v15, 16  ;;  %v11862_v25 = vld [vmem:[%s16009_s4 + $0x60] sm:$0xff]  ;;  %s11831_s20 = sshll.u32 %s12583_s26, 4  ;;  %vm5425_vm12 = vmor %vm5423_vm10, %vm5424_vm11 }
  0x2a   : > { %1219 = vmatpush.bf16.msra.mxu0 %v11856_v6  ;;  %v11854_v26 = vld [vmem:[%s16009_s4 + $0x20] sm:$0xff]  ;;  %v1566_v27 = vsel %vm12609_vm3, %v9121_v16, %v1565_v17  ;;  %v1567_v28 = vrot.slane %v1565_v17, 4  ;;  %v703_v29 = vrot.slane %v701_v19, 4  ;;  %v638_v30 = vld [vmem:[%s12607_s21 + $0xc] sm:$0xf]  ;;  %s14721_s1 = scalar_lea.vmem %s16109_s3, %s11831_s20  ;;  %vm5410_vm11 = vcmask 1041409  }
  0x2b   : > { %1460 = vmatpush.bf16.msra.mxu1 %v11852_v7  ;;  %v11850_v31 = vld [vmem:[%s16009_s4] sm:$0xff]  ;;  %v1684_v32 = vunpack.c.l.b16 %v1566_v27  ;;  %v706_v33 = vrot.slane %v704_v21, 5  ;;  %v712_v34 = vrot.slane %v710_v22, 5  ;;  %v716_v35 = vrot.slane %v714_v23, 4  ;;  %v639_v36 = vld [vmem:[%s12607_s21 + $0x10] sm:$0xf] }
  0x2c   : > { %1810 = vmatpush.bf16.msra.mxu2 %v11859_v8  ;;  %v1569_v37 = vsel %vm12609_vm3, %v1567_v28, %v1568_v18  ;;  %v722_v42 = vrot.slane %v720_v24, 5  ;;  %v640_v43 = vld [vmem:[%s12607_s21 + $0x14] sm:$0x1]  ;;  %v11832_v45 = vld [vmem:[%s12607_s21] sm:$0xff]  ;;  %v1572_v46 = vrot.slane %v639_v36, 5  ;;  %v725_v47 = vshrl.u32 %v638_v30, 16 }
  0x2d   : > { %1972 = vmatpush.bf16.msra.mxu3 %v11863_v9  ;;  %v1685_v38 = vunpack.c.l.b16 %v1569_v37  ;;  %v707_v40 = vor.u32 %v706_v33, %v703_v29  ;;  %v717_v41 = vor.u32 %v716_v35, %v712_v34  ;;  %v728_v48 = vshll.u32 %v638_v30, 16  ;;  %v11834_v22 = vld [vmem:[%s12607_s21 + $0x18] sm:$0xff]  ;;  %s8979_s24 = sshll.u32 %s611_s30, 4 }
  0x2e   : > { %1220 = vmatpush.bf16.msra.mxu0 %v11855_v10  ;;  %v9122_v52 = vrot.slane %v638_v30, 9  ;;  %v727_v53 = vrot.slane %v725_v47, 4  ;;  %v734_v55 = vshll.u32 %v639_v36, 16  ;;  %v1575_v58 = vrot.slane %v640_v43, 5  ;;  %v641_v10 = vld [vmem:[%s12607_s21 + $0x18] sm:$0xf] }
  0x2f   : > { %1461 = vmatpush.bf16.msra.mxu1 %v11851_v11  ;;  %v1716_v49 = vpack.c.b16 %v1685_v38, %v1684_v32  ;;  %v708_v50 = vrot.slane %v707_v40, 4  ;;  %v718_v51 = vrot.slane %v717_v41, 4  ;;  %v730_v54 = vrot.slane %v728_v48, 5  ;;  %v642_v11 = vld [vmem:[%s12607_s21 + $0x1c] sm:$0xf] }
  0x30   : > { %1811 = vmatpush.bf16.msra.mxu2 %v11858_v20  ;;  %v738_v59 = vshrl.u32 %v639_v36, 16  ;;  %v1574_v62 = vrot.slane %v1572_v46, 4  ;;  %v736_v63 = vrot.slane %v734_v55, 5  ;;  %v744_v2 = vshll.u32 %v640_v43, 16  ;;  %v644_v41 = vld [vmem:[%s12607_s21 + $0x24] sm:$0xf] }
  0x31   : > { %1973 = vmatpush.bf16.msra.mxu3 %v11862_v25  ;;  %v713_v56 = vsel %vm12640_vm6, %v708_v50, %v712_v34  ;;  %v723_v57 = vsel %vm12640_vm6, %v718_v51, %v722_v42  ;;  %v731_v0 = vor.u32 %v730_v54, %v727_v53  ;;  %v1573_v5 = vsel %vm12609_vm3, %v9122_v52, %v1572_v46  ;;  %v645_v42 = vld [vmem:[%s12607_s21 + $0x28] sm:$0xf] }
  0x32   : > { %1221 = vmatpush.bf16.msra.mxu0 %v11854_v26  ;;  %v1093_v60 = vunpack.c.l.b16 %v713_v56  ;;  %v1094_v61 = vunpack.c.l.b16 %v723_v57  ;;  %v740_v1 = vrot.slane %v738_v59, 4  ;;  %v1576_v6 = vsel %vm12609_vm3, %v1574_v62, %v1575_v58  ;;  %v643_v26 = vld [vmem:[%s12607_s21 + $0x20] sm:$0x1]  ;;  %v11835_v55 = vld [vmem:[%s12607_s21 + $0x24] sm:$0xff] }
  0x33   : > { %1462 = vmatpush.bf16.msra.mxu1 %v11850_v31  ;;  %9161 = vmatmul.msk.bf16.vlgmr.msra.gmra.mxu2 %vm1165_vm5, %v1716_v49  ;;  %v732_v7 = vrot.slane %v731_v0, 4  ;;  %v746_v9 = vrot.slane %v744_v2, 5  ;;  %v1686_v13 = vunpack.c.l.b16 %v1573_v5  ;;  %v1687_v14 = vunpack.c.l.b16 %v1576_v6 }
  0x34   : > { %9205 = vmatmul.msk.bf16.vlgmr.msra.gmra.mxu3 %vm1165_vm5, %v12635_v39  ;;  %v1125_v3 = vpack.c.b16 %v1094_v61, %v1093_v60  ;;  %v741_v4 = vor.u32 %v740_v1, %v736_v63  ;;  %v749_v15 = vshrl.u32 %v641_v10, 16  ;;  %v752_v16 = vshll.u32 %v641_v10, 16 }
  0x35   : > { %v737_v17 = vsel %vm12640_vm6, %v732_v7, %v736_v63  ;;  %v758_v19 = vshll.u32 %v642_v11, 16  ;;  %v762_v20 = vshrl.u32 %v642_v11, 16  ;;  %v12664_v21 = vpack.c.b16 %v1687_v14, %v1686_v13  ;;  %v646_v63 = vld [vmem:[%s12607_s21 + $0x2c] sm:$0x1]  ;;  %v647_v13 = vld [vmem:[%s12607_s21 + $0x30] sm:$0xf] }
  0x36   : > { %9105 = vmatmul.msk.bf16.vlgmr.msra.gmra.mxu1 %vm1165_vm5, %v11832_v45  ;;  %9009 = vmatmul.msk.bf16.vlgmr.msra.gmra.mxu0 %vm1165_vm5, %v1125_v3  ;;  %v742_v8 = vrot.slane %v741_v4, 4  ;;  %v1579_v23 = vrot.slane %v642_v11, 5  ;;  %v1095_v24 = vunpack.c.l.b16 %v737_v17  ;;  %v751_v27 = vrot.slane %v749_v15, 4  ;;  %v648_v14 = vld [vmem:[%s12607_s21 + $0x34] sm:$0xf] }
  0x37   : > { %v754_v28 = vrot.slane %v752_v16, 5  ;;  %v760_v29 = vrot.slane %v758_v19, 5  ;;  %v764_v30 = vrot.slane %v762_v20, 4  ;;  %v9123_v31 = vrot.slane %v641_v10, 9 }
  0x38   : > { %v747_v18 = vsel %vm12640_vm6, %v742_v8, %v746_v9  ;;  %v1581_v32 = vrot.slane %v1579_v23, 4  ;;  %v1582_v33 = vrot.slane %v643_v26, 5  ;;  %v768_v37 = vshll.u32 %v643_v26, 16 }
  0x39   : > { %v1096_v25 = vunpack.c.l.b16 %v747_v18  ;;  %v755_v35 = vor.u32 %v754_v28, %v751_v27  ;;  %v765_v36 = vor.u32 %v764_v30, %v760_v29  ;;  %v1580_v38 = vsel %vm12609_vm3, %v9123_v31, %v1579_v23 }
  0x3a   : > { %v1583_v40 = vsel %vm12609_vm3, %v1581_v32, %v1582_v33  ;;  %v770_v46 = vrot.slane %v768_v37, 5  ;;  %v1688_v47 = vunpack.c.l.b16 %v1580_v38  ;;  %v773_v48 = vshrl.u32 %v644_v41, 16 }
  0x3b   : > { %v12671_v34 = vpack.c.b16 %v1096_v25, %v1095_v24  ;;  %v756_v43 = vrot.slane %v755_v35, 4  ;;  %v766_v45 = vrot.slane %v765_v36, 4  ;;  %v776_v49 = vshll.u32 %v644_v41, 16  ;;  %v11836_v25 = vld [vmem:[%s12607_s21 + $0x30] sm:$0xff] }
  0x3c   : > { %v782_v50 = vshll.u32 %v645_v42, 16  ;;  %v786_v51 = vshrl.u32 %v645_v42, 16  ;;  %v775_v56 = vrot.slane %v773_v48, 4  ;;  %v1586_v62 = vrot.slane %v645_v42, 5  ;;  %v650_v48 = vld [vmem:[%s12607_s21 + $0x3c] sm:$0xf] }
  0x3d   : > { %v761_v52 = vsel %vm12640_vm6, %v756_v43, %v760_v29  ;;  %v771_v53 = vsel %vm12640_vm6, %v766_v45, %v770_v46  ;;  %v778_v57 = vrot.slane %v776_v49, 5  ;;  %v792_v2 = vshll.u32 %v646_v63, 16  ;;  %v649_v29 = vld [vmem:[%s12607_s21 + $0x38] sm:$0x1]  ;;  %v651_v49 = vld [vmem:[%s12607_s21 + $0x40] sm:$0xf] }
  0x3e   : > { %v784_v58 = vrot.slane %v782_v50, 5  ;;  %v788_v59 = vrot.slane %v786_v51, 4  ;;  %v1097_v60 = vunpack.c.l.b16 %v761_v52  ;;  %v1098_v61 = vunpack.c.l.b16 %v771_v53 }
  0x3f   : > { %v779_v0 = vor.u32 %v778_v57, %v775_v56  ;;  %v9124_v4 = vrot.slane %v644_v41, 9  ;;  %v1588_v5 = vrot.slane %v1586_v62, 4  ;;  %v1589_v6 = vrot.slane %v646_v63, 5 }
  0x40   : > { %v789_v1 = vor.u32 %v788_v59, %v784_v58  ;;  %v12694_v3 = vpack.c.b16 %v1098_v61, %v1097_v60  ;;  %v794_v9 = vrot.slane %v792_v2, 5  ;;  %v797_v19 = vshrl.u32 %v647_v13, 16  ;;  %v11837_v60 = vld [vmem:[%s12607_s21 + $0x3c] sm:$0xff] }
  0x41   : > { %v780_v7 = vrot.slane %v779_v0, 4  ;;  %v1587_v10 = vsel %vm12609_vm3, %v9124_v4, %v1586_v62  ;;  %v1590_v11 = vsel %vm12609_vm3, %v1588_v5, %v1589_v6  ;;  %v800_v20 = vshll.u32 %v647_v13, 16  ;;  %v652_v0 = vld [vmem:[%s12607_s21 + $0x44] sm:$0x1] }
  0x42   : > { %v790_v8 = vrot.slane %v789_v1, 4  ;;  %v1690_v15 = vunpack.c.l.b16 %v1587_v10  ;;  %v1691_v16 = vunpack.c.l.b16 %v1590_v11  ;;  %v810_v23 = vshrl.u32 %v648_v14, 16 }
  0x43   : > { %9162 = vmatmul.msk.bf16.gmra.mxu2 %vm1165_vm5, %v12664_v21  ;;  %v785_v17 = vsel %vm12640_vm6, %v780_v7, %v784_v58  ;;  %v1593_v28 = vrot.slane %v648_v14, 5  ;;  %v799_v30 = vrot.slane %v797_v19, 4  ;;  %v802_v31 = vrot.slane %v800_v20, 5 }
  0x44   : > { %9206 = vmatmul.msk.bf16.gmra.mxu3 %vm1165_vm5, %v11834_v22  ;;  %v795_v18 = vsel %vm12640_vm6, %v790_v8, %v794_v9  ;;  %v12709_v24 = vpack.c.b16 %v1691_v16, %v1690_v15  ;;  %v1099_v26 = vunpack.c.l.b16 %v785_v17  ;;  %v812_v33 = vrot.slane %v810_v23, 4  ;;  %v653_v16 = vld [vmem:[%s12607_s21 + $0x48] sm:$0xf]  ;;  %v654_v17 = vld [vmem:[%s12607_s21 + $0x4c] sm:$0xf] }
  0x45   : > { %v1100_v27 = vunpack.c.l.b16 %v795_v18  ;;  %v9125_v36 = vrot.slane %v647_v13, 9  ;;  %v1596_v37 = vrot.slane %v649_v29, 5  ;;  %v1595_v38 = vrot.slane %v1593_v28, 4 }
  0x46   : > { %9106 = vmatmul.msk.bf16.gmra.mxu1 %vm1165_vm5, %v12635_v39  ;;  %9010 = vmatmul.msk.bf16.gmra.mxu0 %vm1165_vm5, %v12671_v34  ;;  %v1689_v39 = vunpack.c.l.b16 %v1583_v40  ;;  %v803_v40 = vor.u32 %v802_v31, %v799_v30  ;;  %v816_v42 = vshll.u32 %v649_v29, 16  ;;  %v824_v56 = vshll.u32 %v650_v48, 16 }
  0x47   : > { %v12716_v35 = vpack.c.b16 %v1100_v27, %v1099_v26  ;;  %v1594_v43 = vsel %vm12609_vm3, %v9125_v36, %v1593_v28  ;;  %v1597_v45 = vsel %vm12609_vm3, %v1595_v38, %v1596_v37  ;;  %v830_v57 = vshll.u32 %v651_v49, 16 }
  0x48   : > { %v12687_v54 = vpack.c.b16 %v1689_v39, %v1688_v47  ;;  %v804_v46 = vrot.slane %v803_v40, 4  ;;  %v818_v39 = vrot.slane %v816_v42, 5  ;;  %v1692_v50 = vunpack.c.l.b16 %v1594_v43  ;;  %v655_v43 = vld [vmem:[%s12607_s21 + $0x50] sm:$0x1] }
  0x49   : > { %v1693_v51 = vunpack.c.l.b16 %v1597_v45  ;;  %v834_v58 = vshrl.u32 %v651_v49, 16  ;;  %v1600_v61 = vrot.slane %v651_v49, 5  ;;  %v826_v2 = vrot.slane %v824_v56, 5 }
  0x4a   : > { %v832_v4 = vrot.slane %v830_v57, 5  ;;  %v9126_v6 = vrot.slane %v650_v48, 9  ;;  %v1603_v8 = vrot.slane %v652_v0, 5  ;;  %v840_v13 = vshll.u32 %v652_v0, 16  ;;  %v656_v57 = vld [vmem:[%s12607_s21 + $0x54] sm:$0xf] }
  0x4b   : > { %v12731_v59 = vpack.c.b16 %v1693_v51, %v1692_v50  ;;  %v836_v5 = vrot.slane %v834_v58, 4  ;;  %v1602_v7 = vrot.slane %v1600_v61, 4  ;;  %v848_v26 = vshll.u32 %v653_v16, 16  ;;  %v657_v58 = vld [vmem:[%s12607_s21 + $0x58] sm:$0xf] }
  0x4c   : > { %v842_v20 = vrot.slane %v840_v13, 5  ;;  %v854_v27 = vshll.u32 %v654_v17, 16  ;;  %v858_v28 = vshrl.u32 %v654_v17, 16  ;;  %v1607_v42 = vrot.slane %v654_v17, 5 }
  0x4d   : > { %v837_v11 = vor.u32 %v836_v5, %v832_v4  ;;  %v1604_v15 = vsel %vm12609_vm3, %v1602_v7, %v1603_v8  ;;  %v850_v36 = vrot.slane %v848_v26, 5  ;;  %v1610_v50 = vrot.slane %v655_v43, 5 }
  0x4e   : > { %v1695_v23 = vunpack.c.l.b16 %v1604_v15  ;;  %v856_v37 = vrot.slane %v854_v27, 5  ;;  %v860_v38 = vrot.slane %v858_v28, 4  ;;  %v1609_v49 = vrot.slane %v1607_v42, 4 }
  0x4f   : > { %v838_v19 = vrot.slane %v837_v11, 4  ;;  %v869_v0 = vshrl.u32 %v656_v57, 16  ;;  %v658_v11 = vld [vmem:[%s12607_s21 + $0x5c] sm:$0x1]  ;;  %vm5432_vm10 = vsmask.f32 5396 }
  0x50   : > { %v1611_v56 = vsel %vm12609_vm3, %v1609_v49, %v1610_v50 }
  0x51   : > { %v843_v30 = vsel %vm12640_vm6, %v838_v19, %v842_v20  ;;  %v871_v13 = vrot.slane %v869_v0, 4  ;;  %v1617_v19 = vrot.slane %v658_v11, 5 }
  0x53   : > { %9163 = vmatmul.msk.bf16.gmra.mxu2 %vm1165_vm5, %v12687_v54 }
  0x54   : > { %9207 = vmatmul.msk.bf16.gmra.mxu3 %vm1165_vm5, %v11835_v55 }
  0x56   : > { %9107 = vmatmul.msk.bf16.gmra.mxu1 %vm1165_vm5, %v11834_v22  ;;  %9011 = vmatmul.msk.bf16.gmra.mxu0 %vm1165_vm5, %v12694_v3  ;;  %v806_v22 = vshll.u32 %v648_v14, 16  ;;  %v1601_v14 = vsel %vm12609_vm3, %v9126_v6, %v1600_v61  ;;  %v1697_v61 = vunpack.c.l.b16 %v1611_v56  ;;  %v11839_v6 = vld [vmem:[%s12607_s21 + $0x54] sm:$0xff] }
  0x58   : > { %v808_v32 = vrot.slane %v806_v22, 5  ;;  %v1694_v22 = vunpack.c.l.b16 %v1601_v14 }
  0x5a   : > { %v813_v41 = vor.u32 %v812_v33, %v808_v32  ;;  %v809_v52 = vsel %vm12640_vm6, %v804_v46, %v808_v32  ;;  %v12753_v31 = vpack.c.b16 %v1695_v23, %v1694_v22  ;;  %v11838_v32 = vld [vmem:[%s12607_s21 + $0x48] sm:$0xff]  ;;  %v861_v46 = vor.u32 %v860_v38, %v856_v37 }
  0x5b   : > { %v1101_v62 = vunpack.c.l.b16 %v809_v52 }
  0x5c   : > { %v814_v47 = vrot.slane %v813_v41, 4  ;;  %v1104_v41 = vunpack.c.l.b16 %v843_v30  ;;  %v862_v52 = vrot.slane %v861_v46, 4 }
  0x5e   : > { %v819_v53 = vsel %vm12640_vm6, %v814_v47, %v818_v39  ;;  %v864_v47 = vshll.u32 %v655_v43, 16 }
  0x5f   : > { %v1102_v63 = vunpack.c.l.b16 %v819_v53 }
  0x60   : > { %v866_v53 = vrot.slane %v864_v47, 5  ;;  %v11840_v47 = vld [vmem:[%s12607_s21 + $0x60] sm:$0xff] }
  0x61   : > { %v12738_v9 = vpack.c.b16 %v1102_v63, %v1101_v62 }
  0x62   : > { %v867_v63 = vsel %vm12640_vm6, %v862_v52, %v866_v53 }
  0x63   : > { %9164 = vmatmul.msk.bf16.gmra.mxu2 %vm1165_vm5, %v12709_v24  ;;  %v1106_v8 = vunpack.c.l.b16 %v867_v63 }
  0x64   : > { %9208 = vmatmul.msk.bf16.gmra.mxu3 %vm1165_vm5, %v11836_v25 }
  0x66   : > { %9108 = vmatmul.msk.bf16.gmra.mxu1 %vm1165_vm5, %v11835_v55  ;;  %9012 = vmatmul.msk.bf16.gmra.mxu0 %vm1165_vm5, %v12716_v35  ;;  %v821_v55 = vshrl.u32 %v650_v48, 16  ;;  %v9127_v48 = vrot.slane %v653_v16, 9 }
  0x68   : > { %v823_v1 = vrot.slane %v821_v55, 4  ;;  %v1608_v55 = vsel %vm12609_vm3, %v9127_v48, %v1607_v42 }
  0x6a   : > { %v827_v10 = vor.u32 %v826_v2, %v823_v1  ;;  %v872_v1 = vshll.u32 %v656_v57, 16  ;;  %v878_v2 = vshll.u32 %v657_v58, 16 }
  0x6c   : > { %v828_v18 = vrot.slane %v827_v10, 4  ;;  %v1614_v10 = vrot.slane %v657_v58, 5  ;;  %v874_v14 = vrot.slane %v872_v1, 5  ;;  %v880_v15 = vrot.slane %v878_v2, 5 }
  0x6e   : > { %v833_v29 = vsel %vm12640_vm6, %v828_v18, %v832_v4  ;;  %v882_v4 = vshrl.u32 %v657_v58, 16  ;;  %v9128_v18 = vrot.slane %v656_v57, 9  ;;  %v1616_v20 = vrot.slane %v1614_v10, 4 }
  0x6f   : > { %v1103_v40 = vunpack.c.l.b16 %v833_v29  ;;  %v875_v22 = vor.u32 %v874_v14, %v871_v13 }
  0x70   : > { %v1615_v26 = vsel %vm12609_vm3, %v9128_v18, %v1614_v10  ;;  %v1618_v27 = vsel %vm12609_vm3, %v1616_v20, %v1617_v19  ;;  %v663_v10 = vld [vmem:[%s12607_s21 + $0x70] sm:$0xf] }
  0x71   : > { %v12760_v39 = vpack.c.b16 %v1104_v41, %v1103_v40  ;;  %v876_v28 = vrot.slane %v875_v22, 4  ;;  %v930_v18 = vshrl.u32 %v663_v10, 16 }
  0x73   : > { %9165 = vmatmul.msk.bf16.gmra.mxu2 %vm1165_vm5, %v12731_v59  ;;  %v881_v38 = vsel %vm12640_vm6, %v876_v28, %v880_v15 }
  0x74   : > { %9209 = vmatmul.msk.bf16.gmra.mxu3 %vm1165_vm5, %v11837_v60  ;;  %v1107_v48 = vunpack.c.l.b16 %v881_v38 }
  0x76   : > { %9109 = vmatmul.msk.bf16.gmra.mxu1 %vm1165_vm5, %v11836_v25  ;;  %9013 = vmatmul.msk.bf16.gmra.mxu0 %vm1165_vm5, %v12738_v9  ;;  %v845_v25 = vshrl.u32 %v653_v16, 16  ;;  %v884_v16 = vrot.slane %v882_v4, 4  ;;  %v662_v4 = vld [vmem:[%s12607_s21 + $0x6c] sm:$0xf] }
  0x77   : > { %v917_v14 = vshrl.u32 %v662_v4, 16 }
  0x78   : > { %v847_v33 = vrot.slane %v845_v25, 4  ;;  %v885_v23 = vor.u32 %v884_v16, %v880_v15  ;;  %v888_v25 = vshll.u32 %v658_v11, 16  ;;  %v920_v15 = vshll.u32 %v662_v4, 16 }
  0x79   : > { %v926_v16 = vshll.u32 %v663_v10, 16 }
  0x7a   : > { %v851_v45 = vor.u32 %v850_v36, %v847_v33  ;;  %v886_v29 = vrot.slane %v885_v23, 4  ;;  %v890_v30 = vrot.slane %v888_v25, 5  ;;  %v659_v33 = vld [vmem:[%s12607_s21 + $0x60] sm:$0xf]  ;;  %v1698_v36 = vunpack.c.l.b16 %v1615_v26  ;;  %v12822_v23 = vld [vmem:[%s12607_s21 + $0x6c] sm:$0xff] }
  0x7b   : > { %v893_v41 = vshrl.u32 %v659_v33, 16  ;;  %v896_v42 = vshll.u32 %v659_v33, 16  ;;  %v9129_v58 = vrot.slane %v659_v33, 9  ;;  %v1628_v25 = vrot.slane %v663_v10, 5 }
  0x7c   : > { %v852_v51 = vrot.slane %v851_v45, 4  ;;  %v891_v40 = vsel %vm12640_vm6, %v886_v29, %v890_v30  ;;  %v919_v26 = vrot.slane %v917_v14, 4  ;;  %v664_v30 = vld [vmem:[%s12607_s21 + $0x74] sm:$0x1]  ;;  %v928_v33 = vrot.slane %v926_v16, 5 }
  0x7d   : > { %v1108_v49 = vunpack.c.l.b16 %v891_v40  ;;  %v895_v52 = vrot.slane %v893_v41, 4  ;;  %v898_v53 = vrot.slane %v896_v42, 5  ;;  %v1630_v38 = vrot.slane %v1628_v25, 4 }
  0x7e   : > { %v857_v62 = vsel %vm12640_vm6, %v852_v51, %v856_v37  ;;  %v1699_v37 = vunpack.c.l.b16 %v1618_v27  ;;  %v661_v51 = vld [vmem:[%s12607_s21 + $0x68] sm:$0x1]  ;;  %v922_v27 = vrot.slane %v920_v15, 5  ;;  %v1631_v40 = vrot.slane %v664_v30, 5 }
  0x7f   : > { %v1105_v7 = vunpack.c.l.b16 %v857_v62  ;;  %v12804_v57 = vpack.c.b16 %v1108_v49, %v1107_v48  ;;  %v899_v62 = vor.u32 %v898_v53, %v895_v52  ;;  %v912_v0 = vshll.u32 %v661_v51, 16 }
  0x80   : > { %v12797_v46 = vpack.c.b16 %v1699_v37, %v1698_v36  ;;  %v9130_v37 = vrot.slane %v662_v4, 9  ;;  %v923_v41 = vor.u32 %v922_v27, %v919_v26  ;;  %v1632_v53 = vsel %vm12609_vm3, %v1630_v38, %v1631_v40 }
  0x81   : > { %v12782_v17 = vpack.c.b16 %v1106_v8, %v1105_v7  ;;  %v900_v7 = vrot.slane %v899_v62, 4  ;;  %v666_v62 = vld [vmem:[%s12607_s21 + $0x7c] sm:$0xf] }
  0x82   : > { %v1629_v52 = vsel %vm12609_vm3, %v9130_v37, %v1628_v25  ;;  %v954_v10 = vshrl.u32 %v666_v62, 16  ;;  %v1635_v25 = vrot.slane %v666_v62, 5 }
  0x83   : > { %9166 = vmatmul.msk.bf16.gmra.mxu2 %vm1165_vm5, %v12753_v31 }
  0x84   : > { %9210 = vmatmul.msk.bf16.gmra.mxu3 %vm1165_vm5, %v11838_v32  ;;  %v1637_v38 = vrot.slane %v1635_v25, 4 }
  0x86   : > { %9110 = vmatmul.msk.bf16.gmra.mxu1 %vm1165_vm5, %v11837_v60  ;;  %9014 = vmatmul.msk.bf16.gmra.mxu0 %vm1165_vm5, %v12760_v39  ;;  %v1696_v60 = vunpack.c.l.b16 %v1608_v55 }
  0x88   : > { %v12775_v5 = vpack.c.b16 %v1697_v61, %v1696_v60  ;;  %v1624_v61 = vrot.slane %v661_v51, 5 }
  0x93   : > { %9167 = vmatmul.msk.bf16.gmra.mxu2 %vm1165_vm5, %v12775_v5 }
  0x94   : > { %9211 = vmatmul.msk.bf16.gmra.mxu3 %vm1165_vm5, %v11839_v6 }
  0x96   : > { %9111 = vmatmul.msk.bf16.gmra.mxu1 %vm1165_vm5, %v11838_v32  ;;  %9015 = vmatmul.msk.bf16.gmra.mxu0 %vm1165_vm5, %v12782_v17  ;;  %v660_v32 = vld [vmem:[%s12607_s21 + $0x64] sm:$0xf] }
  0x97   : > { %v902_v43 = vshll.u32 %v660_v32, 16  ;;  %v906_v45 = vshrl.u32 %v660_v32, 16  ;;  %v1621_v50 = vrot.slane %v660_v32, 5  ;;  %v932_v32 = vrot.slane %v930_v18, 4  ;;  %v12849_v18 = vld [vmem:[%s12607_s21 + $0x78] sm:$0xff] }
  0x99   : > { %v904_v55 = vrot.slane %v902_v43, 5  ;;  %v908_v56 = vrot.slane %v906_v45, 4  ;;  %v1623_v60 = vrot.slane %v1621_v50, 4  ;;  %v1622_v1 = vsel %vm12609_vm3, %v9129_v58, %v1621_v50 }
  0x9a   : > { %v1700_v11 = vunpack.c.l.b16 %v1622_v1  ;;  %v933_v43 = vor.u32 %v932_v32, %v928_v33  ;;  %v936_v45 = vshll.u32 %v664_v30, 16  ;;  %v1703_v1 = vunpack.c.l.b16 %v1632_v53 }
  0x9b   : > { %v909_v63 = vor.u32 %v908_v56, %v904_v55  ;;  %v1625_v2 = vsel %vm12609_vm3, %v1623_v60, %v1624_v61  ;;  %v905_v19 = vsel %vm12640_vm6, %v900_v7, %v904_v55  ;;  %v924_v55 = vrot.slane %v923_v41, 4  ;;  %v665_v60 = vld [vmem:[%s12607_s21 + $0x78] sm:$0xf] }
  0x9c   : > { %v1701_v13 = vunpack.c.l.b16 %v1625_v2  ;;  %v1109_v28 = vunpack.c.l.b16 %v905_v19  ;;  %v934_v58 = vrot.slane %v933_v43, 4  ;;  %v941_v4 = vshrl.u32 %v665_v60, 16 }
  0x9d   : > { %v910_v8 = vrot.slane %v909_v63, 4  ;;  %v929_v2 = vsel %vm12640_vm6, %v924_v55, %v928_v33  ;;  %v956_v33 = vrot.slane %v954_v10, 4  ;;  %v9131_v37 = vrot.slane %v665_v60, 9 }
  0x9e   : > { %v12819_v22 = vpack.c.b16 %v1701_v13, %v1700_v11  ;;  %v1111_v19 = vunpack.c.l.b16 %v929_v2  ;;  %v943_v26 = vrot.slane %v941_v4, 4 }
  0x9f   : > { %v1636_v53 = vsel %vm12609_vm3, %v9131_v37, %v1635_v25  ;;  %v12879_v25 = vld [vmem:[%s12607_s21 + $0x84] sm:$0xff]  ;;  %v670_v37 = vld [vmem:[%s12607_s21 + $0x8c] sm:$0x1] }
  0xa3   : > { %9168 = vmatmul.msk.bf16.gmra.mxu2 %vm1165_vm5, %v12797_v46 }
  0xa4   : > { %9212 = vmatmul.msk.bf16.gmra.mxu3 %vm1165_vm5, %v11840_v47 }
  0xa6   : > { %9112 = vmatmul.msk.bf16.gmra.mxu1 %vm1165_vm5, %v11839_v6  ;;  %9016 = vmatmul.msk.bf16.gmra.mxu0 %vm1165_vm5, %v12804_v57  ;;  %v914_v6 = vrot.slane %v912_v0, 5  ;;  %v1702_v0 = vunpack.c.l.b16 %v1629_v52 }
  0xa8   : > { %v915_v20 = vsel %vm12640_vm6, %v910_v8, %v914_v6  ;;  %v944_v8 = vshll.u32 %v665_v60, 16  ;;  %v950_v6 = vshll.u32 %v666_v62, 16  ;;  %v12846_v16 = vpack.c.b16 %v1703_v1, %v1702_v0  ;;  %v669_v0 = vld [vmem:[%s12607_s21 + $0x88] sm:$0xf] }
  0xa9   : > { %v1110_v29 = vunpack.c.l.b16 %v915_v20  ;;  %v1704_v1 = vunpack.c.l.b16 %v1636_v53 }
  0xaa   : > { %v952_v30 = vrot.slane %v950_v6, 5 }
  0xab   : > { %v12829_v42 = vpack.c.b16 %v1110_v29, %v1109_v28  ;;  %v667_v28 = vld [vmem:[%s12607_s21 + $0x80] sm:$0x1]  ;;  %v946_v29 = vrot.slane %v944_v8, 5 }
  0xac   : > { %v1638_v40 = vrot.slane %v667_v28, 5 }
  0xad   : > { %v947_v43 = vor.u32 %v946_v29, %v943_v26  ;;  %v1642_v29 = vrot.slane %v669_v0, 5 }
  0xae   : > { %v1639_v55 = vsel %vm12609_vm3, %v1637_v38, %v1638_v40 }
  0xaf   : > { %v1705_v2 = vunpack.c.l.b16 %v1639_v55  ;;  %v984_v55 = vshll.u32 %v670_v37, 16 }
  0xb3   : > { %v1464_v36 = vpop.f32.mrf.mxu1  ;;  %9169 = vmatmul.msk.bf16.gmra.mxu2 %vm1165_vm5, %v12819_v22  ;;  %v1223_v48 = vpop.f32.mrf.mxu0 }
  0xb4   : > { %9213 = vmatmul.msk.bf16.gmra.mxu3 %vm1165_vm5, %v12822_v23  ;;  %v1465_v49 = vadd.f32 %v1464_v36, %v1223_v48  ;;  %v960_v48 = vshll.u32 %v667_v28, 16 }
  0xb6   : > { %9113 = vmatmul.msk.bf16.gmra.mxu1 %vm1165_vm5, %v11840_v47  ;;  %v1813_v50 = vpop.f32.mrf.mxu2  ;;  %9017 = vmatmul.msk.bf16.gmra.mxu0 %vm1165_vm5, %v12829_v42  ;;  %v938_v47 = vrot.slane %v936_v45, 5  ;;  %v957_v45 = vor.u32 %v956_v33, %v952_v30 }
  0xb7   : > { %v1975_v51 = vpop.f32.mrf.mxu3  ;;  %v1893_v56 = vadd.f32 %v1813_v50, %v1465_v49 }
  0xb8   : > { %v939_v7 = vsel %vm12640_vm6, %v934_v58, %v938_v47  ;;  %v958_v58 = vrot.slane %v957_v45, 4  ;;  %v962_v47 = vrot.slane %v960_v48, 5 }
  0xb9   : > { %v12840_v63 = vadd.f32 %v1975_v51, %v1893_v56  ;;  %v1112_v20 = vunpack.c.l.b16 %v939_v7 }
  0xba   : > { %v963_v7 = vsel %vm12640_vm6, %v958_v58, %v962_v47 }
  0xbb   : > { %v1466_v61 = vpop.f32.mrf.mxu1  ;;  %v1225_v11 = vpop.f32.mrf.mxu0  ;;  %v12858_v41 = vpack.c.b16 %v1112_v20, %v1111_v19  ;;  %v12876_v20 = vpack.c.b16 %v1705_v2, %v1704_v1 }
  0xbc   : > { %v1467_v13 = vadd.f32 %v1466_v61, %v1225_v11  ;;  %v668_v61 = vld [vmem:[%s12607_s21 + $0x84] sm:$0xf]  ;;  %v974_v11 = vshll.u32 %v669_v0, 16 }
  0xbd   : > { %v965_v8 = vshrl.u32 %v668_v61, 16  ;;  %v968_v6 = vshll.u32 %v668_v61, 16  ;;  %v9132_v48 = vrot.slane %v668_v61, 9 }
  0xbe   : > { %v1815_v14 = vpop.f32.mrf.mxu2  ;;  %v976_v38 = vrot.slane %v974_v11, 5 }
  0xbf   : > { %v1977_v15 = vpop.f32.mrf.mxu3  ;;  %v1894_v27 = vadd.f32 %v1815_v14, %v1467_v13  ;;  %v978_v13 = vshrl.u32 %v669_v0, 16  ;;  %v970_v33 = vrot.slane %v968_v6, 5  ;;  %v672_v6 = vld [vmem:[%s12607_s21 + $0x94] sm:$0xf] }
  0xc1   : > { %v12852_v36 = vadd.f32 %v1977_v15, %v1894_v27  ;;  %v1114_v27 = vunpack.c.l.b16 %v963_v7  ;;  %v980_v40 = vrot.slane %v978_v13, 4  ;;  %v671_v7 = vld [vmem:[%s12607_s21 + $0x90] sm:$0xf] }
  0xc3   : > { %v1469_v32 = vpop.f32.mrf.mxu1  ;;  %9170 = vmatmul.msk.bf16.gmra.mxu2 %vm1165_vm5, %v12846_v16  ;;  %v1228_v49 = vpop.f32.mrf.mxu0  ;;  %v981_v53 = vor.u32 %v980_v40, %v976_v38 }
  0xc4   : > { %9214 = vmatmul.msk.bf16.gmra.mxu3 %vm1165_vm5, %v12849_v18  ;;  %v1470_v50 = vadd.f32 %v1469_v32, %v1228_v49  ;;  %v1644_v49 = vrot.slane %v1642_v29, 4 }
  0xc5   : > { %v982_v2 = vrot.slane %v981_v53, 4 }
  0xc6   : > { %9114 = vmatmul.msk.bf16.gmra.mxu1 %vm1165_vm5, %v12822_v23  ;;  %v1818_v51 = vpop.f32.mrf.mxu2  ;;  %9018 = vmatmul.msk.bf16.gmra.mxu0 %vm1165_vm5, %v12858_v41  ;;  %v948_v23 = vrot.slane %v947_v43, 4 }
  0xc7   : > { %v1980_v52 = vpop.f32.mrf.mxu3  ;;  %v1895_v56 = vadd.f32 %v1818_v51, %v1470_v50  ;;  %v1645_v50 = vrot.slane %v670_v37, 5  ;;  %v12909_v37 = vld [vmem:[%s12607_s21 + $0x90] sm:$0xff] }
  0xc8   : > { %v953_v4 = vsel %vm12640_vm6, %v948_v23, %v952_v30  ;;  %v967_v30 = vrot.slane %v965_v8, 4 }
  0xc9   : > { %v12869_v62 = vadd.f32 %v1980_v52, %v1895_v56  ;;  %v1113_v26 = vunpack.c.l.b16 %v953_v4  ;;  %v1646_v61 = vsel %vm12609_vm3, %v1644_v49, %v1645_v50  ;;  %v986_v4 = vrot.slane %v984_v55, 5  ;;  %v673_v50 = vld [vmem:[%s12607_s21 + $0x98] sm:$0x1] }
  0xca   : > { %v971_v51 = vor.u32 %v970_v33, %v967_v30  ;;  %v1707_v11 = vunpack.c.l.b16 %v1646_v61 }
  0xcb   : > { %v1471_v60 = vpop.f32.mrf.mxu1  ;;  %v1230_v10 = vpop.f32.mrf.mxu0  ;;  %v12888_v45 = vpack.c.b16 %v1114_v27, %v1113_v26  ;;  %v987_v26 = vsel %vm12640_vm6, %v982_v2, %v986_v4  ;;  %v998_v27 = vshll.u32 %v672_v6, 16  ;;  %v1008_v4 = vshll.u32 %v673_v50, 16 }
  0xcc   : > { %v1472_v14 = vadd.f32 %v1471_v60, %v1230_v10  ;;  %v1643_v60 = vsel %vm12609_vm3, %v9132_v48, %v1642_v29  ;;  %v972_v0 = vrot.slane %v971_v51, 4  ;;  %v1649_v48 = vrot.slane %v672_v6, 5 }
  0xcd   : > { %v1706_v10 = vunpack.c.l.b16 %v1643_v60  ;;  %v1000_v55 = vrot.slane %v998_v27, 5  ;;  %v1652_v60 = vrot.slane %v673_v50, 5 }
  0xce   : > { %v1820_v15 = vpop.f32.mrf.mxu2  ;;  %v977_v13 = vsel %vm12640_vm6, %v972_v0, %v976_v38  ;;  %v1116_v38 = vunpack.c.l.b16 %v987_v26 }
  0xcf   : > { %v1982_v19 = vpop.f32.mrf.mxu3  ;;  %v1896_v28 = vadd.f32 %v1820_v15, %v1472_v14  ;;  %v989_v14 = vshrl.u32 %v671_v7, 16  ;;  %v992_v15 = vshll.u32 %v671_v7, 16  ;;  %v1115_v40 = vunpack.c.l.b16 %v977_v13 }
  0xd1   : > { %v12882_v43 = vadd.f32 %v1982_v19, %v1896_v28  ;;  %v1002_v28 = vshrl.u32 %v672_v6, 16  ;;  %v991_v51 = vrot.slane %v989_v14, 4  ;;  %v12918_v61 = vpack.c.b16 %v1116_v38, %v1115_v40 }
  0xd3   : > { %v1474_v32 = vpop.f32.mrf.mxu1  ;;  %9171 = vmatmul.msk.bf16.gmra.mxu2 %vm1165_vm5, %v12876_v20  ;;  %v1233_v52 = vpop.f32.mrf.mxu0 }
  0xd4   : > { %9215 = vmatmul.msk.bf16.gmra.mxu3 %vm1165_vm5, %v12879_v25  ;;  %v1475_v56 = vadd.f32 %v1474_v32, %v1233_v52  ;;  %v12906_v32 = vpack.c.b16 %v1707_v11, %v1706_v10  ;;  %v994_v52 = vrot.slane %v992_v15, 5 }
  0xd6   : > { %9115 = vmatmul.msk.bf16.gmra.mxu1 %vm1165_vm5, %v12849_v18  ;;  %v1823_v23 = vpop.f32.mrf.mxu2  ;;  %9019 = vmatmul.msk.bf16.gmra.mxu0 %vm1165_vm5, %v12888_v45  ;;  %v995_v0 = vor.u32 %v994_v52, %v991_v51 }
  0xd7   : > { %v1985_v58 = vpop.f32.mrf.mxu3  ;;  %v1897_v47 = vadd.f32 %v1823_v23, %v1475_v56  ;;  %v1004_v56 = vrot.slane %v1002_v28, 4  ;;  %v1010_v28 = vrot.slane %v1008_v4, 5 }
  0xd8   : > { %v996_v15 = vrot.slane %v995_v0, 4  ;;  %v12939_v0 = vld [vmem:[%s12607_s21 + $0x9c] sm:$0xff] }
  0xd9   : > { %v12899_v8 = vadd.f32 %v1985_v58, %v1897_v47  ;;  %v9133_v58 = vrot.slane %v671_v7, 9  ;;  %v1651_v47 = vrot.slane %v1649_v48, 4  ;;  %v1005_v2 = vor.u32 %v1004_v56, %v1000_v55 }
  0xda   : > { %v1001_v38 = vsel %vm12640_vm6, %v996_v15, %v1000_v55 }
  0xdb   : > { %v1476_v1 = vpop.f32.mrf.mxu1  ;;  %v1235_v19 = vpop.f32.mrf.mxu0  ;;  %v1650_v13 = vsel %vm12609_vm3, %v9133_v58, %v1649_v48  ;;  %v1653_v7 = vsel %vm12609_vm3, %v1651_v47, %v1652_v60  ;;  %v1006_v27 = vrot.slane %v1005_v2, 4 }
  0xdc   : > { %v1477_v29 = vadd.f32 %v1476_v1, %v1235_v19  ;;  %v674_v19 = vld [vmem:[%s12607_s21 + $0x9c] sm:$0xf]  ;;  %v1709_v40 = vunpack.c.l.b16 %v1653_v7 }
  0xdd   : > { %v1016_v48 = vshll.u32 %v674_v19, 16 }
  0xde   : > { %v1825_v30 = vpop.f32.mrf.mxu2 }
  0xdf   : > { %v1987_v33 = vpop.f32.mrf.mxu3  ;;  %v1898_v49 = vadd.f32 %v1825_v30, %v1477_v29  ;;  %v675_v29 = vld [vmem:[%s12607_s21 + $0xa0] sm:$0xf] }
  0xe0   : > { %v1022_v50 = vshll.u32 %v675_v29, 16  ;;  %v1026_v51 = vshrl.u32 %v675_v29, 16  ;;  %v1656_v2 = vrot.slane %v675_v29, 5 }
  0xe1   : > { %v12912_v23 = vadd.f32 %v1987_v33, %v1898_v49  ;;  %v1708_v33 = vunpack.c.l.b16 %v1650_v13  ;;  %v1013_v49 = vshrl.u32 %v674_v19, 16 }
  0xe2   : > { %v1024_v13 = vrot.slane %v1022_v50, 5  ;;  %v1028_v7 = vrot.slane %v1026_v51, 4 }
  0xe3   : > { %v1479_v53 = vpop.f32.mrf.mxu1  ;;  %9172 = vmatmul.msk.bf16.gmra.mxu2 %vm1165_vm5, %v12906_v32  ;;  %v1238_v1 = vpop.f32.mrf.mxu0  ;;  %v12936_v60 = vpack.c.b16 %v1709_v40, %v1708_v33  ;;  %v1015_v4 = vrot.slane %v1013_v49, 4 }
  0xe4   : > { %9216 = vmatmul.msk.bf16.gmra.mxu3 %vm1165_vm5, %v12909_v37  ;;  %v1480_v6 = vadd.f32 %v1479_v53, %v1238_v1  ;;  %v1011_v53 = vsel %vm12640_vm6, %v1006_v27, %v1010_v28  ;;  %v1117_v1 = vunpack.c.l.b16 %v1001_v38  ;;  %v1658_v27 = vrot.slane %v1656_v2, 4 }
  0xe5   : > { %v1118_v55 = vunpack.c.l.b16 %v1011_v53  ;;  %v1029_v40 = vor.u32 %v1028_v7, %v1024_v13 }
  0xe6   : > { %9116 = vmatmul.msk.bf16.gmra.mxu1 %vm1165_vm5, %v12879_v25  ;;  %v1828_v10 = vpop.f32.mrf.mxu2  ;;  %9020 = vmatmul.msk.bf16.gmra.mxu0 %vm1165_vm5, %v12918_v61 }
  0xe7   : > { %v1990_v11 = vpop.f32.mrf.mxu3  ;;  %v1899_v14 = vadd.f32 %v1828_v10, %v1480_v6  ;;  %v1018_v6 = vrot.slane %v1016_v48, 5  ;;  %v12948_v33 = vpack.c.b16 %v1118_v55, %v1117_v1  ;;  %v677_v1 = vld [vmem:[%s12607_s21 + $0xa8] sm:$0xf] }
  0xe9   : > { %v12930_v30 = vadd.f32 %v1990_v11, %v1899_v14  ;;  %v676_v11 = vld [vmem:[%s12607_s21 + $0xa4] sm:$0x1]  ;;  %v1019_v29 = vor.u32 %v1018_v6, %v1015_v4  ;;  %v11869_v4 = vld [vmem:[%s16009_s4 + $0x98] sm:$0xff] }
  0xea   : > { %v1659_v28 = vrot.slane %v676_v11, 5  ;;  %v1032_v49 = vshll.u32 %v676_v11, 16  ;;  %2154 = vmatpush.bf16.msrb.mxu0 %v11869_v4  ;;  %v679_v4 = vld [vmem:[%s12607_s21 + $0xb0] sm:$0x1] }
  0xeb   : > { %v1481_v26 = vpop.f32.mrf.mxu1  ;;  %16016 = vst [vmem:[#allocation12_spill] sm:$0xff] %v12930_v30  ;;  %v1240_v52 = vpop.f32.mrf.mxu0  ;;  %v1020_v53 = vrot.slane %v1019_v29, 4 }
  0xec   : > { %v1482_v56 = vadd.f32 %v1481_v26, %v1240_v52  ;;  %v9134_v26 = vrot.slane %v674_v19, 9  ;;  %v1660_v19 = vsel %vm12609_vm3, %v1658_v27, %v1659_v28  ;;  %v1040_v27 = vshll.u32 %v677_v1, 16 }
  0xed   : > { %v1711_v11 = vunpack.c.l.b16 %v1660_v19  ;;  %v1025_v7 = vsel %vm12640_vm6, %v1020_v53, %v1024_v13 }
  0xee   : > { %v1830_v58 = vpop.f32.mrf.mxu2  ;;  %v1657_v52 = vsel %vm12609_vm3, %v9134_v26, %v1656_v2 }
  0xef   : > { %v1992_v47 = vpop.f32.mrf.mxu3  ;;  %v1900_v10 = vadd.f32 %v1830_v58, %v1482_v56  ;;  %v1030_v58 = vrot.slane %v1029_v40, 4  ;;  %v1710_v2 = vunpack.c.l.b16 %v1657_v52  ;;  %v1119_v52 = vunpack.c.l.b16 %v1025_v7 }
  0xf1   : > { %v12942_v15 = vadd.f32 %v1992_v47, %v1900_v10  ;;  %v1034_v47 = vrot.slane %v1032_v49, 5  ;;  %v678_v10 = vld [vmem:[%s12607_s21 + $0xac] sm:$0xf] }
  0xf2   : > { %v1046_v28 = vshll.u32 %v678_v10, 16  ;;  %v1050_v29 = vshrl.u32 %v678_v10, 16 }
  0xf3   : > { %v1484_v14 = vpop.f32.mrf.mxu1  ;;  %16017 = vst [vmem:[#allocation13_spill] sm:$0xff] %v12942_v15  ;;  %9173 = vmatmul.msk.bf16.gmra.mxu2 %vm1165_vm5, %v12936_v60  ;;  %v1243_v48 = vpop.f32.mrf.mxu0  ;;  %v1035_v26 = vsel %vm12640_vm6, %v1030_v58, %v1034_v47 }
  0xf4   : > { %9217 = vmatmul.msk.bf16.gmra.mxu3 %vm1165_vm5, %v12939_v0  ;;  %v1485_v38 = vadd.f32 %v1484_v14, %v1243_v48  ;;  %v1037_v14 = vshrl.u32 %v677_v1, 16  ;;  %v1120_v19 = vunpack.c.l.b16 %v1035_v26  ;;  %v1048_v15 = vrot.slane %v1046_v28, 5  ;;  %v11877_v28 = vld [vmem:[%s16009_s4 + $0xd8] sm:$0xff] }
  0xf5   : > { %v1052_v58 = vrot.slane %v1050_v29, 4  ;;  %v1056_v26 = vshll.u32 %v679_v4, 16  ;;  %2484 = vmatpush.bf16.msrb.mxu2 %v11877_v28 }
  0xf6   : > { %9117 = vmatmul.msk.bf16.gmra.mxu1 %vm1165_vm5, %v12909_v37  ;;  %v1833_v50 = vpop.f32.mrf.mxu2  ;;  %9021 = vmatmul.msk.bf16.gmra.mxu0 %vm1165_vm5, %v12948_v33  ;;  %v1039_v13 = vrot.slane %v1037_v14, 4  ;;  %v12981_v7 = vpack.c.b16 %v1120_v19, %v1119_v52 }
  0xf7   : > { %v1995_v51 = vpop.f32.mrf.mxu3  ;;  %v1901_v56 = vadd.f32 %v1833_v50, %v1485_v38  ;;  %v12969_v50 = vpack.c.b16 %v1711_v11, %v1710_v2  ;;  %v1666_v11 = vrot.slane %v679_v4, 5  ;;  %v1053_v14 = vor.u32 %v1052_v58, %v1048_v15  ;;  %v11876_v4 = vld [vmem:[%s16009_s4 + $0xd0] sm:$0xff] }
  0xf9   : > { %v12963_v55 = vadd.f32 %v1995_v51, %v1901_v56  ;;  %16019 = vst [vmem:[#allocation15_spill] sm:$0xff] %v12969_v50  ;;  %v12972_v51 = vld [vmem:[%s12607_s21 + $0xa8] sm:$0xff]  ;;  %v1663_v56 = vrot.slane %v678_v10, 5  ;;  %v1054_v19 = vrot.slane %v1053_v14, 4  ;;  %2485 = vmatpush.bf16.msrb.mxu2 %v11876_v4  ;;  %v11880_v14 = vld [vmem:[%s16009_s4 + $0xf0] sm:$0xff] }
  0xfa   : > { %v11879_v4 = vld [vmem:[%s16009_s4 + $0xe8] sm:$0xff] }
  0xfb   : > { %v1486_v6 = vpop.f32.mrf.mxu1  ;;  %16018 = vst [vmem:[#allocation14_spill] sm:$0xff] %v12963_v55  ;;  %v1245_v40 = vpop.f32.mrf.mxu0  ;;  %v1042_v55 = vrot.slane %v1040_v27, 5  ;;  %v1665_v2 = vrot.slane %v1663_v56, 4 }
  0xfc   : > { %v1487_v49 = vadd.f32 %v1486_v6, %v1245_v40  ;;  %v9135_v6 = vrot.slane %v677_v1, 9 }
  0xfd   : > { %v1043_v10 = vor.u32 %v1042_v55, %v1039_v13  ;;  %v11881_v55 = vld [vmem:[%s16009_s4 + $0xf8] sm:$0xff]  ;;  %v1058_v13 = vrot.slane %v1056_v26, 5 }
  0xfe   : > { %v1835_v48 = vpop.f32.mrf.mxu2  ;;  %v1664_v1 = vsel %vm12609_vm3, %v9135_v6, %v1663_v56  ;;  %2668 = vmatpush.bf16.msrb.mxu3 %v11881_v55  ;;  %v11873_v56 = vld [vmem:[%s16009_s4 + $0xb8] sm:$0xff] }
  0xff   : > { %v1997_v38 = vpop.f32.mrf.mxu3  ;;  %v1902_v53 = vadd.f32 %v1835_v48, %v1487_v49  ;;  %v1667_v48 = vsel %vm12609_vm3, %v1665_v2, %v1666_v11  ;;  %v1044_v52 = vrot.slane %v1043_v10, 4  ;;  %v13009_v6 = vld [vmem:[%s12607_s21 + $0xb8] sm:$0xf]  ;;  %v1712_v2 = vunpack.c.l.b16 %v1664_v1  ;;  %2322 = vmatpush.bf16.msrb.mxu1 %v11873_v56  ;;  %v11868_v10 = vld [vmem:[%s16009_s4 + $0x90] sm:$0xff]  ;;  %v11867_v56 = vld [vmem:[%s16009_s4 + $0x88] sm:$0xff] }
 0x100   : > { %v1713_v11 = vunpack.c.l.b16 %v1667_v48  ;;  %v1074_v1 = vshrl.u32 %v13009_v6, 16  ;;  %2155 = vmatpush.bf16.msrb.mxu0 %v11868_v10  ;;  %v11872_v48 = vld [vmem:[%s16009_s4 + $0xb0] sm:$0xff] }
 0x101   : > { %v12975_v30 = vadd.f32 %v1997_v38, %v1902_v53  ;;  %v1049_v26 = vsel %vm12640_vm6, %v1044_v52, %v1048_v15  ;;  %v11875_v15 = vld [vmem:[%s16009_s4 + $0xc8] sm:$0xff] }
 0x102   : > { %2669 = vmatpush.bf16.msrb.mxu3 %v11880_v14  ;;  %2486 = vmatpush.bf16.msrb.mxu2 %v11875_v15  ;;  %v1121_v14 = vunpack.c.l.b16 %v1049_v26  ;;  %v11871_v15 = vld [vmem:[%s16009_s4 + $0xa8] sm:$0xff] }
 0x103   : > { %v1489_v47 = vpop.f32.mrf.mxu1  ;;  %16020 = vst [vmem:[#allocation16_spill] sm:$0xff] %v12975_v30  ;;  %9174 = vmatmul.msk.bf16.gmra.mxu2 %vm1165_vm5, %v12969_v50  ;;  %v1248_v27 = vpop.f32.mrf.mxu0  ;;  %2323 = vmatpush.bf16.msrb.mxu1 %v11872_v48  ;;  %v1076_v48 = vrot.slane %v1074_v1, 4 }
 0x104   : > { %9218 = vmatmul.msk.bf16.gmra.mxu3 %vm1165_vm5, %v12972_v51  ;;  %v1490_v29 = vadd.f32 %v1489_v47, %v1248_v27  ;;  %v13006_v47 = vld [vmem:[%s12607_s21 + $0xb4] sm:$0xf]  ;;  %v1059_v27 = vsel %vm12640_vm6, %v1054_v19, %v1058_v13  ;;  %v13031_v19 = vpack.c.b16 %v1713_v11, %v1712_v2  ;;  %2156 = vmatpush.bf16.msrb.mxu0 %v11867_v56 }
 0x105   : > { %v13034_v13 = vld [vmem:[%s12607_s21 + $0xb4] sm:$0xff] }
 0x106   : > { %9118 = vmatmul.msk.bf16.gmra.mxu1 %vm1165_vm5, %v12939_v0  ;;  %v1838_v40 = vpop.f32.mrf.mxu2  ;;  %9022 = vmatmul.msk.bf16.gmra.mxu0 %vm1165_vm5, %v12981_v7  ;;  %16022 = vst [vmem:[#allocation18_spill] sm:$0xff] %v13031_v19 }
 0x107   : > { %v2000_v49 = vpop.f32.mrf.mxu3  ;;  %v1903_v38 = vadd.f32 %v1838_v40, %v1490_v29  ;;  %v1061_v29 = vshrl.u32 %v13006_v47, 16  ;;  %v1064_v40 = vshll.u32 %v13006_v47, 16  ;;  %2670 = vmatpush.bf16.msrb.mxu3 %v11879_v4  ;;  %2324 = vmatpush.bf16.msrb.mxu1 %v11871_v15 }
 0x109   : > { %v13003_v58 = vadd.f32 %v2000_v49, %v1903_v38  ;;  %v1070_v49 = vshll.u32 %v13009_v6, 16  ;;  %v1063_v11 = vrot.slane %v1061_v29, 4  ;;  %v1066_v30 = vrot.slane %v1064_v40, 5 }
 0x10a   : > { %v9136_v40 = vrot.slane %v13006_v47, 9 }
 0x10b   : > { %v1491_v53 = vpop.f32.mrf.mxu1  ;;  %16021 = vst [vmem:[#allocation17_spill] sm:$0xff] %v13003_v58  ;;  %v1250_v28 = vpop.f32.mrf.mxu0  ;;  %v1122_v58 = vunpack.c.l.b16 %v1059_v27  ;;  %v1072_v50 = vrot.slane %v1070_v49, 5  ;;  %v11878_v27 = vld [vmem:[%s16009_s4 + $0xe0] sm:$0xff] }
 0x10c   : > { %v1492_v55 = vadd.f32 %v1491_v53, %v1250_v28  ;;  %v682_v53 = vld [vmem:[%s12607_s21 + $0xbc] sm:$0x1]  ;;  %v1670_v28 = vrot.slane %v13009_v6, 5  ;;  %v11866_v6 = vld [vmem:[%s16009_s4 + $0x80] sm:$0xff]  ;;  %2671 = vmatpush.bf16.msrb.mxu3 %v11878_v27 }
 0x10d   : > { %v13062_v29 = vpack.c.b16 %v1122_v58, %v1121_v14  ;;  %v1673_v1 = vrot.slane %v682_v53, 5  ;;  %v1077_v56 = vor.u32 %v1076_v48, %v1072_v50  ;;  %v1080_v4 = vshll.u32 %v682_v53, 16  ;;  %2157 = vmatpush.bf16.msrb.mxu0 %v11866_v6 }
 0x10e   : > { %v1840_v38 = vpop.f32.mrf.mxu2  ;;  %v1672_v49 = vrot.slane %v1670_v28, 4 }
 0x10f   : > { %v2002_v52 = vpop.f32.mrf.mxu3  ;;  %v1904_v10 = vadd.f32 %v1840_v38, %v1492_v55  ;;  %v11874_v55 = vld [vmem:[%s16009_s4 + $0xc0] sm:$0xff]  ;;  %v1078_v48 = vrot.slane %v1077_v56, 4  ;;  %v1082_v15 = vrot.slane %v1080_v4, 5 }
 0x110   : > { %2487 = vmatpush.bf16.msrb.mxu2 %v11874_v55  ;;  %v1671_v55 = vsel %vm12609_vm3, %v9136_v40, %v1670_v28 }
 0x111   : > { %v13050_v26 = vadd.f32 %v2002_v52, %v1904_v10  ;;  %v1067_v52 = vor.u32 %v1066_v30, %v1063_v11  ;;  %v11870_v10 = vld [vmem:[%s16009_s4 + $0xa0] sm:$0xff]  ;;  %v1674_v30 = vsel %vm12609_vm3, %v1672_v49, %v1673_v1  ;;  %v1714_v6 = vunpack.c.l.b16 %v1671_v55 }
 0x112   : > { %2325 = vmatpush.bf16.msrb.mxu1 %v11870_v10  ;;  %v1715_v27 = vunpack.c.l.b16 %v1674_v30  ;;  %v1083_v28 = vsel %vm12640_vm6, %v1078_v48, %v1082_v15 }
 0x113   : > { %v1494_v2 = vpop.f32.mrf.mxu1  ;;  %16023 = vst [vmem:[#allocation19_spill] sm:$0xff] %v13050_v26  ;;  %9175 = vmatmul.msk.bf16.gmra.mxu2 %vm1165_vm5, %v13031_v19  ;;  %v1253_v38 = vpop.f32.mrf.mxu0  ;;  %v1068_v11 = vrot.slane %v1067_v52, 4  ;;  %v13085_v52 = vld [vmem:[%s12607_s21 + $0xc0] sm:$0xff] }
 0x114   : > { %9219 = vmatmul.msk.bf16.gmra.mxu3 %vm1165_vm5, %v13034_v13  ;;  %v1495_v58 = vadd.f32 %v1494_v2, %v1253_v38  ;;  %v13082_v1 = vpack.c.b16 %v1715_v27, %v1714_v6 }
 0x116   : > { %9119 = vmatmul.msk.bf16.gmra.mxu1 %vm1165_vm5, %v12972_v51  ;;  %v1843_v14 = vpop.f32.mrf.mxu2  ;;  %9023 = vmatmul.msk.bf16.gmra.mxu0 %vm1165_vm5, %v13062_v29 }
 0x117   : > { %v2005_v26 = vpop.f32.mrf.mxu3  ;;  %v1905_v47 = vadd.f32 %v1843_v14, %v1495_v58  ;;  %v1073_v58 = vsel %vm12640_vm6, %v1068_v11, %v1072_v50 }
 0x118   : > { %v1123_v4 = vunpack.c.l.b16 %v1073_v58 }
 0x119   : > { %v13076_v2 = vadd.f32 %v2005_v26, %v1905_v47  ;;  %v1124_v26 = vunpack.c.l.b16 %v1083_v28 }
 0x11b   : > { %v1496_v53 = vpop.f32.mrf.mxu1  ;;  %v1255_v38 = vpop.f32.mrf.mxu0  ;;  %v13093_v50 = vpack.c.b16 %v1124_v26, %v1123_v4 }
 0x11c   : > { %v1497_v40 = vadd.f32 %v1496_v53, %v1255_v38 }
 0x11e   : > { %v1845_v14 = vpop.f32.mrf.mxu2 }
 0x11f   : > { %v2007_v49 = vpop.f32.mrf.mxu3  ;;  %v1906_v56 = vadd.f32 %v1845_v14, %v1497_v40 }
 0x121   : > { %v13087_v47 = vadd.f32 %v2007_v49, %v1906_v56  ;;  %v12344_v56 = vld [vmem:[%s12607_s21 + $0x18] sm:$0xff] }
 0x123   : > { %v1499_v10 = vpop.f32.mrf.mxu1  ;;  %9176 = vmatmul.msk.bf16.gmra.mxu2 %vm1165_vm5, %v13082_v1  ;;  %v1258_v55 = vpop.f32.mrf.mxu0 }
 0x124   : > { %9220 = vmatmul.msk.bf16.gmra.mxu3 %vm1165_vm5, %v13085_v52  ;;  %v1500_v30 = vadd.f32 %v1499_v10, %v1258_v55 }
 0x126   : > { %9120 = vmatmul.msk.bf16.gmra.mxu1 %vm1165_vm5, %v13034_v13  ;;  %v1848_v53 = vpop.f32.mrf.mxu2  ;;  %9024 = vmatmul.msk.bf16.gmra.mxu0 %vm1165_vm5, %v13093_v50 }
 0x127   : > { %v2010_v11 = vpop.f32.mrf.mxu3  ;;  %v1907_v48 = vadd.f32 %v1848_v53, %v1500_v30 }
 0x129   : > { %v13099_v6 = vadd.f32 %v2010_v11, %v1907_v48 }
 0x12b   : > { %v1501_v15 = vpop.f32.mrf.mxu1  ;;  %v1260_v27 = vpop.f32.mrf.mxu0 }
 0x12c   : > { %v1502_v38 = vadd.f32 %v1501_v15, %v1260_v27 }
 0x12e   : > { %v1850_v58 = vpop.f32.mrf.mxu2 }
 0x12f   : > { %v2012_v28 = vpop.f32.mrf.mxu3  ;;  %v1908_v40 = vadd.f32 %v1850_v58, %v1502_v38 }
 0x131   : > { %v13101_v49 = vadd.f32 %v2012_v28, %v1908_v40 }
 0x133   : > { %v1504_v14 = vpop.f32.mrf.mxu1  ;;  %9330 = vmatmul.msk.bf16.vlgmr.msrb.gmra.mxu2 %vm1165_vm5, %v12344_v56  ;;  %v1263_v4 = vpop.f32.mrf.mxu0 }
 0x134   : > { %9370 = vmatmul.msk.bf16.vlgmr.msrb.gmra.mxu3 %vm1165_vm5, %v12694_v3  ;;  %v1505_v26 = vadd.f32 %v1504_v14, %v1263_v4 }
 0x136   : > { %9286 = vmatmul.msk.bf16.vlgmr.msrb.gmra.mxu1 %vm1165_vm5, %v12664_v21  ;;  %v1853_v10 = vpop.f32.mrf.mxu2  ;;  %9245 = vmatmul.msk.bf16.vlgmr.msrb.gmra.mxu0 %vm1165_vm5, %v12671_v34  ;;  %v12345_v21 = vld [vmem:[%s12607_s21 + $0x24] sm:$0xff] }
 0x137   : > { %v2015_v55 = vpop.f32.mrf.mxu3  ;;  %v1909_v30 = vadd.f32 %v1853_v10, %v1505_v26 }
 0x139   : > { %v13111_v11 = vadd.f32 %v2015_v55, %v1909_v30 }
 0x13b   : > { %v1506_v53 = vpop.f32.mrf.mxu1  ;;  %v1265_v48 = vpop.f32.mrf.mxu0 }
 0x13c   : > { %v1507_v15 = vadd.f32 %v1506_v53, %v1265_v48 }
 0x13e   : > { %v1855_v27 = vpop.f32.mrf.mxu2 }
 0x13f   : > { %v2017_v38 = vpop.f32.mrf.mxu3  ;;  %v1910_v58 = vadd.f32 %v1855_v27, %v1507_v15 }
 0x141   : > { %v13113_v40 = vadd.f32 %v2017_v38, %v1910_v58 }
 0x143   : > { %v1509_v28 = vpop.f32.mrf.mxu1  ;;  %9331 = vmatmul.msk.bf16.gmra.mxu2 %vm1165_vm5, %v12345_v21  ;;  %v1268_v34 = vpop.f32.mrf.mxu0  ;;  %v12346_v21 = vld [vmem:[%s12607_s21 + $0x30] sm:$0xff] }
 0x144   : > { %9371 = vmatmul.msk.bf16.gmra.mxu3 %vm1165_vm5, %v12716_v35  ;;  %v1510_v14 = vadd.f32 %v1509_v28, %v1268_v34 }
 0x146   : > { %9287 = vmatmul.msk.bf16.gmra.mxu1 %vm1165_vm5, %v12687_v54  ;;  %v1858_v56 = vpop.f32.mrf.mxu2  ;;  %9246 = vmatmul.msk.bf16.gmra.mxu0 %vm1165_vm5, %v12694_v3 }
 0x147   : > { %v2020_v4 = vpop.f32.mrf.mxu3  ;;  %v1911_v26 = vadd.f32 %v1858_v56, %v1510_v14 }
 0x149   : > { %v13123_v55 = vadd.f32 %v2020_v4, %v1911_v26 }
 0x14b   : > { %v1511_v10 = vpop.f32.mrf.mxu1  ;;  %v1270_v30 = vpop.f32.mrf.mxu0 }
 0x14c   : > { %v1512_v53 = vadd.f32 %v1511_v10, %v1270_v30 }
 0x14e   : > { %v1860_v48 = vpop.f32.mrf.mxu2 }
 0x14f   : > { %v2022_v15 = vpop.f32.mrf.mxu3  ;;  %v1912_v27 = vadd.f32 %v1860_v48, %v1512_v53 }
 0x151   : > { %v13125_v58 = vadd.f32 %v2022_v15, %v1912_v27 }
 0x153   : > { %v1514_v38 = vpop.f32.mrf.mxu1  ;;  %16024 = vst [vmem:[#allocation20_spill] sm:$0xff] %v13125_v58  ;;  %9332 = vmatmul.msk.bf16.gmra.mxu2 %vm1165_vm5, %v12346_v21  ;;  %v1273_v3 = vpop.f32.mrf.mxu0  ;;  %v12347_v58 = vld [vmem:[%s12607_s21 + $0x3c] sm:$0xff] }
 0x154   : > { %9372 = vmatmul.msk.bf16.gmra.mxu3 %vm1165_vm5, %v12738_v9  ;;  %v1515_v28 = vadd.f32 %v1514_v38, %v1273_v3 }
 0x156   : > { %9288 = vmatmul.msk.bf16.gmra.mxu1 %vm1165_vm5, %v12709_v24  ;;  %v1863_v34 = vpop.f32.mrf.mxu2  ;;  %9247 = vmatmul.msk.bf16.gmra.mxu0 %vm1165_vm5, %v12716_v35 }
 0x157   : > { %v2025_v14 = vpop.f32.mrf.mxu3  ;;  %v1913_v56 = vadd.f32 %v1863_v34, %v1515_v28 }
 0x159   : > { %v13135_v26 = vadd.f32 %v2025_v14, %v1913_v56 }
 0x15b   : > { %v1516_v4 = vpop.f32.mrf.mxu1  ;;  %v1275_v10 = vpop.f32.mrf.mxu0 }
 0x15c   : > { %v1517_v30 = vadd.f32 %v1516_v4, %v1275_v10 }
 0x15e   : > { %v1865_v53 = vpop.f32.mrf.mxu2 }
 0x15f   : > { %v2027_v48 = vpop.f32.mrf.mxu3  ;;  %v1914_v15 = vadd.f32 %v1865_v53, %v1517_v30 }
 0x161   : > { %v13137_v21 = vadd.f32 %v2027_v48, %v1914_v15 }
 0x163   : > { %v1519_v27 = vpop.f32.mrf.mxu1  ;;  %16025 = vst [vmem:[#allocation21_spill] sm:$0xff] %v13137_v21  ;;  %9333 = vmatmul.msk.bf16.gmra.mxu2 %vm1165_vm5, %v12347_v58  ;;  %v1278_v35 = vpop.f32.mrf.mxu0  ;;  %v12348_v21 = vld [vmem:[%s12607_s21 + $0x48] sm:$0xff] }
 0x164   : > { %9373 = vmatmul.msk.bf16.gmra.mxu3 %vm1165_vm5, %v12760_v39  ;;  %v1520_v38 = vadd.f32 %v1519_v27, %v1278_v35 }
 0x166   : > { %9289 = vmatmul.msk.bf16.gmra.mxu1 %vm1165_vm5, %v12731_v59  ;;  %v1868_v3 = vpop.f32.mrf.mxu2  ;;  %9248 = vmatmul.msk.bf16.gmra.mxu0 %vm1165_vm5, %v12738_v9 }
 0x167   : > { %v2030_v28 = vpop.f32.mrf.mxu3  ;;  %v1915_v34 = vadd.f32 %v1868_v3, %v1520_v38 }
 0x169   : > { %v13147_v56 = vadd.f32 %v2030_v28, %v1915_v34 }
 0x16b   : > { %v1521_v14 = vpop.f32.mrf.mxu1  ;;  %v1280_v4 = vpop.f32.mrf.mxu0 }
 0x16c   : > { %v1522_v58 = vadd.f32 %v1521_v14, %v1280_v4 }
 0x16e   : > { %v1870_v10 = vpop.f32.mrf.mxu2 }
 0x16f   : > { %v2032_v30 = vpop.f32.mrf.mxu3  ;;  %v1916_v53 = vadd.f32 %v1870_v10, %v1522_v58 }
 0x171   : > { %v13149_v15 = vadd.f32 %v2032_v30, %v1916_v53 }
 0x173   : > { %v1524_v48 = vpop.f32.mrf.mxu1  ;;  %16026 = vst [vmem:[#allocation22_spill] sm:$0xff] %v13149_v15  ;;  %9334 = vmatmul.msk.bf16.gmra.mxu2 %vm1165_vm5, %v12348_v21  ;;  %v1283_v9 = vpop.f32.mrf.mxu0  ;;  %v12349_v15 = vld [vmem:[%s12607_s21 + $0x54] sm:$0xff] }
 0x174   : > { %9374 = vmatmul.msk.bf16.gmra.mxu3 %vm1165_vm5, %v12782_v17  ;;  %v1525_v27 = vadd.f32 %v1524_v48, %v1283_v9 }
 0x176   : > { %9290 = vmatmul.msk.bf16.gmra.mxu1 %vm1165_vm5, %v12753_v31  ;;  %v1873_v35 = vpop.f32.mrf.mxu2  ;;  %9249 = vmatmul.msk.bf16.gmra.mxu0 %vm1165_vm5, %v12760_v39 }
 0x177   : > { %v2035_v38 = vpop.f32.mrf.mxu3  ;;  %v1917_v3 = vadd.f32 %v1873_v35, %v1525_v27 }
 0x179   : > { %v13159_v34 = vadd.f32 %v2035_v38, %v1917_v3 }
 0x17b   : > { %v1526_v28 = vpop.f32.mrf.mxu1  ;;  %v1285_v14 = vpop.f32.mrf.mxu0 }
 0x17c   : > { %v1527_v21 = vadd.f32 %v1526_v28, %v1285_v14 }
 0x17e   : > { %v1875_v4 = vpop.f32.mrf.mxu2 }
 0x17f   : > { %v2037_v58 = vpop.f32.mrf.mxu3  ;;  %v1918_v10 = vadd.f32 %v1875_v4, %v1527_v21 }
 0x181   : > { %v13161_v53 = vadd.f32 %v2037_v58, %v1918_v10 }
 0x183   : > { %v1529_v30 = vpop.f32.mrf.mxu1  ;;  %16027 = vst [vmem:[#allocation23_spill] sm:$0xff] %v13161_v53  ;;  %9335 = vmatmul.msk.bf16.gmra.mxu2 %vm1165_vm5, %v12349_v15  ;;  %v1288_v39 = vpop.f32.mrf.mxu0  ;;  %v12350_v53 = vld [vmem:[%s12607_s21 + $0x60] sm:$0xff] }
 0x184   : > { %9375 = vmatmul.msk.bf16.gmra.mxu3 %vm1165_vm5, %v12804_v57  ;;  %v1530_v48 = vadd.f32 %v1529_v30, %v1288_v39 }
 0x186   : > { %9291 = vmatmul.msk.bf16.gmra.mxu1 %vm1165_vm5, %v12775_v5  ;;  %v1878_v9 = vpop.f32.mrf.mxu2  ;;  %9250 = vmatmul.msk.bf16.gmra.mxu0 %vm1165_vm5, %v12782_v17 }
 0x187   : > { %v2040_v27 = vpop.f32.mrf.mxu3  ;;  %v1919_v35 = vadd.f32 %v1878_v9, %v1530_v48 }
 0x189   : > { %v13171_v3 = vadd.f32 %v2040_v27, %v1919_v35 }
 0x18b   : > { %v1531_v38 = vpop.f32.mrf.mxu1  ;;  %v1290_v28 = vpop.f32.mrf.mxu0 }
 0x18c   : > { %v1532_v15 = vadd.f32 %v1531_v38, %v1290_v28 }
 0x18e   : > { %v1880_v14 = vpop.f32.mrf.mxu2 }
 0x18f   : > { %v2042_v21 = vpop.f32.mrf.mxu3  ;;  %v1920_v4 = vadd.f32 %v1880_v14, %v1532_v15 }
 0x191   : > { %v13173_v10 = vadd.f32 %v2042_v21, %v1920_v4 }
 0x193   : > { %v1534_v58 = vpop.f32.mrf.mxu1  ;;  %16028 = vst [vmem:[#allocation24_spill] sm:$0xff] %v13173_v10  ;;  %9336 = vmatmul.msk.bf16.gmra.mxu2 %vm1165_vm5, %v12350_v53  ;;  %v1293_v17 = vpop.f32.mrf.mxu0  ;;  %v12351_v10 = vld [vmem:[%s12607_s21 + $0x6c] sm:$0xff] }
 0x194   : > { %9376 = vmatmul.msk.bf16.gmra.mxu3 %vm1165_vm5, %v12829_v42  ;;  %v1535_v30 = vadd.f32 %v1534_v58, %v1293_v17 }
 0x196   : > { %9292 = vmatmul.msk.bf16.gmra.mxu1 %vm1165_vm5, %v12797_v46  ;;  %v1883_v39 = vpop.f32.mrf.mxu2  ;;  %9251 = vmatmul.msk.bf16.gmra.mxu0 %vm1165_vm5, %v12804_v57 }
 0x197   : > { %v2045_v48 = vpop.f32.mrf.mxu3  ;;  %v1921_v9 = vadd.f32 %v1883_v39, %v1535_v30 }
 0x199   : > { %v13183_v35 = vadd.f32 %v2045_v48, %v1921_v9 }
 0x19b   : > { %v1536_v27 = vpop.f32.mrf.mxu1  ;;  %v1295_v38 = vpop.f32.mrf.mxu0 }
 0x19c   : > { %v1537_v53 = vadd.f32 %v1536_v27, %v1295_v38 }
 0x19e   : > { %v1885_v28 = vpop.f32.mrf.mxu2 }
 0x19f   : > { %v2047_v15 = vpop.f32.mrf.mxu3  ;;  %v1922_v14 = vadd.f32 %v1885_v28, %v1537_v53 }
 0x1a1   : > { %v13185_v4 = vadd.f32 %v2047_v15, %v1922_v14 }
 0x1a3   : > { %v1539_v21 = vpop.f32.mrf.mxu1  ;;  %9337 = vmatmul.msk.bf16.gmra.mxu2 %vm1165_vm5, %v12351_v10  ;;  %v1298_v57 = vpop.f32.mrf.mxu0 }
 0x1a4   : > { %9377 = vmatmul.msk.bf16.gmra.mxu3 %vm1165_vm5, %v12858_v41  ;;  %v1540_v58 = vadd.f32 %v1539_v21, %v1298_v57 }
 0x1a6   : > { %9293 = vmatmul.msk.bf16.gmra.mxu1 %vm1165_vm5, %v12819_v22  ;;  %v1888_v17 = vpop.f32.mrf.mxu2  ;;  %9252 = vmatmul.msk.bf16.gmra.mxu0 %vm1165_vm5, %v12829_v42 }
 0x1a7   : > { %v2050_v30 = vpop.f32.mrf.mxu3  ;;  %v1923_v39 = vadd.f32 %v1888_v17, %v1540_v58 }
 0x1a9   : > { %v13195_v9 = vadd.f32 %v2050_v30, %v1923_v39 }
 0x1ab   : > { %v1541_v48 = vpop.f32.mrf.mxu1  ;;  %v1300_v27 = vpop.f32.mrf.mxu0 }
 0x1ac   : > { %v1542_v38 = vadd.f32 %v1541_v48, %v1300_v27 }
 0x1ae   : > { %v1890_v10 = vpop.f32.mrf.mxu2 }
 0x1af   : > { %v2052_v53 = vpop.f32.mrf.mxu3  ;;  %v1924_v28 = vadd.f32 %v1890_v10, %v1542_v38 }
 0x1b1   : > { %v13197_v14 = vadd.f32 %v2052_v53, %v1924_v28 }
 0x1b3   : > { %v2327_v15 = vpop.f32.mrf.mxu1  ;;  %16029 = vst [vmem:[#allocation25_spill] sm:$0xff] %v13197_v14  ;;  %9338 = vmatmul.msk.bf16.gmra.mxu2 %vm1165_vm5, %v12849_v18  ;;  %v2159_v42 = vpop.f32.mrf.mxu0 }
 0x1b4   : > { %9378 = vmatmul.msk.bf16.gmra.mxu3 %vm1165_vm5, %v12888_v45  ;;  %v2239_v21 = vadd.f32 %v2159_v42, %v12840_v63 }
 0x1b6   : > { %9294 = vmatmul.msk.bf16.gmra.mxu1 %vm1165_vm5, %v12846_v16  ;;  %v2489_v57 = vpop.f32.mrf.mxu2  ;;  %v2407_v17 = vadd.f32 %v2327_v15, %v2239_v21  ;;  %9253 = vmatmul.msk.bf16.gmra.mxu0 %vm1165_vm5, %v12858_v41 }
 0x1b7   : > { %v2673_v58 = vpop.f32.mrf.mxu3 }
 0x1b8   : > { %v2569_v39 = vadd.f32 %v2489_v57, %v2407_v17 }
 0x1ba   : > { %v13208_v48 = vadd.f32 %v2673_v58, %v2569_v39 }
 0x1bb   : > { %v2329_v30 = vpop.f32.mrf.mxu1  ;;  %v2161_v18 = vpop.f32.mrf.mxu0 }
 0x1bc   : > { %v2240_v27 = vadd.f32 %v2161_v18, %v12852_v36 }
 0x1be   : > { %v2491_v38 = vpop.f32.mrf.mxu2  ;;  %v2408_v53 = vadd.f32 %v2329_v30, %v2240_v27 }
 0x1bf   : > { %v2675_v10 = vpop.f32.mrf.mxu3 }
 0x1c0   : > { %v2570_v14 = vadd.f32 %v2491_v38, %v2408_v53 }
 0x1c2   : > { %v13215_v63 = vadd.f32 %v2675_v10, %v2570_v14 }
 0x1c3   : > { %v2332_v28 = vpop.f32.mrf.mxu1  ;;  %9339 = vmatmul.msk.bf16.gmra.mxu2 %vm1165_vm5, %v12879_v25  ;;  %v2164_v41 = vpop.f32.mrf.mxu0 }
 0x1c4   : > { %9379 = vmatmul.msk.bf16.gmra.mxu3 %vm1165_vm5, %v12918_v61  ;;  %v2241_v15 = vadd.f32 %v2164_v41, %v12869_v62 }
 0x1c6   : > { %9295 = vmatmul.msk.bf16.gmra.mxu1 %vm1165_vm5, %v12876_v20  ;;  %v2494_v36 = vpop.f32.mrf.mxu2  ;;  %v2409_v21 = vadd.f32 %v2332_v28, %v2241_v15  ;;  %9254 = vmatmul.msk.bf16.gmra.mxu0 %vm1165_vm5, %v12888_v45 }
 0x1c7   : > { %v2678_v42 = vpop.f32.mrf.mxu3 }
 0x1c8   : > { %v2571_v58 = vadd.f32 %v2494_v36, %v2409_v21 }
 0x1ca   : > { %v13222_v25 = vadd.f32 %v2678_v42, %v2571_v58 }
 0x1cb   : > { %v2334_v57 = vpop.f32.mrf.mxu1  ;;  %v2166_v17 = vpop.f32.mrf.mxu0 }
 0x1cc   : > { %v2242_v14 = vadd.f32 %v2166_v17, %v12882_v43 }
 0x1ce   : > { %v2496_v30 = vpop.f32.mrf.mxu2  ;;  %v2410_v18 = vadd.f32 %v2334_v57, %v2242_v14 }
 0x1cf   : > { %v2680_v39 = vpop.f32.mrf.mxu3 }
 0x1d0   : > { %v2572_v38 = vadd.f32 %v2496_v30, %v2410_v18  ;;  %v16030_v30 = vld [vmem:[#allocation12_spill] sm:$0xff] }
 0x1d2   : > { %v13229_v62 = vadd.f32 %v2680_v39, %v2572_v38 }
 0x1d3   : > { %v2337_v27 = vpop.f32.mrf.mxu1  ;;  %9340 = vmatmul.msk.bf16.gmra.mxu2 %vm1165_vm5, %v12909_v37  ;;  %v2169_v45 = vpop.f32.mrf.mxu0 }
 0x1d4   : > { %9380 = vmatmul.msk.bf16.gmra.mxu3 %vm1165_vm5, %v12948_v33  ;;  %v2243_v10 = vadd.f32 %v2169_v45, %v12899_v8 }
 0x1d6   : > { %9296 = vmatmul.msk.bf16.gmra.mxu1 %vm1165_vm5, %v12906_v32  ;;  %v2499_v43 = vpop.f32.mrf.mxu2  ;;  %v2411_v28 = vadd.f32 %v2337_v27, %v2243_v10  ;;  %9255 = vmatmul.msk.bf16.gmra.mxu0 %vm1165_vm5, %v12918_v61 }
 0x1d7   : > { %v2683_v53 = vpop.f32.mrf.mxu3 }
 0x1d8   : > { %v2573_v15 = vadd.f32 %v2499_v43, %v2411_v28  ;;  %v16031_v43 = vld [vmem:[#allocation13_spill] sm:$0xff] }
 0x1da   : > { %v13236_v37 = vadd.f32 %v2683_v53, %v2573_v15 }
 0x1db   : > { %v2339_v41 = vpop.f32.mrf.mxu1  ;;  %v2171_v36 = vpop.f32.mrf.mxu0 }
 0x1dc   : > { %v2244_v42 = vadd.f32 %v2171_v36, %v12912_v23 }
 0x1de   : > { %v2501_v21 = vpop.f32.mrf.mxu2  ;;  %v2412_v58 = vadd.f32 %v2339_v41, %v2244_v42 }
 0x1df   : > { %v2685_v57 = vpop.f32.mrf.mxu3 }
 0x1e0   : > { %v2574_v14 = vadd.f32 %v2501_v21, %v2412_v58  ;;  %v16032_v21 = vld [vmem:[#allocation15_spill] sm:$0xff]  ;;  %v13265_v58 = vld [vmem:[%s12607_s21 + $0xc4] sm:$0xf] }
 0x1e2   : > { %v13243_v8 = vadd.f32 %v2685_v57, %v2574_v14  ;;  %v13262_v57 = vld [vmem:[%s12607_s21 + $0xc0] sm:$0xf] }
 0x1e3   : > { %v2342_v17 = vpop.f32.mrf.mxu1  ;;  %9341 = vmatmul.msk.bf16.gmra.mxu2 %vm1165_vm5, %v12939_v0  ;;  %v2174_v61 = vpop.f32.mrf.mxu0  ;;  %v16033_v14 = vld [vmem:[#allocation14_spill] sm:$0xff] }
 0x1e4   : > { %9381 = vmatmul.msk.bf16.gmra.mxu3 %vm1165_vm5, %v12981_v7  ;;  %v2245_v39 = vadd.f32 %v2174_v61, %v16030_v30 }
 0x1e6   : > { %9297 = vmatmul.msk.bf16.gmra.mxu1 %vm1165_vm5, %v12936_v60  ;;  %v2504_v23 = vpop.f32.mrf.mxu2  ;;  %v2413_v27 = vadd.f32 %v2342_v17, %v2245_v39  ;;  %9256 = vmatmul.msk.bf16.gmra.mxu0 %vm1165_vm5, %v12948_v33 }
 0x1e7   : > { %v2688_v18 = vpop.f32.mrf.mxu3 }
 0x1e8   : > { %v2575_v38 = vadd.f32 %v2504_v23, %v2413_v27  ;;  %v2091_v23 = vshll.u32 %v13262_v57, 16  ;;  %v2101_v27 = vshrl.u32 %v13265_v58, 16 }
 0x1ea   : > { %v13250_v45 = vadd.f32 %v2688_v18, %v2575_v38  ;;  %v2097_v18 = vshll.u32 %v13265_v58, 16 }
 0x1eb   : > { %v2344_v0 = vpop.f32.mrf.mxu1  ;;  %v2176_v10 = vpop.f32.mrf.mxu0 }
 0x1ec   : > { %v2246_v53 = vadd.f32 %v2176_v10, %v16031_v43  ;;  %v11885_v43 = vld [vmem:[%s16009_s4 + $0x118] sm:$0xff] }
 0x1ed   : > { %2836 = vmatpush.bf16.msra.mxu0 %v11885_v43 }
 0x1ee   : > { %v2506_v28 = vpop.f32.mrf.mxu2  ;;  %v2414_v15 = vadd.f32 %v2344_v0, %v2246_v53 }
 0x1ef   : > { %v2690_v41 = vpop.f32.mrf.mxu3 }
 0x1f0   : > { %v2576_v42 = vadd.f32 %v2506_v28, %v2414_v15  ;;  %v2093_v28 = vrot.slane %v2091_v23, 5  ;;  %v2103_v15 = vrot.slane %v2101_v27, 4 }
 0x1f2   : > { %v13257_v33 = vadd.f32 %v2690_v41, %v2576_v42  ;;  %v2099_v41 = vrot.slane %v2097_v18, 5 }
 0x1f3   : > { %v2347_v36 = vpop.f32.mrf.mxu1  ;;  %9342 = vmatmul.msk.bf16.gmra.mxu2 %vm1165_vm5, %v12972_v51  ;;  %v2179_v17 = vpop.f32.mrf.mxu0  ;;  %v2088_v51 = vshrl.u32 %v13262_v57, 16 }
 0x1f4   : > { %9382 = vmatmul.msk.bf16.gmra.mxu3 %vm1165_vm5, %v13062_v29  ;;  %v2247_v61 = vadd.f32 %v2179_v17, %v16033_v14  ;;  %v13282_v17 = vld [vmem:[%s12607_s21 + $0xc8] sm:$0x1]  ;;  %v16034_v14 = vld [vmem:[#allocation16_spill] sm:$0xff] }
 0x1f5   : > { %v2090_v53 = vrot.slane %v2088_v51, 4  ;;  %v2104_v51 = vor.u32 %v2103_v15, %v2099_v41  ;;  %v2107_v23 = vshll.u32 %v13282_v17, 16 }
 0x1f6   : > { %9298 = vmatmul.msk.bf16.gmra.mxu1 %vm1165_vm5, %v16032_v21  ;;  %v2509_v30 = vpop.f32.mrf.mxu2  ;;  %v2415_v0 = vadd.f32 %v2347_v36, %v2247_v61  ;;  %9257 = vmatmul.msk.bf16.gmra.mxu0 %vm1165_vm5, %v12981_v7 }
 0x1f7   : > { %v2693_v39 = vpop.f32.mrf.mxu3  ;;  %v2105_v27 = vrot.slane %v2104_v51, 4 }
 0x1f8   : > { %v2577_v10 = vadd.f32 %v2509_v30, %v2415_v0  ;;  %v2094_v0 = vor.u32 %v2093_v28, %v2090_v53  ;;  %v13304_v53 = vld [vmem:[%s12607_s21 + $0xd0] sm:$0xf]  ;;  %v16040_v28 = vld [vmem:[#allocation17_spill] sm:$0xff] }
 0x1f9   : > { %16039 = vst [vmem:[#allocation16_spill] sm:$0xff] %v13304_v53 }
 0x1fa   : > { %v13279_v42 = vadd.f32 %v2693_v39, %v2577_v10  ;;  %v2095_v39 = vrot.slane %v2094_v0, 4  ;;  %v2109_v10 = vrot.slane %v2107_v23, 5 }
 0x1fb   : > { %v13274_v38 = vpop.f32.mrf.mxu1  ;;  %v2181_v36 = vpop.f32.mrf.mxu0 }
 0x1fc   : > { %v13285_v7 = vadd.f32 %v2181_v36, %v16034_v14  ;;  %v13301_v36 = vld [vmem:[%s12607_s21 + $0xcc] sm:$0xf]  ;;  %v2100_v0 = vsel %vm12640_vm6, %v2095_v39, %v2099_v41  ;;  %v2110_v51 = vsel %vm12640_vm6, %v2105_v27, %v2109_v10  ;;  %v11884_v41 = vld [vmem:[%s16009_s4 + $0x110] sm:$0xff] }
 0x1fd   : > { %16038 = vst [vmem:[#allocation14_spill] sm:$0xff] %v13301_v36  ;;  %v2602_v23 = vshrl.u32 %v13301_v36, 16  ;;  %2837 = vmatpush.bf16.msra.mxu0 %v11884_v41  ;;  %v2274_v41 = vrot.slane %v13265_v58, 5 }
 0x1fe   : > { %v13287_v61 = vpop.f32.mrf.mxu2 }
 0x1ff   : > { %16035 = vst [vmem:[#allocation12_spill] sm:$0xff] %v13287_v61  ;;  %v13289_v30 = vpop.f32.mrf.mxu3  ;;  %v2604_v39 = vrot.slane %v2602_v23, 4  ;;  %v2276_v58 = vrot.slane %v2274_v41, 4 }
 0x200   : > { %16036 = vst [vmem:[#allocation13_spill] sm:$0xff] %v13289_v30 }
 0x203   : > { %v13292_v18 = vpop.f32.mrf.mxu1  ;;  %9343 = vmatmul.msk.bf16.gmra.mxu2 %vm1165_vm5, %v13034_v13  ;;  %v2184_v43 = vpop.f32.mrf.mxu0 }
 0x204   : > { %16037 = vst [vmem:[#allocation15_spill] sm:$0xff] %v13292_v18  ;;  %9383 = vmatmul.msk.bf16.gmra.mxu3 %vm1165_vm5, %v13093_v50  ;;  %v13307_v15 = vadd.f32 %v2184_v43, %v16040_v28  ;;  %v2605_v18 = vshll.u32 %v13301_v36, 16  ;;  %v2611_v43 = vshll.u32 %v13304_v53, 16  ;;  %v2615_v28 = vshrl.u32 %v13304_v53, 16  ;;  %v16046_v36 = vld [vmem:[#allocation19_spill] sm:$0xff] }
 0x206   : > { %9299 = vmatmul.msk.bf16.gmra.mxu1 %vm1165_vm5, %v13031_v19  ;;  %16041 = vst [vmem:[#allocation17_spill] sm:$0xff] %v13307_v15  ;;  %v13309_v14 = vpop.f32.mrf.mxu2  ;;  %9258 = vmatmul.msk.bf16.gmra.mxu0 %vm1165_vm5, %v13062_v29  ;;  %v2121_v15 = vunpack.c.l.b16 %v2110_v51  ;;  %v2607_v27 = vrot.slane %v2605_v18, 5  ;;  %v2613_v10 = vrot.slane %v2611_v43, 5  ;;  %v2617_v29 = vrot.slane %v2615_v28, 4  ;;  %v13329_v19 = vld [vmem:[%s12607_s21 + $0xd4] sm:$0x1] }
 0x207   : > { %16042 = vst [vmem:[#allocation26_spill] sm:$0xff] %v13309_v14  ;;  %v13311_v13 = vpop.f32.mrf.mxu3  ;;  %v11883_v51 = vld [vmem:[%s16009_s4 + $0x108] sm:$0xff]  ;;  %v2621_v43 = vshll.u32 %v13329_v19, 16 }
 0x208   : > { %16043 = vst [vmem:[#allocation27_spill] sm:$0xff] %v13311_v13  ;;  %v2120_v13 = vunpack.c.l.b16 %v2100_v0  ;;  %v2608_v23 = vor.u32 %v2607_v27, %v2604_v39  ;;  %v2618_v18 = vor.u32 %v2617_v29, %v2613_v10  ;;  %2838 = vmatpush.bf16.msra.mxu0 %v11883_v51  ;;  %v9261_v27 = vrot.slane %v13262_v57, 9 }
 0x209   : > { %16045 = vst [vmem:[#allocation29_spill] sm:$0xff] %v13329_v19  ;;  %v2277_v29 = vrot.slane %v13282_v17, 5 }
 0x20a   : > { %v2122_v0 = vpack.c.b16 %v2121_v15, %v2120_v13  ;;  %v2619_v15 = vrot.slane %v2618_v18, 4  ;;  %v2623_v13 = vrot.slane %v2621_v43, 5 }
 0x20b   : > { %v13323_v14 = vpop.f32.mrf.mxu1  ;;  %v2186_v30 = vpop.f32.mrf.mxu0  ;;  %v2278_v17 = vsel %vm12609_vm3, %v2276_v58, %v2277_v29 }
 0x20c   : > { %16044 = vst [vmem:[#allocation28_spill] sm:$0xff] %v13323_v14  ;;  %v13332_v61 = vadd.f32 %v2186_v30, %v16046_v36  ;;  %v11882_v30 = vld [vmem:[%s16009_s4 + $0x100] sm:$0xff]  ;;  %v2609_v36 = vrot.slane %v2608_v23, 4  ;;  %v2624_v57 = vsel %vm12640_vm6, %v2619_v15, %v2623_v13  ;;  %v11849_v15 = vld [vmem:[%s12607_s21 + $0xcc] sm:$0xff]  ;;  %s12292_s21 = sshll.u32 %s12536_s0, 4  ;;  %s8862_s0 = scalar_lea.sflag [#allocation3], %s611_s30 }
 0x20d   : > { %2839 = vmatpush.bf16.msra.mxu0 %v11882_v30  ;;  %v2635_v30 = vunpack.c.l.b16 %v2624_v57  ;;  %s8873_s26 = scalar_lea.hbm %s15979_s18, %s12292_s21  ;;  %s12372_s21 = scalar_lea.hbm %s15979_s18, 32 }
 0x20e   : > { %v13334_v53 = vpop.f32.mrf.mxu2  ;;  %v2614_v23 = vsel %vm12640_vm6, %v2609_v36, %v2613_v10 }
 0x20f   : > { %v13336_v14 = vpop.f32.mrf.mxu3  ;;  %v2634_v43 = vunpack.c.l.b16 %v2614_v23 }
 0x211   : > { %v2636_v13 = vpack.c.b16 %v2635_v30, %v2634_v43 }
 0x213   : > { %v13342_v28 = vpop.f32.mrf.mxu1  ;;  %9344 = vmatmul.msk.bf16.gmra.mxu2 %vm1165_vm5, %v13085_v52  ;;  %v2189_v39 = vpop.f32.mrf.mxu0 }
 0x214   : > { %9384 = vmatmul.msk.bf16.gmra.mxu3 %vm1165_vm5, %v2122_v0  ;;  %v13356_v52 = vadd.f32 %v2189_v39, %v13076_v2  ;;  %v2275_v2 = vsel %vm12609_vm3, %v9261_v27, %v2274_v41 }
 0x215   : > { %v2288_v39 = vunpack.c.l.b16 %v2275_v2 }
 0x216   : > { %9300 = vmatmul.msk.bf16.gmra.mxu1 %vm1165_vm5, %v13082_v1  ;;  %v13358_v51 = vpop.f32.mrf.mxu2  ;;  %9259 = vmatmul.msk.bf16.gmra.mxu0 %vm1165_vm5, %v13093_v50 }
 0x217   : > { %16047 = vst [vmem:[#allocation19_spill] sm:$0xff] %v13358_v51  ;;  %v13360_v19 = vpop.f32.mrf.mxu3 }
 0x218   : > { %16048 = vst [vmem:[#allocation30_spill] sm:$0xff] %v13360_v19  ;;  %v2289_v19 = vunpack.c.l.b16 %v2278_v17 }
 0x21a   : > { %v13382_v44 = vpack.c.b16 %v2289_v19, %v2288_v39 }
 0x21b   : > { %v13368_v18 = vpop.f32.mrf.mxu1  ;;  %v2191_v51 = vpop.f32.mrf.mxu0 }
 0x21c   : > { %v13375_v50 = vadd.f32 %v2191_v51, %v13087_v47 }
 0x21e   : > { %v13377_v10 = vpop.f32.mrf.mxu2 }
 0x21f   : > { %v13379_v36 = vpop.f32.mrf.mxu3 }
 0x223   : > { %v13384_v41 = vpop.f32.mrf.mxu1  ;;  %9345 = vmatmul.msk.bf16.gmra.mxu2 %vm1165_vm5, %v11849_v15  ;;  %v2194_v27 = vpop.f32.mrf.mxu0 }
 0x224   : > { %9385 = vmatmul.msk.bf16.gmra.mxu3 %vm1165_vm5, %v2636_v13  ;;  %v13391_v47 = vadd.f32 %v2194_v27, %v13099_v6 }
 0x226   : > { %9301 = vmatmul.msk.bf16.gmra.mxu1 %vm1165_vm5, %v13382_v44  ;;  %v13393_v58 = vpop.f32.mrf.mxu2  ;;  %9260 = vmatmul.msk.bf16.gmra.mxu0 %vm1165_vm5, %v2122_v0 }
 0x227   : > { %v13395_v29 = vpop.f32.mrf.mxu3 }
 0x228   : > { %16049 = vst [vmem:[#allocation31_spill] sm:$0xff] %v13395_v29 }
 0x22b   : > { %v13398_v19 = vpop.f32.mrf.mxu1  ;;  %v2196_v51 = vpop.f32.mrf.mxu0 }
 0x22c   : > { %v13401_v23 = vadd.f32 %v2196_v51, %v13101_v49 }
 0x22e   : > { %v13403_v57 = vpop.f32.mrf.mxu2 }
 0x22f   : > { %16050 = vst [vmem:[#allocation32_spill] sm:$0xff] %v13403_v57  ;;  %v13405_v2 = vpop.f32.mrf.mxu3 }
 0x230   : > { %16051 = vst [vmem:[#allocation33_spill] sm:$0xff] %v13405_v2 }
 0x233   : > { %v2367_v17 = vpop.f32.mrf.mxu1  ;;  %v2199_v43 = vpop.f32.mrf.mxu0 }
 0x234   : > { %v2255_v6 = vadd.f32 %v2199_v43, %v13111_v11 }
 0x236   : > { %v2529_v30 = vpop.f32.mrf.mxu2  ;;  %v2423_v15 = vadd.f32 %v2367_v17, %v2255_v6  ;;  %9411 = vmatmul.msk.bf16.vlgmr.msra.gmra.mxu0 %vm1165_vm5, %v12687_v54 }
 0x237   : > { %v2713_v39 = vpop.f32.mrf.mxu3 }
 0x238   : > { %v2585_v13 = vadd.f32 %v2529_v30, %v2423_v15 }
 0x23a   : > { %v13412_v27 = vadd.f32 %v2713_v39, %v2585_v13  ;;  %v16056_v13 = vld [vmem:[#allocation20_spill] sm:$0xff] }
 0x23b   : > { %v13410_v0 = vpop.f32.mrf.mxu1  ;;  %v2201_v49 = vpop.f32.mrf.mxu0 }
 0x23c   : > { %16052 = vst [vmem:[#allocation34_spill] sm:$0xff] %v13412_v27  ;;  %v13415_v51 = vadd.f32 %v2201_v49, %v13113_v40 }
 0x23e   : > { %v13417_v2 = vpop.f32.mrf.mxu2 }
 0x23f   : > { %16053 = vst [vmem:[#allocation35_spill] sm:$0xff] %v13417_v2  ;;  %v13419_v29 = vpop.f32.mrf.mxu3 }
 0x240   : > { %16054 = vst [vmem:[#allocation36_spill] sm:$0xff] %v13419_v29 }
 0x243   : > { %v2372_v11 = vpop.f32.mrf.mxu1  ;;  %v2204_v43 = vpop.f32.mrf.mxu0 }
 0x244   : > { %v2257_v17 = vadd.f32 %v2204_v43, %v13123_v55 }
 0x246   : > { %v2534_v6 = vpop.f32.mrf.mxu2  ;;  %v2425_v54 = vadd.f32 %v2372_v11, %v2257_v17  ;;  %9412 = vmatmul.msk.bf16.gmra.mxu0 %vm1165_vm5, %v12709_v24 }
 0x247   : > { %v2718_v57 = vpop.f32.mrf.mxu3 }
 0x248   : > { %v2587_v39 = vadd.f32 %v2534_v6, %v2425_v54 }
 0x24a   : > { %v13426_v15 = vadd.f32 %v2718_v57, %v2587_v39 }
 0x24b   : > { %v13424_v30 = vpop.f32.mrf.mxu1  ;;  %v2206_v40 = vpop.f32.mrf.mxu0 }
 0x24c   : > { %16055 = vst [vmem:[#allocation37_spill] sm:$0xff] %v13426_v15  ;;  %v13429_v49 = vadd.f32 %v2206_v40, %v16056_v13  ;;  %v16060_v40 = vld [vmem:[#allocation21_spill] sm:$0xff] }
 0x24e   : > { %v13431_v29 = vpop.f32.mrf.mxu2 }
 0x24f   : > { %16057 = vst [vmem:[#allocation20_spill] sm:$0xff] %v13431_v29  ;;  %v13433_v2 = vpop.f32.mrf.mxu3 }
 0x250   : > { %16058 = vst [vmem:[#allocation38_spill] sm:$0xff] %v13433_v2 }
 0x253   : > { %v2377_v55 = vpop.f32.mrf.mxu1  ;;  %v2209_v43 = vpop.f32.mrf.mxu0 }
 0x254   : > { %v2259_v11 = vadd.f32 %v2209_v43, %v13135_v26 }
 0x256   : > { %v2539_v17 = vpop.f32.mrf.mxu2  ;;  %v2427_v24 = vadd.f32 %v2377_v55, %v2259_v11  ;;  %9413 = vmatmul.msk.bf16.gmra.mxu0 %vm1165_vm5, %v12731_v59 }
 0x257   : > { %v2723_v27 = vpop.f32.mrf.mxu3 }
 0x258   : > { %v2589_v6 = vadd.f32 %v2539_v17, %v2427_v24 }
 0x25a   : > { %v13440_v54 = vadd.f32 %v2723_v27, %v2589_v6 }
 0x25b   : > { %v13438_v57 = vpop.f32.mrf.mxu1  ;;  %v2211_v39 = vpop.f32.mrf.mxu0 }
 0x25c   : > { %16059 = vst [vmem:[#allocation39_spill] sm:$0xff] %v13440_v54  ;;  %v13443_v13 = vadd.f32 %v2211_v39, %v16060_v40  ;;  %v16063_v39 = vld [vmem:[#allocation22_spill] sm:$0xff] }
 0x25e   : > { %v13445_v2 = vpop.f32.mrf.mxu2 }
 0x25f   : > { %16061 = vst [vmem:[#allocation21_spill] sm:$0xff] %v13445_v2  ;;  %v13447_v29 = vpop.f32.mrf.mxu3 }
 0x260   : > { %16062 = vst [vmem:[#allocation40_spill] sm:$0xff] %v13447_v29 }
 0x263   : > { %v2382_v26 = vpop.f32.mrf.mxu1  ;;  %v2214_v43 = vpop.f32.mrf.mxu0 }
 0x264   : > { %v2261_v55 = vadd.f32 %v2214_v43, %v13147_v56 }
 0x266   : > { %v2544_v11 = vpop.f32.mrf.mxu2  ;;  %v2429_v59 = vadd.f32 %v2382_v26, %v2261_v55  ;;  %9414 = vmatmul.msk.bf16.gmra.mxu0 %vm1165_vm5, %v12753_v31 }
 0x267   : > { %v2728_v15 = vpop.f32.mrf.mxu3 }
 0x268   : > { %v2591_v27 = vadd.f32 %v2544_v11, %v2429_v59 }
 0x26a   : > { %v13454_v24 = vadd.f32 %v2728_v15, %v2591_v27  ;;  %v16065_v27 = vld [vmem:[#allocation23_spill] sm:$0xff] }
 0x26b   : > { %v13452_v17 = vpop.f32.mrf.mxu1  ;;  %v2216_v6 = vpop.f32.mrf.mxu0 }
 0x26c   : > { %v13457_v40 = vadd.f32 %v2216_v6, %v16063_v39 }
 0x26e   : > { %v13459_v29 = vpop.f32.mrf.mxu2 }
 0x26f   : > { %v13461_v2 = vpop.f32.mrf.mxu3 }
 0x270   : > { %16064 = vst [vmem:[#allocation22_spill] sm:$0xff] %v13461_v2 }
 0x273   : > { %v2219_v56 = vpop.f32.mrf.mxu0  ;;  %v2387_v43 = vpop.f32.mrf.mxu1 }
 0x274   : > { %v2263_v26 = vadd.f32 %v2219_v56, %v13159_v34  ;;  %v16066_v56 = vld [vmem:[#allocation24_spill] sm:$0xff] }
 0x276   : > { %v2549_v55 = vpop.f32.mrf.mxu2  ;;  %v2431_v54 = vadd.f32 %v2387_v43, %v2263_v26  ;;  %9415 = vmatmul.msk.bf16.gmra.mxu0 %vm1165_vm5, %v12775_v5 }
 0x277   : > { %v2733_v31 = vpop.f32.mrf.mxu3 }
 0x278   : > { %v2593_v15 = vadd.f32 %v2549_v55, %v2431_v54 }
 0x27a   : > { %v13466_v11 = vadd.f32 %v2733_v31, %v2593_v15  ;;  %v16067_v15 = vld [vmem:[#allocation25_spill] sm:$0xff] }
 0x27b   : > { %v2221_v59 = vpop.f32.mrf.mxu0 }
 0x27c   : > { %v13469_v6 = vadd.f32 %v2221_v59, %v16065_v27 }
 0x283   : > { %v2224_v39 = vpop.f32.mrf.mxu0 }
 0x284   : > { %v13472_v2 = vadd.f32 %v2224_v39, %v13171_v3 }
 0x286   : > { %9416 = vmatmul.msk.bf16.gmra.mxu0 %vm1165_vm5, %v12797_v46 }
 0x28b   : > { %v2226_v34 = vpop.f32.mrf.mxu0 }
 0x28c   : > { %v13477_v43 = vadd.f32 %v2226_v34, %v16066_v56 }
 0x293   : > { %v2229_v5 = vpop.f32.mrf.mxu0 }
 0x294   : > { %v13480_v54 = vadd.f32 %v2229_v5, %v13183_v35 }
 0x296   : > { %9417 = vmatmul.msk.bf16.gmra.mxu0 %vm1165_vm5, %v12819_v22  ;;  %v13501_v22 = vld [vmem:[%s15969_s8] ss:$0 sm:$0xff] }
 0x29b   : > { %v2231_v26 = vpop.f32.mrf.mxu0 }
 0x29c   : > { %v13485_v55 = vadd.f32 %v2231_v26, %v13185_v4 }
 0x2a3   : > { %v2234_v3 = vpop.f32.mrf.mxu0 }
 0x2a4   : > { %v13488_v31 = vadd.f32 %v2234_v3, %v13195_v9 }
 0x2a6   : > { %9418 = vmatmul.msk.bf16.gmra.mxu0 %vm1165_vm5, %v12846_v16 }
 0x2ab   : > { %v2236_v46 = vpop.f32.mrf.mxu0 }
 0x2ac   : > { %v13493_v59 = vadd.f32 %v2236_v46, %v16067_v15 }
 0x2b3   : > { %v2841_v35 = vpop.f32.mrf.mxu0 }
 0x2b4   : > { %v2921_v27 = vadd.f32 %v2841_v35, %v13208_v48 }
 0x2b6   : > { %9419 = vmatmul.msk.bf16.gmra.mxu0 %vm1165_vm5, %v12876_v20  ;;  %v13505_v16 = vadd.f32 %v13501_v22, %v2921_v27 }
 0x2bb   : > { %v2843_v4 = vpop.f32.mrf.mxu0 }
 0x2bc   : > { %v2922_v9 = vadd.f32 %v2843_v4, %v13215_v63 }
 0x2be   : > { %v13508_v39 = vadd.f32 %v13501_v22, %v2922_v9 }
 0x2c3   : > { %v2846_v34 = vpop.f32.mrf.mxu0 }
 0x2c4   : > { %v2923_v20 = vadd.f32 %v2846_v34, %v13222_v25 }
 0x2c6   : > { %9420 = vmatmul.msk.bf16.gmra.mxu0 %vm1165_vm5, %v12906_v32  ;;  %v13517_v63 = vadd.f32 %v13501_v22, %v2923_v20 }
 0x2cb   : > { %v2848_v56 = vpop.f32.mrf.mxu0 }
 0x2cc   : > { %v2924_v5 = vadd.f32 %v2848_v56, %v13229_v62  ;;  %v2416_v56 = vadd.f32 %v13274_v38, %v13285_v7  ;;  %v16072_v38 = vld [vmem:[#allocation15_spill] sm:$0xff] }
 0x2ce   : > { %v13520_v26 = vadd.f32 %v13501_v22, %v2924_v5 }
 0x2d3   : > { %v2851_v46 = vpop.f32.mrf.mxu0 }
 0x2d4   : > { %v2925_v15 = vadd.f32 %v2851_v46, %v13236_v37  ;;  %v16068_v46 = vld [vmem:[#allocation12_spill] sm:$0xff] }
 0x2d6   : > { %9421 = vmatmul.msk.bf16.gmra.mxu0 %vm1165_vm5, %v12936_v60  ;;  %v13529_v62 = vadd.f32 %v13501_v22, %v2925_v15  ;;  %v16069_v15 = vld [vmem:[#allocation18_spill] sm:$0xff] }
 0x2db   : > { %v2853_v25 = vpop.f32.mrf.mxu0 }
 0x2dc   : > { %v2926_v32 = vadd.f32 %v2853_v25, %v13243_v8 }
 0x2de   : > { %v13532_v35 = vadd.f32 %v13501_v22, %v2926_v32 }
 0x2e0   : > { %v2996_v27 = vpack.c.bf16 %v13532_v35, %v13529_v62  ;;  %v2428_v35 = vadd.f32 %v13438_v57, %v13443_v13  ;;  %v2430_v57 = vadd.f32 %v13452_v17, %v13457_v40  ;;  %v2389_v13 = vpop.f32.mrf.mxu1 }
 0x2e3   : > { %v2856_v4 = vpop.f32.mrf.mxu0 }
 0x2e4   : > { %v2927_v9 = vadd.f32 %v2856_v4, %v13250_v45 }
 0x2e6   : > { %9422 = vmatmul.msk.bf16.gmra.mxu0 %vm1165_vm5, %v16032_v21  ;;  %v13541_v8 = vadd.f32 %v13501_v22, %v2927_v9  ;;  %v2578_v21 = vadd.f32 %v16068_v46, %v2416_v56  ;;  %v16073_v56 = vld [vmem:[#allocation28_spill] sm:$0xff] }
 0x2eb   : > { %v2858_v37 = vpop.f32.mrf.mxu0 }
 0x2ec   : > { %v2928_v60 = vadd.f32 %v2858_v37, %v13257_v33  ;;  %v16070_v33 = vld [vmem:[#allocation13_spill] sm:$0xff] }
 0x2ed   : > { %v2762_v25 = vadd.f32 %v16070_v33, %v2578_v21 }
 0x2ee   : > { %v13544_v34 = vadd.f32 %v13501_v22, %v2928_v60  ;;  %v16071_v60 = vld [vmem:[#allocation17_spill] sm:$0xff] }
 0x2ef   : > { %v2417_v7 = vadd.f32 %v16072_v38, %v16071_v60 }
 0x2f0   : > { %v2997_v20 = vpack.c.bf16 %v13544_v34, %v13541_v8 }
 0x2f3   : > { %v2861_v5 = vpop.f32.mrf.mxu0 }
 0x2f4   : > { %v2929_v45 = vadd.f32 %v2861_v5, %v13279_v42  ;;  %v2418_v5 = vadd.f32 %v16073_v56, %v13332_v61  ;;  %v2419_v61 = vadd.f32 %v13342_v28, %v13356_v52  ;;  %v16080_v28 = vld [vmem:[#allocation30_spill] sm:$0xff] }
 0x2f6   : > { %9423 = vmatmul.msk.bf16.gmra.mxu0 %vm1165_vm5, %v16069_v15  ;;  %v13556_v9 = vadd.f32 %v13501_v22, %v2929_v45  ;;  %v16074_v15 = vld [vmem:[#allocation26_spill] sm:$0xff]  ;;  %v2580_v33 = vadd.f32 %v13334_v53, %v2418_v5  ;;  %v16075_v45 = vld [vmem:[#allocation27_spill] sm:$0xff]  ;;  %v2420_v53 = vadd.f32 %v13368_v18, %v13375_v50 }
 0x2f7   : > { %v2579_v21 = vadd.f32 %v16074_v15, %v2417_v7  ;;  %v16077_v15 = vld [vmem:[#allocation19_spill] sm:$0xff] }
 0x2fb   : > { %v2863_v32 = vpop.f32.mrf.mxu0 }
 0x2fc   : > { %v2930_v4 = vadd.f32 %v2863_v32, %v2762_v25  ;;  %v2763_v25 = vadd.f32 %v16075_v45, %v2579_v21  ;;  %v2764_v32 = vadd.f32 %v13336_v14, %v2580_v33  ;;  %v2581_v21 = vadd.f32 %v16077_v15, %v2419_v61 }
 0x2fd   : > { %v2582_v14 = vadd.f32 %v13377_v10, %v2420_v53  ;;  %v2421_v53 = vadd.f32 %v13384_v41, %v13391_v47 }
 0x2fe   : > { %v13559_v37 = vadd.f32 %v13501_v22, %v2930_v4  ;;  %v2765_v52 = vadd.f32 %v16080_v28, %v2581_v21  ;;  %v16081_v21 = vld [vmem:[#allocation32_spill] sm:$0xff] }
 0x300   : > { %v2998_v42 = vpack.c.bf16 %v13559_v37, %v13556_v9  ;;  %v16089_v9 = vld [vmem:[#allocation38_spill] sm:$0xff] }
 0x303   : > { %v2866_v46 = vpop.f32.mrf.mxu0 }
 0x304   : > { %v2931_v4 = vadd.f32 %v2866_v46, %v2763_v25  ;;  %v16078_v46 = vld [vmem:[#allocation14_spill] sm:$0xff]  ;;  %v16079_v25 = vld [vmem:[#allocation29_spill] sm:$0xff] }
 0x305   : > { %v9386_v33 = vrot.slane %v16078_v46, 9  ;;  %v16082_v46 = vld [vmem:[#allocation31_spill] sm:$0xff] }
 0x306   : > { %9424 = vmatmul.msk.bf16.gmra.mxu0 %vm1165_vm5, %v13082_v1  ;;  %v2967_v48 = vadd.f32 %v13501_v22, %v2931_v4  ;;  %v16076_v1 = vld [vmem:[#allocation16_spill] sm:$0xff] }
 0x307   : > { %v2788_v5 = vrot.slane %v16076_v1, 5 }
 0x309   : > { %v2790_v45 = vrot.slane %v2788_v5, 4 }
 0x30b   : > { %v2868_v60 = vpop.f32.mrf.mxu0 }
 0x30c   : > { %v2932_v38 = vadd.f32 %v2868_v60, %v2764_v32  ;;  %v2791_v32 = vrot.slane %v16079_v25, 5 }
 0x30e   : > { %v2968_v3 = vadd.f32 %v13501_v22, %v2932_v38  ;;  %v2792_v10 = vsel %vm12609_vm3, %v2790_v45, %v2791_v32  ;;  %v16083_v45 = vld [vmem:[#allocation33_spill] sm:$0xff] }
 0x30f   : > { %v2803_v61 = vunpack.c.l.b16 %v2792_v10  ;;  %v16086_v10 = vld [vmem:[#allocation36_spill] sm:$0xff] }
 0x310   : > { %v2999_v7 = vpack.c.bf16 %v2968_v3, %v2967_v48  ;;  %v2766_v48 = vadd.f32 %v13379_v36, %v2582_v14  ;;  %v2789_v3 = vsel %vm12609_vm3, %v9386_v33, %v2788_v5  ;;  %v2422_v36 = vadd.f32 %v13398_v19, %v13401_v23 }
 0x311   : > { %v2802_v38 = vunpack.c.l.b16 %v2789_v3  ;;  %v2583_v5 = vadd.f32 %v13393_v58, %v2421_v53  ;;  %v2424_v23 = vadd.f32 %v13410_v0, %v13415_v51  ;;  %v2426_v51 = vadd.f32 %v13424_v30, %v13429_v49  ;;  %v16087_v53 = vld [vmem:[#allocation37_spill] sm:$0xff] }
 0x312   : > { %v2584_v14 = vadd.f32 %v16081_v21, %v2422_v36  ;;  %v16088_v36 = vld [vmem:[#allocation20_spill] sm:$0xff] }
 0x313   : > { %v2871_v56 = vpop.f32.mrf.mxu0  ;;  %v2767_v33 = vadd.f32 %v16082_v46, %v2583_v5  ;;  %v16094_v21 = vld [vmem:[#allocation40_spill] sm:$0xff] }
 0x314   : > { %v2933_v18 = vadd.f32 %v2871_v56, %v2765_v52  ;;  %v2804_v56 = vpack.c.b16 %v2803_v61, %v2802_v38  ;;  %v2768_v25 = vadd.f32 %v16083_v45, %v2584_v14 }
 0x316   : > { %9425 = vmatmul.msk.bf16.gmra.mxu0 %vm1165_vm5, %v13382_v44  ;;  %v2969_v44 = vadd.f32 %v13501_v22, %v2933_v18 }
 0x31b   : > { %v2873_v50 = vpop.f32.mrf.mxu0 }
 0x31c   : > { %v2934_v4 = vadd.f32 %v2873_v50, %v2766_v48  ;;  %v16084_v48 = vld [vmem:[#allocation34_spill] sm:$0xff]  ;;  %v16085_v50 = vld [vmem:[#allocation35_spill] sm:$0xff] }
 0x31d   : > { %v2586_v3 = vadd.f32 %v16085_v50, %v2424_v23 }
 0x31e   : > { %v2970_v60 = vadd.f32 %v13501_v22, %v2934_v4 }
 0x31f   : > { %v2770_v4 = vadd.f32 %v16086_v10, %v2586_v3 }
 0x320   : > { %v3000_v1 = vpack.c.bf16 %v2970_v60, %v2969_v44 }
 0x323   : > { %v2876_v15 = vpop.f32.mrf.mxu0 }
 0x324   : > { %v2935_v32 = vadd.f32 %v2876_v15, %v2767_v33  ;;  %v16093_v15 = vld [vmem:[#allocation21_spill] sm:$0xff] }
 0x325   : > { %v2590_v5 = vadd.f32 %v16093_v15, %v2428_v35 }
 0x326   : > { %9426 = vmatmul.msk.bf16.gmra.mxu0 %vm1165_vm5, %v2804_v56  ;;  %v2971_v41 = vadd.f32 %v13501_v22, %v2935_v32  ;;  %v2588_v56 = vadd.f32 %v16088_v36, %v2426_v51  ;;  %v11887_v51 = vld [vmem:[%s15973_s12 + $0x4] sm:$0xf0] }
 0x327   : > { %v2774_v14 = vadd.f32 %v16094_v21, %v2590_v5  ;;  %v9437_v5 = vld [vmem:[%s15973_s12 + $0x10] sm:$0xf] }
 0x328   : > { %v2772_v37 = vadd.f32 %v16089_v9, %v2588_v56 }
 0x32b   : > { %v2878_v28 = vpop.f32.mrf.mxu0 }
 0x32c   : > { %v2936_v52 = vadd.f32 %v2878_v28, %v2768_v25  ;;  %v2592_v28 = vadd.f32 %v13459_v29, %v2430_v57 }
 0x32e   : > { %v2972_v47 = vadd.f32 %v13501_v22, %v2936_v52  ;;  %v2551_v52 = vpop.f32.mrf.mxu2 }
 0x330   : > { %v3001_v19 = vpack.c.bf16 %v2972_v47, %v2971_v41  ;;  %v16095_v41 = vld [vmem:[#allocation22_spill] sm:$0xff] }
 0x331   : > { %v2776_v47 = vadd.f32 %v16095_v41, %v2592_v28 }
 0x332   : > { %3037 = vmatpush.bf16.msra.mxu1 %v3001_v19  ;;  %v2735_v19 = vpop.f32.mrf.mxu3 }
 0x333   : > { %v2881_v58 = vpop.f32.mrf.mxu0 }
 0x334   : > { %v2937_v18 = vadd.f32 %v2881_v58, %v16084_v48  ;;  %v2392_v58 = vpop.f32.mrf.mxu1 }
 0x336   : > { %3038 = vmatpush.bf16.msra.mxu1 %v3000_v1  ;;  %v13611_v38 = vadd.f32 %v13501_v22, %v2937_v18  ;;  %v2554_v17 = vpop.f32.mrf.mxu2 }
 0x33a   : > { %3039 = vmatpush.bf16.msra.mxu1 %v2999_v7  ;;  %v2738_v3 = vpop.f32.mrf.mxu3 }
 0x33b   : > { %v2883_v44 = vpop.f32.mrf.mxu0 }
 0x33c   : > { %v2938_v60 = vadd.f32 %v2883_v44, %v2770_v4  ;;  %v2394_v44 = vpop.f32.mrf.mxu1 }
 0x33e   : > { %v13614_v61 = vadd.f32 %v13501_v22, %v2938_v60  ;;  %3040 = vmatpush.bf16.msra.mxu1 %v2998_v42  ;;  %v16090_v42 = vpack.c.bf16 %v13520_v26, %v13517_v63  ;;  %v16092_v26 = vld [vmem:[#allocation39_spill] sm:$0xff]  ;;  %v9429_v60 = vld [vmem:[%s15973_s12] sm:$0xf] }
 0x340   : > { %v3002_v0 = vpack.c.bf16 %v13614_v61, %v13611_v38 }
 0x342   : > { %3041 = vmatpush.bf16.msra.mxu1 %v2997_v20  ;;  %v16091_v20 = vpack.c.bf16 %v13508_v39, %v13505_v16  ;;  %v2740_v56 = vpop.f32.mrf.mxu3 }
 0x343   : > { %v2886_v7 = vpop.f32.mrf.mxu0 }
 0x344   : > { %v2939_v1 = vadd.f32 %v2886_v7, %v16087_v53  ;;  %v9430_v7 = vor.u32 %v11887_v51, %v9429_v60 }
 0x346   : > { %3042 = vmatpush.bf16.msra.mxu1 %v2996_v27  ;;  %v13636_v8 = vadd.f32 %v13501_v22, %v2939_v1  ;;  %v2556_v1 = vpop.f32.mrf.mxu2 }
 0x34a   : > { %3043 = vmatpush.bf16.msra.mxu1 %v16090_v42  ;;  %v2397_v42 = vpop.f32.mrf.mxu1  ;;  %v2743_v15 = vpop.f32.mrf.mxu3 }
 0x34b   : > { %v2888_v30 = vpop.f32.mrf.mxu0  ;;  %v2435_v28 = vadd.f32 %v2397_v42, %v13480_v54  ;;  %v13738_v42 = vld [vmem:[%s13713_s23 + $0xc] sm:$0x1] }
 0x34c   : > { %v2940_v49 = vadd.f32 %v2888_v30, %v2772_v37  ;;  %v2433_v37 = vadd.f32 %v2392_v58, %v13472_v2  ;;  %v11889_v2 = vld [vmem:[%s15973_s12 + $0x14] sm:$0xf0] }
 0x34d   : > { %v9438_v21 = vor.u32 %v11889_v2, %v9437_v5 }
 0x34e   : > { %v13639_v34 = vadd.f32 %v13501_v22, %v2940_v49  ;;  %3044 = vmatpush.bf16.msra.mxu1 %v16091_v20  ;;  %v2434_v49 = vadd.f32 %v2394_v44, %v13477_v43  ;;  %v2595_v35 = vadd.f32 %v2554_v17, %v2433_v37  ;;  %v13716_v17 = vld [vmem:[%s13713_s23] sm:$0xf]  ;;  %v13735_v37 = vld [vmem:[%s13713_s23 + $0x4] sm:$0x1] }
 0x34f   : > { %v3463_v38 = vrot.slane %v13735_v37, 5 }
 0x350   : > { %v3003_v62 = vpack.c.bf16 %v13639_v34, %v13636_v8 }
 0x351   : > { %3045 = vmatmul.bf16.vlgmr.msra.gmra.mxu1 %v9430_v7 }
 0x353   : > { %v2891_v63 = vpop.f32.mrf.mxu0 }
 0x354   : > { %v2941_v27 = vadd.f32 %v2891_v63, %v16092_v26  ;;  %v2559_v63 = vpop.f32.mrf.mxu2  ;;  %v2596_v26 = vadd.f32 %v2556_v1, %v2434_v49 }
 0x355   : > { %v2597_v58 = vadd.f32 %v2559_v63, %v2435_v28  ;;  %v11893_v63 = vld [vmem:[%s15966_s5 + $0x18] sm:$0xff] }
 0x356   : > { %v13652_v45 = vadd.f32 %v13501_v22, %v2941_v27  ;;  %v2779_v27 = vadd.f32 %v2738_v3, %v2595_v35  ;;  %v3171_v3 = vshrl.u32 %v13716_v17, 16  ;;  %v11895_v35 = vld [vmem:[%s15966_s5 + $0x28] sm:$0xff]  ;;  %3428 = vmatpush.bf16.msrb.mxu1 %v11893_v63 }
 0x357   : > { %v2781_v51 = vadd.f32 %v2743_v15, %v2597_v58  ;;  %v3194_v15 = vshll.u32 %v13738_v42, 16 }
 0x35b   : > { %v2893_v46 = vpop.f32.mrf.mxu0 }
 0x35c   : > { %v2942_v33 = vadd.f32 %v2893_v46, %v2774_v14  ;;  %v2780_v14 = vadd.f32 %v2740_v56, %v2596_v26  ;;  %v2399_v46 = vpop.f32.mrf.mxu1 }
 0x35d   : > { %v2436_v41 = vadd.f32 %v2399_v46, %v13485_v55  ;;  %v13719_v55 = vld [vmem:[%s13713_s23 + $0x8] sm:$0xf] }
 0x35e   : > { %v13655_v16 = vadd.f32 %v13501_v22, %v2942_v33  ;;  %v3188_v60 = vshll.u32 %v13719_v55, 16  ;;  %v3377_v63 = vunpack.c.l.b16 %v13719_v55  ;;  %v9492_v61 = vrot.slane %v13719_v55, 9 }
 0x360   : > { %v3004_v39 = vpack.c.bf16 %v13655_v16, %v13652_v45  ;;  %v3190_v49 = vrot.slane %v3188_v60, 5  ;;  %v13890_v16 = vld [vmem:[%s13713_s23 + $0x34] sm:$0x1] }
 0x361   : > { %3050 = vmatmul.bf16.gmra.mxu1 %v9438_v21 }
 0x363   : > { %v2896_v25 = vpop.f32.mrf.mxu0 }
 0x364   : > { %v2943_v32 = vadd.f32 %v2896_v25, %v13454_v24  ;;  %v2432_v24 = vadd.f32 %v2389_v13, %v13469_v6  ;;  %v2561_v13 = vpop.f32.mrf.mxu2  ;;  %v2402_v54 = vpop.f32.mrf.mxu1 }
 0x366   : > { %v13665_v18 = vadd.f32 %v13501_v22, %v2943_v32  ;;  %v2594_v4 = vadd.f32 %v2551_v52, %v2432_v24  ;;  %v13724_v24 = vld [vmem:[%s15973_s12 + $0x20] sm:$0x33] }
 0x367   : > { %v3023_v44 = vunpack.c.l.b16 %v13724_v24 }
 0x368   : > { %v2778_v53 = vadd.f32 %v2735_v19, %v2594_v4  ;;  %v11897_v19 = vld [vmem:[%s15966_s5 + $0x38] sm:$0xff]  ;;  %v3185_v4 = vshrl.u32 %v13719_v55, 16 }
 0x369   : > { %3343 = vmatpush.bf16.msra.mxu3 %v11897_v19  ;;  %v3029_v56 = vpack.c.b16 %v3023_v44, %v3023_v44  ;;  %v11892_v19 = vld [vmem:[%s15966_s5 + $0x10] sm:$0xff] }
 0x36a   : > { %3429 = vmatpush.bf16.msrb.mxu1 %v11892_v19 }
 0x36b   : > { %v2898_v23 = vpop.f32.mrf.mxu0 }
 0x36c   : > { %v2944_v48 = vadd.f32 %v2898_v23, %v2776_v47  ;;  %v2745_v47 = vpop.f32.mrf.mxu3  ;;  %v2564_v7 = vpop.f32.mrf.mxu2 }
 0x36e   : > { %v13668_v50 = vadd.f32 %v13501_v22, %v2944_v48  ;;  %v2598_v48 = vadd.f32 %v2561_v13, %v2436_v41  ;;  %v2404_v13 = vpop.f32.mrf.mxu1 }
 0x36f   : > { %v2438_v44 = vadd.f32 %v2404_v13, %v13493_v59  ;;  %v11890_v59 = vld [vmem:[%s15966_s5] sm:$0xff] }
 0x370   : > { %v3005_v40 = vpack.c.bf16 %v13668_v50, %v13665_v18 }
 0x371   : > { %3055 = vmatmul.bf16.gmra.mxu1 %v3029_v56 }
 0x373   : > { %v2901_v29 = vpop.f32.mrf.mxu0 }
 0x374   : > { %v2945_v10 = vadd.f32 %v2901_v29, %v13466_v11  ;;  %v11896_v29 = vld [vmem:[%s15966_s5 + $0x30] sm:$0xff]  ;;  %v2748_v21 = vpop.f32.mrf.mxu3  ;;  %v2566_v60 = vpop.f32.mrf.mxu2 }
 0x375   : > { %3344 = vmatpush.bf16.msra.mxu3 %v11896_v29 }
 0x376   : > { %v13681_v9 = vadd.f32 %v13501_v22, %v2945_v10  ;;  %v3174_v10 = vshll.u32 %v13716_v17, 16 }
 0x378   : > { %v3176_v1 = vrot.slane %v3174_v10, 5 }
 0x379   : > { %3345 = vmatpush.bf16.msra.mxu3 %v11895_v35  ;;  %v3376_v35 = vunpack.c.l.b16 %v13716_v17 }
 0x37b   : > { %v2903_v36 = vpop.f32.mrf.mxu0 }
 0x37c   : > { %v2946_v6 = vadd.f32 %v2903_v36, %v2778_v53  ;;  %v3173_v53 = vrot.slane %v3171_v3, 4  ;;  %v3187_v36 = vrot.slane %v3185_v4, 4  ;;  %v2437_v3 = vadd.f32 %v2402_v54, %v13488_v31  ;;  %v13776_v54 = vld [vmem:[%s13713_s23 + $0x10] sm:$0xf]  ;;  %v2750_v56 = vpop.f32.mrf.mxu3 }
 0x37d   : > { %v2600_v31 = vadd.f32 %v2566_v60, %v2438_v44 }
 0x37e   : > { %v13684_v11 = vadd.f32 %v13501_v22, %v2946_v6  ;;  %v2782_v6 = vadd.f32 %v2745_v47, %v2598_v48  ;;  %v3177_v26 = vor.u32 %v3176_v1, %v3173_v53  ;;  %v3191_v2 = vor.u32 %v3190_v49, %v3187_v36  ;;  %v11894_v47 = vld [vmem:[%s15966_s5 + $0x20] sm:$0xff]  ;;  %v11891_v53 = vld [vmem:[%s15966_s5 + $0x8] sm:$0xff] }
 0x37f   : > { %3346 = vmatpush.bf16.msra.mxu3 %v11894_v47  ;;  %v2599_v36 = vadd.f32 %v2564_v7, %v2437_v3  ;;  %3430 = vmatpush.bf16.msrb.mxu1 %v11891_v53  ;;  %v3199_v49 = vshrl.u32 %v13776_v54, 16 }
 0x380   : > { %v3006_v30 = vpack.c.bf16 %v13684_v11, %v13681_v9  ;;  %v3178_v46 = vrot.slane %v3177_v26, 4  ;;  %v13869_v9 = vld [vmem:[%s13713_s23 + $0x30] sm:$0xf]  ;;  %v13872_v11 = vld [vmem:[%s13713_s23 + $0x38] sm:$0xf] }
 0x381   : > { %v3269_v18 = vshrl.u32 %v13872_v11, 16  ;;  %v3272_v50 = vshll.u32 %v13872_v11, 16 }
 0x383   : > { %v2906_v20 = vpop.f32.mrf.mxu0  ;;  %3431 = vmatpush.bf16.msrb.mxu1 %v11890_v59 }
 0x384   : > { %v2947_v33 = vadd.f32 %v2906_v20, %v2779_v27  ;;  %v3180_v27 = vshll.u32 %v13735_v37, 16 }
 0x386   : > { %v13697_v25 = vadd.f32 %v13501_v22, %v2947_v33  ;;  %v3182_v33 = vrot.slane %v3180_v27, 5  ;;  %v2783_v27 = vadd.f32 %v2748_v21, %v2599_v36 }
 0x388   : > { %v3183_v58 = vsel %vm12640_vm6, %v3178_v46, %v3182_v33  ;;  %v3384_v46 = vpack.c.b16 %v3377_v63, %v3376_v35  ;;  %v13793_v33 = vld [vmem:[%s13713_s23 + $0x14] sm:$0x1] }
 0x389   : > { %v3291_v29 = vunpack.c.l.b16 %v3183_v58 }
 0x38a   : > { %9487 = vmatmul.msk.bf16.vlgmr.msrb.gmra.mxu1 %vm1165_vm5, %v3384_v46 }
 0x38b   : > { %v2908_v43 = vpop.f32.mrf.mxu0 }
 0x38c   : > { %v2948_v57 = vadd.f32 %v2908_v43, %v2780_v14  ;;  %v3196_v43 = vrot.slane %v3194_v15, 5  ;;  %v3201_v15 = vrot.slane %v3199_v49, 4  ;;  %v13821_v49 = vld [vmem:[%s13713_s23 + $0x28] sm:$0xf] }
 0x38d   : > { %v3241_v35 = vshrl.u32 %v13821_v49, 16 }
 0x38e   : > { %v13700_v32 = vadd.f32 %v13501_v22, %v2948_v57  ;;  %v3192_v57 = vrot.slane %v3191_v2, 4 }
 0x390   : > { %v3007_v52 = vpack.c.bf16 %v13700_v32, %v13697_v25  ;;  %v3197_v48 = vsel %vm12640_vm6, %v3192_v57, %v3196_v43  ;;  %v13796_v43 = vld [vmem:[%s13713_s23 + $0x1c] sm:$0x1] }
 0x391   : > { %v13767_v4 = vunpack.c.l.b16 %v3197_v48  ;;  %v3222_v47 = vshll.u32 %v13796_v43, 16 }
 0x393   : > { %v2911_v23 = vpop.f32.mrf.mxu0  ;;  %v3224_v3 = vrot.slane %v3222_v47, 5 }
 0x394   : > { %v2949_v20 = vadd.f32 %v2911_v23, %v2781_v51  ;;  %v3299_v51 = vpack.c.b16 %v13767_v4, %v3291_v29 }
 0x396   : > { %v13749_v28 = vadd.f32 %v13501_v22, %v2949_v20  ;;  %9467 = vmatmul.msk.bf16.vlgmr.msra.gmra.mxu3 %vm1165_vm5, %v3299_v51  ;;  %v3202_v20 = vshll.u32 %v13776_v54, 16 }
 0x39b   : > { %v2913_v5 = vpop.f32.mrf.mxu0 }
 0x39c   : > { %v2950_v14 = vadd.f32 %v2913_v5, %v2782_v6  ;;  %v13779_v6 = vld [vmem:[%s13713_s23 + $0x18] sm:$0xf]  ;;  %v3204_v5 = vrot.slane %v3202_v20, 5 }
 0x39d   : > { %v3213_v7 = vshrl.u32 %v13779_v6, 16  ;;  %v3216_v26 = vshll.u32 %v13779_v6, 16 }
 0x39e   : > { %v13752_v41 = vadd.f32 %v13501_v22, %v2950_v14  ;;  %v2784_v14 = vadd.f32 %v2750_v56, %v2600_v31 }
 0x39f   : > { %v3215_v2 = vrot.slane %v3213_v7, 4  ;;  %v3218_v57 = vrot.slane %v3216_v26, 5  ;;  %v3244_v26 = vshll.u32 %v13821_v49, 16 }
 0x3a0   : > { %v3008_v10 = vpack.c.bf16 %v13752_v41, %v13749_v28  ;;  %v3205_v28 = vor.u32 %v3204_v5, %v3201_v15  ;;  %v3208_v41 = vshll.u32 %v13793_v33, 16  ;;  %v3379_v15 = vunpack.c.l.b16 %v13779_v6 }
 0x3a1   : > { %v3219_v19 = vor.u32 %v3218_v57, %v3215_v2  ;;  %v3246_v46 = vrot.slane %v3244_v26, 5  ;;  %v13836_v57 = vld [vmem:[%s13713_s23 + $0x24] sm:$0x1] }
 0x3a2   : > { %v3206_v48 = vrot.slane %v3205_v28, 4  ;;  %v3210_v29 = vrot.slane %v3208_v41, 5  ;;  %v3236_v41 = vshll.u32 %v13836_v57, 16 }
 0x3a3   : > { %v2916_v1 = vpop.f32.mrf.mxu0  ;;  %v3220_v44 = vrot.slane %v3219_v19, 4 }
 0x3a4   : > { %v2951_v13 = vadd.f32 %v2916_v1, %v2783_v27  ;;  %v3211_v53 = vsel %vm12640_vm6, %v3206_v48, %v3210_v29  ;;  %v3378_v27 = vunpack.c.l.b16 %v13776_v54 }
 0x3a5   : > { %v3225_v1 = vsel %vm12640_vm6, %v3220_v44, %v3224_v3  ;;  %v13807_v36 = vunpack.c.l.b16 %v3211_v53 }
 0x3a6   : > { %v2987_v60 = vadd.f32 %v13501_v22, %v2951_v13  ;;  %v13809_v56 = vunpack.c.l.b16 %v3225_v1  ;;  %v13839_v13 = vld [vmem:[%s13713_s23 + $0x2c] sm:$0x1] }
 0x3a8   : > { %v13813_v59 = vpack.c.b16 %v13809_v56, %v13807_v36 }
 0x3aa   : > { %9468 = vmatmul.msk.bf16.gmra.mxu3 %vm1165_vm5, %v13813_v59 }
 0x3ab   : > { %v2918_v21 = vpop.f32.mrf.mxu0 }
 0x3ac   : > { %v2952_v58 = vadd.f32 %v2918_v21, %v2784_v14  ;;  %v3243_v14 = vrot.slane %v3241_v35, 4  ;;  %v3250_v21 = vshll.u32 %v13839_v13, 16  ;;  %v9431_v35 = vld [vmem:[%s15973_s12 + $0x8] sm:$0xf0] }
 0x3ae   : > { %v2988_v51 = vadd.f32 %v13501_v22, %v2952_v58  ;;  %v13818_v22 = vld [vmem:[%s13713_s23 + $0x20] sm:$0xf]  ;;  %v3247_v47 = vor.u32 %v3246_v46, %v3243_v14  ;;  %v3238_v58 = vrot.slane %v3236_v41, 5  ;;  %v3252_v29 = vrot.slane %v3250_v21, 5 }
 0x3af   : > { %v3227_v20 = vshrl.u32 %v13818_v22, 16  ;;  %v3230_v7 = vshll.u32 %v13818_v22, 16 }
 0x3b0   : > { %v3009_v31 = vpack.c.bf16 %v2988_v51, %v2987_v60  ;;  %v3248_v48 = vrot.slane %v3247_v47, 4  ;;  %v3258_v60 = vshll.u32 %v13869_v9, 16  ;;  %v3381_v51 = vunpack.c.l.b16 %v13821_v49 }
 0x3b1   : > { %v3229_v5 = vrot.slane %v3227_v20, 4  ;;  %v3232_v2 = vrot.slane %v3230_v7, 5  ;;  %v3274_v20 = vrot.slane %v3272_v50, 5  ;;  %v11886_v7 = vld [vmem:[%s15973_s12 + $0x4] sm:$0xf] }
 0x3b2   : > { %3060 = vmatpush.bf16.msra.mxu2 %v3009_v31  ;;  %v3253_v32 = vsel %vm12640_vm6, %v3248_v48, %v3252_v29  ;;  %v3260_v1 = vrot.slane %v3258_v60, 5  ;;  %v3271_v31 = vrot.slane %v3269_v18, 4  ;;  %v9491_v48 = vrot.slane %v13716_v17, 9  ;;  %v11900_v29 = vld [vmem:[%s15966_s5 + $0x50] sm:$0xff] }
 0x3b3   : > { %v3233_v28 = vor.u32 %v3232_v2, %v3229_v5  ;;  %v13857_v3 = vunpack.c.l.b16 %v3253_v32  ;;  %v3264_v5 = vshll.u32 %v13890_v16, 16  ;;  %v11905_v32 = vld [vmem:[%s15966_s5 + $0x78] sm:$0xff]  ;;  %v11904_v18 = vld [vmem:[%s15966_s5 + $0x70] sm:$0xff] }
 0x3b4   : > { %v3275_v2 = vor.u32 %v3274_v20, %v3271_v31  ;;  %v3464_v17 = vsel %vm12609_vm3, %v9491_v48, %v3463_v38  ;;  %3642 = vmatpush.bf16.msrb.mxu3 %v11905_v32  ;;  %v11888_v31 = vld [vmem:[%s15973_s12 + $0x14] sm:$0xf]  ;;  %v9439_v20 = vld [vmem:[%s15973_s12 + $0x18] sm:$0xf0]  ;;  %v9496_v32 = vrot.slane %v13821_v49, 9 }
 0x3b5   : > { %v3234_v19 = vrot.slane %v3233_v28, 4  ;;  %v3266_v8 = vrot.slane %v3264_v5, 5  ;;  %v9434_v28 = vor.u32 %v11886_v7, %v9431_v35  ;;  %v11898_v35 = vld [vmem:[%s15966_s5 + $0x40] sm:$0xff]  ;;  %v11909_v5 = vld [vmem:[%s15966_s5 + $0x98] sm:$0xff] }
 0x3b6   : > { %3061 = vmatpush.bf16.msra.mxu2 %v3008_v10  ;;  %v13833_v10 = vpack.c.b16 %v3379_v15, %v3378_v27  ;;  %v3276_v34 = vrot.slane %v3275_v2, 4  ;;  %3743 = vmatpush.bf16.msra.mxu1 %v11909_v5  ;;  %v9442_v2 = vor.u32 %v11888_v31, %v9439_v20 }
 0x3b7   : > { %v3239_v25 = vsel %vm12640_vm6, %v3234_v19, %v3238_v58  ;;  %v11901_v58 = vld [vmem:[%s15966_s5 + $0x58] sm:$0xff] }
 0x3b8   : > { %9488 = vmatmul.msk.bf16.gmra.mxu1 %vm1165_vm5, %v13833_v10  ;;  %3643 = vmatpush.bf16.msrb.mxu3 %v11904_v18 }
 0x3ba   : > { %3062 = vmatpush.bf16.msra.mxu2 %v3007_v52  ;;  %v13855_v52 = vunpack.c.l.b16 %v3239_v25  ;;  %v3467_v25 = vrot.slane %v13738_v42, 5  ;;  %v11899_v42 = vld [vmem:[%s15966_s5 + $0x48] sm:$0xff] }
 0x3bc   : > { %v13861_v44 = vpack.c.b16 %v13857_v3, %v13855_v52  ;;  %v3468_v37 = vsel %vm12609_vm3, %v9492_v61, %v3467_v25  ;;  %v3479_v25 = vrot.slane %v13836_v57, 5 }
 0x3bd   : > { %v3503_v60 = vunpack.c.l.b16 %v3468_v37 }
 0x3be   : > { %3063 = vmatpush.bf16.msra.mxu2 %v3006_v30  ;;  %9469 = vmatmul.msk.bf16.gmra.mxu3 %vm1165_vm5, %v13861_v44  ;;  %v3255_v30 = vshrl.u32 %v13869_v9, 16 }
 0x3c0   : > { %v3257_v53 = vrot.slane %v3255_v30, 4  ;;  %v3502_v30 = vunpack.c.l.b16 %v3464_v17 }
 0x3c2   : > { %3064 = vmatpush.bf16.msra.mxu2 %v3005_v40  ;;  %v3380_v40 = vunpack.c.l.b16 %v13818_v22  ;;  %v3261_v26 = vor.u32 %v3260_v1, %v3257_v53  ;;  %v3510_v50 = vpack.c.b16 %v3503_v60, %v3502_v30  ;;  %v3382_v53 = vunpack.c.l.b16 %v13869_v9 }
 0x3c3   : > { %v3383_v1 = vunpack.c.l.b16 %v13872_v11  ;;  %v9498_v30 = vrot.slane %v13872_v11, 9 }
 0x3c4   : > { %v13887_v45 = vpack.c.b16 %v3381_v51, %v3380_v40  ;;  %v3262_v46 = vrot.slane %v3261_v26, 4  ;;  %v11903_v26 = vld [vmem:[%s15966_s5 + $0x68] sm:$0xff] }
 0x3c5   : > { %v13960_v7 = vpack.c.b16 %v3383_v1, %v3382_v53  ;;  %3644 = vmatpush.bf16.msrb.mxu3 %v11903_v26 }
 0x3c6   : > { %3065 = vmatpush.bf16.msra.mxu2 %v3004_v39  ;;  %v13893_v39 = vld [vmem:[%s13713_s23 + $0x3c] sm:$0x1]  ;;  %v3267_v41 = vsel %vm12640_vm6, %v3262_v46, %v3266_v8  ;;  %v11908_v46 = vld [vmem:[%s15966_s5 + $0x90] sm:$0xff]  ;;  %v9493_v8 = vrot.slane %v13776_v54, 9  ;;  %v11906_v54 = vld [vmem:[%s15966_s5 + $0x80] sm:$0xff] }
 0x3c7   : > { %v3278_v14 = vshll.u32 %v13893_v39, 16  ;;  %v13915_v21 = vunpack.c.l.b16 %v3267_v41  ;;  %3744 = vmatpush.bf16.msra.mxu1 %v11908_v46  ;;  %v3598_v41 = vpack.c.b16 %v3378_v27, %v3377_v63  ;;  %v3699_v63 = vpack.c.b16 %v13807_v36, %v13767_v4  ;;  %v11917_v46 = vld [vmem:[%s15966_s5 + $0xd8] sm:$0xff] }
 0x3c8   : > { %9489 = vmatmul.msk.bf16.gmra.mxu1 %vm1165_vm5, %v13887_v45  ;;  %v3024_v27 = vunpack.c.h.b16 %v13724_v24  ;;  %v3483_v4 = vrot.slane %v13839_v13, 5  ;;  %v3599_v36 = vpack.c.b16 %v3380_v40, %v3379_v15  ;;  %v3700_v15 = vpack.c.b16 %v13855_v52, %v13809_v56 }
 0x3c9   : > { %v9497_v13 = vrot.slane %v13869_v9, 9  ;;  %v3487_v40 = vrot.slane %v13890_v16, 5  ;;  %v3600_v52 = vpack.c.b16 %v3382_v53, %v3381_v51  ;;  %v3701_v49 = vpack.c.b16 %v13915_v21, %v13857_v3  ;;  %v14073_v9 = vld [vmem:[%s13713_s23 + $0x40] sm:$0xf]  ;;  %v11913_v51 = vld [vmem:[%s15966_s5 + $0xb8] sm:$0xff]  ;;  %v11912_v3 = vld [vmem:[%s15966_s5 + $0xb0] sm:$0xff] }
 0x3ca   : > { %3066 = vmatpush.bf16.msra.mxu2 %v3003_v62  ;;  %v3280_v62 = vrot.slane %v3278_v14, 5  ;;  %v11902_v14 = vld [vmem:[%s15966_s5 + $0x60] sm:$0xff]  ;;  %v3030_v38 = vpack.c.b16 %v3024_v27, %v3024_v27  ;;  %v14025_v17 = vsel %vm12609_vm3, %v9496_v32, %v3483_v4  ;;  %v3676_v53 = vshrl.u32 %v14073_v9, 16  ;;  %v11921_v27 = vld [vmem:[%s15966_s5 + $0xf8] sm:$0xff]  ;;  %v11919_v32 = vld [vmem:[%s15966_s5 + $0xe8] sm:$0xff] }
 0x3cb   : > { %3645 = vmatpush.bf16.msrb.mxu3 %v11902_v14  ;;  %v3507_v57 = vunpack.c.l.b16 %v14025_v17  ;;  %v14048_v18 = vsel %vm12609_vm3, %v9497_v13, %v3487_v40  ;;  %v3679_v20 = vshll.u32 %v14073_v9, 16  ;;  %v3159_v14 = vld [vmem:[%s13713_s23 + $0x44] sm:$0x1] }
 0x3cc   : > { %v3281_v47 = vsel %vm12640_vm6, %v3276_v34, %v3280_v62  ;;  %v3471_v34 = vrot.slane %v13793_v33, 5  ;;  %v9494_v62 = vrot.slane %v13779_v6, 9  ;;  %v3508_v16 = vunpack.c.l.b16 %v14048_v18 }
 0x3cd   : > { %v13917_v19 = vunpack.c.l.b16 %v3281_v47  ;;  %v11907_v47 = vld [vmem:[%s15966_s5 + $0x88] sm:$0xff]  ;;  %v3678_v26 = vrot.slane %v3676_v53, 4  ;;  %v3681_v5 = vrot.slane %v3679_v20, 5  ;;  %v3779_v40 = vrot.slane %v3159_v14, 5 }
 0x3ce   : > { %3067 = vmatpush.bf16.msra.mxu2 %v3002_v0  ;;  %3745 = vmatpush.bf16.msra.mxu1 %v11907_v47  ;;  %v14202_v53 = vld [vmem:[%s13713_s23 + $0x4c] sm:$0x1] }
 0x3cf   : > { %v13927_v0 = vpack.c.b16 %v13917_v19, %v13915_v21  ;;  %3911 = vmatpush.bf16.msra.mxu3 %v11917_v46 }
 0x3d1   : > { %3068 = vmatmul.bf16.vlgmr.msra.gmra.mxu2 %v9434_v28  ;;  %9470 = vmatmul.msk.bf16.gmra.mxu3 %vm1165_vm5, %v13927_v0  ;;  %v3475_v28 = vrot.slane %v13796_v43, 5 }
 0x3d2   : > { %3554 = vmatpush.bf16.msrb.mxu2 %v11901_v58  ;;  %v3472_v58 = vsel %vm12609_vm3, %v9493_v8, %v3471_v34  ;;  %3746 = vmatpush.bf16.msra.mxu1 %v11906_v54  ;;  %v3682_v8 = vor.u32 %v3681_v5, %v3678_v26  ;;  %v3685_v34 = vshll.u32 %v3159_v14, 16  ;;  %v11924_v26 = vld [vmem:[%s15966_s5 + $0x110] sm:$0xff] }
 0x3d3   : > { %v13994_v33 = vsel %vm12609_vm3, %v9494_v62, %v3475_v28  ;;  %v3504_v48 = vunpack.c.l.b16 %v3472_v58  ;;  %v11911_v62 = vld [vmem:[%s15966_s5 + $0xa8] sm:$0xff]  ;;  %v11910_v58 = vld [vmem:[%s15966_s5 + $0xa0] sm:$0xff] }
 0x3d4   : > { %v3505_v55 = vunpack.c.l.b16 %v13994_v33  ;;  %v3683_v28 = vrot.slane %v3682_v8, 4  ;;  %v3687_v11 = vrot.slane %v3685_v34, 5 }
 0x3d5   : > { %v14009_v61 = vpack.c.b16 %v3504_v48, %v3503_v60  ;;  %v3491_v60 = vrot.slane %v13893_v39, 5 }
 0x3d6   : > { %3555 = vmatpush.bf16.msrb.mxu2 %v11900_v29  ;;  %v14005_v43 = vpack.c.b16 %v3505_v55, %v3504_v48  ;;  %v9495_v29 = vrot.slane %v13818_v22, 9  ;;  %v14034_v22 = vpop.f32.mrf.mxu1  ;;  %4000 = vmatpush.bf16.msrb.mxu1 %v11921_v27 }
 0x3d7   : > { %v14052_v56 = vsel %vm12609_vm3, %v9498_v30, %v3491_v60  ;;  %v14184_v30 = vld [vmem:[%s13713_s23 + $0x48] sm:$0xf]  ;;  %s16112_s23 = smov 32  }
 0x3d8   : > { %9490 = vmatmul.msk.bf16.gmra.mxu1 %vm1165_vm5, %v13960_v7  ;;  %v14021_v24 = vsel %vm12609_vm3, %v9495_v29, %v3479_v25  ;;  %v3948_v60 = vshll.u32 %v14184_v30, 16 }
 0x3d9   : > { %v3506_v37 = vunpack.c.l.b16 %v14021_v24 }
 0x3da   : > { %3556 = vmatpush.bf16.msrb.mxu2 %v11899_v42 }
 0x3db   : > { %v14032_v6 = vpack.c.b16 %v3507_v57, %v3506_v37  ;;  %v3792_v29 = vpack.c.b16 %v3506_v37, %v3505_v55 }
 0x3de   : > { %3557 = vmatpush.bf16.msrb.mxu2 %v11898_v35  ;;  %v14044_v42 = vpop.f32.mrf.mxu1  ;;  %v3597_v35 = vunpack.c.l.b16 %v14073_v9 }
 0x3e1   : > { %3073 = vmatmul.bf16.gmra.mxu2 %v9442_v2  ;;  %9551 = vmatmul.msk.bf16.vlgmr.msrb.gmra.mxu3 %vm1165_vm5, %v3598_v41  ;;  %v3601_v2 = vpack.c.b16 %v3597_v35, %v3383_v1  ;;  %v11916_v1 = vld [vmem:[%s15966_s5 + $0xd0] sm:$0xff]  ;;  %v3688_v41 = vsel %vm12640_vm6, %v3683_v28, %v3687_v11 }
 0x3e2   : > { %3835 = vmatpush.bf16.msra.mxu2 %v11913_v51  ;;  %v14105_v47 = vunpack.c.l.b16 %v3688_v41  ;;  %3912 = vmatpush.bf16.msra.mxu3 %v11916_v1  ;;  %v11922_v41 = vld [vmem:[%s15966_s5 + $0x100] sm:$0xff] }
 0x3e4   : > { %v3702_v54 = vpack.c.b16 %v14105_v47, %v13917_v19  ;;  %v11920_v19 = vld [vmem:[%s15966_s5 + $0xf0] sm:$0xff] }
 0x3e5   : > { %4001 = vmatpush.bf16.msrb.mxu1 %v11920_v19 }
 0x3e6   : > { %v14067_v31 = vpop.f32.mrf.mxu1  ;;  %3836 = vmatpush.bf16.msra.mxu2 %v11912_v3  ;;  %v3954_v3 = vshll.u32 %v14202_v53, 16 }
 0x3e8   : > { %9579 = vmatmul.msk.bf16.vlgmr.msra.gmra.mxu1 %vm1165_vm5, %v3699_v63  ;;  %v11915_v63 = vld [vmem:[%s15966_s5 + $0xc8] sm:$0xff] }
 0x3e9   : > { %3913 = vmatpush.bf16.msra.mxu3 %v11915_v63  ;;  %4002 = vmatpush.bf16.msrb.mxu1 %v11919_v32 }
 0x3ea   : > { %3837 = vmatpush.bf16.msra.mxu2 %v11911_v62  ;;  %v11923_v62 = vld [vmem:[%s15966_s5 + $0x108] sm:$0xff] }
 0x3ee   : > { %v14086_v21 = vpop.f32.mrf.mxu1  ;;  %3838 = vmatpush.bf16.msra.mxu2 %v11910_v58 }
 0x3f1   : > { %3078 = vmatmul.bf16.gmra.mxu2 %v3030_v38  ;;  %9552 = vmatmul.msk.bf16.gmra.mxu3 %vm1165_vm5, %v3599_v36  ;;  %v11914_v38 = vld [vmem:[%s15966_s5 + $0xc0] sm:$0xff] }
 0x3f2   : > { %3914 = vmatpush.bf16.msra.mxu3 %v11914_v38  ;;  %v11918_v36 = vld [vmem:[%s15966_s5 + $0xe0] sm:$0xff] }
 0x3f3   : > { %4003 = vmatpush.bf16.msrb.mxu1 %v11918_v36 }
 0x3f6   : > { %v14110_v48 = vpop.f32.mrf.mxu1 }
 0x3f8   : > { %9580 = vmatmul.msk.bf16.gmra.mxu1 %vm1165_vm5, %v3700_v15 }
 0x3fe   : > { %v3058_v25 = vpop.f32.mrf.mxu1 }
 0x401   : > { %9523 = vmatmul.msk.bf16.vlgmr.msrb.gmra.mxu2 %vm1165_vm5, %v3510_v50  ;;  %v3509_v50 = vunpack.c.l.b16 %v14052_v56  ;;  %9553 = vmatmul.msk.bf16.gmra.mxu3 %vm1165_vm5, %v3600_v52  ;;  %v3878_v52 = vunpack.c.l.b16 %v14184_v30 }
 0x403   : > { %v14065_v39 = vpack.c.b16 %v3509_v50, %v3508_v16  ;;  %v3879_v51 = vpack.c.b16 %v3878_v52, %v3597_v35 }
 0x407   : > { %v14141_v24 = vpop.f32.mrf.mxu1 }
 0x408   : > { %9581 = vmatmul.msk.bf16.gmra.mxu1 %vm1165_vm5, %v3701_v49  ;;  %v3950_v49 = vrot.slane %v3948_v60, 5 }
 0x40f   : > { %v14149_v55 = vpop.f32.mrf.mxu1 }
 0x411   : > { %9524 = vmatmul.msk.bf16.gmra.mxu2 %vm1165_vm5, %v14005_v43  ;;  %9554 = vmatmul.msk.bf16.gmra.mxu3 %vm1165_vm5, %v3601_v2 }
 0x418   : > { %9582 = vmatmul.msk.bf16.gmra.mxu1 %vm1165_vm5, %v3702_v54 }
 0x419   : > { %v14136_v4 = vpop.f32.mrf.mxu3 }
 0x421   : > { %9525 = vmatmul.msk.bf16.gmra.mxu2 %vm1165_vm5, %v14032_v6  ;;  %9636 = vmatmul.msk.bf16.vlgmr.msra.gmra.mxu3 %vm1165_vm5, %v13833_v10  ;;  %v14145_v33 = vpop.f32.mrf.mxu3 }
 0x428   : > { %9664 = vmatmul.msk.bf16.vlgmr.msrb.gmra.mxu1 %vm1165_vm5, %v13813_v59  ;;  %v3793_v59 = vpack.c.b16 %v3508_v16, %v3507_v57 }
 0x42d   : > { %v14153_v10 = vpop.f32.mrf.mxu3 }
 0x431   : > { %9526 = vmatmul.msk.bf16.gmra.mxu2 %vm1165_vm5, %v14065_v39  ;;  %9637 = vmatmul.msk.bf16.gmra.mxu3 %vm1165_vm5, %v13887_v45  ;;  %v9583_v45 = vrot.slane %v14073_v9, 9  ;;  %v3956_v9 = vrot.slane %v3954_v3, 5 }
 0x435   : > { %v14155_v37 = vpop.f32.mrf.mxu1  ;;  %v14165_v15 = vpop.f32.mrf.mxu3 }
 0x436   : > { %v3439_v52 = vadd.f32 %v14155_v37, %v14153_v10 }
 0x438   : > { %9665 = vmatmul.msk.bf16.gmra.mxu1 %vm1165_vm5, %v13861_v44 }
 0x43d   : > { %v14167_v13 = vpop.f32.mrf.mxu1 }
 0x441   : > { %9608 = vmatmul.msk.bf16.vlgmr.msra.gmra.mxu2 %vm1165_vm5, %v14009_v61  ;;  %9638 = vmatmul.msk.bf16.gmra.mxu3 %vm1165_vm5, %v13960_v7  ;;  %v14172_v44 = vpop.f32.mrf.mxu3  ;;  %v14176_v61 = vsel %vm12609_vm3, %v9583_v45, %v3779_v40  ;;  %v3945_v7 = vshrl.u32 %v14184_v30, 16 }
 0x442   : > { %v3790_v57 = vunpack.c.l.b16 %v14176_v61 }
 0x443   : > { %v3947_v16 = vrot.slane %v3945_v7, 4 }
 0x444   : > { %v14193_v18 = vpack.c.b16 %v3790_v57, %v3509_v50 }
 0x445   : > { %v14178_v17 = vpop.f32.mrf.mxu1  ;;  %v3951_v56 = vor.u32 %v3950_v49, %v3947_v16 }
 0x446   : > { %v3444_v10 = vadd.f32 %v14178_v17, %v14172_v44 }
 0x447   : > { %v3952_v2 = vrot.slane %v3951_v56, 4 }
 0x448   : > { %9666 = vmatmul.msk.bf16.gmra.mxu1 %vm1165_vm5, %v13927_v0  ;;  %v11925_v0 = vld [vmem:[%s15966_s5 + $0x118] sm:$0xff] }
 0x449   : > { %4080 = vmatpush.bf16.msrb.mxu2 %v11925_v0  ;;  %v14210_v5 = vpop.f32.mrf.mxu3 }
 0x44d   : > { %4081 = vmatpush.bf16.msrb.mxu2 %v11924_v26  ;;  %v14212_v8 = vpop.f32.mrf.mxu1 }
 0x451   : > { %9609 = vmatmul.msk.bf16.gmra.mxu2 %vm1165_vm5, %v3792_v29  ;;  %9639 = vmatmul.msk.bf16.gmra.mxu3 %vm1165_vm5, %v3879_v51 }
 0x452   : > { %4082 = vmatpush.bf16.msrb.mxu2 %v11923_v62 }
 0x454   : > { %v3069_v20 = vpop.f32.mrf.mxu2  ;;  %v3363_v63 = vpop.f32.mrf.mxu3 }
 0x455   : > { %v3070_v50 = vadd.f32 %v3069_v20, %v14034_v22  ;;  %v3957_v22 = vsel %vm12640_vm6, %v3952_v2, %v3956_v9  ;;  %vm4525_vm6 = vcmask 1046534  }
 0x456   : > { %v3967_v34 = vunpack.c.l.b16 %v3957_v22  ;;  %4083 = vmatpush.bf16.msrb.mxu2 %v11922_v41 }
 0x457   : > { %v3088_v35 = vrot.slane %v3070_v50, 2  ;;  %v3089_v14 = vrot.slane %v3070_v50, 4  ;;  %v3090_v46 = vrot.slane %v3070_v50, 6  ;;  %3101 = vst [vmem:[#allocation1] ss:$4 sm:$0xff] %v3070_v50 }
 0x458   : > { %v3968_v28 = vpack.c.b16 %v3967_v34, %v14105_v47  ;;  %v3448_v47 = vpop.f32.mrf.mxu1 }
 0x459   : > { %3103 = vst [vmem:[#allocation1 + $0x1] ss:$4 sm:$0xff] %v3088_v35  ;;  %v3449_v44 = vadd.f32 %v3448_v47, %v3363_v63 }
 0x45a   : > { %3105 = vst [vmem:[#allocation1 + $0x2] ss:$4 sm:$0xff] %v3089_v14  ;;  %9667 = vmatmul.msk.bf16.gmra.mxu1 %vm1165_vm5, %v3968_v28  ;;  %v9668_v14 = vrot.slane %v14184_v30, 9 }
 0x45b   : > { %3108 = vst [vmem:[#allocation1 + $0x20] ss:$4 sm:$0xff] %v3090_v46  ;;  %v4036_v46 = vrot.slane %v14202_v53, 5 }
 0x45c   : > { %v3071_v11 = vpop.f32.mrf.mxu2  ;;  %v14233_v45 = vpop.f32.mrf.mxu3 }
 0x45d   : > { %v3072_v1 = vadd.f32 %v3071_v11, %v14044_v42  ;;  %v3434_v42 = vadd.f32 %v14141_v24, %v14136_v4  ;;  %v4037_v22 = vsel %vm12609_vm3, %v9668_v14, %v4036_v46  ;;  %vm4523_vm3 = vcmask 1044484  }
 0x45e   : > { %v4047_v34 = vunpack.c.l.b16 %v4037_v22  ;;  %vm4524_vm4 = vmor %vm14522_vm2, %vm4523_vm3 }
 0x45f   : > { %v3091_v23 = vrot.slane %v3072_v1, 2  ;;  %v3092_v58 = vrot.slane %v3072_v1, 4  ;;  %v3093_v54 = vrot.slane %v3072_v1, 6  ;;  %3110 = vst [vmem:[#allocation1 + $0x21] ss:$4 sm:$0xff] %v3072_v1  ;;  %vm14562_vm9 = vmor %vm4524_vm4, %vm4525_vm6 }
 0x460   : > { %v14235_v40 = vpop.f32.mrf.mxu1  ;;  %vm5427_vm2 = vmor %vm5425_vm12, %vm5426_vm13  ;;  %vm5430_vm4 = vsmask.f32 4368  ;;  %vm5412_vm12 = vcmask 1043459  }
 0x461   : > { %v14225_v27 = vld.sshfl [vmem:[#allocation1] sm:$0xff pattern:$0x73625140]  ;;  %3112 = vst [vmem:[#allocation1 + $0x22] ss:$4 sm:$0xff] %v3091_v23  ;;  %9610 = vmatmul.msk.bf16.gmra.mxu2 %vm1165_vm5, %v3793_v59  ;;  %vm5429_vm3 = vmor %vm5427_vm2, %vm5428_vm14  ;;  %vm5414_vm2 = vcmask 1042433  }
 0x462   : > { %3115 = vst [vmem:[#allocation1 + $0x1] ss:$4 sm:$0xff] %v3093_v54  ;;  %vm5431_vm6 = vmor %vm5429_vm3, %vm5430_vm4  ;;  %vm5434_vm14 = vsmask.f32 6424  ;;  %vm5436_vm3 = vsmask.f32 7452 }
 0x463   : > { %3114 = vst [vmem:[#allocation1] ss:$4 sm:$0xff] %v3092_v58  ;;  %vm5433_vm13 = vmor %vm5431_vm6, %vm5432_vm10  ;;  %vm5258_vm10 = vcmask 130048  }
 0x464   : > { %v3074_v38 = vpop.f32.mrf.mxu2  ;;  %v3647_v49 = vpop.f32.mrf.mxu3  ;;  %vm5435_vm4 = vmor %vm5433_vm13, %vm5434_vm14 }
 0x465   : > { %v3075_v19 = vadd.f32 %v3074_v38, %v14067_v31  ;;  %vm14761_vm6 = vmor %vm5435_vm4, %vm5436_vm3 }
 0x467   : > { %v3094_v29 = vrot.slane %v3075_v19, 2  ;;  %v3095_v25 = vrot.slane %v3075_v19, 4  ;;  %v3096_v32 = vrot.slane %v3075_v19, 6  ;;  %3116 = vst [vmem:[#allocation1 + $0x2] ss:$4 sm:$0xff] %v3075_v19 }
 0x468   : > { %v14231_v36 = vld.sshfl [vmem:[#allocation1 + $0x20] sm:$0xff pattern:$0x73625140]  ;;  %v3748_v51 = vpop.f32.mrf.mxu1 }
 0x469   : > { %3118 = vst [vmem:[#allocation1 + $0x20] ss:$4 sm:$0xff] %v3094_v29 }
 0x46a   : > { %3120 = vst [vmem:[#allocation1 + $0x22] ss:$4 sm:$0xff] %v3096_v32 }
 0x46b   : > { %3119 = vst [vmem:[#allocation1 + $0x21] ss:$4 sm:$0xff] %v3095_v25 }
 0x46c   : > { %v3076_v59 = vpop.f32.mrf.mxu2  ;;  %v14247_v3 = vpop.f32.mrf.mxu3 }
 0x46d   : > { %v3077_v4 = vadd.f32 %v3076_v59, %v14086_v21 }
 0x46e   : > { %v14238_v24 = vld.sshfl [vmem:[#allocation1] sm:$0xff pattern:$0x73625140] }
 0x46f   : > { %v3097_v7 = vrot.slane %v3077_v4, 2  ;;  %v3098_v31 = vrot.slane %v3077_v4, 4  ;;  %v3099_v60 = vrot.slane %v3077_v4, 6  ;;  %3122 = vst [vmem:[#allocation1] ss:$4 sm:$0xff] %v3077_v4 }
 0x470   : > { %v14249_v50 = vpop.f32.mrf.mxu1 }
 0x471   : > { %3123 = vst [vmem:[#allocation1 + $0x1] ss:$4 sm:$0xff] %v3097_v7  ;;  %9611 = vmatmul.msk.bf16.gmra.mxu2 %vm1165_vm5, %v14193_v18 }
 0x472   : > { %v14244_v0 = vld.sshfl [vmem:[#allocation1 + $0x20] sm:$0xff pattern:$0x73625140]  ;;  %3124 = vst [vmem:[#allocation1 + $0x2] ss:$4 sm:$0xff] %v3098_v31 }
 0x473   : > { %3126 = vst [vmem:[#allocation1 + $0x20] ss:$4 sm:$0xff] %v3099_v60 }
 0x474   : > { %v3079_v16 = vpop.f32.mrf.mxu2  ;;  %v3652_v2 = vpop.f32.mrf.mxu3 }
 0x475   : > { %v3080_v21 = vadd.f32 %v3079_v16, %v14110_v48 }
 0x477   : > { %v3100_v20 = vrot.slane %v3080_v21, 2  ;;  %3127 = vst [vmem:[#allocation1 + $0x21] ss:$4 sm:$0xff] %v3080_v21 }
 0x478   : > { %v3753_v9 = vpop.f32.mrf.mxu1 }
 0x479   : > { %3128 = vst [vmem:[#allocation1 + $0x22] ss:$4 sm:$0xff] %v3100_v20 }
 0x47c   : > { %v3081_v56 = vpop.f32.mrf.mxu2  ;;  %v14265_v17 = vpop.f32.mrf.mxu3 }
 0x480   : > { %v14267_v28 = vpop.f32.mrf.mxu1 }
 0x481   : > { %9693 = vmatmul.msk.bf16.vlgmr.msrb.gmra.mxu2 %vm1165_vm5, %v14005_v43  ;;  %v4048_v43 = vpack.c.b16 %v4047_v34, %v3790_v57 }
 0x484   : > { %v3559_v37 = vpop.f32.mrf.mxu2  ;;  %v3657_v41 = vpop.f32.mrf.mxu3 }
 0x485   : > { %v3579_v18 = vadd.f32 %v3559_v37, %v3434_v42 }
 0x487   : > { %v3667_v26 = vadd.f32 %v3647_v49, %v3579_v18 }
 0x488   : > { %v3758_v12 = vpop.f32.mrf.mxu1 }
 0x489   : > { %v3768_v48 = vadd.f32 %v3748_v51, %v3667_v26 }
 0x48c   : > { %v14255_v35 = vpop.f32.mrf.mxu2  ;;  %v3659_v58 = vpop.f32.mrf.mxu3 }
 0x490   : > { %v3760_v57 = vpop.f32.mrf.mxu1 }
 0x491   : > { %9694 = vmatmul.msk.bf16.gmra.mxu2 %vm1165_vm5, %v14032_v6 }
 0x494   : > { %v3564_v62 = vpop.f32.mrf.mxu2  ;;  %v3662_v42 = vpop.f32.mrf.mxu3 }
 0x495   : > { %v3581_v11 = vadd.f32 %v3564_v62, %v3439_v52 }
 0x497   : > { %v3669_v30 = vadd.f32 %v3652_v2, %v3581_v11 }
 0x498   : > { %v3763_v47 = vpop.f32.mrf.mxu1 }
 0x499   : > { %v3770_v1 = vadd.f32 %v3753_v9, %v3669_v30 }
 0x49c   : > { %v3566_v53 = vpop.f32.mrf.mxu2  ;;  %v3664_v32 = vpop.f32.mrf.mxu3 }
 0x4a0   : > { %v3765_v4 = vpop.f32.mrf.mxu1 }
 0x4a1   : > { %9695 = vmatmul.msk.bf16.gmra.mxu2 %vm1165_vm5, %v14065_v39 }
 0x4a4   : > { %v3569_v23 = vpop.f32.mrf.mxu2  ;;  %v3916_v39 = vpop.f32.mrf.mxu3 }
 0x4a5   : > { %v3583_v6 = vadd.f32 %v3569_v23, %v3444_v10 }
 0x4a7   : > { %v3671_v61 = vadd.f32 %v3657_v41, %v3583_v6 }
 0x4a8   : > { %v4005_v60 = vpop.f32.mrf.mxu1 }
 0x4a9   : > { %v3772_v54 = vadd.f32 %v3758_v12, %v3671_v61  ;;  %v3446_v61 = vadd.f32 %v14212_v8, %v14210_v5 }
 0x4ac   : > { %v3571_v63 = vpop.f32.mrf.mxu2  ;;  %v3918_v2 = vpop.f32.mrf.mxu3 }
 0x4b0   : > { %v14272_v14 = vpop.f32.mrf.mxu1 }
 0x4b1   : > { %9696 = vmatmul.msk.bf16.gmra.mxu2 %vm1165_vm5, %v4048_v43 }
 0x4b4   : > { %v3574_v38 = vpop.f32.mrf.mxu2  ;;  %v3921_v46 = vpop.f32.mrf.mxu3 }
 0x4b5   : > { %v3585_v19 = vadd.f32 %v3574_v38, %v3449_v44 }
 0x4b7   : > { %v3673_v29 = vadd.f32 %v3662_v42, %v3585_v19  ;;  %v3584_v42 = vadd.f32 %v3571_v63, %v3446_v61  ;;  %v3441_v19 = vadd.f32 %v14167_v13, %v14165_v15 }
 0x4b9   : > { %v3774_v25 = vadd.f32 %v3763_v47, %v3673_v29 }
 0x4bc   : > { %v3576_v59 = vpop.f32.mrf.mxu2  ;;  %v3923_v44 = vpop.f32.mrf.mxu3 }
 0x4c4   : > { %v3840_v7 = vpop.f32.mrf.mxu2  ;;  %v3926_v30 = vpop.f32.mrf.mxu3 }
 0x4c5   : > { %v3860_v31 = vadd.f32 %v3840_v7, %v3768_v48  ;;  %v4010_v48 = vpop.f32.mrf.mxu1  ;;  %v3672_v7 = vadd.f32 %v3659_v58, %v3584_v42 }
 0x4c7   : > { %v3936_v52 = vadd.f32 %v3916_v39, %v3860_v31  ;;  %v3436_v31 = vadd.f32 %v14149_v55, %v14145_v33  ;;  %v3773_v8 = vadd.f32 %v3760_v57, %v3672_v7  ;;  %v14316_v7 = vld.sshfl [vmem:[#allocation1] sm:$0xff pattern:$0x73625140] }
 0x4c9   : > { %v4025_v16 = vadd.f32 %v4005_v60, %v3936_v52  ;;  %v3580_v52 = vadd.f32 %v14255_v35, %v3436_v31 }
 0x4cc   : > { %v3842_v49 = vpop.f32.mrf.mxu2  ;;  %v3928_v12 = vpop.f32.mrf.mxu3 }
 0x4cd   : > { %v4012_v62 = vpop.f32.mrf.mxu1 }
 0x4d4   : > { %v3845_v21 = vpop.f32.mrf.mxu2  ;;  %v3931_v38 = vpop.f32.mrf.mxu3 }
 0x4d5   : > { %v3862_v51 = vadd.f32 %v3845_v21, %v3770_v1  ;;  %v4015_v1 = vpop.f32.mrf.mxu1 }
 0x4dc   : > { %v3847_v20 = vpop.f32.mrf.mxu2  ;;  %v3933_v15 = vpop.f32.mrf.mxu3 }
 0x4dd   : > { %v4017_v6 = vpop.f32.mrf.mxu1 }
 0x4e4   : > { %v3850_v56 = vpop.f32.mrf.mxu2 }
 0x4e5   : > { %v3864_v10 = vadd.f32 %v3850_v56, %v3772_v54  ;;  %v3451_v54 = vadd.f32 %v14235_v40, %v14233_v45  ;;  %v4020_v60 = vpop.f32.mrf.mxu1 }
 0x4e7   : > { %v3586_v47 = vadd.f32 %v3576_v59, %v3451_v54  ;;  %v3668_v59 = vadd.f32 %v14247_v3, %v3580_v52  ;;  %v3940_v35 = vadd.f32 %v3926_v30, %v3864_v10  ;;  %v12340_v3 = vld [vmem:[%s15970_s9] ss:$0 sm:$0xff] }
 0x4e9   : > { %v3674_v39 = vadd.f32 %v3664_v32, %v3586_v47  ;;  %v3769_v33 = vadd.f32 %v14249_v50, %v3668_v59  ;;  %v14335_v59 = vld [vmem:[%s14321_s29 + $0xc] sm:$0x7] }
 0x4eb   : > { %v3775_v45 = vadd.f32 %v3765_v4, %v3674_v39 }
 0x4ec   : > { %v3852_v37 = vpop.f32.mrf.mxu2 }
 0x4ed   : > { %v3865_v40 = vadd.f32 %v3852_v37, %v3773_v8  ;;  %v4022_v55 = vpop.f32.mrf.mxu1  ;;  %v14326_v8 = vld [vmem:[%s14321_s29] sm:$0x7] }
 0x4ef   : > { %v3941_v32 = vadd.f32 %v3928_v12, %v3865_v40 }
 0x4f1   : > { %v4030_v4 = vadd.f32 %v4017_v6, %v3941_v32 }
 0x4f4   : > { %v3855_v18 = vpop.f32.mrf.mxu2 }
 0x4f5   : > { %v3866_v26 = vadd.f32 %v3855_v18, %v3774_v25  ;;  %v3582_v25 = vadd.f32 %v3566_v53, %v3441_v19 }
 0x4f7   : > { %v3670_v5 = vadd.f32 %v14265_v17, %v3582_v25  ;;  %v3942_v53 = vadd.f32 %v3931_v38, %v3866_v26  ;;  %v3861_v17 = vadd.f32 %v3842_v49, %v3769_v33  ;;  %v4029_v26 = vadd.f32 %v4015_v1, %v3940_v35  ;;  %v11942_v25 = vld [vmem:[%s15967_s6 + $0x70] sm:$0xff] }
 0x4f9   : > { %v3771_v13 = vadd.f32 %v14267_v28, %v3670_v5  ;;  %v4031_v56 = vadd.f32 %v4020_v60, %v3942_v53  ;;  %v3938_v28 = vadd.f32 %v3921_v46, %v3862_v51  ;;  %v3937_v12 = vadd.f32 %v3918_v2, %v3861_v17  ;;  %v14323_v5 = vld.sshfl [vmem:[#allocation1 + $0x20] sm:$0xff pattern:$0x73625140]  ;;  %v11941_v17 = vld [vmem:[%s15967_s6 + $0x68] sm:$0xff] }
 0x4fb   : > { %v3863_v58 = vadd.f32 %v3847_v20, %v3771_v13  ;;  %v4027_v30 = vadd.f32 %v4010_v48, %v3938_v28  ;;  %v4026_v42 = vadd.f32 %v14272_v14, %v3937_v12  ;;  %v11926_v14 = vld [vmem:[%s15974_s13] sm:$0xff] }
 0x4fc   : > { %v3857_v9 = vpop.f32.mrf.mxu2 }
 0x4fd   : > { %v3867_v63 = vadd.f32 %v3857_v9, %v3775_v45  ;;  %v3939_v57 = vadd.f32 %v3923_v44, %v3863_v58  ;;  %v14329_v45 = vld [vmem:[%s14321_s29 + $0x4] sm:$0x7] }
 0x4fe   : > { %v4265_v53 = vrot.slane %v14329_v45, 2 }
 0x4ff   : > { %v3943_v21 = vadd.f32 %v3933_v15, %v3867_v63  ;;  %v4028_v61 = vadd.f32 %v4012_v62, %v3939_v57  ;;  %v14332_v63 = vld [vmem:[%s14321_s29 + $0x8] sm:$0x7]  ;;  %v11935_v57 = vld [vmem:[%s15967_s6 + $0x38] sm:$0xff] }
 0x500   : > { %v4266_v32 = vrot.slane %v14332_v63, 2  ;;  %4502 = vmatpush.bf16.msra.mxu2 %v11935_v57 }
 0x501   : > { %v4032_v18 = vadd.f32 %v4022_v55, %v3943_v21  ;;  %v4267_v21 = vrot.slane %v14335_v59, 2 }
 0x504   : > { %v4085_v22 = vpop.f32.mrf.mxu2 }
 0x505   : > { %v14274_v34 = vadd.f32 %v4085_v22, %v4025_v16 }
 0x50c   : > { %v14276_v43 = vpop.f32.mrf.mxu2 }
 0x50d   : > { %v4106_v19 = vadd.f32 %v14276_v43, %v4026_v42  ;;  %v11927_v43 = vld [vmem:[%s15974_s13 + $0x8] sm:$0xff] }
 0x50f   : > { %v4118_v2 = vadd.f32 %v12340_v3, %v4106_v19 }
 0x514   : > { %v4090_v11 = vpop.f32.mrf.mxu2 }
 0x515   : > { %v4107_v47 = vadd.f32 %v4090_v11, %v4027_v30  ;;  %v14376_v30 = vsel %vm4272_vm8, %v14332_v63, %v4266_v32 }
 0x517   : > { %v4119_v1 = vadd.f32 %v12340_v3, %v4107_v47 }
 0x51c   : > { %v4092_v41 = vpop.f32.mrf.mxu2 }
 0x51d   : > { %v4108_v49 = vadd.f32 %v4092_v41, %v4028_v61 }
 0x51f   : > { %v4120_v51 = vadd.f32 %v12340_v3, %v4108_v49 }
 0x521   : > { %v4131_v62 = vpack.c.bf16 %v4120_v51, %v4119_v1  ;;  %v14391_v51 = vsel %vm4272_vm8, %v14335_v59, %v4267_v21 }
 0x524   : > { %v4095_v23 = vpop.f32.mrf.mxu2 }
 0x525   : > { %v4109_v50 = vadd.f32 %v4095_v23, %v4029_v26  ;;  %v4117_v23 = vadd.f32 %v12340_v3, %v14274_v34  ;;  %v4129_v34 = vld [vmem:[%s15974_s13 + $0x10] sm:$0x3] }
 0x526   : > { %v4143_v11 = vunpack.c.l.b16 %v4129_v34 }
 0x527   : > { %v4121_v38 = vadd.f32 %v12340_v3, %v4109_v50  ;;  %v4130_v48 = vpack.c.bf16 %v4118_v2, %v4117_v23 }
 0x528   : > { %v4146_v41 = vpack.c.b16 %v4143_v11, %v4143_v11  ;;  %v11939_v11 = vld [vmem:[%s15967_s6 + $0x58] sm:$0xff] }
 0x52c   : > { %v4097_v29 = vpop.f32.mrf.mxu2 }
 0x52d   : > { %v4110_v20 = vadd.f32 %v4097_v29, %v4030_v4  ;;  %v11943_v29 = vld [vmem:[%s15967_s6 + $0x78] sm:$0xff] }
 0x52e   : > { %4431 = vmatpush.bf16.msra.mxu1 %v11943_v29  ;;  %v4287_v29 = vrot.slane %v14376_v30, 2  ;;  %v11982_v30 = vld [vmem:[%s15967_s6 + $0x1b0] sm:$0xff] }
 0x52f   : > { %v4122_v44 = vadd.f32 %v12340_v3, %v4110_v20 }
 0x531   : > { %v4132_v46 = vpack.c.bf16 %v4122_v44, %v4121_v38  ;;  %v11940_v44 = vld [vmem:[%s15967_s6 + $0x60] sm:$0xff] }
 0x532   : > { %4432 = vmatpush.bf16.msra.mxu1 %v11942_v25  ;;  %v4293_v25 = vrot.slane %v14391_v51, 2 }
 0x534   : > { %v4100_v16 = vpop.f32.mrf.mxu2 }
 0x535   : > { %v4111_v37 = vadd.f32 %v4100_v16, %v4031_v56  ;;  %v4264_v16 = vrot.slane %v14326_v8, 2  ;;  %v14347_v56 = vsel %vm4268_vm7, %v14329_v45, %v4265_v53 }
 0x536   : > { %v4314_v20 = vshrl.u32 %v14347_v56, 16  ;;  %4433 = vmatpush.bf16.msra.mxu1 %v11941_v17  ;;  %v4317_v49 = vshll.u32 %v14347_v56, 16 }
 0x537   : > { %v4123_v54 = vadd.f32 %v12340_v3, %v4111_v37  ;;  %v14343_v55 = vsel %vm4268_vm7, %v14326_v8, %v4264_v16  ;;  %v14357_v37 = vsel %vm4268_vm7, %v14332_v63, %v4266_v32  ;;  %v14366_v28 = vsel %vm4272_vm8, %v14326_v8, %v4264_v16 }
 0x538   : > { %v4304_v26 = vshll.u32 %v14343_v55, 16  ;;  %v4327_v42 = vshrl.u32 %v14357_v37, 16  ;;  %v4330_v47 = vshll.u32 %v14357_v37, 16  ;;  %v4275_v19 = vrot.slane %v14366_v28, 2 }
 0x539   : > { %v4319_v34 = vrot.slane %v4317_v49, 7 }
 0x53a   : > { %4434 = vmatpush.bf16.msra.mxu1 %v11940_v44  ;;  %v4306_v23 = vrot.slane %v4304_v26, 7  ;;  %v4310_v16 = vshll.u32 %v4275_v19, 16 }
 0x53c   : > { %v4102_v9 = vpop.f32.mrf.mxu2  ;;  %v4312_v44 = vrot.slane %v4310_v16, 7 }
 0x53d   : > { %v4112_v22 = vadd.f32 %v4102_v9, %v4032_v18  ;;  %v14361_v18 = vsel %vm4268_vm7, %v14335_v59, %v4267_v21  ;;  %v4301_v9 = vshrl.u32 %v14343_v55, 16 }
 0x53e   : > { %v4343_v1 = vshll.u32 %v14361_v18, 16  ;;  %4435 = vmatpush.bf16.msra.mxu1 %v11939_v11 }
 0x53f   : > { %v4124_v10 = vadd.f32 %v12340_v3, %v4112_v22 }
 0x541   : > { %v4133_v6 = vpack.c.bf16 %v4124_v10, %v4123_v54  ;;  %v14372_v10 = vsel %vm4272_vm8, %v14329_v45, %v4265_v53 }
 0x542   : > { %v4281_v2 = vrot.slane %v14372_v10, 2  ;;  %v11962_v10 = vld [vmem:[%s15967_s6 + $0x110] sm:$0xff] }
 0x543   : > { %4160 = vmatpush.bf16.msrb.mxu3 %v4133_v6  ;;  %v11934_v6 = vld [vmem:[%s15967_s6 + $0x30] sm:$0xff] }
 0x544   : > { %4503 = vmatpush.bf16.msra.mxu2 %v11934_v6  ;;  %v4323_v57 = vshll.u32 %v4281_v2, 16  ;;  %v4533_v28 = vrot.slane %v4281_v2, 7 }
 0x547   : > { %4161 = vmatpush.bf16.msrb.mxu3 %v4132_v46  ;;  %v4340_v46 = vshrl.u32 %v14361_v18, 16 }
 0x54b   : > { %4162 = vmatpush.bf16.msrb.mxu3 %v4131_v62  ;;  %v4303_v62 = vrot.slane %v4301_v9, 6  ;;  %v11950_v9 = vld [vmem:[%s15967_s6 + $0xb0] sm:$0xff] }
 0x54f   : > { %4163 = vmatpush.bf16.msrb.mxu3 %v4130_v48 }
 0x552   : > { %9705 = vmatmul.msk.bf16.vlgmr.msrb.gmra.mxu3 %vm1165_vm5, %v11926_v14 }
 0x562   : > { %9706 = vmatmul.msk.bf16.gmra.mxu3 %vm1165_vm5, %v11927_v43  ;;  %v4316_v43 = vrot.slane %v4314_v20, 6  ;;  %v4336_v20 = vshll.u32 %v4287_v29, 16 }
 0x564   : > { %v4320_v17 = vor.u32 %v4319_v34, %v4316_v43  ;;  %v11931_v43 = vld [vmem:[%s15967_s6 + $0x18] sm:$0xff] }
 0x572   : > { %9707 = vmatmul.msk.bf16.gmra.mxu3 %vm1165_vm5, %v4146_v41  ;;  %v11951_v41 = vld [vmem:[%s15967_s6 + $0xb8] sm:$0xff] }
 0x573   : > { %4621 = vmatpush.bf16.msra.mxu3 %v11951_v41 }
 0x577   : > { %4622 = vmatpush.bf16.msra.mxu3 %v11950_v9 }
 0x5d5   : > { %v4165_v39 = vpop.f32.mrf.mxu3 }
 0x5d6   : > { %v4184_v31 = vrot.slane %v4165_v39, 2  ;;  %v4185_v60 = vrot.slane %v4165_v39, 4  ;;  %v4186_v52 = vrot.slane %v4165_v39, 6  ;;  %4197 = vst [vmem:[#allocation1] ss:$4 sm:$0xff] %v4165_v39  ;;  %v4329_v39 = vrot.slane %v4327_v42, 6 }
 0x5d7   : > { %v4321_v42 = vrot.slane %v4320_v17, 2  ;;  %v11929_v17 = vld [vmem:[%s15967_s6 + $0x8] sm:$0xff] }
 0x5d8   : > { %4199 = vst [vmem:[#allocation1 + $0x1] ss:$4 sm:$0xff] %v4184_v31  ;;  %v4332_v31 = vrot.slane %v4330_v47, 7  ;;  %v4325_v47 = vrot.slane %v4323_v57, 7 }
 0x5d9   : > { %4204 = vst [vmem:[#allocation1 + $0x20] ss:$4 sm:$0xff] %v4186_v52 }
 0x5da   : > { %4201 = vst [vmem:[#allocation1 + $0x2] ss:$4 sm:$0xff] %v4185_v60  ;;  %v11933_v60 = vld [vmem:[%s15967_s6 + $0x28] sm:$0xff]  ;;  %v4333_v26 = vor.u32 %v4332_v31, %v4329_v39  ;;  %v14462_v31 = vsel %vm14441_vm15, %v4321_v42, %v4325_v47  ;;  %v11974_v42 = vld [vmem:[%s15967_s6 + $0x170] sm:$0xff] }
 0x5db   : > { %4504 = vmatpush.bf16.msra.mxu2 %v11933_v60  ;;  %v11936_v60 = vld [vmem:[%s15967_s6 + $0x40] sm:$0xff]  ;;  %v11954_v47 = vld [vmem:[%s15967_s6 + $0xd0] sm:$0xff] }
 0x5dd   : > { %v4167_v40 = vpop.f32.mrf.mxu3 }
 0x5de   : > { %v4187_v15 = vrot.slane %v4167_v40, 2  ;;  %v4189_v13 = vrot.slane %v4167_v40, 6  ;;  %4206 = vst [vmem:[#allocation1 + $0x21] ss:$4 sm:$0xff] %v4167_v40  ;;  %v4188_v58 = vrot.slane %v4167_v40, 4 }
 0x5e0   : > { %4208 = vst [vmem:[#allocation1 + $0x22] ss:$4 sm:$0xff] %v4187_v15  ;;  %v4342_v15 = vrot.slane %v4340_v46, 6  ;;  %v11949_v46 = vld [vmem:[%s15967_s6 + $0xa8] sm:$0xff] }
 0x5e1   : > { %v4202_v33 = vld.sshfl [vmem:[#allocation1] sm:$0xff pattern:$0x73625140]  ;;  %4623 = vmatpush.bf16.msra.mxu3 %v11949_v46  ;;  %v4529_v46 = vrot.slane %v4275_v19, 7  ;;  %v9790_v19 = vrot.slane %v14357_v37, 9 }
 0x5e2   : > { %4211 = vst [vmem:[#allocation1 + $0x1] ss:$4 sm:$0xff] %v4189_v13  ;;  %v4232_v35 = vpack.c.bf16 %v4202_v33, %v4202_v33  ;;  %v4345_v13 = vrot.slane %v4343_v1, 7  ;;  %v11959_v1 = vld [vmem:[%s15967_s6 + $0xf8] sm:$0xff] }
 0x5e3   : > { %4210 = vst [vmem:[#allocation1] ss:$4 sm:$0xff] %v4188_v58  ;;  %4712 = vmatpush.bf16.msrb.mxu0 %v11959_v1  ;;  %v11947_v33 = vld [vmem:[%s15967_s6 + $0x98] sm:$0xff] }
 0x5e4   : > { %v7081_v4 = vunpack.c.l.b16 %v4232_v35  ;;  %v4307_v35 = vor.u32 %v4306_v23, %v4303_v62  ;;  %v4334_v62 = vrot.slane %v4333_v26, 2  ;;  %v4338_v23 = vrot.slane %v4336_v20, 7  ;;  %v11956_v26 = vld [vmem:[%s15967_s6 + $0xe0] sm:$0xff]  ;;  %v11963_v1 = vld [vmem:[%s15967_s6 + $0x118] sm:$0xff] }
 0x5e5   : > { %v4170_v3 = vpop.f32.mrf.mxu3  ;;  %v11928_v20 = vld [vmem:[%s15967_s6] sm:$0xff] }
 0x5e6   : > { %v4190_v22 = vrot.slane %v4170_v3, 2  ;;  %v4191_v12 = vrot.slane %v4170_v3, 4  ;;  %v4192_v61 = vrot.slane %v4170_v3, 6  ;;  %4212 = vst [vmem:[#allocation1 + $0x2] ss:$4 sm:$0xff] %v4170_v3  ;;  %v7087_v50 = vpack.c.b16 %v7081_v4, %v7081_v4  ;;  %v11938_v4 = vld [vmem:[%s15967_s6 + $0x50] sm:$0xff] }
 0x5e7   : > { %v4209_v54 = vld.sshfl [vmem:[#allocation1 + $0x20] sm:$0xff pattern:$0x73625140]  ;;  %4436 = vmatpush.bf16.msra.mxu1 %v11938_v4  ;;  %v4308_v49 = vrot.slane %v4307_v35, 2  ;;  %v11957_v35 = vld [vmem:[%s15967_s6 + $0xe8] sm:$0xff]  ;;  %v11966_v4 = vld [vmem:[%s15967_s6 + $0x130] sm:$0xff] }
 0x5e8   : > { %4214 = vst [vmem:[#allocation1 + $0x20] ss:$4 sm:$0xff] %v4190_v22  ;;  %7093 = vrot.lane.b32.xlu0 %v7087_v50, %s15994_s19  ;;  %v4233_v38 = vpack.c.bf16 %v4209_v54, %v4209_v54  ;;  %v11932_v3 = vld [vmem:[%s15967_s6 + $0x20] sm:$0xff]  ;;  %v4349_v50 = vshll.u32 %v4293_v25, 16  ;;  %v12278_v54 = vld [vmem:[%s15977_s16 + $0x410] sm:$0xff] }
 0x5e9   : > { %4215 = vst [vmem:[#allocation1 + $0x21] ss:$4 sm:$0xff] %v4191_v12  ;;  %4505 = vmatpush.bf16.msra.mxu2 %v11932_v3  ;;  %v4313_v39 = vsel %vm14441_vm15, %v4308_v49, %v4312_v44  ;;  %v11946_v3 = vld [vmem:[%s15967_s6 + $0x90] sm:$0xff]  ;;  %v11945_v49 = vld [vmem:[%s15967_s6 + $0x88] sm:$0xff]  ;;  %v11955_v44 = vld [vmem:[%s15967_s6 + $0xd8] sm:$0xff] }
 0x5ea   : > { %4216 = vst [vmem:[#allocation1 + $0x22] ss:$4 sm:$0xff] %v4192_v61  ;;  %v7082_v48 = vunpack.c.l.b16 %v4233_v38  ;;  %v4346_v61 = vor.u32 %v4345_v13, %v4342_v15  ;;  %v11937_v38 = vld [vmem:[%s15967_s6 + $0x48] sm:$0xff]  ;;  %v4351_v11 = vrot.slane %v4349_v50, 7  ;;  %v14477_v15 = vsel %vm14441_vm15, %v4334_v62, %v4338_v23  ;;  %v11983_v62 = vld [vmem:[%s15967_s6 + $0x1b8] sm:$0xff] }
 0x5eb   : > { %4437 = vmatpush.bf16.msra.mxu1 %v11937_v38  ;;  %v9788_v38 = vrot.slane %v14343_v55, 9  ;;  %v11973_v23 = vld [vmem:[%s15967_s6 + $0x168] sm:$0xff]  ;;  %v9789_v55 = vrot.slane %v14347_v56, 9 }
 0x5ec   : > { %v7088_v53 = vpack.c.b16 %v7082_v48, %v7082_v48  ;;  %v4347_v34 = vrot.slane %v4346_v61, 2  ;;  %v11953_v56 = vld [vmem:[%s15967_s6 + $0xc8] sm:$0xff] }
 0x5ed   : > { %v4172_v52 = vpop.f32.mrf.mxu3  ;;  %v4213_v40 = vld.sshfl [vmem:[#allocation1] sm:$0xff pattern:$0x73625140]  ;;  %4506 = vmatpush.bf16.msra.mxu2 %v11931_v43  ;;  %v14573_v43 = vld [vmem:[%s14321_s29 + $0x10] sm:$0x7]  ;;  %v4530_v37 = vsel %vm14562_vm9, %v9788_v38, %v4529_v46  ;;  %v14594_v51 = vsel %vm14562_vm9, %v9789_v55, %v4533_v28  ;;  %v11977_v38 = vld [vmem:[%s15967_s6 + $0x188] sm:$0xff] }
 0x5ee   : > { %v4193_v58 = vrot.slane %v4172_v52, 2  ;;  %v4194_v32 = vrot.slane %v4172_v52, 4  ;;  %v4195_v21 = vrot.slane %v4172_v52, 6  ;;  %4218 = vst [vmem:[#allocation1] ss:$4 sm:$0xff] %v4172_v52  ;;  %v4234_v22 = vpack.c.bf16 %v4213_v40, %v4213_v40  ;;  %v11948_v52 = vld [vmem:[%s15967_s6 + $0xa0] sm:$0xff] }
 0x5ef   : > { %v11958_v40 = vld [vmem:[%s15967_s6 + $0xf0] sm:$0xff]  ;;  %4438 = vmatpush.bf16.msra.mxu1 %v11936_v60  ;;  %4624 = vmatpush.bf16.msra.mxu3 %v11948_v52  ;;  %v11961_v60 = vld [vmem:[%s15967_s6 + $0x108] sm:$0xff]  ;;  %v11987_v46 = vld [vmem:[%s15967_s6 + $0x1d8] sm:$0xff] }
 0x5f0   : > { %4219 = vst [vmem:[#allocation1 + $0x1] ss:$4 sm:$0xff] %v4193_v58  ;;  %7095 = vrot.lane.b32.xlu0 %v7088_v53, %s15994_s19  ;;  %v7083_v6 = vunpack.c.l.b16 %v4234_v22  ;;  %v11967_v53 = vld [vmem:[%s15967_s6 + $0x138] sm:$0xff]  ;;  %v11930_v58 = vld [vmem:[%s15967_s6 + $0x10] sm:$0xff]  ;;  %4713 = vmatpush.bf16.msrb.mxu0 %v11958_v40  ;;  %v11965_v22 = vld [vmem:[%s15967_s6 + $0x128] sm:$0xff] }
 0x5f1   : > { %v4217_v12 = vld.sshfl [vmem:[#allocation1 + $0x20] sm:$0xff pattern:$0x73625140]  ;;  %4220 = vst [vmem:[#allocation1 + $0x2] ss:$4 sm:$0xff] %v4194_v32  ;;  %v14487_v32 = vsel %vm14441_vm15, %v4347_v34, %v4351_v11  ;;  %4507 = vmatpush.bf16.msra.mxu2 %v11930_v58  ;;  %v9791_v34 = vrot.slane %v14361_v18, 9 }
 0x5f2   : > { %4222 = vst [vmem:[#allocation1 + $0x20] ss:$4 sm:$0xff] %v4195_v21  ;;  %v7089_v48 = vpack.c.b16 %v7083_v6, %v7083_v6  ;;  %v4235_v14 = vpack.c.bf16 %v4217_v12, %v4217_v12  ;;  %v11975_v12 = vld [vmem:[%s15967_s6 + $0x178] sm:$0xff]  ;;  %v11964_v6 = vld [vmem:[%s15967_s6 + $0x120] sm:$0xff]  ;;  %v4541_v11 = vrot.slane %v4293_v25, 7  ;;  %v4729_v25 = vrot.slane %v14573_v43, 2 }
 0x5f3   : > { %4823 = vmatpush.bf16.msrb.mxu1 %v11967_v53  ;;  %4625 = vmatpush.bf16.msra.mxu3 %v11947_v33  ;;  %v11972_v18 = vld [vmem:[%s15967_s6 + $0x160] sm:$0xff]  ;;  %v11981_v52 = vld [vmem:[%s15967_s6 + $0x1a8] sm:$0xff]  ;;  %v11991_v40 = vld [vmem:[%s15967_s6 + $0x1f8] sm:$0xff] }
 0x5f4   : > { %7097 = vrot.lane.b32.xlu1 %v7089_v48, %s15994_s19  ;;  %v7084_v13 = vunpack.c.l.b16 %v4235_v14  ;;  %4714 = vmatpush.bf16.msrb.mxu0 %v11957_v35  ;;  %v4537_v14 = vrot.slane %v4287_v29, 7  ;;  %v14625_v53 = vsel %vm4268_vm7, %v14573_v43, %v4729_v25  ;;  %v11960_v58 = vld [vmem:[%s15967_s6 + $0x100] sm:$0xff]  ;;  %v11990_v33 = vld [vmem:[%s15967_s6 + $0x1f0] sm:$0xff]  ;;  %v14638_v35 = vsel %vm4272_vm8, %v14573_v43, %v4729_v25  ;;  %v11993_v25 = vld [vmem:[%s15967_s6 + $0x208] sm:$0xff] }
 0x5f5   : > { %v4175_v41 = vpop.f32.mrf.mxu3  ;;  %4508 = vmatpush.bf16.msra.mxu2 %v11929_v17  ;;  %v4735_v17 = vshrl.u32 %v14625_v53, 16  ;;  %v11996_v55 = vld [vmem:[%s15967_s6 + $0x220] sm:$0xff] }
 0x5f6   : > { %4223 = vst [vmem:[#allocation1 + $0x21] ss:$4 sm:$0xff] %v4175_v41  ;;  %v4196_v21 = vrot.slane %v4175_v41, 2  ;;  %v7090_v57 = vpack.c.b16 %v7084_v13, %v7084_v13  ;;  %v14598_v29 = vsel %vm14562_vm9, %v9790_v19, %v4537_v14  ;;  %v14603_v41 = vsel %vm14562_vm9, %v9791_v34, %v4541_v11  ;;  %v11971_v13 = vld [vmem:[%s15967_s6 + $0x158] sm:$0xff]  ;;  %v11976_v28 = vld [vmem:[%s15967_s6 + $0x180] sm:$0xff]  ;;  %v11986_v14 = vld [vmem:[%s15967_s6 + $0x1d0] sm:$0xff] }
 0x5f7   : > { %4824 = vmatpush.bf16.msrb.mxu1 %v11966_v4  ;;  %4626 = vmatpush.bf16.msra.mxu3 %v11946_v3  ;;  %v11970_v4 = vld [vmem:[%s15967_s6 + $0x150] sm:$0xff]  ;;  %v11999_v3 = vld [vmem:[%s15967_s6 + $0x238] sm:$0xff]  ;;  %v12276_v48 = vld [vmem:[%s15977_s16 + $0x400] sm:$0xff] }
 0x5f8   : > { %v14473_v16 = vld.sshfl [vmem:[#allocation1] sm:$0xff pattern:$0x73625140]  ;;  %4224 = vst [vmem:[#allocation1 + $0x22] ss:$4 sm:$0xff] %v4196_v21  ;;  %4715 = vmatpush.bf16.msrb.mxu0 %v11956_v26  ;;  %v11979_v26 = vld [vmem:[%s15967_s6 + $0x198] sm:$0xff] }
 0x5f9   : > { %4371 = vst [vmem:[#allocation1] ss:$4 sm:$0xff] %v4313_v39  ;;  %4509 = vmatpush.bf16.msra.mxu2 %v11928_v20  ;;  %v11952_v39 = vld [vmem:[%s15967_s6 + $0xc0] sm:$0xff]  ;;  %v11989_v20 = vld [vmem:[%s15967_s6 + $0x1e8] sm:$0xff]  ;;  %v11995_v34 = vld [vmem:[%s15967_s6 + $0x218] sm:$0xff] }
 0x5fa   : > { %4374 = vst [vmem:[#allocation1 + $0x1] ss:$4 sm:$0xff] %v14462_v31  ;;  %v11980_v21 = vld [vmem:[%s15967_s6 + $0x1a0] sm:$0xff]  ;;  %v14707_v11 = vld [vmem:[%s14321_s29 + $0x14] sm:$0x7] }
 0x5fb   : > { %4377 = vst [vmem:[#allocation1 + $0x2] ss:$4 sm:$0xff] %v14477_v15  ;;  %4825 = vmatpush.bf16.msrb.mxu1 %v11965_v22  ;;  %4627 = vmatpush.bf16.msra.mxu3 %v11945_v49  ;;  %v11998_v49 = vld [vmem:[%s15967_s6 + $0x230] sm:$0xff] }
 0x5fc   : > { %4380 = vst [vmem:[#allocation1 + $0x3] ss:$4 sm:$0xff] %v14487_v32  ;;  %7099 = vrot.lane.b32.xlu1 %v7090_v57, %s15994_s19  ;;  %4716 = vmatpush.bf16.msrb.mxu0 %v11955_v44  ;;  %v4738_v57 = vshll.u32 %v14625_v53, 16  ;;  %v11978_v44 = vld [vmem:[%s15967_s6 + $0x190] sm:$0xff]  ;;  %s8876_s19 = sshll.u32 %s8873_s26, 4  ;;  %s8877_s19 = int_to_ptr.hbm [resolvable:$true] %s8876_s19 }
 0x5fd   : > { %v4177_v9 = vpop.f32.mrf.mxu3  ;;  %4919 = vmatpush.bf16.msrb.mxu2 %v11975_v12  ;;  %v4737_v12 = vrot.slane %v4735_v17, 6 }
 0x5fe   : > { %v4734_v9 = vrot.slane %v14638_v35, 2  ;;  %v4740_v61 = vrot.slane %v4738_v57, 7 }
 0x5ff   : > { %4826 = vmatpush.bf16.msrb.mxu1 %v11964_v6 }
 0x600   : > { %4717 = vmatpush.bf16.msrb.mxu0 %v11954_v47  ;;  %v4741_v6 = vor.u32 %v4740_v61, %v4737_v12  ;;  %v11997_v47 = vld [vmem:[%s15967_s6 + $0x228] sm:$0xff] }
 0x601   : > { %4920 = vmatpush.bf16.msrb.mxu2 %v11974_v42  ;;  %v4744_v42 = vshll.u32 %v4734_v9, 16 }
 0x603   : > { %v4381_v50 = vld.sshfl [vmem:[#allocation1] sm:$0xff pattern:$0x73625140]  ;;  %4827 = vmatpush.bf16.msrb.mxu1 %v11963_v1  ;;  %v4742_v1 = vrot.slane %v4741_v6, 2 }
 0x604   : > { %4445 = vst [vmem:[#allocation1] ss:$4 sm:$0xff] %v14326_v8  ;;  %4439 = vmatmul.bf16.vlgmr.msra.gmra.mxu1 %v4381_v50  ;;  %v11944_v8 = vld [vmem:[%s15967_s6 + $0x80] sm:$0xff]  ;;  %4718 = vmatpush.bf16.msrb.mxu0 %v11953_v56  ;;  %v11969_v50 = vld [vmem:[%s15967_s6 + $0x148] sm:$0xff]  ;;  %v11994_v56 = vld [vmem:[%s15967_s6 + $0x210] sm:$0xff] }
 0x605   : > { %4447 = vst [vmem:[#allocation1 + $0x1] ss:$4 sm:$0xff] %v14329_v45  ;;  %4628 = vmatpush.bf16.msra.mxu3 %v11944_v8  ;;  %4921 = vmatpush.bf16.msrb.mxu2 %v11973_v23  ;;  %v11968_v8 = vld [vmem:[%s15967_s6 + $0x140] sm:$0xff] }
 0x606   : > { %4449 = vst [vmem:[#allocation1 + $0x2] ss:$4 sm:$0xff] %v14332_v63 }
 0x607   : > { %4451 = vst [vmem:[#allocation1 + $0x3] ss:$4 sm:$0xff] %v14335_v59  ;;  %4828 = vmatpush.bf16.msrb.mxu1 %v11962_v10  ;;  %v4842_v10 = vrot.slane %v4734_v9, 7 }
 0x608   : > { %4719 = vmatpush.bf16.msrb.mxu0 %v11952_v39 }
 0x609   : > { %5010 = vmatpush.bf16.msrb.mxu3 %v11983_v62  ;;  %4922 = vmatpush.bf16.msrb.mxu2 %v11972_v18  ;;  %v4746_v62 = vrot.slane %v4744_v42, 7  ;;  %v5027_v18 = vrot.slane %v14707_v11, 2 }
 0x60b   : > { %4829 = vmatpush.bf16.msrb.mxu1 %v11961_v60  ;;  %v14691_v19 = vsel %vm14441_vm15, %v4742_v1, %v4746_v62  ;;  %v14732_v60 = vld [vmem:[%s14721_s1 + $0xc] sm:$0xf] }
 0x60c   : > { %5121 = vmatpush.bf16.msra.mxu0 %v11991_v40  ;;  %v6437_v40 = vrot.slane %v14732_v60, 1 }
 0x60d   : > { %5011 = vmatpush.bf16.msrb.mxu3 %v11982_v30  ;;  %4923 = vmatpush.bf16.msrb.mxu2 %v11971_v13  ;;  %v11984_v30 = vld [vmem:[%s15967_s6 + $0x1c0] sm:$0xff]  ;;  %v6438_v13 = vrot.slane %v14732_v60, 2 }
 0x60e   : > { %v4452_v2 = vld.sshfl [vmem:[#allocation1] sm:$0xff pattern:$0x73625140]  ;;  %v6442_v35 = vsel %vm4520_vm0, %v14732_v60, %v6437_v40  ;;  %v6610_v57 = vsel %vm5410_vm11, %v14732_v60, %v6437_v40 }
 0x60f   : > { %4561 = vst [vmem:[#allocation1] ss:$4 sm:$0xff] %v4530_v37  ;;  %4510 = vmatmul.bf16.vlgmr.msra.gmra.mxu2 %v4452_v2  ;;  %4830 = vmatpush.bf16.msrb.mxu1 %v11960_v58  ;;  %v9936_v37 = vrot.slane %v14625_v53, 9  ;;  %v11992_v53 = vld [vmem:[%s15967_s6 + $0x200] sm:$0xff]  ;;  %v5030_v58 = vsel %vm4272_vm8, %v14707_v11, %v5027_v18 }
 0x610   : > { %4564 = vst [vmem:[#allocation1 + $0x1] ss:$4 sm:$0xff] %v14594_v51  ;;  %5122 = vmatpush.bf16.msra.mxu0 %v11990_v33 }
 0x611   : > { %4567 = vst [vmem:[#allocation1 + $0x2] ss:$4 sm:$0xff] %v14598_v29  ;;  %5012 = vmatpush.bf16.msrb.mxu3 %v11981_v52  ;;  %4924 = vmatpush.bf16.msrb.mxu2 %v11970_v4  ;;  %v14728_v39 = vsel %vm14562_vm9, %v9936_v37, %v4842_v10  ;;  %v5029_v52 = vsel %vm4268_vm7, %v14707_v11, %v5027_v18  ;;  %v5032_v4 = vrot.slane %v5030_v58, 2 }
 0x612   : > { %4570 = vst [vmem:[#allocation1 + $0x3] ss:$4 sm:$0xff] %v14603_v41  ;;  %v5036_v33 = vshll.u32 %v5029_v52, 16 }
 0x613   : > { %5217 = vmatpush.bf16.msra.mxu1 %v11999_v3  ;;  %v5042_v6 = vshll.u32 %v5032_v4, 16 }
 0x614   : > { %5123 = vmatpush.bf16.msra.mxu0 %v11989_v20  ;;  %v5038_v12 = vrot.slane %v5036_v33, 7 }
 0x615   : > { %5013 = vmatpush.bf16.msrb.mxu3 %v11980_v21  ;;  %4925 = vmatpush.bf16.msrb.mxu2 %v11969_v50  ;;  %v5033_v21 = vshrl.u32 %v5029_v52, 16 }
 0x617   : > { %5218 = vmatpush.bf16.msra.mxu1 %v11998_v49  ;;  %v5035_v3 = vrot.slane %v5033_v21, 6 }
 0x619   : > { %v4571_v22 = vld.sshfl [vmem:[#allocation1] sm:$0xff pattern:$0x73625140]  ;;  %5014 = vmatpush.bf16.msrb.mxu3 %v11979_v26  ;;  %4926 = vmatpush.bf16.msrb.mxu2 %v11968_v8 }
 0x61a   : > { %4654 = vst [vmem:[#allocation1] ss:$4 sm:$0xff] %v14329_v45  ;;  %4629 = vmatmul.bf16.vlgmr.msra.gmra.mxu3 %v4571_v22  ;;  %v11988_v45 = vld [vmem:[%s15967_s6 + $0x1e0] sm:$0xff] }
 0x61b   : > { %4656 = vst [vmem:[#allocation1 + $0x1] ss:$4 sm:$0xff] %v14332_v63  ;;  %5124 = vmatpush.bf16.msra.mxu0 %v11988_v45  ;;  %5219 = vmatpush.bf16.msra.mxu1 %v11997_v47  ;;  %v5039_v45 = vor.u32 %v5038_v12, %v5035_v3 }
 0x61c   : > { %4658 = vst [vmem:[#allocation1 + $0x2] ss:$4 sm:$0xff] %v14335_v59 }
 0x61d   : > { %4661 = vst [vmem:[#allocation1 + $0x3] ss:$4 sm:$0xff] %v14573_v43  ;;  %5015 = vmatpush.bf16.msrb.mxu3 %v11978_v44  ;;  %v5040_v8 = vrot.slane %v5039_v45, 2  ;;  %v12033_v45 = vld [vmem:[%s15968_s7 + $0xf8] sm:$0xff]  ;;  %v12082_v44 = vld [vmem:[%s15968_s7 + $0x280] sm:$0xff] }
 0x61f   : > { %5125 = vmatpush.bf16.msra.mxu0 %v11987_v46  ;;  %5220 = vmatpush.bf16.msra.mxu1 %v11996_v55 }
 0x621   : > { %5016 = vmatpush.bf16.msrb.mxu3 %v11977_v38  ;;  %v5140_v38 = vrot.slane %v5032_v4, 7  ;;  %v12341_v4 = vld [vmem:[%s15971_s10] ss:$0 sm:$0xff] }
 0x623   : > { %5126 = vmatpush.bf16.msra.mxu0 %v11986_v14  ;;  %5221 = vmatpush.bf16.msra.mxu1 %v11995_v34 }
 0x624   : > { %v4662_v23 = vld.sshfl [vmem:[#allocation1] sm:$0xff pattern:$0x73625140] }
 0x625   : > { %4765 = vst [vmem:[#allocation1] ss:$4 sm:$0xff] %v14462_v31  ;;  %4720 = vmatmul.bf16.vlgmr.msrb.gmra.mxu0 %v4662_v23  ;;  %5017 = vmatpush.bf16.msrb.mxu3 %v11976_v28  ;;  %v11985_v31 = vld [vmem:[%s15967_s6 + $0x1c8] sm:$0xff] }
 0x626   : > { %4767 = vst [vmem:[#allocation1 + $0x1] ss:$4 sm:$0xff] %v14477_v15 }
 0x627   : > { %4769 = vst [vmem:[#allocation1 + $0x2] ss:$4 sm:$0xff] %v14487_v32  ;;  %5127 = vmatpush.bf16.msra.mxu0 %v11985_v31  ;;  %5222 = vmatpush.bf16.msra.mxu1 %v11994_v56 }
 0x628   : > { %4772 = vst [vmem:[#allocation1 + $0x3] ss:$4 sm:$0xff] %v14691_v19 }
 0x62b   : > { %5128 = vmatpush.bf16.msra.mxu0 %v11984_v30  ;;  %5223 = vmatpush.bf16.msra.mxu1 %v11993_v25 }
 0x62f   : > { %v4773_v2 = vld.sshfl [vmem:[#allocation1] sm:$0xff pattern:$0x73625140]  ;;  %5224 = vmatpush.bf16.msra.mxu1 %v11992_v53  ;;  %5605 = vmatpush.bf16.msrb.mxu0 %v12033_v45 }
 0x630   : > { %4861 = vst [vmem:[#allocation1] ss:$4 sm:$0xff] %v14594_v51  ;;  %4831 = vmatmul.bf16.vlgmr.msrb.gmra.mxu1 %v4773_v2  ;;  %v6439_v51 = vrot.slane %v14732_v60, 3 }
 0x631   : > { %4863 = vst [vmem:[#allocation1 + $0x1] ss:$4 sm:$0xff] %v14598_v29 }
 0x632   : > { %4865 = vst [vmem:[#allocation1 + $0x2] ss:$4 sm:$0xff] %v14603_v41  ;;  %v6445_v17 = vsel %vm4521_vm1, %v6438_v13, %v6439_v51  ;;  %v6611_v9 = vsel %vm5412_vm12, %v6438_v13, %v6439_v51 }
 0x633   : > { %4868 = vst [vmem:[#allocation1 + $0x3] ss:$4 sm:$0xff] %v14728_v39  ;;  %v14754_v26 = vsel %vm4268_vm7, %v6442_v35, %v6445_v17  ;;  %v6612_v20 = vsel %vm5414_vm2, %v6610_v57, %v6611_v9 }
 0x634   : > { %v6614_v61 = vrot.slane %v6612_v20, 1  ;;  %v6615_v50 = vshrl.u32 %v14754_v26, 16 }
 0x636   : > { %v6620_v49 = vshll.u32 %v6614_v61, 16 }
 0x638   : > { %v14768_v42 = vsel %vm14761_vm6, %v6615_v50, %v6620_v49  ;;  %v12000_v50 = vld [vmem:[%s15975_s14] sm:$0xff]  ;;  %v12025_v49 = vld [vmem:[%s15968_s7 + $0xb8] sm:$0xff] }
 0x639   : > { %5592 = vmatpush.bf16.msra.mxu3 %v12025_v49  ;;  %v12064_v49 = vld [vmem:[%s15968_s7 + $0x1f0] sm:$0xff] }
 0x63a   : > { %v4869_v22 = vld.sshfl [vmem:[#allocation1] sm:$0xff pattern:$0x73625140] }
 0x63b   : > { %4952 = vst [vmem:[#allocation1] ss:$4 sm:$0xff] %v14332_v63  ;;  %4927 = vmatmul.bf16.vlgmr.msrb.gmra.mxu2 %v4869_v22  ;;  %v5044_v63 = vrot.slane %v5042_v6, 7  ;;  %v12024_v6 = vld [vmem:[%s15968_s7 + $0xb0] sm:$0xff] }
 0x63c   : > { %4954 = vst [vmem:[#allocation1 + $0x1] ss:$4 sm:$0xff] %v14335_v59 }
 0x63d   : > { %4956 = vst [vmem:[#allocation1 + $0x2] ss:$4 sm:$0xff] %v14573_v43  ;;  %v5045_v59 = vsel %vm14441_vm15, %v5040_v8, %v5044_v63  ;;  %v10081_v43 = vrot.slane %v5029_v52, 9  ;;  %5593 = vmatpush.bf16.msra.mxu3 %v12024_v6  ;;  %v12001_v8 = vld [vmem:[%s15975_s14 + $0x8] sm:$0xff]  ;;  %v5243_v63 = vld [vmem:[%s15975_s14 + $0x10] sm:$0x3] }
 0x63e   : > { %4959 = vst [vmem:[#allocation1 + $0x3] ss:$4 sm:$0xff] %v14707_v11  ;;  %v12002_v6 = vld [vmem:[%s15968_s7] sm:$0xff] }
 0x63f   : > { %v5141_v1 = vsel %vm14562_vm9, %v10081_v43, %v5140_v38  ;;  %v12032_v43 = vld [vmem:[%s15968_s7 + $0xf0] sm:$0xff]  ;;  %v12023_v38 = vld [vmem:[%s15968_s7 + $0xa8] sm:$0xff] }
 0x640   : > { %5606 = vmatpush.bf16.msrb.mxu0 %v12032_v43  ;;  %v12036_v43 = vld [vmem:[%s15968_s7 + $0x110] sm:$0xff] }
 0x641   : > { %5594 = vmatpush.bf16.msra.mxu3 %v12023_v38  ;;  %v12044_v38 = vld [vmem:[%s15968_s7 + $0x150] sm:$0xff] }
 0x645   : > { %v4960_v47 = vld.sshfl [vmem:[#allocation1] sm:$0xff pattern:$0x73625140] }
 0x646   : > { %5063 = vst [vmem:[#allocation1] ss:$4 sm:$0xff] %v14477_v15  ;;  %5018 = vmatmul.bf16.vlgmr.msrb.gmra.mxu3 %v4960_v47  ;;  %v5254_v47 = vunpack.c.l.b16 %v5243_v63 }
 0x647   : > { %5065 = vst [vmem:[#allocation1 + $0x1] ss:$4 sm:$0xff] %v14487_v32 }
 0x648   : > { %5067 = vst [vmem:[#allocation1 + $0x2] ss:$4 sm:$0xff] %v14691_v19 }
 0x649   : > { %5070 = vst [vmem:[#allocation1 + $0x3] ss:$4 sm:$0xff] %v5045_v59  ;;  %v5257_v59 = vpack.c.b16 %v5254_v47, %v5254_v47  ;;  %v12057_v47 = vld [vmem:[%s15968_s7 + $0x1b8] sm:$0xff] }
 0x650   : > { %v5071_v46 = vld.sshfl [vmem:[#allocation1] sm:$0xff pattern:$0x73625140] }
 0x651   : > { %5129 = vmatmul.bf16.vlgmr.msra.gmra.mxu0 %v5071_v46  ;;  %5159 = vst [vmem:[#allocation1] ss:$4 sm:$0xff] %v14598_v29  ;;  %v12031_v46 = vld [vmem:[%s15968_s7 + $0xe8] sm:$0xff] }
 0x652   : > { %5161 = vst [vmem:[#allocation1 + $0x1] ss:$4 sm:$0xff] %v14603_v41  ;;  %5607 = vmatpush.bf16.msrb.mxu0 %v12031_v46  ;;  %v12063_v46 = vld [vmem:[%s15968_s7 + $0x1e8] sm:$0xff] }
 0x653   : > { %5163 = vst [vmem:[#allocation1 + $0x2] ss:$4 sm:$0xff] %v14728_v39 }
 0x654   : > { %5166 = vst [vmem:[#allocation1 + $0x3] ss:$4 sm:$0xff] %v5141_v1  ;;  %v12022_v1 = vld [vmem:[%s15968_s7 + $0xa0] sm:$0xff] }
 0x655   : > { %5595 = vmatpush.bf16.msra.mxu3 %v12022_v1 }
 0x65b   : > { %v5167_v15 = vld.sshfl [vmem:[#allocation1] sm:$0xff pattern:$0x73625140] }
 0x65c   : > { %5225 = vmatmul.bf16.vlgmr.msra.gmra.mxu1 %v5167_v15  ;;  %v12030_v15 = vld [vmem:[%s15968_s7 + $0xe0] sm:$0xff] }
 0x65d   : > { %5608 = vmatpush.bf16.msrb.mxu0 %v12030_v15 }
 0x681   : > { %v4440_v32 = vpop.f32.mrf.mxu1 }
 0x689   : > { %v4442_v23 = vpop.f32.mrf.mxu1 }
 0x692   : > { %v4511_v62 = vpop.f32.mrf.mxu2 }
 0x693   : > { %v4512_v31 = vadd.f32 %v4511_v62, %v4440_v32  ;;  %v12017_v32 = vld [vmem:[%s15968_s7 + $0x78] sm:$0xff] }
 0x694   : > { %v12021_v62 = vld [vmem:[%s15968_s7 + $0x98] sm:$0xff] }
 0x695   : > { %5596 = vmatpush.bf16.msra.mxu3 %v12021_v62  ;;  %v12056_v62 = vld [vmem:[%s15968_s7 + $0x1b0] sm:$0xff] }
 0x69a   : > { %v4513_v19 = vpop.f32.mrf.mxu2 }
 0x69b   : > { %v4514_v29 = vadd.f32 %v4513_v19, %v4442_v23  ;;  %v12029_v23 = vld [vmem:[%s15968_s7 + $0xd8] sm:$0xff]  ;;  %v12020_v19 = vld [vmem:[%s15968_s7 + $0x90] sm:$0xff] }
 0x69c   : > { %5609 = vmatpush.bf16.msrb.mxu0 %v12029_v23  ;;  %5597 = vmatpush.bf16.msra.mxu3 %v12020_v19 }
 0x69d   : > { %v4630_v55 = vpop.f32.mrf.mxu3 }
 0x69e   : > { %v4635_v37 = vadd.f32 %v4630_v55, %v4512_v31  ;;  %v12016_v55 = vld [vmem:[%s15968_s7 + $0x70] sm:$0xff] }
 0x69f   : > { %v12008_v31 = vld [vmem:[%s15968_s7 + $0x30] sm:$0xff] }
 0x6a2   : > { %v4721_v28 = vpop.f32.mrf.mxu0 }
 0x6a3   : > { %v4726_v30 = vadd.f32 %v4721_v28, %v4635_v37  ;;  %v12009_v28 = vld [vmem:[%s15968_s7 + $0x38] sm:$0xff]  ;;  %v12014_v37 = vld [vmem:[%s15968_s7 + $0x60] sm:$0xff] }
 0x6a4   : > { %5721 = vmatpush.bf16.msrb.mxu1 %v12009_v28  ;;  %v12062_v28 = vld [vmem:[%s15968_s7 + $0x1e0] sm:$0xff] }
 0x6a5   : > { %v4632_v34 = vpop.f32.mrf.mxu3 }
 0x6a6   : > { %v4636_v18 = vadd.f32 %v4632_v34, %v4514_v29  ;;  %v12015_v34 = vld [vmem:[%s15968_s7 + $0x68] sm:$0xff] }
 0x6a7   : > { %v12007_v29 = vld [vmem:[%s15968_s7 + $0x28] sm:$0xff] }
 0x6a8   : > { %5722 = vmatpush.bf16.msrb.mxu1 %v12008_v31 }
 0x6aa   : > { %v4723_v11 = vpop.f32.mrf.mxu0 }
 0x6ab   : > { %v4727_v39 = vadd.f32 %v4723_v11, %v4636_v18  ;;  %v12019_v11 = vld [vmem:[%s15968_s7 + $0x88] sm:$0xff]  ;;  %v12041_v18 = vld [vmem:[%s15968_s7 + $0x138] sm:$0xff] }
 0x6ac   : > { %5598 = vmatpush.bf16.msra.mxu3 %v12019_v11  ;;  %5723 = vmatpush.bf16.msrb.mxu1 %v12007_v29 }
 0x6ad   : > { %v4832_v14 = vpop.f32.mrf.mxu1 }
 0x6ae   : > { %v4837_v25 = vadd.f32 %v4832_v14, %v4726_v30  ;;  %v12028_v14 = vld [vmem:[%s15968_s7 + $0xd0] sm:$0xff]  ;;  %v12013_v30 = vld [vmem:[%s15968_s7 + $0x58] sm:$0xff] }
 0x6af   : > { %5610 = vmatpush.bf16.msrb.mxu0 %v12028_v14  ;;  %v12034_v14 = vld [vmem:[%s15968_s7 + $0x100] sm:$0xff] }
 0x6b5   : > { %v4834_v41 = vpop.f32.mrf.mxu1 }
 0x6b6   : > { %v4838_v40 = vadd.f32 %v4834_v41, %v4727_v39  ;;  %v12026_v41 = vld [vmem:[%s15968_s7 + $0xc0] sm:$0xff]  ;;  %v12012_v39 = vld [vmem:[%s15968_s7 + $0x50] sm:$0xff] }
 0x6be   : > { %v4928_v56 = vpop.f32.mrf.mxu2 }
 0x6bf   : > { %v4933_v13 = vadd.f32 %v4928_v56, %v4837_v25  ;;  %v12027_v56 = vld [vmem:[%s15968_s7 + $0xc8] sm:$0xff]  ;;  %v12006_v25 = vld [vmem:[%s15968_s7 + $0x20] sm:$0xff] }
 0x6c0   : > { %5611 = vmatpush.bf16.msrb.mxu0 %v12027_v56  ;;  %5724 = vmatpush.bf16.msrb.mxu1 %v12006_v25 }
 0x6c4   : > { %5612 = vmatpush.bf16.msrb.mxu0 %v12026_v41 }
 0x6c6   : > { %v4930_v52 = vpop.f32.mrf.mxu2 }
 0x6c7   : > { %v4934_v21 = vadd.f32 %v4930_v52, %v4838_v40  ;;  %v12040_v52 = vld [vmem:[%s15968_s7 + $0x130] sm:$0xff] }
 0x6c8   : > { %v12048_v40 = vld [vmem:[%s15968_s7 + $0x170] sm:$0xff] }
 0x6c9   : > { %v5019_v10 = vpop.f32.mrf.mxu3 }
 0x6ca   : > { %v5024_v58 = vadd.f32 %v5019_v10, %v4933_v13  ;;  %v12018_v10 = vld [vmem:[%s15968_s7 + $0x80] sm:$0xff]  ;;  %v12005_v13 = vld [vmem:[%s15968_s7 + $0x18] sm:$0xff] }
 0x6cb   : > { %5599 = vmatpush.bf16.msra.mxu3 %v12018_v10  ;;  %5725 = vmatpush.bf16.msrb.mxu1 %v12005_v13  ;;  %v14957_v10 = vld [vmem:[%s14721_s1] sm:$0xf] }
 0x6cc   : > { %v5358_v13 = vrot.slane %v14957_v10, 3 }
 0x6ce   : > { %v5130_v2 = vpop.f32.mrf.mxu0 }
 0x6cf   : > { %v5135_v17 = vadd.f32 %v5130_v2, %v5024_v58  ;;  %v12049_v2 = vld [vmem:[%s15968_s7 + $0x178] sm:$0xff]  ;;  %5889 = vmatpush.bf16.msrb.mxu3 %v12041_v18  ;;  %v12047_v58 = vld [vmem:[%s15968_s7 + $0x168] sm:$0xff] }
 0x6d0   : > { %5902 = vmatpush.bf16.msra.mxu0 %v12049_v2  ;;  %v12061_v18 = vld [vmem:[%s15968_s7 + $0x1d8] sm:$0xff]  ;;  %v14967_v2 = vld [vmem:[%s14721_s1 + $0x4] sm:$0xf] }
 0x6d1   : > { %v5021_v53 = vpop.f32.mrf.mxu3 }
 0x6d2   : > { %v5025_v33 = vadd.f32 %v5021_v53, %v4934_v21  ;;  %v12011_v53 = vld [vmem:[%s15968_s7 + $0x48] sm:$0xff] }
 0x6d3   : > { %5890 = vmatpush.bf16.msrb.mxu3 %v12040_v52  ;;  %v5356_v52 = vrot.slane %v14957_v10, 1 }
 0x6d4   : > { %5903 = vmatpush.bf16.msra.mxu0 %v12048_v40  ;;  %v5357_v40 = vrot.slane %v14957_v10, 2 }
 0x6d6   : > { %v5132_v35 = vpop.f32.mrf.mxu0 }
 0x6d7   : > { %v5136_v9 = vadd.f32 %v5132_v35, %v5025_v33  ;;  %v12004_v33 = vld [vmem:[%s15968_s7 + $0x10] sm:$0xff] }
 0x6d8   : > { %5904 = vmatpush.bf16.msra.mxu0 %v12047_v58  ;;  %5726 = vmatpush.bf16.msrb.mxu1 %v12004_v33  ;;  %v5361_v58 = vrot.slane %v14967_v2, 3  ;;  %v12060_v33 = vld [vmem:[%s15968_s7 + $0x1d0] sm:$0xff] }
 0x6d9   : > { %v5226_v51 = vpop.f32.mrf.mxu1 }
 0x6da   : > { %v5231_v57 = vadd.f32 %v5226_v51, %v5135_v17  ;;  %v12039_v51 = vld [vmem:[%s15968_s7 + $0x128] sm:$0xff] }
 0x6db   : > { %5891 = vmatpush.bf16.msrb.mxu3 %v12039_v51  ;;  %v5359_v51 = vrot.slane %v14967_v2, 1 }
 0x6dc   : > { %v5237_v22 = vadd.f32 %v12341_v4, %v5231_v57 }
 0x6e1   : > { %v5228_v3 = vpop.f32.mrf.mxu1 }
 0x6e2   : > { %v5232_v20 = vadd.f32 %v5228_v3, %v5136_v9  ;;  %v12010_v9 = vld [vmem:[%s15968_s7 + $0x40] sm:$0xff] }
 0x6e3   : > { %v12038_v3 = vld [vmem:[%s15968_s7 + $0x120] sm:$0xff] }
 0x6e4   : > { %v5238_v12 = vadd.f32 %v12341_v4, %v5232_v20  ;;  %v14897_v4 = vld.sshfl [vmem:[#allocation1 + $0x20] sm:$0xff pattern:$0x73625140]  ;;  %5892 = vmatpush.bf16.msrb.mxu3 %v12038_v3 }
 0x6e5   : > { %v12046_v20 = vld [vmem:[%s15968_s7 + $0x160] sm:$0xff] }
 0x6e6   : > { %v5244_v61 = vpack.c.bf16 %v5238_v12, %v5237_v22  ;;  %v12065_v22 = vld [vmem:[%s15968_s7 + $0x1f8] sm:$0xff]  ;;  %v12003_v12 = vld [vmem:[%s15968_s7 + $0x8] sm:$0xff]  ;;  %5905 = vmatpush.bf16.msra.mxu0 %v12046_v20 }
 0x6e7   : > { %5727 = vmatpush.bf16.msrb.mxu1 %v12003_v12  ;;  %v12053_v12 = vld [vmem:[%s15968_s7 + $0x198] sm:$0xff] }
 0x6e8   : > { %5275 = vmatpush.bf16.msra.mxu2 %v5244_v61  ;;  %v12037_v61 = vld [vmem:[%s15968_s7 + $0x118] sm:$0xff] }
 0x6e9   : > { %5893 = vmatpush.bf16.msrb.mxu3 %v12037_v61  ;;  %v5411_v61 = vsel %vm5410_vm11, %v14957_v10, %v5356_v52 }
 0x6eb   : > { %10138 = vmatmul.msk.bf16.vlgmr.msra.gmra.mxu2 %vm5258_vm10, %v12000_v50  ;;  %v12045_v50 = vld [vmem:[%s15968_s7 + $0x158] sm:$0xff]  ;;  %5728 = vmatpush.bf16.msrb.mxu1 %v12002_v6  ;;  %v12059_v6 = vld [vmem:[%s15968_s7 + $0x1c8] sm:$0xff] }
 0x6ec   : > { %5734 = vmatpush.bf16.msrb.mxu2 %v12017_v32  ;;  %5906 = vmatpush.bf16.msra.mxu0 %v12045_v50  ;;  %v12035_v32 = vld [vmem:[%s15968_s7 + $0x108] sm:$0xff]  ;;  %v5413_v50 = vsel %vm5412_vm12, %v5357_v40, %v5358_v13 }
 0x6ed   : > { %5894 = vmatpush.bf16.msrb.mxu3 %v12036_v43 }
 0x6ef   : > { %6063 = vmatpush.bf16.msra.mxu1 %v12057_v47  ;;  %v5415_v47 = vsel %vm5414_vm2, %v5411_v61, %v5413_v50  ;;  %v12072_v50 = vld [vmem:[%s15968_s7 + $0x230] sm:$0xff] }
 0x6f0   : > { %5735 = vmatpush.bf16.msrb.mxu2 %v12016_v55  ;;  %5907 = vmatpush.bf16.msra.mxu0 %v12044_v38  ;;  %v12043_v55 = vld [vmem:[%s15968_s7 + $0x148] sm:$0xff]  ;;  %v12052_v38 = vld [vmem:[%s15968_s7 + $0x190] sm:$0xff] }
 0x6f1   : > { %5895 = vmatpush.bf16.msrb.mxu3 %v12035_v32  ;;  %v5373_v32 = vsel %vm4520_vm0, %v14967_v2, %v5359_v51 }
 0x6f3   : > { %6064 = vmatpush.bf16.msra.mxu1 %v12056_v62 }
 0x6f4   : > { %5736 = vmatpush.bf16.msrb.mxu2 %v12015_v34  ;;  %5908 = vmatpush.bf16.msra.mxu0 %v12043_v55  ;;  %v5417_v55 = vrot.slane %v5415_v47, 1 }
 0x6f5   : > { %5896 = vmatpush.bf16.msrb.mxu3 %v12034_v14  ;;  %v4237_v14 = vpack.c.bf16 %v14897_v4, %v14897_v4 }
 0x6f8   : > { %5737 = vmatpush.bf16.msrb.mxu2 %v12014_v37  ;;  %v12055_v37 = vld [vmem:[%s15968_s7 + $0x1a8] sm:$0xff] }
 0x6f9   : > { %6065 = vmatpush.bf16.msra.mxu1 %v12055_v37 }
 0x6fb   : > { %10139 = vmatmul.msk.bf16.gmra.mxu2 %vm5258_vm10, %v12001_v8 }
 0x6fc   : > { %5738 = vmatpush.bf16.msrb.mxu2 %v12013_v30  ;;  %v12042_v30 = vld [vmem:[%s15968_s7 + $0x140] sm:$0xff] }
 0x6fd   : > { %5909 = vmatpush.bf16.msra.mxu0 %v12042_v30 }
 0x700   : > { %5739 = vmatpush.bf16.msrb.mxu2 %v12012_v39  ;;  %v12054_v39 = vld [vmem:[%s15968_s7 + $0x1a0] sm:$0xff] }
 0x701   : > { %6066 = vmatpush.bf16.msra.mxu1 %v12054_v39 }
 0x704   : > { %5740 = vmatpush.bf16.msrb.mxu2 %v12011_v53  ;;  %v5360_v53 = vrot.slane %v14967_v2, 2 }
 0x705   : > { %6067 = vmatpush.bf16.msra.mxu1 %v12053_v12 }
 0x706   : > { %v5376_v62 = vsel %vm4521_vm1, %v5360_v53, %v5361_v58 }
 0x708   : > { %5741 = vmatpush.bf16.msrb.mxu2 %v12010_v9 }
 0x709   : > { %6068 = vmatpush.bf16.msra.mxu1 %v12052_v38  ;;  %v12088_v38 = vld [vmem:[%s15968_s7 + $0x2b0] sm:$0xff] }
 0x70b   : > { %10140 = vmatmul.msk.bf16.gmra.mxu2 %vm5258_vm10, %v5257_v59 }
 0x70c   : > { %6076 = vmatpush.bf16.msra.mxu2 %v12065_v22 }
 0x710   : > { %6077 = vmatpush.bf16.msra.mxu2 %v12064_v49  ;;  %v5418_v49 = vsel %vm5410_vm11, %v14967_v2, %v5359_v51  ;;  %v12050_v51 = vld [vmem:[%s15968_s7 + $0x180] sm:$0xff] }
 0x714   : > { %6078 = vmatpush.bf16.msra.mxu2 %v12063_v46  ;;  %v5365_v46 = vsel %vm4520_vm0, %v14957_v10, %v5356_v52 }
 0x718   : > { %6079 = vmatpush.bf16.msra.mxu2 %v12062_v28 }
 0x71c   : > { %6080 = vmatpush.bf16.msra.mxu2 %v12061_v18  ;;  %v5443_v18 = vshll.u32 %v5417_v55, 16  ;;  %v12068_v55 = vld [vmem:[%s15968_s7 + $0x210] sm:$0xff] }
 0x720   : > { %6081 = vmatpush.bf16.msra.mxu2 %v12060_v33 }
 0x724   : > { %6082 = vmatpush.bf16.msra.mxu2 %v12059_v6  ;;  %v12097_v6 = vld [vmem:[%s15968_s7 + $0x2f8] sm:$0xff] }
 0x76e   : > { %v5277_v21 = vpop.f32.mrf.mxu2 }
 0x76f   : > { %v5296_v35 = vrot.slane %v5277_v21, 2  ;;  %v5297_v17 = vrot.slane %v5277_v21, 4  ;;  %v5298_v57 = vrot.slane %v5277_v21, 6  ;;  %5309 = vst [vmem:[#allocation1] ss:$4 sm:$0xff] %v5277_v21 }
 0x771   : > { %5316 = vst [vmem:[#allocation1 + $0x20] ss:$4 sm:$0xff] %v5298_v57  ;;  %v4236_v57 = vpack.c.bf16 %v14473_v16, %v14473_v16  ;;  %v5419_v16 = vsel %vm5412_vm12, %v5360_v53, %v5361_v58 }
 0x772   : > { %5311 = vst [vmem:[#allocation1 + $0x1] ss:$4 sm:$0xff] %v5296_v35 }
 0x773   : > { %5313 = vst [vmem:[#allocation1 + $0x2] ss:$4 sm:$0xff] %v5297_v17 }
 0x776   : > { %v5279_v45 = vpop.f32.mrf.mxu2 }
 0x777   : > { %v5299_v8 = vrot.slane %v5279_v45, 2  ;;  %v5300_v63 = vrot.slane %v5279_v45, 4  ;;  %5318 = vst [vmem:[#allocation1 + $0x21] ss:$4 sm:$0xff] %v5279_v45  ;;  %v5301_v59 = vrot.slane %v5279_v45, 6 }
 0x779   : > { %5320 = vst [vmem:[#allocation1 + $0x22] ss:$4 sm:$0xff] %v5299_v8 }
 0x77a   : > { %v5314_v1 = vld.sshfl [vmem:[#allocation1] sm:$0xff pattern:$0x73625140] }
 0x77b   : > { %v5344_v15 = vpack.c.bf16 %v5314_v1, %v5314_v1  ;;  %5322 = vst [vmem:[#allocation1] ss:$4 sm:$0xff] %v5300_v63  ;;  %v7085_v63 = vunpack.c.l.b16 %v4236_v57  ;;  %v5369_v1 = vsel %vm4521_vm1, %v5357_v40, %v5358_v13  ;;  %v7086_v40 = vunpack.c.l.b16 %v4237_v14 }
 0x77c   : > { %5323 = vst [vmem:[#allocation1 + $0x1] ss:$4 sm:$0xff] %v5301_v59 }
 0x77d   : > { %v7111_v23 = vunpack.c.l.b16 %v5344_v15  ;;  %v5420_v15 = vsel %vm5414_vm2, %v5418_v49, %v5419_v16  ;;  %v12080_v49 = vld [vmem:[%s15968_s7 + $0x270] sm:$0xff]  ;;  %v12071_v16 = vld [vmem:[%s15968_s7 + $0x228] sm:$0xff] }
 0x77e   : > { %v5282_v19 = vpop.f32.mrf.mxu2 }
 0x77f   : > { %v5302_v34 = vrot.slane %v5282_v19, 2  ;;  %v5303_v31 = vrot.slane %v5282_v19, 4  ;;  %v5304_v11 = vrot.slane %v5282_v19, 6  ;;  %v7117_v56 = vpack.c.b16 %v7111_v23, %v7111_v23  ;;  %5324 = vst [vmem:[#allocation1 + $0x2] ss:$4 sm:$0xff] %v5282_v19 }
 0x780   : > { %v5321_v29 = vld.sshfl [vmem:[#allocation1 + $0x20] sm:$0xff pattern:$0x73625140]  ;;  %v7091_v19 = vpack.c.b16 %v7085_v63, %v7085_v63 }
 0x781   : > { %5326 = vst [vmem:[#allocation1 + $0x20] ss:$4 sm:$0xff] %v5302_v34  ;;  %7123 = vrot.lane.b32.xlu2 %v7117_v56, %s12417_s22  ;;  %v5345_v41 = vpack.c.bf16 %v5321_v29, %v5321_v29  ;;  %v12058_v34 = vld [vmem:[%s15968_s7 + $0x1c0] sm:$0xff]  ;;  %v12051_v29 = vld [vmem:[%s15968_s7 + $0x188] sm:$0xff] }
 0x782   : > { %5327 = vst [vmem:[#allocation1 + $0x21] ss:$4 sm:$0xff] %v5303_v31  ;;  %v5370_v31 = vsel %vm4268_vm7, %v5365_v46, %v5369_v1  ;;  %6083 = vmatpush.bf16.msra.mxu2 %v12058_v34  ;;  %6069 = vmatpush.bf16.msra.mxu1 %v12051_v29  ;;  %v12069_v46 = vld [vmem:[%s15968_s7 + $0x218] sm:$0xff] }
 0x783   : > { %5328 = vst [vmem:[#allocation1 + $0x22] ss:$4 sm:$0xff] %v5304_v11  ;;  %v7112_v25 = vunpack.c.l.b16 %v5345_v41  ;;  %v5422_v11 = vrot.slane %v5420_v15, 1  ;;  %v15018_v41 = vsel %vm4268_vm7, %v5373_v32, %v5376_v62  ;;  %v5438_v30 = vshrl.u32 %v5370_v31, 16  ;;  %v12077_v1 = vld [vmem:[%s15968_s7 + $0x258] sm:$0xff]  ;;  %v12095_v32 = vld [vmem:[%s15968_s7 + $0x2e8] sm:$0xff] }
 0x784   : > { %v5446_v39 = vshrl.u32 %v15018_v41, 16  ;;  %v15082_v15 = vld [vmem:[%s14721_s1 + $0x8] sm:$0xf]  ;;  %s12366_s1 = sshra.s32 %s8877_s19, 4  ;;  %s12367_s1 = int_to_ptr.hbm [resolvable:$true] %s12366_s1 }
 0x785   : > { %v7118_v21 = vpack.c.b16 %v7112_v25, %v7112_v25  ;;  %v5451_v52 = vshll.u32 %v5422_v11, 16  ;;  %v5445_v53 = vsel %vm14761_vm6, %v5438_v30, %v5443_v18  ;;  %v12087_v62 = vld [vmem:[%s15968_s7 + $0x2a8] sm:$0xff]  ;;  %v5917_v14 = vrot.slane %v15082_v15, 1  ;;  %v12094_v11 = vld [vmem:[%s15968_s7 + $0x2e0] sm:$0xff]  ;;  %p12373_p0 = scmp.lt.s32.totalorder %s12367_s1, %s15979_s18 }
 0x786   : > { %v5284_v35 = vpop.f32.mrf.mxu2  ;;  %v5325_v17 = vld.sshfl [vmem:[#allocation1] sm:$0xff pattern:$0x73625140]  ;;  %6070 = vmatpush.bf16.msra.mxu1 %v12050_v51  ;;  %v5918_v34 = vrot.slane %v15082_v15, 2  ;;  %v12075_v30 = vld [vmem:[%s15968_s7 + $0x248] sm:$0xff] }
 0x787   : > { %v5305_v9 = vrot.slane %v5284_v35, 2  ;;  %v5306_v3 = vrot.slane %v5284_v35, 4  ;;  %v5307_v20 = vrot.slane %v5284_v35, 6  ;;  %v5346_v22 = vpack.c.bf16 %v5325_v17, %v5325_v17  ;;  %5330 = vst [vmem:[#allocation1] ss:$4 sm:$0xff] %v5284_v35  ;;  %v12066_v51 = vld [vmem:[%s15968_s7 + $0x200] sm:$0xff] }
 0x788   : > { %v15030_v33 = vsel %vm14761_vm6, %v5446_v39, %v5451_v52  ;;  %v7092_v35 = vpack.c.b16 %v7086_v40, %v7086_v40  ;;  %v5922_v18 = vsel %vm4520_vm0, %v15082_v15, %v5917_v14  ;;  %v12093_v52 = vld [vmem:[%s15968_s7 + $0x2d8] sm:$0xff]  ;;  %vm6980_vm0 = vcmask 31744  }
 0x789   : > { %7125 = vrot.lane.b32.xlu2 %v7118_v21, %s12417_s22  ;;  %v7113_v45 = vunpack.c.l.b16 %v5346_v22  ;;  %5331 = vst [vmem:[#allocation1 + $0x1] ss:$4 sm:$0xff] %v5305_v9  ;;  %v12081_v22 = vld [vmem:[%s15968_s7 + $0x278] sm:$0xff] }
 0x78a   : > { %v5329_v8 = vld.sshfl [vmem:[#allocation1 + $0x20] sm:$0xff pattern:$0x73625140]  ;;  %5332 = vst [vmem:[#allocation1 + $0x2] ss:$4 sm:$0xff] %v5306_v3  ;;  %v12085_v40 = vld [vmem:[%s15968_s7 + $0x298] sm:$0xff] }
 0x78b   : > { %5334 = vst [vmem:[#allocation1 + $0x20] ss:$4 sm:$0xff] %v5307_v20  ;;  %v7119_v59 = vpack.c.b16 %v7113_v45, %v7113_v45  ;;  %v5347_v43 = vpack.c.bf16 %v5329_v8, %v5329_v8  ;;  %v12073_v20 = vld [vmem:[%s15968_s7 + $0x238] sm:$0xff]  ;;  %v12079_v45 = vld [vmem:[%s15968_s7 + $0x268] sm:$0xff] }
 0x78c   : > { %v12089_v8 = vld [vmem:[%s15968_s7 + $0x2b8] sm:$0xff] }
 0x78d   : > { %7127 = vrot.lane.b32.xlu0 %v7119_v59, %s12417_s22  ;;  %v7114_v23 = vunpack.c.l.b16 %v5347_v43  ;;  %v12070_v59 = vld [vmem:[%s15968_s7 + $0x220] sm:$0xff] }
 0x78e   : > { %v5287_v28 = vpop.f32.mrf.mxu2  ;;  %v12078_v43 = vld [vmem:[%s15968_s7 + $0x260] sm:$0xff] }
 0x78f   : > { %v5308_v56 = vrot.slane %v5287_v28, 2  ;;  %5335 = vst [vmem:[#allocation1 + $0x21] ss:$4 sm:$0xff] %v5287_v28  ;;  %v7120_v37 = vpack.c.b16 %v7114_v23, %v7114_v23  ;;  %v12076_v28 = vld [vmem:[%s15968_s7 + $0x250] sm:$0xff] }
 0x791   : > { %5336 = vst [vmem:[#allocation1 + $0x22] ss:$4 sm:$0xff] %v5308_v56  ;;  %7129 = vrot.lane.b32.xlu1 %v7120_v37, %s12417_s22  ;;  %7101 = vrot.lane.b32.xlu2 %v7091_v19, %s16112_s23  ;;  %v5333_v4 = vld.sshfl [vmem:[#allocation1] sm:$0xff pattern:$0x73625140]  ;;  %v6090_v37 = vsel %vm5410_vm11, %v15082_v15, %v5917_v14  ;;  %v12099_v14 = vld [vmem:[%s15968_s7 + $0x308] sm:$0xff] }
 0x792   : > { %v5348_v25 = vpack.c.bf16 %v5333_v4, %v5333_v4  ;;  %v12086_v56 = vld [vmem:[%s15968_s7 + $0x2a0] sm:$0xff]  ;;  %v12067_v4 = vld [vmem:[%s15968_s7 + $0x208] sm:$0xff] }
 0x794   : > { %v7115_v13 = vunpack.c.l.b16 %v5348_v25 }
 0x796   : > { %v7121_v58 = vpack.c.b16 %v7115_v13, %v7115_v13  ;;  %v5289_v21 = vpop.f32.mrf.mxu2 }
 0x798   : > { %v5337_v17 = vld.sshfl [vmem:[#allocation1 + $0x20] sm:$0xff pattern:$0x73625140]  ;;  %7131 = vrot.lane.b32.xlu0 %v7121_v58, %s12417_s22 }
 0x799   : > { %7103 = vrot.lane.b32.xlu1 %v7092_v35, %s16112_s23  ;;  %5488 = vst [vmem:[#allocation1] ss:$9 sm:$0xff] %v5445_v53  ;;  %v5349_v57 = vpack.c.bf16 %v5337_v17, %v5337_v17  ;;  %v12105_v53 = vld [vmem:[%s15968_s7 + $0x338] sm:$0xff]  ;;  %v12074_v58 = vld [vmem:[%s15968_s7 + $0x240] sm:$0xff]  ;;  %s613_s23 = scalar_lea.vmem [#allocation2], %s8979_s24  ;;  %s12368_s24 = scalar_lea.hbm %s12367_s1, 16 }
 0x79a   : > { %5491 = vst [vmem:[#allocation1 + $0x1] ss:$9 sm:$0xff] %v15030_v33  ;;  %s8874_s27 = sshll.u32 %s613_s23, 4  ;;  %p12369_p11 = scmp.ne.s32.totalorder %s12367_s1, %s12368_s24  ;;  %s8875_s27 = int_to_ptr.vmem [resolvable:$true] %s8874_s27 }
 0x79b   : > { %v7116_v9 = vunpack.c.l.b16 %v5349_v57  ;;  %v12113_v57 = vld [vmem:[%s15968_s7 + $0x378] sm:$0xff]  ;;  %p12374_p1 = scmp.lt.s32.totalorder %s12372_s21, %s12368_s24 }
 0x79c   : > { %p12370_p12 = pnand %p12369_p11, %p12553_p5 }
 0x79d   : > { %v7122_v3 = vpack.c.b16 %v7116_v9, %v7116_v9  ;;  %v12092_v9 = vld [vmem:[%s15968_s7 + $0x2d0] sm:$0xff]  ;;  %p12375_p2 = por %p12374_p1, %p12373_p0 }
 0x79e   : > { %p12371_p13 = pneg %p12370_p12 }
 0x79f   : > { %7133 = vrot.lane.b32.xlu2 %v7122_v3, %s12417_s22  ;;  %v12084_v3 = vld [vmem:[%s15968_s7 + $0x290] sm:$0xff] }
 0x7a0   : > { %p12376_p3 = pnand %p12375_p2, %p12371_p13 }
 0x7a1   : > { %v5492_v12 = vld [vmem:[#allocation1] sm:$0xff]  ;;  %v5493_v61 = vld [vmem:[#allocation1 + $0x9] sm:$0xff] }
 0x7a2   : > { %5600 = vmatmul.bf16.vlgmr.msra.gmra.mxu3 %v5492_v12  ;;  %5618 = vst [vmem:[#allocation1] ss:$9 sm:$0xff] %v5370_v31  ;;  %5613 = vmatmul.bf16.vlgmr.msrb.gmra.mxu0 %v5493_v61  ;;  %v5919_v31 = vrot.slane %v15082_v15, 3  ;;  %v12112_v12 = vld [vmem:[%s15968_s7 + $0x370] sm:$0xff]  ;;  %v12091_v61 = vld [vmem:[%s15968_s7 + $0x2c8] sm:$0xff] }
 0x7a3   : > { %5620 = vst [vmem:[#allocation1 + $0x1] ss:$9 sm:$0xff] %v15018_v41  ;;  %6240 = vmatpush.bf16.msra.mxu3 %v12073_v20  ;;  %6253 = vmatpush.bf16.msrb.mxu0 %v12081_v22 }
 0x7a4   : > { %v6091_v29 = vsel %vm5412_vm12, %v5918_v34, %v5919_v31  ;;  %v5925_v25 = vsel %vm4521_vm1, %v5918_v34, %v5919_v31  ;;  %v12107_v34 = vld [vmem:[%s15968_s7 + $0x348] sm:$0xff]  ;;  %v12118_v31 = vld [vmem:[%s15968_s7 + $0x3a0] sm:$0xff]  ;;  %vm7135_vm1 = vcmask 261120  }
 0x7a5   : > { %v6092_v39 = vsel %vm5414_vm2, %v6090_v37, %v6091_v29  ;;  %v15125_v13 = vsel %vm4268_vm7, %v5922_v18, %v5925_v25  ;;  %v12125_v37 = vld [vmem:[%s15968_s7 + $0x3d8] sm:$0xff]  ;;  %v12098_v29 = vld [vmem:[%s15968_s7 + $0x300] sm:$0xff] }
 0x7a6   : > { %v6094_v21 = vrot.slane %v6092_v39, 1  ;;  %v6095_v20 = vshrl.u32 %v15125_v13, 16  ;;  %v12145_v18 = vld [vmem:[%s15968_s7 + $0x478] sm:$0xff]  ;;  %v12124_v39 = vld [vmem:[%s15968_s7 + $0x3d0] sm:$0xff] }
 0x7a7   : > { %6241 = vmatpush.bf16.msra.mxu3 %v12072_v50  ;;  %6254 = vmatpush.bf16.msrb.mxu0 %v12080_v49  ;;  %v12083_v50 = vld [vmem:[%s15968_s7 + $0x288] sm:$0xff]  ;;  %v12117_v25 = vld [vmem:[%s15968_s7 + $0x398] sm:$0xff] }
 0x7a8   : > { %v6100_v22 = vshll.u32 %v6094_v21, 16 }
 0x7aa   : > { %v5621_v63 = vld [vmem:[#allocation1] sm:$0xff]  ;;  %v5622_v47 = vld [vmem:[#allocation1 + $0x9] sm:$0xff]  ;;  %v15162_v49 = vsel %vm14761_vm6, %v6095_v20, %v6100_v22  ;;  %v12133_v20 = vld [vmem:[%s15968_s7 + $0x418] sm:$0xff] }
 0x7ab   : > { %5747 = vst [vmem:[#allocation1] sm:$0xff] %v14957_v10  ;;  %6242 = vmatpush.bf16.msra.mxu3 %v12071_v16  ;;  %6255 = vmatpush.bf16.msrb.mxu0 %v12079_v45  ;;  %v12096_v10 = vld [vmem:[%s15968_s7 + $0x2f0] sm:$0xff]  ;;  %v12103_v16 = vld [vmem:[%s15968_s7 + $0x328] sm:$0xff] }
 0x7ac   : > { %5750 = vst [vmem:[#allocation1 + $0x10] sm:$0xff] %v14967_v2  ;;  %5742 = vmatmul.bf16.vlgmr.msrb.gmra.mxu2 %v5622_v47  ;;  %5729 = vmatmul.bf16.vlgmr.msrb.gmra.mxu1 %v5621_v63  ;;  %v12111_v45 = vld [vmem:[%s15968_s7 + $0x368] sm:$0xff]  ;;  %v12090_v63 = vld [vmem:[%s15968_s7 + $0x2c0] sm:$0xff]  ;;  %v12129_v47 = vld [vmem:[%s15968_s7 + $0x3f8] sm:$0xff] }
 0x7ad   : > { %6422 = vmatpush.bf16.msrb.mxu2 %v12097_v6  ;;  %6409 = vmatpush.bf16.msrb.mxu1 %v12089_v8 }
 0x7af   : > { %6243 = vmatpush.bf16.msra.mxu3 %v12070_v59  ;;  %6256 = vmatpush.bf16.msrb.mxu0 %v12078_v43  ;;  %v12121_v59 = vld [vmem:[%s15968_s7 + $0x3b8] sm:$0xff]  ;;  %v12110_v43 = vld [vmem:[%s15968_s7 + $0x360] sm:$0xff] }
 0x7b1   : > { %6423 = vmatpush.bf16.msrb.mxu2 %v12096_v10  ;;  %6410 = vmatpush.bf16.msrb.mxu1 %v12088_v38  ;;  %v12128_v10 = vld [vmem:[%s15968_s7 + $0x3f0] sm:$0xff]  ;;  %v12101_v38 = vld [vmem:[%s15968_s7 + $0x318] sm:$0xff] }
 0x7b2   : > { %v5749_v23 = vld [vmem:[#allocation1 + $0x1] ss:$2 sm:$0xff] }
 0x7b3   : > { %6244 = vmatpush.bf16.msra.mxu3 %v12069_v46  ;;  %6257 = vmatpush.bf16.msrb.mxu0 %v12077_v1  ;;  %v5752_v19 = vld [vmem:[#allocation1 + $0x11] ss:$2 sm:$0xff] }
 0x7b4   : > { %5786 = vst [vmem:[#allocation1] ss:$9 sm:$0xff] %v5749_v23  ;;  %v12109_v46 = vld [vmem:[%s15968_s7 + $0x358] sm:$0xff]  ;;  %v12120_v1 = vld [vmem:[%s15968_s7 + $0x3b0] sm:$0xff]  ;;  %v12127_v23 = vld [vmem:[%s15968_s7 + $0x3e8] sm:$0xff] }
 0x7b5   : > { %5788 = vst [vmem:[#allocation1 + $0x1] ss:$9 sm:$0xff] %v5752_v19  ;;  %6424 = vmatpush.bf16.msrb.mxu2 %v12095_v32  ;;  %6411 = vmatpush.bf16.msrb.mxu1 %v12087_v62  ;;  %v12126_v19 = vld [vmem:[%s15968_s7 + $0x3e0] sm:$0xff] }
 0x7b7   : > { %6245 = vmatpush.bf16.msra.mxu3 %v12068_v55  ;;  %6258 = vmatpush.bf16.msrb.mxu0 %v12076_v28  ;;  %v12100_v55 = vld [vmem:[%s15968_s7 + $0x310] sm:$0xff] }
 0x7b8   : > { %v12108_v28 = vld [vmem:[%s15968_s7 + $0x350] sm:$0xff] }
 0x7b9   : > { %6425 = vmatpush.bf16.msrb.mxu2 %v12094_v11  ;;  %6412 = vmatpush.bf16.msrb.mxu1 %v12086_v56 }
 0x7bb   : > { %6246 = vmatpush.bf16.msra.mxu3 %v12067_v4  ;;  %6259 = vmatpush.bf16.msrb.mxu0 %v12075_v30  ;;  %v12106_v4 = vld [vmem:[%s15968_s7 + $0x340] sm:$0xff]  ;;  %v12137_v30 = vld [vmem:[%s15968_s7 + $0x438] sm:$0xff] }
 0x7bc   : > { %v5789_v35 = vld [vmem:[#allocation1] sm:$0xff]  ;;  %v5790_v17 = vld [vmem:[#allocation1 + $0x9] sm:$0xff] }
 0x7bd   : > { %5897 = vmatmul.bf16.vlgmr.msrb.gmra.mxu3 %v5789_v35  ;;  %5960 = vst [vmem:[#allocation1] ss:$9 sm:$0xff] %v15018_v41  ;;  %5910 = vmatmul.bf16.vlgmr.msra.gmra.mxu0 %v5790_v17  ;;  %v12104_v41 = vld [vmem:[%s15968_s7 + $0x330] sm:$0xff]  ;;  %v12135_v35 = vld [vmem:[%s15968_s7 + $0x428] sm:$0xff] }
 0x7be   : > { %5962 = vst [vmem:[#allocation1 + $0x1] ss:$9 sm:$0xff] %v15125_v13  ;;  %6426 = vmatpush.bf16.msrb.mxu2 %v12093_v52  ;;  %6413 = vmatpush.bf16.msrb.mxu1 %v12085_v40  ;;  %v12136_v52 = vld [vmem:[%s15968_s7 + $0x430] sm:$0xff]  ;;  %v12143_v17 = vld [vmem:[%s15968_s7 + $0x468] sm:$0xff] }
 0x7bf   : > { %6247 = vmatpush.bf16.msra.mxu3 %v12066_v51  ;;  %6260 = vmatpush.bf16.msrb.mxu0 %v12074_v58  ;;  %v12144_v40 = vld [vmem:[%s15968_s7 + $0x470] sm:$0xff]  ;;  %v12123_v51 = vld [vmem:[%s15968_s7 + $0x3c8] sm:$0xff] }
 0x7c2   : > { %6427 = vmatpush.bf16.msrb.mxu2 %v12092_v9  ;;  %6414 = vmatpush.bf16.msrb.mxu1 %v12084_v3  ;;  %v12115_v9 = vld [vmem:[%s15968_s7 + $0x388] sm:$0xff]  ;;  %v12134_v3 = vld [vmem:[%s15968_s7 + $0x420] sm:$0xff] }
 0x7c3   : > { %6583 = vmatpush.bf16.msrb.mxu3 %v12105_v53  ;;  %6596 = vmatpush.bf16.msra.mxu0 %v12113_v57  ;;  %v12116_v53 = vld [vmem:[%s15968_s7 + $0x390] sm:$0xff]  ;;  %v12122_v57 = vld [vmem:[%s15968_s7 + $0x3c0] sm:$0xff] }
 0x7c5   : > { %v5964_v6 = vld [vmem:[#allocation1 + $0x9] sm:$0xff]  ;;  %v5963_v8 = vld [vmem:[#allocation1] sm:$0xff] }
 0x7c6   : > { %6428 = vmatpush.bf16.msrb.mxu2 %v12091_v61  ;;  %6136 = vst [vmem:[#allocation1] ss:$9 sm:$0xff] %v15030_v33  ;;  %6415 = vmatpush.bf16.msrb.mxu1 %v12083_v50  ;;  %v12102_v33 = vld [vmem:[%s15968_s7 + $0x320] sm:$0xff]  ;;  %v12132_v61 = vld [vmem:[%s15968_s7 + $0x410] sm:$0xff] }
 0x7c7   : > { %6584 = vmatpush.bf16.msrb.mxu3 %v12104_v41  ;;  %6597 = vmatpush.bf16.msra.mxu0 %v12112_v12  ;;  %6139 = vst [vmem:[#allocation1 + $0x1] ss:$9 sm:$0xff] %v15162_v49  ;;  %v12141_v12 = vld [vmem:[%s15968_s7 + $0x458] sm:$0xff]  ;;  %v12140_v50 = vld [vmem:[%s15968_s7 + $0x450] sm:$0xff] }
 0x7c8   : > { %6084 = vmatmul.bf16.vlgmr.msra.gmra.mxu2 %v5964_v6  ;;  %6071 = vmatmul.bf16.vlgmr.msra.gmra.mxu1 %v5963_v8  ;;  %v12130_v6 = vld [vmem:[%s15968_s7 + $0x400] sm:$0xff] }
 0x7c9   : > { %v12138_v8 = vld [vmem:[%s15968_s7 + $0x440] sm:$0xff] }
 0x7ca   : > { %6429 = vmatpush.bf16.msrb.mxu2 %v12090_v63  ;;  %6416 = vmatpush.bf16.msrb.mxu1 %v12082_v44 }
 0x7cb   : > { %6585 = vmatpush.bf16.msrb.mxu3 %v12103_v16  ;;  %6598 = vmatpush.bf16.msra.mxu0 %v12111_v45  ;;  %v12131_v16 = vld [vmem:[%s15968_s7 + $0x408] sm:$0xff] }
 0x7ce   : > { %6773 = vmatpush.bf16.msra.mxu2 %v12129_v47  ;;  %6760 = vmatpush.bf16.msra.mxu1 %v12121_v59  ;;  %v6140_v32 = vld [vmem:[#allocation1] sm:$0xff]  ;;  %v6141_v62 = vld [vmem:[#allocation1 + $0x9] sm:$0xff] }
 0x7cf   : > { %6586 = vmatpush.bf16.msrb.mxu3 %v12102_v33  ;;  %6599 = vmatpush.bf16.msra.mxu0 %v12110_v43  ;;  %6267 = vst [vmem:[#allocation1] sm:$0xff] %v14967_v2  ;;  %v12119_v2 = vld [vmem:[%s15968_s7 + $0x3a8] sm:$0xff] }
 0x7d0   : > { %6248 = vmatmul.bf16.vlgmr.msra.gmra.mxu3 %v6140_v32  ;;  %6270 = vst [vmem:[#allocation1 + $0x10] sm:$0xff] %v15082_v15  ;;  %6261 = vmatmul.bf16.vlgmr.msrb.gmra.mxu0 %v6141_v62 }
 0x7d2   : > { %6774 = vmatpush.bf16.msra.mxu2 %v12128_v10  ;;  %6761 = vmatpush.bf16.msra.mxu1 %v12120_v1 }
 0x7d3   : > { %6587 = vmatpush.bf16.msrb.mxu3 %v12101_v38  ;;  %6600 = vmatpush.bf16.msra.mxu0 %v12109_v46 }
 0x7d6   : > { %6775 = vmatpush.bf16.msra.mxu2 %v12127_v23  ;;  %6762 = vmatpush.bf16.msra.mxu1 %v12119_v2  ;;  %v6269_v11 = vld [vmem:[#allocation1 + $0x1] ss:$2 sm:$0xff] }
 0x7d7   : > { %6588 = vmatpush.bf16.msrb.mxu3 %v12100_v55  ;;  %6601 = vmatpush.bf16.msra.mxu0 %v12108_v28  ;;  %v6272_v56 = vld [vmem:[#allocation1 + $0x11] ss:$2 sm:$0xff] }
 0x7d8   : > { %6306 = vst [vmem:[#allocation1] ss:$9 sm:$0xff] %v6269_v11 }
 0x7d9   : > { %6308 = vst [vmem:[#allocation1 + $0x1] ss:$9 sm:$0xff] %v6272_v56 }
 0x7da   : > { %6776 = vmatpush.bf16.msra.mxu2 %v12126_v19  ;;  %6763 = vmatpush.bf16.msra.mxu1 %v12118_v31 }
 0x7db   : > { %6589 = vmatpush.bf16.msrb.mxu3 %v12099_v14  ;;  %6602 = vmatpush.bf16.msra.mxu0 %v12107_v34 }
 0x7de   : > { %6777 = vmatpush.bf16.msra.mxu2 %v12125_v37  ;;  %6764 = vmatpush.bf16.msra.mxu1 %v12117_v25 }
 0x7df   : > { %6590 = vmatpush.bf16.msrb.mxu3 %v12098_v29  ;;  %6603 = vmatpush.bf16.msra.mxu0 %v12106_v4 }
 0x7e0   : > { %v6310_v58 = vld [vmem:[#allocation1 + $0x9] sm:$0xff]  ;;  %v6309_v21 = vld [vmem:[#allocation1] sm:$0xff] }
 0x7e1   : > { %6480 = vst [vmem:[#allocation1] ss:$9 sm:$0xff] %v15125_v13  ;;  %6430 = vmatmul.bf16.vlgmr.msrb.gmra.mxu2 %v6310_v58  ;;  %6417 = vmatmul.bf16.vlgmr.msrb.gmra.mxu1 %v6309_v21  ;;  %v12114_v13 = vld [vmem:[%s15968_s7 + $0x380] sm:$0xff] }
 0x7e2   : > { %6778 = vmatpush.bf16.msra.mxu2 %v12124_v39  ;;  %6482 = vst [vmem:[#allocation1 + $0x1] ss:$9 sm:$0xff] %v14754_v26  ;;  %6765 = vmatpush.bf16.msra.mxu1 %v12116_v53  ;;  %v12142_v26 = vld [vmem:[%s15968_s7 + $0x460] sm:$0xff] }
 0x7e3   : > { %6929 = vmatpush.bf16.msra.mxu3 %v12137_v30  ;;  %6942 = vmatpush.bf16.msrb.mxu0 %v12145_v18 }
 0x7e6   : > { %6779 = vmatpush.bf16.msra.mxu2 %v12123_v51  ;;  %6766 = vmatpush.bf16.msra.mxu1 %v12115_v9 }
 0x7e7   : > { %6930 = vmatpush.bf16.msra.mxu3 %v12136_v52  ;;  %6943 = vmatpush.bf16.msrb.mxu0 %v12144_v40 }
 0x7e9   : > { %v6483_v22 = vld [vmem:[#allocation1] sm:$0xff]  ;;  %v6484_v41 = vld [vmem:[#allocation1 + $0x9] sm:$0xff] }
 0x7ea   : > { %6780 = vmatpush.bf16.msra.mxu2 %v12122_v57  ;;  %6591 = vmatmul.bf16.vlgmr.msrb.gmra.mxu3 %v6483_v22  ;;  %6656 = vst [vmem:[#allocation1] ss:$9 sm:$0xff] %v15162_v49 }
 0x7eb   : > { %6931 = vmatpush.bf16.msra.mxu3 %v12135_v35  ;;  %6944 = vmatpush.bf16.msrb.mxu0 %v12143_v17  ;;  %6659 = vst [vmem:[#allocation1 + $0x1] ss:$9 sm:$0xff] %v14768_v42  ;;  %v12139_v42 = vld [vmem:[%s15968_s7 + $0x448] sm:$0xff] }
 0x7ec   : > { %6604 = vmatmul.bf16.vlgmr.msra.gmra.mxu0 %v6484_v41  ;;  %6767 = vmatpush.bf16.msra.mxu1 %v12114_v13 }
 0x7ef   : > { %6932 = vmatpush.bf16.msra.mxu3 %v12134_v3  ;;  %6945 = vmatpush.bf16.msrb.mxu0 %v12142_v26 }
 0x7f2   : > { %v6660_v49 = vld [vmem:[#allocation1] sm:$0xff]  ;;  %v6661_v45 = vld [vmem:[#allocation1 + $0x9] sm:$0xff] }
 0x7f3   : > { %6933 = vmatpush.bf16.msra.mxu3 %v12133_v20  ;;  %6946 = vmatpush.bf16.msrb.mxu0 %v12141_v12  ;;  %6787 = vst [vmem:[#allocation1] sm:$0xff] %v15082_v15 }
 0x7f4   : > { %6781 = vmatmul.bf16.vlgmr.msra.gmra.mxu2 %v6661_v45  ;;  %6768 = vmatmul.bf16.vlgmr.msra.gmra.mxu1 %v6660_v49  ;;  %6790 = vst [vmem:[#allocation1 + $0x10] sm:$0xff] %v14732_v60 }
 0x7f7   : > { %6934 = vmatpush.bf16.msra.mxu3 %v12132_v61  ;;  %6947 = vmatpush.bf16.msrb.mxu0 %v12140_v50 }
 0x7fa   : > { %v6789_v63 = vld [vmem:[#allocation1 + $0x1] ss:$2 sm:$0xff] }
 0x7fb   : > { %6935 = vmatpush.bf16.msra.mxu3 %v12131_v16  ;;  %6948 = vmatpush.bf16.msrb.mxu0 %v12139_v42  ;;  %v6792_v44 = vld [vmem:[#allocation1 + $0x11] ss:$2 sm:$0xff] }
 0x7fc   : > { %6826 = vst [vmem:[#allocation1] ss:$9 sm:$0xff] %v6789_v63 }
 0x7fd   : > { %6828 = vst [vmem:[#allocation1 + $0x1] ss:$9 sm:$0xff] %v6792_v44 }
 0x7ff   : > { %6936 = vmatpush.bf16.msra.mxu3 %v12130_v6  ;;  %6949 = vmatpush.bf16.msrb.mxu0 %v12138_v8  ;;  %v12342_v6 = vld [vmem:[%s15972_s11] ss:$0 sm:$0xff] }
 0x804   : > { %v6829_v15 = vld [vmem:[#allocation1] sm:$0xff]  ;;  %v6830_v47 = vld [vmem:[#allocation1 + $0x9] sm:$0xff] }
 0x805   : > { %6937 = vmatmul.bf16.vlgmr.msra.gmra.mxu3 %v6829_v15  ;;  %6950 = vmatmul.bf16.vlgmr.msrb.gmra.mxu0 %v6830_v47 }
 0x81f   : > { %v5614_v60 = vpop.f32.mrf.mxu0 }
 0x825   : > { %v5601_v59 = vpop.f32.mrf.mxu3 }
 0x826   : > { %v5615_v33 = vadd.f32 %v5614_v60, %v5601_v59  ;;  %v12146_v59 = vld [vmem:[%s15976_s15] sm:$0xff] }
 0x827   : > { %v5616_v43 = vpop.f32.mrf.mxu0 }
 0x828   : > { %v12179_v43 = vld [vmem:[%s15977_s16 + $0xf8] sm:$0xff] }
 0x829   : > { %v5730_v10 = vpop.f32.mrf.mxu1  ;;  %7436 = vmatpush.bf16.msrb.mxu3 %v12179_v43  ;;  %v15469_v43 = vpop.permute.xlu1 %7097 }
 0x82a   : > { %v5731_v38 = vadd.f32 %v5730_v10, %v5615_v33  ;;  %v12171_v33 = vld [vmem:[%s15977_s16 + $0xb8] sm:$0xff]  ;;  %v12170_v10 = vld [vmem:[%s15977_s16 + $0xb0] sm:$0xff] }
 0x82b   : > { %7422 = vmatpush.bf16.msrb.mxu2 %v12171_v33  ;;  %v12201_v33 = vld [vmem:[%s15977_s16 + $0x1a8] sm:$0xff] }
 0x82d   : > { %v5603_v46 = vpop.f32.mrf.mxu3 }
 0x82e   : > { %v12155_v46 = vld [vmem:[%s15977_s16 + $0x38] sm:$0xff] }
 0x82f   : > { %v5743_v1 = vpop.f32.mrf.mxu2  ;;  %7557 = vmatpush.bf16.msra.mxu0 %v12155_v46  ;;  %7423 = vmatpush.bf16.msrb.mxu2 %v12170_v10  ;;  %v7124_v10 = vpop.permute.xlu2 %7123 }
 0x830   : > { %v5744_v32 = vadd.f32 %v5743_v1, %v5731_v38  ;;  %v12178_v38 = vld [vmem:[%s15977_s16 + $0xf0] sm:$0xff]  ;;  %v12163_v1 = vld [vmem:[%s15977_s16 + $0x78] sm:$0xff] }
 0x831   : > { %v5732_v62 = vpop.f32.mrf.mxu1  ;;  %7437 = vmatpush.bf16.msrb.mxu3 %v12178_v38 }
 0x832   : > { %v12177_v62 = vld [vmem:[%s15977_s16 + $0xe8] sm:$0xff] }
 0x835   : > { %7438 = vmatpush.bf16.msrb.mxu3 %v12177_v62 }
 0x837   : > { %v5745_v23 = vpop.f32.mrf.mxu2 }
 0x838   : > { %v12147_v23 = vld [vmem:[%s15976_s15 + $0x8] sm:$0xff] }
 0x83a   : > { %v5911_v55 = vpop.f32.mrf.mxu0 }
 0x840   : > { %v5898_v28 = vpop.f32.mrf.mxu3 }
 0x841   : > { %v5912_v2 = vadd.f32 %v5911_v55, %v5898_v28  ;;  %v6965_v55 = vld [vmem:[%s15976_s15 + $0x10] sm:$0x3] }
 0x842   : > { %v5913_v19 = vpop.f32.mrf.mxu0  ;;  %v6976_v28 = vunpack.c.l.b16 %v6965_v55  ;;  %v12190_v55 = vld [vmem:[%s15977_s16 + $0x150] sm:$0xff] }
 0x843   : > { %v5915_v14 = vadd.f32 %v5912_v2, %v5744_v32  ;;  %v12169_v32 = vld [vmem:[%s15977_s16 + $0xa8] sm:$0xff]  ;;  %v12168_v19 = vld [vmem:[%s15977_s16 + $0xa0] sm:$0xff] }
 0x844   : > { %7424 = vmatpush.bf16.msrb.mxu2 %v12169_v32  ;;  %v6979_v2 = vpack.c.b16 %v6976_v28, %v6976_v28  ;;  %v3136_v28 = vpack.c.bf16 %v14225_v27, %v14225_v27 }
 0x845   : > { %v6072_v34 = vpop.f32.mrf.mxu1 }
 0x848   : > { %v5900_v31 = vpop.f32.mrf.mxu3  ;;  %7425 = vmatpush.bf16.msrb.mxu2 %v12168_v19  ;;  %v12200_v19 = vld [vmem:[%s15977_s16 + $0x1a0] sm:$0xff] }
 0x849   : > { %v12162_v31 = vld [vmem:[%s15977_s16 + $0x70] sm:$0xff] }
 0x84b   : > { %v6085_v11 = vpop.f32.mrf.mxu2 }
 0x84c   : > { %v6086_v9 = vadd.f32 %v6085_v11, %v6072_v34  ;;  %v12154_v34 = vld [vmem:[%s15977_s16 + $0x30] sm:$0xff]  ;;  %v12167_v11 = vld [vmem:[%s15977_s16 + $0x98] sm:$0xff] }
 0x84d   : > { %v6074_v56 = vpop.f32.mrf.mxu1  ;;  %v6262_v37 = vpop.f32.mrf.mxu0  ;;  %7558 = vmatpush.bf16.msra.mxu0 %v12154_v34  ;;  %7426 = vmatpush.bf16.msrb.mxu2 %v12167_v11 }
 0x84e   : > { %v6089_v13 = vadd.f32 %v6086_v9, %v5915_v14  ;;  %v12176_v14 = vld [vmem:[%s15977_s16 + $0xe0] sm:$0xff]  ;;  %v12175_v56 = vld [vmem:[%s15977_s16 + $0xd8] sm:$0xff]  ;;  %v12149_v9 = vld [vmem:[%s15977_s16 + $0x8] sm:$0xff] }
 0x84f   : > { %7439 = vmatpush.bf16.msrb.mxu3 %v12176_v14  ;;  %v12208_v14 = vld [vmem:[%s15977_s16 + $0x1e0] sm:$0xff] }
 0x853   : > { %v6249_v29 = vpop.f32.mrf.mxu3  ;;  %v6087_v4 = vpop.f32.mrf.mxu2  ;;  %7440 = vmatpush.bf16.msrb.mxu3 %v12175_v56  ;;  %v12181_v56 = vld [vmem:[%s15977_s16 + $0x108] sm:$0xff] }
 0x854   : > { %v6263_v26 = vadd.f32 %v6262_v37, %v6249_v29  ;;  %v12153_v37 = vld [vmem:[%s15977_s16 + $0x28] sm:$0xff]  ;;  %v12166_v4 = vld [vmem:[%s15977_s16 + $0x90] sm:$0xff] }
 0x855   : > { %v6264_v30 = vpop.f32.mrf.mxu0  ;;  %v12161_v29 = vld [vmem:[%s15977_s16 + $0x68] sm:$0xff]  ;;  %7559 = vmatpush.bf16.msra.mxu0 %v12153_v37  ;;  %7427 = vmatpush.bf16.msrb.mxu2 %v12166_v4 }
 0x856   : > { %v6266_v41 = vadd.f32 %v6263_v26, %v6089_v13  ;;  %v12174_v30 = vld [vmem:[%s15977_s16 + $0xd0] sm:$0xff]  ;;  %v12189_v37 = vld [vmem:[%s15977_s16 + $0x148] sm:$0xff] }
 0x857   : > { %7441 = vmatpush.bf16.msrb.mxu3 %v12174_v30  ;;  %v12186_v26 = vld [vmem:[%s15977_s16 + $0x130] sm:$0xff] }
 0x858   : > { %v12194_v13 = vld [vmem:[%s15977_s16 + $0x170] sm:$0xff] }
 0x85b   : > { %v6251_v18 = vpop.f32.mrf.mxu3 }
 0x85c   : > { %v12152_v18 = vld [vmem:[%s15977_s16 + $0x20] sm:$0xff] }
 0x85d   : > { %7560 = vmatpush.bf16.msra.mxu0 %v12152_v18 }
 0x85e   : > { %v6418_v25 = vpop.f32.mrf.mxu1 }
 0x864   : > { %v6431_v39 = vpop.f32.mrf.mxu2 }
 0x865   : > { %v6432_v20 = vadd.f32 %v6431_v39, %v6418_v25  ;;  %v12160_v25 = vld [vmem:[%s15977_s16 + $0x60] sm:$0xff]  ;;  %v12165_v39 = vld [vmem:[%s15977_s16 + $0x88] sm:$0xff] }
 0x866   : > { %v6420_v40 = vpop.f32.mrf.mxu1  ;;  %7428 = vmatpush.bf16.msrb.mxu2 %v12165_v39  ;;  %v3137_v39 = vpack.c.bf16 %v14231_v36, %v14231_v36 }
 0x867   : > { %v6435_v61 = vadd.f32 %v6432_v20, %v6266_v41  ;;  %v12151_v40 = vld [vmem:[%s15977_s16 + $0x18] sm:$0xff]  ;;  %v12148_v20 = vld [vmem:[%s15977_s16] sm:$0xff] }
 0x868   : > { %7561 = vmatpush.bf16.msra.mxu0 %v12151_v40 }
 0x869   : > { %v6605_v52 = vpop.f32.mrf.mxu0 }
 0x86c   : > { %v6433_v53 = vpop.f32.mrf.mxu2 }
 0x86d   : > { %v6592_v51 = vpop.f32.mrf.mxu3  ;;  %v12164_v53 = vld [vmem:[%s15977_s16 + $0x80] sm:$0xff] }
 0x86e   : > { %v6606_v12 = vadd.f32 %v6605_v52, %v6592_v51  ;;  %v12173_v52 = vld [vmem:[%s15977_s16 + $0xc8] sm:$0xff]  ;;  %v12159_v51 = vld [vmem:[%s15977_s16 + $0x58] sm:$0xff]  ;;  %7429 = vmatpush.bf16.msrb.mxu2 %v12164_v53  ;;  %v7126_v53 = vpop.permute.xlu2 %7125 }
 0x86f   : > { %7442 = vmatpush.bf16.msrb.mxu3 %v12173_v52 }
 0x870   : > { %v6609_v16 = vadd.f32 %v6606_v12, %v6435_v61  ;;  %v12185_v12 = vld [vmem:[%s15977_s16 + $0x128] sm:$0xff] }
 0x871   : > { %v6607_v58 = vpop.f32.mrf.mxu0  ;;  %v6769_v21 = vpop.f32.mrf.mxu1  ;;  %v12193_v61 = vld [vmem:[%s15977_s16 + $0x168] sm:$0xff] }
 0x872   : > { %v12172_v58 = vld [vmem:[%s15977_s16 + $0xc0] sm:$0xff] }
 0x873   : > { %7443 = vmatpush.bf16.msrb.mxu3 %v12172_v58 }
 0x875   : > { %v6594_v35 = vpop.f32.mrf.mxu3 }
 0x876   : > { %v12158_v35 = vld [vmem:[%s15977_s16 + $0x50] sm:$0xff] }
 0x877   : > { %v6782_v17 = vpop.f32.mrf.mxu2 }
 0x878   : > { %v6783_v50 = vadd.f32 %v6782_v17, %v6769_v21  ;;  %v12150_v21 = vld [vmem:[%s15977_s16 + $0x10] sm:$0xff]  ;;  %v12187_v17 = vld [vmem:[%s15977_s16 + $0x138] sm:$0xff] }
 0x879   : > { %v6771_v57 = vpop.f32.mrf.mxu1  ;;  %7562 = vmatpush.bf16.msra.mxu0 %v12150_v21  ;;  %7749 = vmatpush.bf16.msra.mxu2 %v12187_v17 }
 0x87a   : > { %v6786_v49 = vadd.f32 %v6783_v50, %v6609_v16  ;;  %v12195_v57 = vld [vmem:[%s15977_s16 + $0x178] sm:$0xff] }
 0x87b   : > { %7763 = vmatpush.bf16.msra.mxu3 %v12195_v57  ;;  %v12203_v50 = vld [vmem:[%s15977_s16 + $0x1b8] sm:$0xff] }
 0x87d   : > { %7563 = vmatpush.bf16.msra.mxu0 %v12149_v9  ;;  %7750 = vmatpush.bf16.msra.mxu2 %v12186_v26  ;;  %v12188_v26 = vld [vmem:[%s15977_s16 + $0x140] sm:$0xff] }
 0x87f   : > { %v6784_v3 = vpop.f32.mrf.mxu2  ;;  %7764 = vmatpush.bf16.msra.mxu3 %v12194_v13  ;;  %v12198_v13 = vld [vmem:[%s15977_s16 + $0x190] sm:$0xff] }
 0x880   : > { %v12157_v3 = vld [vmem:[%s15977_s16 + $0x48] sm:$0xff] }
 0x881   : > { %7564 = vmatpush.bf16.msra.mxu0 %v12148_v20  ;;  %7751 = vmatpush.bf16.msra.mxu2 %v12185_v12 }
 0x882   : > { %v6951_v22 = vpop.f32.mrf.mxu0 }
 0x883   : > { %7765 = vmatpush.bf16.msra.mxu3 %v12193_v61 }
 0x885   : > { %7923 = vmatpush.bf16.msrb.mxu0 %v12203_v50 }
 0x888   : > { %v6938_v42 = vpop.f32.mrf.mxu3 }
 0x889   : > { %v6952_v45 = vadd.f32 %v6951_v22, %v6938_v42  ;;  %v12156_v22 = vld [vmem:[%s15977_s16 + $0x40] sm:$0xff] }
 0x88a   : > { %v6953_v8 = vpop.f32.mrf.mxu0 }
 0x88b   : > { %v6955_v63 = vadd.f32 %v6952_v45, %v6786_v49  ;;  %v12211_v45 = vld [vmem:[%s15977_s16 + $0x1f8] sm:$0xff]  ;;  %v12192_v8 = vld [vmem:[%s15977_s16 + $0x160] sm:$0xff] }
 0x88c   : > { %7766 = vmatpush.bf16.msra.mxu3 %v12192_v8  ;;  %v12205_v8 = vld [vmem:[%s15977_s16 + $0x1c8] sm:$0xff] }
 0x88d   : > { %v6960_v44 = vadd.f32 %v12342_v6, %v6955_v63  ;;  %v12184_v6 = vld [vmem:[%s15977_s16 + $0x120] sm:$0xff]  ;;  %v12202_v63 = vld [vmem:[%s15977_s16 + $0x1b0] sm:$0xff] }
 0x88e   : > { %7752 = vmatpush.bf16.msra.mxu2 %v12184_v6  ;;  %7924 = vmatpush.bf16.msrb.mxu0 %v12202_v63  ;;  %v12197_v6 = vld [vmem:[%s15977_s16 + $0x188] sm:$0xff] }
 0x88f   : > { %v6966_v15 = vpack.c.bf16 %v6960_v44, %v6960_v44  ;;  %v12210_v44 = vld [vmem:[%s15977_s16 + $0x1f0] sm:$0xff] }
 0x890   : > { %v6940_v47 = vpop.f32.mrf.mxu3 }
 0x891   : > { %v6991_v60 = vsel %vm4268_vm7, %v6966_v15, 0  ;;  %v7094_v15 = vpop.permute.xlu0 %7093 }
 0x892   : > { %7000 = vmatpush.bf16.msrb.mxu1 %v6991_v60  ;;  %v12183_v60 = vld [vmem:[%s15977_s16 + $0x118] sm:$0xff]  ;;  %7925 = vmatpush.bf16.msrb.mxu0 %v12201_v33  ;;  %v7138_v34 = vsel %vm7135_vm1, %v3136_v28, %v7094_v15 }
 0x893   : > { %7753 = vmatpush.bf16.msra.mxu2 %v12183_v60  ;;  %v7155_v27 = vsel %vm1165_vm5, %v7138_v34, %v7124_v10  ;;  %v3138_v60 = vpack.c.bf16 %v14238_v24, %v14238_v24  ;;  %v3139_v10 = vpack.c.bf16 %v14244_v0, %v14244_v0  ;;  %v12204_v34 = vld [vmem:[%s15977_s16 + $0x1c0] sm:$0xff] }
 0x895   : > { %10985 = vmatmul.msk.bf16.vlgmr.msrb.gmra.mxu1 %vm6980_vm0, %v12146_v59  ;;  %v12191_v59 = vld [vmem:[%s15977_s16 + $0x158] sm:$0xff] }
 0x896   : > { %7571 = vmatpush.bf16.msra.mxu1 %v12163_v1  ;;  %v12209_v1 = vld [vmem:[%s15977_s16 + $0x1e8] sm:$0xff]  ;;  %7767 = vmatpush.bf16.msra.mxu3 %v12191_v59 }
 0x897   : > { %7926 = vmatpush.bf16.msrb.mxu0 %v12200_v19 }
 0x899   : > { %v7096_v52 = vpop.permute.xlu0 %7095 }
 0x89a   : > { %7572 = vmatpush.bf16.msra.mxu1 %v12162_v31  ;;  %7768 = vmatpush.bf16.msra.mxu3 %v12190_v55  ;;  %v7141_v57 = vsel %vm7135_vm1, %v3137_v39, %v7096_v52 }
 0x89b   : > { %v7157_v20 = vsel %vm1165_vm5, %v7141_v57, %v7126_v53 }
 0x89e   : > { %7573 = vmatpush.bf16.msra.mxu1 %v12161_v29  ;;  %v12199_v29 = vld [vmem:[%s15977_s16 + $0x198] sm:$0xff]  ;;  %7769 = vmatpush.bf16.msra.mxu3 %v12189_v37 }
 0x89f   : > { %7927 = vmatpush.bf16.msrb.mxu0 %v12199_v29 }
 0x8a2   : > { %7574 = vmatpush.bf16.msra.mxu1 %v12160_v25  ;;  %v12207_v25 = vld [vmem:[%s15977_s16 + $0x1d8] sm:$0xff]  ;;  %7770 = vmatpush.bf16.msra.mxu3 %v12188_v26 }
 0x8a3   : > { %7928 = vmatpush.bf16.msrb.mxu0 %v12198_v13 }
 0x8a5   : > { %10986 = vmatmul.msk.bf16.gmra.mxu1 %vm6980_vm0, %v12147_v23  ;;  %v12182_v23 = vld [vmem:[%s15977_s16 + $0x110] sm:$0xff] }
 0x8a6   : > { %7575 = vmatpush.bf16.msra.mxu1 %v12159_v51  ;;  %7754 = vmatpush.bf16.msra.mxu2 %v12182_v23  ;;  %v7100_v51 = vpop.permute.xlu1 %7099  ;;  %v7144_v23 = vsel %vm7135_vm1, %v3138_v60, %v15469_v43  ;;  %v12196_v43 = vld [vmem:[%s15977_s16 + $0x180] sm:$0xff] }
 0x8a7   : > { %7929 = vmatpush.bf16.msrb.mxu0 %v12197_v6 }
 0x8aa   : > { %7576 = vmatpush.bf16.msra.mxu1 %v12158_v35  ;;  %7755 = vmatpush.bf16.msra.mxu2 %v12181_v56 }
 0x8ab   : > { %7930 = vmatpush.bf16.msrb.mxu0 %v12196_v43 }
 0x8ae   : > { %7577 = vmatpush.bf16.msra.mxu1 %v12157_v3  ;;  %v12180_v3 = vld [vmem:[%s15977_s16 + $0x100] sm:$0xff] }
 0x8af   : > { %7756 = vmatpush.bf16.msra.mxu2 %v12180_v3 }
 0x8b2   : > { %7578 = vmatpush.bf16.msra.mxu1 %v12156_v22  ;;  %v12206_v22 = vld [vmem:[%s15977_s16 + $0x1d0] sm:$0xff] }
 0x8b5   : > { %10987 = vmatmul.msk.bf16.gmra.mxu1 %vm6980_vm0, %v6979_v2 }
 0x8b6   : > { %7937 = vmatpush.bf16.msrb.mxu1 %v12211_v45 }
 0x8ba   : > { %7938 = vmatpush.bf16.msrb.mxu1 %v12210_v44 }
 0x8be   : > { %7939 = vmatpush.bf16.msrb.mxu1 %v12209_v1 }
 0x8c2   : > { %7940 = vmatpush.bf16.msrb.mxu1 %v12208_v14 }
 0x8c6   : > { %7941 = vmatpush.bf16.msrb.mxu1 %v12207_v25 }
 0x8ca   : > { %7942 = vmatpush.bf16.msrb.mxu1 %v12206_v22 }
 0x8ce   : > { %7943 = vmatpush.bf16.msrb.mxu1 %v12205_v8 }
 0x8d2   : > { %7944 = vmatpush.bf16.msrb.mxu1 %v12204_v34 }
 0x912   : > { %v7002_v41 = vpop.f32.mrf.mxu1 }
 0x913   : > { %v7021_v16 = vrot.slane %v7002_v41, 2  ;;  %v7022_v42 = vrot.slane %v7002_v41, 4  ;;  %v7023_v49 = vrot.slane %v7002_v41, 6  ;;  %7034 = vst [vmem:[#allocation1] ss:$4 sm:$0xff] %v7002_v41 }
 0x915   : > { %7036 = vst [vmem:[#allocation1 + $0x1] ss:$4 sm:$0xff] %v7021_v16 }
 0x916   : > { %7041 = vst [vmem:[#allocation1 + $0x20] ss:$4 sm:$0xff] %v7023_v49 }
 0x917   : > { %7038 = vst [vmem:[#allocation1 + $0x2] ss:$4 sm:$0xff] %v7022_v42 }
 0x91a   : > { %v7004_v47 = vpop.f32.mrf.mxu1 }
 0x91b   : > { %v7024_v38 = vrot.slane %v7004_v47, 2  ;;  %v7025_v46 = vrot.slane %v7004_v47, 4  ;;  %7043 = vst [vmem:[#allocation1 + $0x21] ss:$4 sm:$0xff] %v7004_v47  ;;  %v7026_v32 = vrot.slane %v7004_v47, 6 }
 0x91d   : > { %7045 = vst [vmem:[#allocation1 + $0x22] ss:$4 sm:$0xff] %v7024_v38  ;;  %v7128_v38 = vpop.permute.xlu0 %7127 }
 0x91e   : > { %v7039_v62 = vld.sshfl [vmem:[#allocation1] sm:$0xff pattern:$0x73625140] }
 0x91f   : > { %7047 = vst [vmem:[#allocation1] ss:$4 sm:$0xff] %v7025_v46  ;;  %v7069_v2 = vpack.c.bf16 %v7039_v62, %v7039_v62  ;;  %v7130_v46 = vpop.permute.xlu1 %7129 }
 0x920   : > { %7048 = vst [vmem:[#allocation1 + $0x1] ss:$4 sm:$0xff] %v7026_v32 }
 0x921   : > { %v7170_v31 = vrot.slane %v7069_v2, 6  ;;  %v7147_v2 = vsel %vm7135_vm1, %v3139_v10, %v7100_v51  ;;  %v12227_v10 = vld [vmem:[%s15977_s16 + $0x278] sm:$0xff] }
 0x922   : > { %v7007_v11 = vpop.f32.mrf.mxu1 }
 0x923   : > { %v15500_v4 = vsel %vm4268_vm7, %v7155_v27, %v7170_v31  ;;  %v7027_v30 = vrot.slane %v7007_v11, 2  ;;  %v7028_v18 = vrot.slane %v7007_v11, 4  ;;  %7049 = vst [vmem:[#allocation1 + $0x2] ss:$4 sm:$0xff] %v7007_v11  ;;  %v7029_v17 = vrot.slane %v7007_v11, 6 }
 0x924   : > { %v7046_v40 = vld.sshfl [vmem:[#allocation1 + $0x20] sm:$0xff pattern:$0x73625140]  ;;  %v7226_v21 = vshrl.u32 %v15500_v4, 16  ;;  %v7229_v35 = vshll.u32 %v15500_v4, 16  ;;  %v15511_v36 = vsel %vm4272_vm8, %v7155_v27, %v7170_v31  ;;  %v7159_v31 = vsel %vm1165_vm5, %v7144_v23, %v7128_v38  ;;  %v12225_v23 = vld [vmem:[%s15977_s16 + $0x268] sm:$0xff] }
 0x925   : > { %v7070_v58 = vpack.c.bf16 %v7046_v40, %v7046_v40  ;;  %7051 = vst [vmem:[#allocation1 + $0x20] ss:$4 sm:$0xff] %v7027_v30  ;;  %v7216_v49 = vrot.slane %v15511_v36, 2  ;;  %v7161_v27 = vsel %vm1165_vm5, %v7147_v2, %v7130_v46 }
 0x926   : > { %7052 = vst [vmem:[#allocation1 + $0x21] ss:$4 sm:$0xff] %v7028_v18  ;;  %v7228_v61 = vrot.slane %v7226_v21, 6  ;;  %v7231_v50 = vrot.slane %v7229_v35, 7 }
 0x927   : > { %v7171_v9 = vrot.slane %v7070_v58, 6  ;;  %7053 = vst [vmem:[#allocation1 + $0x22] ss:$4 sm:$0xff] %v7029_v17  ;;  %v7235_v28 = vshll.u32 %v7216_v49, 16 }
 0x928   : > { %v7232_v1 = vor.u32 %v7231_v50, %v7228_v61 }
 0x929   : > { %v15527_v41 = vsel %vm4268_vm7, %v7157_v20, %v7171_v9  ;;  %v15530_v12 = vsel %vm4272_vm8, %v7157_v20, %v7171_v9  ;;  %v7237_v51 = vrot.slane %v7235_v28, 7 }
 0x92a   : > { %v7239_v16 = vshrl.u32 %v15527_v41, 16  ;;  %v7242_v42 = vshll.u32 %v15527_v41, 16  ;;  %v7009_v45 = vpop.f32.mrf.mxu1  ;;  %v7219_v63 = vrot.slane %v15530_v12, 2  ;;  %v7050_v44 = vld.sshfl [vmem:[#allocation1] sm:$0xff pattern:$0x73625140] }
 0x92b   : > { %v7030_v15 = vrot.slane %v7009_v45, 2  ;;  %v7031_v47 = vrot.slane %v7009_v45, 4  ;;  %7055 = vst [vmem:[#allocation1] ss:$4 sm:$0xff] %v7009_v45  ;;  %v7071_v32 = vpack.c.bf16 %v7050_v44, %v7050_v44  ;;  %v7032_v62 = vrot.slane %v7009_v45, 6 }
 0x92c   : > { %v7241_v59 = vrot.slane %v7239_v16, 6  ;;  %v7244_v33 = vrot.slane %v7242_v42, 7  ;;  %v7248_v0 = vshll.u32 %v7219_v63, 16  ;;  %v7233_v11 = vrot.slane %v7232_v1, 2  ;;  %v12218_v1 = vld [vmem:[%s15977_s16 + $0x230] sm:$0xff] }
 0x92d   : > { %7056 = vst [vmem:[#allocation1 + $0x1] ss:$4 sm:$0xff] %v7030_v15  ;;  %v7172_v19 = vrot.slane %v7071_v32, 6  ;;  %v12226_v32 = vld [vmem:[%s15977_s16 + $0x270] sm:$0xff]  ;;  %v7595_v28 = vrot.slane %v7219_v63, 7  ;;  %v11149_v36 = vrot.slane %v15527_v41, 9 }
 0x92e   : > { %v7245_v55 = vor.u32 %v7244_v33, %v7241_v59  ;;  %v7054_v24 = vld.sshfl [vmem:[#allocation1 + $0x20] sm:$0xff pattern:$0x73625140]  ;;  %7057 = vst [vmem:[#allocation1 + $0x2] ss:$4 sm:$0xff] %v7031_v47  ;;  %v7250_v40 = vrot.slane %v7248_v0, 7  ;;  %v7238_v9 = vsel %vm14441_vm15, %v7233_v11, %v7237_v51 }
 0x92f   : > { %v7072_v14 = vpack.c.bf16 %v7054_v24, %v7054_v24  ;;  %7059 = vst [vmem:[#allocation1 + $0x20] ss:$4 sm:$0xff] %v7032_v62  ;;  %v15562_v56 = vsel %vm4268_vm7, %v7159_v31, %v7172_v19  ;;  %v7220_v37 = vsel %vm4272_vm8, %v7159_v31, %v7172_v19  ;;  %v12219_v33 = vld [vmem:[%s15977_s16 + $0x238] sm:$0xff]  ;;  %v12217_v62 = vld [vmem:[%s15977_s16 + $0x228] sm:$0xff]  ;;  %v11148_v24 = vrot.slane %v15500_v4, 9  ;;  %v12224_v63 = vld [vmem:[%s15977_s16 + $0x260] sm:$0xff] }
 0x930   : > { %v7246_v30 = vrot.slane %v7245_v55, 2  ;;  %v7222_v18 = vrot.slane %v7220_v37, 2  ;;  %v7252_v25 = vshrl.u32 %v15562_v56, 16  ;;  %v7255_v39 = vshll.u32 %v15562_v56, 16  ;;  %v12235_v19 = vld [vmem:[%s15977_s16 + $0x2b8] sm:$0xff] }
 0x931   : > { %v7173_v29 = vrot.slane %v7072_v14, 6  ;;  %v7591_v55 = vrot.slane %v7216_v49, 7  ;;  %v12243_v14 = vld [vmem:[%s15977_s16 + $0x2f8] sm:$0xff]  ;;  %v11150_v49 = vrot.slane %v15562_v56, 9  ;;  %v15639_v11 = vsel %vm14562_vm9, %v11149_v36, %v7595_v28  ;;  %v12258_v28 = vld [vmem:[%s15977_s16 + $0x370] sm:$0xff] }
 0x932   : > { %v7012_v52 = vpop.f32.mrf.mxu1  ;;  %v7254_v21 = vrot.slane %v7252_v25, 6  ;;  %v7257_v35 = vrot.slane %v7255_v39, 7  ;;  %v7261_v17 = vshll.u32 %v7222_v18, 16  ;;  %v15579_v22 = vsel %vm14441_vm15, %v7246_v30, %v7250_v40  ;;  %v7132_v30 = vpop.permute.xlu0 %7131  ;;  %v12234_v39 = vld [vmem:[%s15977_s16 + $0x2b0] sm:$0xff]  ;;  %v12215_v40 = vld [vmem:[%s15977_s16 + $0x218] sm:$0xff] }
 0x933   : > { %v15568_v53 = vsel %vm4268_vm7, %v7161_v27, %v7173_v29  ;;  %v7223_v58 = vsel %vm4272_vm8, %v7161_v27, %v7173_v29  ;;  %7060 = vst [vmem:[#allocation1 + $0x21] ss:$4 sm:$0xff] %v7012_v52  ;;  %v7033_v57 = vrot.slane %v7012_v52, 2  ;;  %v7599_v2 = vrot.slane %v7222_v18, 7  ;;  %v7102_v27 = vpop.permute.xlu2 %7101  ;;  %v12242_v52 = vld [vmem:[%s15977_s16 + $0x2f0] sm:$0xff]  ;;  %v12223_v51 = vld [vmem:[%s15977_s16 + $0x258] sm:$0xff] }
 0x934   : > { %v7225_v26 = vrot.slane %v7223_v58, 2  ;;  %v7265_v13 = vshrl.u32 %v15568_v53, 16  ;;  %v7268_v20 = vshll.u32 %v15568_v53, 16  ;;  %v7258_v61 = vor.u32 %v7257_v35, %v7254_v21 }
 0x935   : > { %v15573_v3 = vld.sshfl [vmem:[#allocation1] sm:$0xff pattern:$0x73625140]  ;;  %v7263_v6 = vrot.slane %v7261_v17, 7  ;;  %7061 = vst [vmem:[#allocation1 + $0x22] ss:$4 sm:$0xff] %v7033_v57  ;;  %v7592_v43 = vsel %vm14562_vm9, %v11148_v24, %v7591_v55  ;;  %v3140_v29 = vpack.c.bf16 %v14316_v7, %v14316_v7  ;;  %v15646_v18 = vsel %vm14562_vm9, %v11150_v49, %v7599_v2 }
 0x936   : > { %7312 = vst [vmem:[#allocation1] ss:$4 sm:$0xff] %v7238_v9  ;;  %v7267_v50 = vrot.slane %v7265_v13, 6  ;;  %v7270_v16 = vrot.slane %v7268_v20, 7  ;;  %v7274_v42 = vshll.u32 %v7225_v26, 16  ;;  %v7259_v45 = vrot.slane %v7258_v61, 2 }
 0x937   : > { %7315 = vst [vmem:[#allocation1 + $0x1] ss:$4 sm:$0xff] %v15579_v22  ;;  %v7073_v0 = vpack.c.bf16 %v15573_v3, %v15573_v3  ;;  %v7603_v12 = vrot.slane %v7225_v26, 7  ;;  %v11151_v37 = vrot.slane %v15568_v53, 9  ;;  %v7150_v58 = vsel %vm7135_vm1, %v3140_v29, %v7102_v27  ;;  %v12233_v17 = vld [vmem:[%s15977_s16 + $0x2a8] sm:$0xff]  ;;  %v12214_v9 = vld [vmem:[%s15977_s16 + $0x210] sm:$0xff] }
 0x938   : > { %v7271_v8 = vor.u32 %v7270_v16, %v7267_v50  ;;  %v15584_v44 = vsel %vm14441_vm15, %v7259_v45, %v7263_v6  ;;  %v7276_v60 = vrot.slane %v7274_v42, 7  ;;  %v7163_v21 = vsel %vm1165_vm5, %v7150_v58, %v7132_v30  ;;  %v12241_v57 = vld [vmem:[%s15977_s16 + $0x2e8] sm:$0xff]  ;;  %v12222_v3 = vld [vmem:[%s15977_s16 + $0x250] sm:$0xff]  ;;  %v12232_v20 = vld [vmem:[%s15977_s16 + $0x2a0] sm:$0xff] }
 0x939   : > { %7318 = vst [vmem:[#allocation1 + $0x2] ss:$4 sm:$0xff] %v15584_v44  ;;  %v7780_v25 = vrot.slane %v7073_v0, 6  ;;  %v15657_v7 = vsel %vm14562_vm9, %v11151_v37, %v7603_v12  ;;  %v12240_v61 = vld [vmem:[%s15977_s16 + $0x2e0] sm:$0xff]  ;;  %v12213_v50 = vld [vmem:[%s15977_s16 + $0x208] sm:$0xff]  ;;  %v12250_v55 = vld [vmem:[%s15977_s16 + $0x330] sm:$0xff]  ;;  %v3141_v58 = vpack.c.bf16 %v14323_v5, %v14323_v5 }
 0x93a   : > { %v7014_v15 = vpop.f32.mrf.mxu1  ;;  %v7272_v47 = vrot.slane %v7271_v8, 2  ;;  %v12221_v16 = vld [vmem:[%s15977_s16 + $0x248] sm:$0xff]  ;;  %v12248_v27 = vld [vmem:[%s15977_s16 + $0x320] sm:$0xff]  ;;  %v12266_v30 = vld [vmem:[%s15977_s16 + $0x3b0] sm:$0xff] }
 0x93b   : > { %v15670_v35 = vsel %vm4268_vm7, %v7163_v21, %v7780_v25  ;;  %v15699_v6 = vsel %vm4272_vm8, %v7163_v21, %v7780_v25  ;;  %v12229_v2 = vld [vmem:[%s15977_s16 + $0x288] sm:$0xff]  ;;  %v12256_v37 = vld [vmem:[%s15977_s16 + $0x360] sm:$0xff]  ;;  %v12274_v25 = vld [vmem:[%s15977_s16 + $0x3f0] sm:$0xff] }
 0x93c   : > { %v15589_v59 = vsel %vm14441_vm15, %v7272_v47, %v7276_v60  ;;  %v7956_v26 = vshrl.u32 %v15670_v35, 16  ;;  %v7959_v13 = vshll.u32 %v15670_v35, 16  ;;  %v12231_v47 = vld [vmem:[%s15977_s16 + $0x298] sm:$0xff]  ;;  %v12237_v0 = vld [vmem:[%s15977_s16 + $0x2c8] sm:$0xff] }
 0x93d   : > { %7321 = vst [vmem:[#allocation1 + $0x3] ss:$4 sm:$0xff] %v15589_v59  ;;  %v12239_v60 = vld [vmem:[%s15977_s16 + $0x2d8] sm:$0xff]  ;;  %v12249_v49 = vld [vmem:[%s15977_s16 + $0x328] sm:$0xff] }
 0x93e   : > { %v7958_v8 = vrot.slane %v7956_v26, 6  ;;  %v7961_v15 = vrot.slane %v7959_v13, 7  ;;  %v12257_v12 = vld [vmem:[%s15977_s16 + $0x368] sm:$0xff] }
 0x93f   : > { %v12265_v26 = vld [vmem:[%s15977_s16 + $0x3a8] sm:$0xff] }
 0x940   : > { %v12273_v5 = vld [vmem:[%s15977_s16 + $0x3e8] sm:$0xff] }
 0x944   : > { %v7322_v38 = vld.sshfl [vmem:[#allocation1] sm:$0xff pattern:$0x73625140]  ;;  %v7323_v46 = vld.sshfl [vmem:[#allocation1 + $0x8] sm:$0xff pattern:$0x73625140] }
 0x945   : > { %7450 = vst [vmem:[#allocation1] ss:$4 sm:$0xff] %v15500_v4  ;;  %7430 = vmatmul.bf16.vlgmr.msrb.gmra.mxu2 %v7322_v38  ;;  %7444 = vmatmul.bf16.vlgmr.msrb.gmra.mxu3 %v7323_v46  ;;  %v12216_v4 = vld [vmem:[%s15977_s16 + $0x220] sm:$0xff]  ;;  %v12251_v38 = vld [vmem:[%s15977_s16 + $0x338] sm:$0xff] }
 0x946   : > { %7454 = vst [vmem:[#allocation1 + $0x2] ss:$4 sm:$0xff] %v15562_v56  ;;  %8110 = vmatpush.bf16.msrb.mxu2 %v12219_v33  ;;  %8124 = vmatpush.bf16.msrb.mxu3 %v12227_v10  ;;  %v7955_v33 = vrot.slane %v15699_v6, 2  ;;  %v12220_v10 = vld [vmem:[%s15977_s16 + $0x240] sm:$0xff]  ;;  %v12259_v46 = vld [vmem:[%s15977_s16 + $0x378] sm:$0xff]  ;;  %v12245_v6 = vld [vmem:[%s15977_s16 + $0x308] sm:$0xff] }
 0x947   : > { %7452 = vst [vmem:[#allocation1 + $0x1] ss:$4 sm:$0xff] %v15527_v41 }
 0x948   : > { %7456 = vst [vmem:[#allocation1 + $0x3] ss:$4 sm:$0xff] %v15568_v53 }
 0x94a   : > { %8111 = vmatpush.bf16.msrb.mxu2 %v12218_v1  ;;  %8125 = vmatpush.bf16.msrb.mxu3 %v12226_v32  ;;  %v7962_v1 = vor.u32 %v7961_v15, %v7958_v8  ;;  %v12230_v32 = vld [vmem:[%s15977_s16 + $0x290] sm:$0xff]  ;;  %v12253_v8 = vld [vmem:[%s15977_s16 + $0x348] sm:$0xff] }
 0x94c   : > { %v7963_v24 = vrot.slane %v7962_v1, 2 }
 0x94e   : > { %8112 = vmatpush.bf16.msrb.mxu2 %v12217_v62  ;;  %8126 = vmatpush.bf16.msrb.mxu3 %v12225_v23  ;;  %v12238_v62 = vld [vmem:[%s15977_s16 + $0x2d0] sm:$0xff]  ;;  %v7965_v23 = vshll.u32 %v7955_v33, 16 }
 0x94f   : > { %v7457_v34 = vld.sshfl [vmem:[#allocation1] sm:$0xff pattern:$0x73625140]  ;;  %v7458_v31 = vld.sshfl [vmem:[#allocation1 + $0x8] sm:$0xff pattern:$0x73625140] }
 0x950   : > { %7565 = vmatmul.bf16.vlgmr.msra.gmra.mxu0 %v7457_v34  ;;  %7579 = vmatmul.bf16.vlgmr.msra.gmra.mxu1 %v7458_v31  ;;  %7639 = vst [vmem:[#allocation1] ss:$4 sm:$0xff] %v7592_v43  ;;  %v7967_v36 = vrot.slane %v7965_v23, 7  ;;  %v12267_v43 = vld [vmem:[%s15977_s16 + $0x3b8] sm:$0xff] }
 0x951   : > { %7642 = vst [vmem:[#allocation1 + $0x1] ss:$4 sm:$0xff] %v15639_v11  ;;  %8286 = vmatpush.bf16.msra.mxu0 %v12235_v19  ;;  %8300 = vmatpush.bf16.msra.mxu1 %v12243_v14  ;;  %v12275_v34 = vld [vmem:[%s15977_s16 + $0x3f8] sm:$0xff]  ;;  %v7062_v31 = vld.sshfl [vmem:[#allocation1 + $0x20] sm:$0xff pattern:$0x73625140] }
 0x952   : > { %7645 = vst [vmem:[#allocation1 + $0x2] ss:$4 sm:$0xff] %v15646_v18  ;;  %8113 = vmatpush.bf16.msrb.mxu2 %v12216_v4  ;;  %8127 = vmatpush.bf16.msrb.mxu3 %v12224_v63  ;;  %v15752_v4 = vsel %vm14441_vm15, %v7963_v24, %v7967_v36  ;;  %v12236_v63 = vld [vmem:[%s15977_s16 + $0x2c0] sm:$0xff]  ;;  %v7074_v29 = vpack.c.bf16 %v7062_v31, %v7062_v31  ;;  %v12281_v36 = vld [vmem:[%s15977_s16 + $0x428] sm:$0xff] }
 0x953   : > { %7648 = vst [vmem:[#allocation1 + $0x3] ss:$4 sm:$0xff] %v15657_v7 }
 0x955   : > { %8287 = vmatpush.bf16.msra.mxu0 %v12234_v39  ;;  %8301 = vmatpush.bf16.msra.mxu1 %v12242_v52  ;;  %v7104_v39 = vpop.permute.xlu1 %7103  ;;  %v8143_v52 = vrot.slane %v7955_v33, 7  ;;  %v12271_v33 = vld [vmem:[%s15977_s16 + $0x3d8] sm:$0xff] }
 0x956   : > { %8114 = vmatpush.bf16.msrb.mxu2 %v12215_v40  ;;  %8128 = vmatpush.bf16.msrb.mxu3 %v12223_v51  ;;  %v12247_v40 = vld [vmem:[%s15977_s16 + $0x318] sm:$0xff] }
 0x957   : > { %v12255_v51 = vld [vmem:[%s15977_s16 + $0x358] sm:$0xff] }
 0x959   : > { %8288 = vmatpush.bf16.msra.mxu0 %v12233_v17  ;;  %8302 = vmatpush.bf16.msra.mxu1 %v12241_v57  ;;  %v11440_v57 = vrot.slane %v15670_v35, 9 }
 0x95a   : > { %v7649_v42 = vld.sshfl [vmem:[#allocation1] sm:$0xff pattern:$0x73625140]  ;;  %v7650_v45 = vld.sshfl [vmem:[#allocation1 + $0x8] sm:$0xff pattern:$0x73625140]  ;;  %8115 = vmatpush.bf16.msrb.mxu2 %v12214_v9  ;;  %8129 = vmatpush.bf16.msrb.mxu3 %v12222_v3  ;;  %v7153_v9 = vsel %vm7135_vm1, %v3141_v58, %v7104_v39 }
 0x95b   : > { %7757 = vmatmul.bf16.vlgmr.msra.gmra.mxu2 %v7649_v42  ;;  %7771 = vmatmul.bf16.vlgmr.msra.gmra.mxu3 %v7650_v45  ;;  %7816 = vst [vmem:[#allocation1] ss:$4 sm:$0xff] %v15527_v41  ;;  %v12212_v41 = vld [vmem:[%s15977_s16 + $0x200] sm:$0xff]  ;;  %v8317_v3 = vrot.slane %v7074_v29, 6  ;;  %v15800_v13 = vsel %vm14562_vm9, %v11440_v57, %v8143_v52  ;;  %v12285_v58 = vld [vmem:[%s15977_s16 + $0x448] sm:$0xff] }
 0x95c   : > { %7818 = vst [vmem:[#allocation1 + $0x1] ss:$4 sm:$0xff] %v15562_v56  ;;  %v12264_v42 = vld [vmem:[%s15977_s16 + $0x3a0] sm:$0xff] }
 0x95d   : > { %7820 = vst [vmem:[#allocation1 + $0x2] ss:$4 sm:$0xff] %v15568_v53  ;;  %8289 = vmatpush.bf16.msra.mxu0 %v12232_v20  ;;  %8303 = vmatpush.bf16.msra.mxu1 %v12240_v61  ;;  %v12254_v20 = vld [vmem:[%s15977_s16 + $0x350] sm:$0xff]  ;;  %v7134_v61 = vpop.permute.xlu2 %7133  ;;  %v12272_v45 = vld [vmem:[%s15977_s16 + $0x3e0] sm:$0xff] }
 0x95e   : > { %7822 = vst [vmem:[#allocation1 + $0x3] ss:$4 sm:$0xff] %v15670_v35  ;;  %8116 = vmatpush.bf16.msrb.mxu2 %v12213_v50  ;;  %8130 = vmatpush.bf16.msrb.mxu3 %v12221_v16  ;;  %v7165_v50 = vsel %vm1165_vm5, %v7153_v9, %v7134_v61 }
 0x95f   : > { %v15812_v16 = vsel %vm4268_vm7, %v7165_v50, %v8317_v3  ;;  %v8490_v1 = vsel %vm4272_vm8, %v7165_v50, %v8317_v3 }
 0x960   : > { %v8493_v15 = vshrl.u32 %v15812_v16, 16  ;;  %v8492_v24 = vrot.slane %v8490_v1, 2  ;;  %v11729_v52 = vrot.slane %v15812_v16, 9 }
 0x961   : > { %8290 = vmatpush.bf16.msra.mxu0 %v12231_v47  ;;  %8304 = vmatpush.bf16.msra.mxu1 %v12239_v60  ;;  %v8496_v47 = vshll.u32 %v15812_v16, 16  ;;  %v12263_v60 = vld [vmem:[%s15977_s16 + $0x398] sm:$0xff] }
 0x962   : > { %8117 = vmatpush.bf16.msrb.mxu2 %v12212_v41  ;;  %8131 = vmatpush.bf16.msrb.mxu3 %v12220_v10  ;;  %v12244_v41 = vld [vmem:[%s15977_s16 + $0x300] sm:$0xff]  ;;  %v8495_v23 = vrot.slane %v8493_v15, 6 }
 0x963   : > { %v12252_v10 = vld [vmem:[%s15977_s16 + $0x340] sm:$0xff] }
 0x965   : > { %v7823_v19 = vld.sshfl [vmem:[#allocation1] sm:$0xff pattern:$0x73625140]  ;;  %v7824_v14 = vld.sshfl [vmem:[#allocation1 + $0x8] sm:$0xff pattern:$0x73625140]  ;;  %8291 = vmatpush.bf16.msra.mxu0 %v12230_v32  ;;  %8305 = vmatpush.bf16.msra.mxu1 %v12238_v62 }
 0x966   : > { %8460 = vmatpush.bf16.msra.mxu2 %v12251_v38  ;;  %8474 = vmatpush.bf16.msra.mxu3 %v12259_v46  ;;  %8002 = vst [vmem:[#allocation1] ss:$4 sm:$0xff] %v15579_v22  ;;  %v12228_v22 = vld [vmem:[%s15977_s16 + $0x280] sm:$0xff]  ;;  %v12283_v32 = vld [vmem:[%s15977_s16 + $0x438] sm:$0xff] }
 0x967   : > { %7931 = vmatmul.bf16.vlgmr.msrb.gmra.mxu0 %v7823_v19  ;;  %7945 = vmatmul.bf16.vlgmr.msrb.gmra.mxu1 %v7824_v14  ;;  %8004 = vst [vmem:[#allocation1 + $0x1] ss:$4 sm:$0xff] %v15584_v44  ;;  %v12291_v62 = vld [vmem:[%s15977_s16 + $0x478] sm:$0xff]  ;;  %v12269_v19 = vld [vmem:[%s15977_s16 + $0x3c8] sm:$0xff]  ;;  %v8502_v14 = vshll.u32 %v8492_v24, 16 }
 0x968   : > { %8006 = vst [vmem:[#allocation1 + $0x2] ss:$4 sm:$0xff] %v15589_v59 }
 0x969   : > { %8009 = vst [vmem:[#allocation1 + $0x3] ss:$4 sm:$0xff] %v15752_v4  ;;  %8292 = vmatpush.bf16.msra.mxu0 %v12229_v2  ;;  %8306 = vmatpush.bf16.msra.mxu1 %v12237_v0  ;;  %v12261_v0 = vld [vmem:[%s15977_s16 + $0x388] sm:$0xff]  ;;  %v8504_v31 = vrot.slane %v8502_v14, 7 }
 0x96a   : > { %8461 = vmatpush.bf16.msra.mxu2 %v12250_v55  ;;  %8475 = vmatpush.bf16.msra.mxu3 %v12258_v28  ;;  %v8498_v55 = vrot.slane %v8496_v47, 7  ;;  %v12270_v28 = vld [vmem:[%s15977_s16 + $0x3d0] sm:$0xff] }
 0x96c   : > { %v8499_v2 = vor.u32 %v8498_v55, %v8495_v23 }
 0x96d   : > { %8293 = vmatpush.bf16.msra.mxu0 %v12228_v22  ;;  %8307 = vmatpush.bf16.msra.mxu1 %v12236_v63  ;;  %v12260_v22 = vld [vmem:[%s15977_s16 + $0x380] sm:$0xff] }
 0x96e   : > { %8462 = vmatpush.bf16.msra.mxu2 %v12249_v49  ;;  %8476 = vmatpush.bf16.msra.mxu3 %v12257_v12  ;;  %v12289_v49 = vld [vmem:[%s15977_s16 + $0x468] sm:$0xff]  ;;  %v8500_v12 = vrot.slane %v8499_v2, 2  ;;  %v12268_v63 = vld [vmem:[%s15977_s16 + $0x3c0] sm:$0xff] }
 0x970   : > { %v8010_v21 = vld.sshfl [vmem:[#allocation1] sm:$0xff pattern:$0x73625140]  ;;  %v8011_v17 = vld.sshfl [vmem:[#allocation1 + $0x8] sm:$0xff pattern:$0x73625140]  ;;  %v8505_v29 = vsel %vm14441_vm15, %v8500_v12, %v8504_v31 }
 0x971   : > { %8647 = vmatpush.bf16.msrb.mxu0 %v12267_v43  ;;  %8661 = vmatpush.bf16.msrb.mxu1 %v12275_v34  ;;  %8178 = vst [vmem:[#allocation1] ss:$4 sm:$0xff] %v15639_v11  ;;  %v12246_v11 = vld [vmem:[%s15977_s16 + $0x310] sm:$0xff] }
 0x972   : > { %8463 = vmatpush.bf16.msra.mxu2 %v12248_v27  ;;  %8477 = vmatpush.bf16.msra.mxu3 %v12256_v37  ;;  %8180 = vst [vmem:[#allocation1 + $0x1] ss:$4 sm:$0xff] %v15646_v18  ;;  %v12280_v27 = vld [vmem:[%s15977_s16 + $0x420] sm:$0xff] }
 0x973   : > { %8118 = vmatmul.bf16.vlgmr.msrb.gmra.mxu2 %v8010_v21  ;;  %8132 = vmatmul.bf16.vlgmr.msrb.gmra.mxu3 %v8011_v17  ;;  %8182 = vst [vmem:[#allocation1 + $0x2] ss:$4 sm:$0xff] %v15657_v7  ;;  %v12288_v37 = vld [vmem:[%s15977_s16 + $0x460] sm:$0xff] }
 0x974   : > { %8185 = vst [vmem:[#allocation1 + $0x3] ss:$4 sm:$0xff] %v15800_v13 }
 0x975   : > { %8648 = vmatpush.bf16.msrb.mxu0 %v12266_v30  ;;  %8662 = vmatpush.bf16.msrb.mxu1 %v12274_v25  ;;  %v8680_v30 = vrot.slane %v8492_v24, 7 }
 0x976   : > { %8464 = vmatpush.bf16.msra.mxu2 %v12247_v40  ;;  %8478 = vmatpush.bf16.msra.mxu3 %v12255_v51  ;;  %v12277_v51 = vld [vmem:[%s15977_s16 + $0x408] sm:$0xff] }
 0x977   : > { %v8681_v40 = vsel %vm14562_vm9, %v11729_v52, %v8680_v30 }
 0x979   : > { %8649 = vmatpush.bf16.msrb.mxu0 %v12265_v26  ;;  %8663 = vmatpush.bf16.msrb.mxu1 %v12273_v5 }
 0x97a   : > { %8465 = vmatpush.bf16.msra.mxu2 %v12246_v11  ;;  %8479 = vmatpush.bf16.msra.mxu3 %v12254_v20 }
 0x97b   : > { %v8186_v38 = vld.sshfl [vmem:[#allocation1] sm:$0xff pattern:$0x73625140]  ;;  %v8187_v46 = vld.sshfl [vmem:[#allocation1 + $0x8] sm:$0xff pattern:$0x73625140] }
 0x97c   : > { %8294 = vmatmul.bf16.vlgmr.msra.gmra.mxu0 %v8186_v38  ;;  %8308 = vmatmul.bf16.vlgmr.msra.gmra.mxu1 %v8187_v46  ;;  %8353 = vst [vmem:[#allocation1] ss:$4 sm:$0xff] %v15562_v56  ;;  %v12262_v56 = vld [vmem:[%s15977_s16 + $0x390] sm:$0xff] }
 0x97d   : > { %8650 = vmatpush.bf16.msrb.mxu0 %v12264_v42  ;;  %8664 = vmatpush.bf16.msrb.mxu1 %v12272_v45  ;;  %8355 = vst [vmem:[#allocation1 + $0x1] ss:$4 sm:$0xff] %v15568_v53  ;;  %v12282_v53 = vld [vmem:[%s15977_s16 + $0x430] sm:$0xff] }
 0x97e   : > { %8466 = vmatpush.bf16.msra.mxu2 %v12245_v6  ;;  %8480 = vmatpush.bf16.msra.mxu3 %v12253_v8  ;;  %8357 = vst [vmem:[#allocation1 + $0x2] ss:$4 sm:$0xff] %v15670_v35  ;;  %v12290_v35 = vld [vmem:[%s15977_s16 + $0x470] sm:$0xff] }
 0x97f   : > { %8359 = vst [vmem:[#allocation1 + $0x3] ss:$4 sm:$0xff] %v15812_v16 }
 0x981   : > { %8651 = vmatpush.bf16.msrb.mxu0 %v12263_v60  ;;  %8665 = vmatpush.bf16.msrb.mxu1 %v12271_v33 }
 0x982   : > { %8467 = vmatpush.bf16.msra.mxu2 %v12244_v41  ;;  %8481 = vmatpush.bf16.msra.mxu3 %v12252_v10 }
 0x985   : > { %8652 = vmatpush.bf16.msrb.mxu0 %v12262_v56  ;;  %8666 = vmatpush.bf16.msrb.mxu1 %v12270_v28 }
 0x986   : > { %8823 = vmatpush.bf16.msrb.mxu2 %v12283_v32  ;;  %8837 = vmatpush.bf16.msrb.mxu3 %v12291_v62  ;;  %v8360_v43 = vld.sshfl [vmem:[#allocation1] sm:$0xff pattern:$0x73625140]  ;;  %v8361_v34 = vld.sshfl [vmem:[#allocation1 + $0x8] sm:$0xff pattern:$0x73625140] }
 0x987   : > { %8468 = vmatmul.bf16.vlgmr.msra.gmra.mxu2 %v8360_v43  ;;  %8482 = vmatmul.bf16.vlgmr.msra.gmra.mxu3 %v8361_v34  ;;  %8539 = vst [vmem:[#allocation1] ss:$4 sm:$0xff] %v15584_v44  ;;  %v12279_v44 = vld [vmem:[%s15977_s16 + $0x418] sm:$0xff] }
 0x988   : > { %8541 = vst [vmem:[#allocation1 + $0x1] ss:$4 sm:$0xff] %v15589_v59  ;;  %v12287_v59 = vld [vmem:[%s15977_s16 + $0x458] sm:$0xff] }
 0x989   : > { %8653 = vmatpush.bf16.msrb.mxu0 %v12261_v0  ;;  %8667 = vmatpush.bf16.msrb.mxu1 %v12269_v19  ;;  %8543 = vst [vmem:[#allocation1 + $0x2] ss:$4 sm:$0xff] %v15752_v4  ;;  %v12286_v4 = vld [vmem:[%s15977_s16 + $0x450] sm:$0xff] }
 0x98a   : > { %8824 = vmatpush.bf16.msrb.mxu2 %v12282_v53  ;;  %8838 = vmatpush.bf16.msrb.mxu3 %v12290_v35  ;;  %8546 = vst [vmem:[#allocation1 + $0x3] ss:$4 sm:$0xff] %v8505_v29 }
 0x98d   : > { %8654 = vmatpush.bf16.msrb.mxu0 %v12260_v22  ;;  %8668 = vmatpush.bf16.msrb.mxu1 %v12268_v63 }
 0x98e   : > { %8825 = vmatpush.bf16.msrb.mxu2 %v12281_v36  ;;  %8839 = vmatpush.bf16.msrb.mxu3 %v12289_v49 }
 0x991   : > { %v8547_v25 = vld.sshfl [vmem:[#allocation1] sm:$0xff pattern:$0x73625140]  ;;  %v8548_v39 = vld.sshfl [vmem:[#allocation1 + $0x8] sm:$0xff pattern:$0x73625140] }
 0x992   : > { %8826 = vmatpush.bf16.msrb.mxu2 %v12280_v27  ;;  %8840 = vmatpush.bf16.msrb.mxu3 %v12288_v37  ;;  %8715 = vst [vmem:[#allocation1] ss:$4 sm:$0xff] %v15646_v18  ;;  %v12284_v18 = vld [vmem:[%s15977_s16 + $0x440] sm:$0xff] }
 0x993   : > { %8655 = vmatmul.bf16.vlgmr.msrb.gmra.mxu0 %v8547_v25  ;;  %8669 = vmatmul.bf16.vlgmr.msrb.gmra.mxu1 %v8548_v39  ;;  %8717 = vst [vmem:[#allocation1 + $0x1] ss:$4 sm:$0xff] %v15657_v7 }
 0x994   : > { %8719 = vst [vmem:[#allocation1 + $0x2] ss:$4 sm:$0xff] %v15800_v13 }
 0x995   : > { %8722 = vst [vmem:[#allocation1 + $0x3] ss:$4 sm:$0xff] %v8681_v40 }
 0x996   : > { %8827 = vmatpush.bf16.msrb.mxu2 %v12279_v44  ;;  %8841 = vmatpush.bf16.msrb.mxu3 %v12287_v59 }
 0x99a   : > { %8828 = vmatpush.bf16.msrb.mxu2 %v12278_v54  ;;  %8842 = vmatpush.bf16.msrb.mxu3 %v12286_v4 }
 0x99c   : > { %v8723_v7 = vld.sshfl [vmem:[#allocation1] sm:$0xff pattern:$0x73625140]  ;;  %v8724_v21 = vld.sshfl [vmem:[#allocation1 + $0x8] sm:$0xff pattern:$0x73625140] }
 0x99e   : > { %8829 = vmatpush.bf16.msrb.mxu2 %v12277_v51  ;;  %8843 = vmatpush.bf16.msrb.mxu3 %v12285_v58  ;;  %v12343_v58 = vld [vmem:[%s15978_s17] ss:$0 sm:$0xff] }
 0x9a2   : > { %8830 = vmatpush.bf16.msrb.mxu2 %v12276_v48  ;;  %8844 = vmatpush.bf16.msrb.mxu3 %v12284_v18 }
 0x9a5   : > { %8831 = vmatmul.bf16.vlgmr.msrb.gmra.mxu2 %v8723_v7  ;;  %8845 = vmatmul.bf16.vlgmr.msrb.gmra.mxu3 %v8724_v21 }
 0x9c8   : > { %v7431_v17 = vpop.f32.mrf.mxu2  ;;  %v7445_v57 = vpop.f32.mrf.mxu3 }
 0x9c9   : > { %v7446_v38 = vadd.f32 %v7445_v57, %v7431_v17 }
 0x9cd   : > { %v7566_v9 = vpop.f32.mrf.mxu0  ;;  %v7580_v3 = vpop.f32.mrf.mxu1 }
 0x9ce   : > { %v7567_v46 = vadd.f32 %v7566_v9, %v7446_v38 }
 0x9d0   : > { %v7433_v26 = vpop.f32.mrf.mxu2  ;;  %v7447_v5 = vpop.f32.mrf.mxu3  ;;  %v7581_v23 = vadd.f32 %v7580_v3, %v7567_v46 }
 0x9d1   : > { %v7448_v55 = vadd.f32 %v7447_v5, %v7433_v26 }
 0x9d5   : > { %v7568_v13 = vpop.f32.mrf.mxu0  ;;  %v7582_v11 = vpop.f32.mrf.mxu1 }
 0x9d6   : > { %v7569_v35 = vadd.f32 %v7568_v13, %v7448_v55 }
 0x9d8   : > { %v7583_v14 = vadd.f32 %v7582_v11, %v7569_v35 }
 0x9de   : > { %v7758_v20 = vpop.f32.mrf.mxu2  ;;  %v7772_v61 = vpop.f32.mrf.mxu3 }
 0x9df   : > { %v7773_v1 = vadd.f32 %v7772_v61, %v7758_v20 }
 0x9e1   : > { %v7777_v24 = vadd.f32 %v7773_v1, %v7581_v23 }
 0x9e4   : > { %v7932_v50 = vpop.f32.mrf.mxu0  ;;  %v7946_v16 = vpop.f32.mrf.mxu1 }
 0x9e5   : > { %v7947_v53 = vadd.f32 %v7946_v16, %v7932_v50 }
 0x9e6   : > { %v7760_v42 = vpop.f32.mrf.mxu2  ;;  %v7774_v45 = vpop.f32.mrf.mxu3 }
 0x9e7   : > { %v7951_v0 = vadd.f32 %v7947_v53, %v7777_v24  ;;  %v7775_v19 = vadd.f32 %v7774_v45, %v7760_v42 }
 0x9e9   : > { %v7778_v34 = vadd.f32 %v7775_v19, %v7583_v14 }
 0x9ec   : > { %v7934_v6 = vpop.f32.mrf.mxu0  ;;  %v7948_v8 = vpop.f32.mrf.mxu1 }
 0x9ed   : > { %v7949_v31 = vadd.f32 %v7948_v8, %v7934_v6 }
 0x9ef   : > { %v7952_v44 = vadd.f32 %v7949_v31, %v7778_v34 }
 0x9f6   : > { %v8119_v15 = vpop.f32.mrf.mxu2  ;;  %v8133_v47 = vpop.f32.mrf.mxu3 }
 0x9f7   : > { %v8134_v2 = vadd.f32 %v8133_v47, %v8119_v15 }
 0x9f9   : > { %v8295_v60 = vpop.f32.mrf.mxu0  ;;  %v8309_v33 = vpop.f32.mrf.mxu1  ;;  %v8138_v36 = vadd.f32 %v8134_v2, %v7951_v0 }
 0x9fa   : > { %v8310_v49 = vadd.f32 %v8309_v33, %v8295_v60 }
 0x9fc   : > { %v8314_v37 = vadd.f32 %v8310_v49, %v8138_v36 }
 0x9fe   : > { %v8121_v41 = vpop.f32.mrf.mxu2  ;;  %v8135_v10 = vpop.f32.mrf.mxu3 }
 0x9ff   : > { %v8136_v29 = vadd.f32 %v8135_v10, %v8121_v41 }
 0xa01   : > { %v8297_v56 = vpop.f32.mrf.mxu0  ;;  %v8311_v28 = vpop.f32.mrf.mxu1  ;;  %v8139_v54 = vadd.f32 %v8136_v29, %v7952_v44 }
 0xa02   : > { %v8312_v4 = vadd.f32 %v8311_v28, %v8297_v56 }
 0xa04   : > { %v8315_v7 = vadd.f32 %v8312_v4, %v8139_v54 }
 0xa0a   : > { %v8469_v32 = vpop.f32.mrf.mxu2  ;;  %v8483_v62 = vpop.f32.mrf.mxu3 }
 0xa0b   : > { %v8484_v27 = vadd.f32 %v8483_v62, %v8469_v32 }
 0xa0d   : > { %v8488_v59 = vadd.f32 %v8484_v27, %v8314_v37 }
 0xa10   : > { %v8656_v12 = vpop.f32.mrf.mxu0  ;;  %v8670_v22 = vpop.f32.mrf.mxu1 }
 0xa11   : > { %v8671_v30 = vadd.f32 %v8670_v22, %v8656_v12 }
 0xa12   : > { %v8471_v63 = vpop.f32.mrf.mxu2  ;;  %v8485_v43 = vpop.f32.mrf.mxu3 }
 0xa13   : > { %v8675_v52 = vadd.f32 %v8671_v30, %v8488_v59  ;;  %v8486_v40 = vadd.f32 %v8485_v43, %v8471_v63 }
 0xa15   : > { %v8489_v17 = vadd.f32 %v8486_v40, %v8315_v7 }
 0xa18   : > { %v8658_v48 = vpop.f32.mrf.mxu0  ;;  %v8672_v18 = vpop.f32.mrf.mxu1 }
 0xa19   : > { %v8673_v57 = vadd.f32 %v8672_v18, %v8658_v48 }
 0xa1b   : > { %v8676_v5 = vadd.f32 %v8673_v57, %v8489_v17 }
 0xa28   : > { %v8832_v25 = vpop.f32.mrf.mxu2  ;;  %v8846_v39 = vpop.f32.mrf.mxu3 }
 0xa29   : > { %v8847_v51 = vadd.f32 %v8846_v39, %v8832_v25 }
 0xa2b   : > { %v8851_v21 = vadd.f32 %v8847_v51, %v8675_v52 }
 0xa2d   : > { %v8857_v9 = vadd.f32 %v12343_v58, %v8851_v21 }
 0xa2f   : > { %8859 = vst [vmem:[%s613_s23] sm:$0xff] %v8857_v9 }
 0xa30   : > { %v8834_v3 = vpop.f32.mrf.mxu2  ;;  %v8848_v26 = vpop.f32.mrf.mxu3 }
 0xa31   : > { %v8849_v13 = vadd.f32 %v8848_v26, %v8834_v3 }
 0xa33   : > { %v8852_v11 = vadd.f32 %v8849_v13, %v8676_v5 }
 0xa35   : > { %v8858_v20 = vadd.f32 %v12343_v58, %v8852_v11 }
 0xa37   : > { %8860 = vst [vmem:[%s613_s23 + $0x8] sm:$0xff] %v8858_v20 }
 0xa38   : > { %12379 = shalt.err (!%p12376_p3)
}
 0xa39   : > { %s12418_s30 = smov 128   ;;  %s12419_s23 = smov 8  }
 0xa3a   : > { %12296 = dma.vmem_to_hbm [thread:$0]  (%p12553_p5), %s8875_s27, 256, %s8877_s19, %s8862_s0, %s12418_s30, %s12418_s30, %s12419_s23  }
 0xa3b PF: > { %s16113_s26 = sld [smem:[#allocation7_spill]] }
 0xa3c   : > { %s16114_s3 = sld [smem:[#allocation5_spill]] }
 0xa41   : > { %p12302_p4 = scmp.ge.s32.totalorder %s16113_s26, 2 }
 0xa42   : > { %s8891_s25 = sand.u32 1, %s16114_s3  }
 0xa43   : > { %p12299_p7 = pnand %p12302_p4, %p12557_p6  ;;  %s8892_s20 = scalar_lea.sflag [#allocation3], %s8891_s25 }
 0xa45   : > { %p12300_p8 = pneg %p12299_p7 }
 0xa47   : > { %12397 = dma.done.wait (%p12300_p8), %s8892_s20, 256  }
 0xa48   : > { %12399 = vsyncadd (%p12300_p8), %s8892_s20, 4294967040  ;;  %s16116_s30 = sld [smem:[#allocation8_spill]]  ;;  %s16119_s27 = smov %s12406_s28 }
 0xa49   : > { %s16117_s1 = sld [smem:[#allocation6_spill]] }
 0xa4a   : > { %s16118_s29 = sld [smem:[#allocation9_spill]] }
 0xa4e   : > { %p28_p9 = scmp.ge.s32.totalorder %s16116_s30, 4  }
 0xa4f   : > { %s16120_s28 = smov %s16117_s1 }
 0xa50   :  { %30 = sbr.rel (!%p28_p9) target bundleno = 9 (0x9), region = 265 }
 0xa55   :  { %8898 = vsyncpa [#allocation3], 1 }
 0xa56   :  { %8900 = vsyncpa [#allocation3 + $0x1], 1 }

</bundles_post_ra>
